<compile_context>
chip_gen: v7x
topology: tpu7x:2x2x1
jax: 0.10.0
libtpu: 0.0.40
codegen_flags: <defaults>
</compile_context>

<pallas_src>
import functools
import math

import jax
import jax.numpy as jnp
from jax.experimental import pallas as pl
from jax.experimental.pallas import tpu as pltpu

ACT_DTYPE = jnp.bfloat16          # activation / matmul operand dtype (accumulate f32)
_VMEM_LIMIT = 48 * 1024 * 1024    # explicit scoped-VMEM cap: > v5e/v6e defaults, < v7x physical


# ----------------------------------------------------------------------------
# Tiling helpers
# ----------------------------------------------------------------------------
def _m_tile(M, preferred=512):
    """Row tile: full M when small (block == array dims, always legal), else 512."""
    return M if M <= preferred else preferred


def _feat_tile(dim, preferred=512, align=128):
    """Feature-axis tile that exactly divides `dim` (falls back to full dim)."""
    if dim % align != 0 or dim <= preferred:
        return dim
    t = preferred
    while dim % t != 0:
        t -= align
    return t


def _seq_tile(S, preferred=256):
    """Sequence tile for attention q-axis: exact divisor, multiple of 8, else full S."""
    if S <= preferred or S % 8 != 0:
        return S
    t = preferred
    while t >= 8:
        if S % t == 0:
            return t
        t -= 8
    return S


def _params(dim_sem):
    return pltpu.CompilerParams(dimension_semantics=dim_sem,
                                vmem_limit_bytes=_VMEM_LIMIT)


# ----------------------------------------------------------------------------
# Linear (+ optional fused residual) with K/N tiling and f32 accumulator
# ----------------------------------------------------------------------------
def _linear_kernel(*refs, act, n_k, has_res):
    if has_res:
        x_ref, w_ref, b_ref, r_ref, o_ref, acc_ref = refs
    else:
        x_ref, w_ref, b_ref, o_ref, acc_ref = refs
        r_ref = None
    k = pl.program_id(2)

    @pl.when(k == 0)
    def _():
        acc_ref[...] = jnp.zeros_like(acc_ref)

    x = x_ref[...]
    w = w_ref[...]
    if x.dtype != w.dtype:
        x = x.astype(w.dtype)
    acc_ref[...] += jnp.dot(x, w, preferred_element_type=jnp.float32)

    @pl.when(k == n_k - 1)
    def _():
        y = acc_ref[...] + b_ref[...].astype(jnp.float32)
        if act == "gelu":
            # TODO(synk): PyTorch nn.GELU default is exact erf; tanh approx used here.
            y = jax.nn.gelu(y, approximate=True)
        if r_ref is not None:
            y = y + r_ref[...].astype(jnp.float32)
        o_ref[...] = y.astype(o_ref.dtype)


def linear(x, w, b, act="none", residual=None, out_dtype=ACT_DTYPE):
    """x: (M, K) @ w: (K, N) + b, optional fused residual add (residual: (M, N))."""
    M, K = x.shape
    N = w.shape[1]
    tm = _m_tile(M)
    tk = _feat_tile(K, preferred=1024)
    tn = _feat_tile(N, preferred=512)
    n_k = K // tk
    args = [x, w, b.reshape(1, N)]
    in_specs = [
        pl.BlockSpec((tm, tk), lambda i, j, k: (i, k)),
        pl.BlockSpec((tk, tn), lambda i, j, k: (k, j)),
        pl.BlockSpec((1, tn), lambda i, j, k: (0, j)),
    ]
    has_res = residual is not None
    if has_res:
        args.append(residual)
        in_specs.append(pl.BlockSpec((tm, tn), lambda i, j, k: (i, j)))
    return pl.pallas_call(
        functools.partial(_linear_kernel, act=act, n_k=n_k, has_res=has_res),
        out_shape=jax.ShapeDtypeStruct((M, N), out_dtype),
        grid=(pl.cdiv(M, tm), N // tn, n_k),
        in_specs=in_specs,
        out_specs=pl.BlockSpec((tm, tn), lambda i, j, k: (i, j)),
        scratch_shapes=[pltpu.VMEM((tm, tn), jnp.float32)],
        compiler_params=_params(("parallel", "parallel", "arbitrary")),
    )(*args)


# ----------------------------------------------------------------------------
# Fused LayerNorm -> linear (LN computed once per row tile, cached in VMEM)
# ----------------------------------------------------------------------------
def _ln_linear_kernel(x_ref, g_ref, bln_ref, w_ref, b_ref, o_ref, xn_ref, *, act, eps):
    j = pl.program_id(1)

    @pl.when(j == 0)
    def _():
        x = x_ref[...].astype(jnp.float32)
        mu = jnp.mean(x, axis=-1, keepdims=True)
        var = jnp.mean(jnp.square(x - mu), axis=-1, keepdims=True)
        xn = (x - mu) * jax.lax.rsqrt(var + eps)
        xn = xn * g_ref[...].astype(jnp.float32) + bln_ref[...].astype(jnp.float32)
        xn_ref[...] = xn.astype(xn_ref.dtype)

    y = jnp.dot(xn_ref[...], w_ref[...],
                preferred_element_type=jnp.float32) + b_ref[...].astype(jnp.float32)
    if act == "gelu":
        # TODO(synk): PyTorch nn.GELU default is exact erf; tanh approx used here.
        y = jax.nn.gelu(y, approximate=True)
    o_ref[...] = y.astype(o_ref.dtype)


def ln_linear(x, g, bln, w, b, act="none", eps=1e-5, out_dtype=ACT_DTYPE):
    """Fused LayerNorm(x) @ w + b. K is kept whole (needed for the LN stats)."""
    M, K = x.shape
    N = w.shape[1]
    tm = _m_tile(M)
    tn = _feat_tile(N, preferred=512)
    return pl.pallas_call(
        functools.partial(_ln_linear_kernel, act=act, eps=eps),
        out_shape=jax.ShapeDtypeStruct((M, N), out_dtype),
        grid=(pl.cdiv(M, tm), N // tn),
        in_specs=[
            pl.BlockSpec((tm, K), lambda i, j: (i, 0)),
            pl.BlockSpec((1, K), lambda i, j: (0, 0)),
            pl.BlockSpec((1, K), lambda i, j: (0, 0)),
            pl.BlockSpec((K, tn), lambda i, j: (0, j)),
            pl.BlockSpec((1, tn), lambda i, j: (0, j)),
        ],
        out_specs=pl.BlockSpec((tm, tn), lambda i, j: (i, j)),
        scratch_shapes=[pltpu.VMEM((tm, K), ACT_DTYPE)],
        compiler_params=_params(("parallel", "arbitrary")),
    )(x, g.reshape(1, K), bln.reshape(1, K), w, b.reshape(1, N))


# ----------------------------------------------------------------------------
# Fused residual + MLP: x + fc2(gelu(fc1(LN(x)))), hidden-axis accumulation,
# LN result cached once per row tile.
# ----------------------------------------------------------------------------
def _mlp_kernel(x_ref, g_ref, bln_ref, w1_ref, b1_ref, w2_ref, b2_ref,
                o_ref, acc_ref, xn_ref, *, eps, n_h):
    h_idx = pl.program_id(1)

    @pl.when(h_idx == 0)
    def _():
        x = x_ref[...].astype(jnp.float32)
        mu = jnp.mean(x, axis=-1, keepdims=True)
        var = jnp.mean(jnp.square(x - mu), axis=-1, keepdims=True)
        xn = (x - mu) * jax.lax.rsqrt(var + eps)
        xn = xn * g_ref[...].astype(jnp.float32) + bln_ref[...].astype(jnp.float32)
        xn_ref[...] = xn.astype(xn_ref.dtype)
        # residual + fc2 bias added exactly once
        acc_ref[...] = x + b2_ref[...].astype(jnp.float32)

    h = jnp.dot(xn_ref[...], w1_ref[...],
                preferred_element_type=jnp.float32) + b1_ref[...].astype(jnp.float32)
    # TODO(synk): PyTorch nn.GELU default is exact erf; tanh approx used here.
    h = jax.nn.gelu(h, approximate=True)
    acc_ref[...] += jnp.dot(h.astype(w2_ref.dtype), w2_ref[...],
                            preferred_element_type=jnp.float32)

    @pl.when(h_idx == n_h - 1)
    def _():
        o_ref[...] = acc_ref[...].astype(o_ref.dtype)


def mlp_block(x, g, bln, w1, b1, w2, b2, eps=1e-5, out_dtype=ACT_DTYPE):
    M, D = x.shape
    H = w1.shape[1]
    tm = _m_tile(M)                       # 512 cap keeps v7x (64 MiB VMEM) comfortable
    th = _feat_tile(H, preferred=1024)
    n_h = H // th
    return pl.pallas_call(
        functools.partial(_mlp_kernel, eps=eps, n_h=n_h),
        out_shape=jax.ShapeDtypeStruct((M, D), out_dtype),
        grid=(pl.cdiv(M, tm), n_h),
        in_specs=[
            pl.BlockSpec((tm, D), lambda i, h: (i, 0)),
            pl.BlockSpec((1, D), lambda i, h: (0, 0)),
            pl.BlockSpec((1, D), lambda i, h: (0, 0)),
            pl.BlockSpec((D, th), lambda i, h: (0, h)),
            pl.BlockSpec((1, th), lambda i, h: (0, h)),
            pl.BlockSpec((th, D), lambda i, h: (h, 0)),
            pl.BlockSpec((1, D), lambda i, h: (0, 0)),
        ],
        out_specs=pl.BlockSpec((tm, D), lambda i, h: (i, 0)),
        scratch_shapes=[pltpu.VMEM((tm, D), jnp.float32),
                        pltpu.VMEM((tm, D), ACT_DTYPE)],
        compiler_params=_params(("parallel", "arbitrary")),
    )(x, g.reshape(1, D), bln.reshape(1, D), w1, b1.reshape(1, H), w2, b2.reshape(1, D))


# ----------------------------------------------------------------------------
# Attention: batched-head einsums, q-tiled grid (B, Sq/tq), full K/V per batch.
# ----------------------------------------------------------------------------
def _mha(q, k, v, num_heads, scale, out_dtype):
    """q: (Sq, D), k/v: (Sk, D) -> (Sq, D); heads batched on a leading axis."""
    Sq, D = q.shape
    Sk = k.shape[0]
    Dh = D // num_heads
    qh = jnp.transpose(q.reshape(Sq, num_heads, Dh), (1, 0, 2))
    kh = jnp.transpose(k.reshape(Sk, num_heads, Dh), (1, 0, 2))
    vh = jnp.transpose(v.reshape(Sk, num_heads, Dh), (1, 0, 2))
    s = jnp.einsum('hqd,hkd->hqk', qh, kh, preferred_element_type=jnp.float32) * scale
    s = s - jnp.max(s, axis=-1, keepdims=True)
    p = jnp.exp(s)
    p = p / jnp.sum(p, axis=-1, keepdims=True)          # exact softmax normalization
    o = jnp.einsum('hqk,hkd->hqd', p.astype(vh.dtype), vh,
                   preferred_element_type=jnp.float32)
    return jnp.transpose(o, (1, 0, 2)).reshape(Sq, D).astype(out_dtype)


def _self_attn_kernel(qkv_q_ref, qkv_kv_ref, o_ref, *, num_heads, scale):
    # TODO(synk): for very long sequences (>~4k) add kv-tiled online-softmax (flash).
    D = o_ref.shape[-1]
    q = qkv_q_ref[0][:, :D]          # (tq, D)
    kv = qkv_kv_ref[0]               # (S, 3D)
    o_ref[0] = _mha(q, kv[:, D:2 * D], kv[:, 2 * D:], num_heads, scale, o_ref.dtype)


def _cross_attn_kernel(q_ref, kv_ref, o_ref, *, num_heads, scale):
    D = o_ref.shape[-1]
    q = q_ref[0]                     # (tq, D)
    kv = kv_ref[0]                   # (Sk, 2D)
    o_ref[0] = _mha(q, kv[:, :D], kv[:, D:], num_heads, scale, o_ref.dtype)


def self_attn(qkv, num_heads, out_dtype=ACT_DTYPE):
    """qkv: (B, S, 3D) with feature layout [q|k|v] x [head][Dh] -> (B, S, D)."""
    B, S, D3 = qkv.shape
    D = D3 // 3
    scale = 1.0 / math.sqrt(D // num_heads)
    tq = _seq_tile(S)
    return pl.pallas_call(
        functools.partial(_self_attn_kernel, num_heads=num_heads, scale=scale),
        out_shape=jax.ShapeDtypeStruct((B, S, D), out_dtype),
        grid=(B, S // tq),
        in_specs=[pl.BlockSpec((1, tq, D3), lambda b, qi: (b, qi, 0)),   # q rows
                  pl.BlockSpec((1, S, D3), lambda b, qi: (b, 0, 0))],    # full k/v
        out_specs=pl.BlockSpec((1, tq, D), lambda b, qi: (b, qi, 0)),
        compiler_params=_params(("parallel", "parallel")),
    )(qkv, qkv)


def cross_attn(q, kv, num_heads, out_dtype=ACT_DTYPE):
    """q: (B, Sq, D), kv: (B, Sk, 2D) with feature layout [k|v] x [head][Dh]."""
    B, Sq, D = q.shape
    Sk = kv.shape[1]
    scale = 1.0 / math.sqrt(D // num_heads)
    tq = _seq_tile(Sq)
    return pl.pallas_call(
        functools.partial(_cross_attn_kernel, num_heads=num_heads, scale=scale),
        out_shape=jax.ShapeDtypeStruct((B, Sq, D), out_dtype),
        grid=(B, Sq // tq),
        in_specs=[pl.BlockSpec((1, tq, D), lambda b, qi: (b, qi, 0)),
                  pl.BlockSpec((1, Sk, 2 * D), lambda b, qi: (b, 0, 0))],
        out_specs=pl.BlockSpec((1, tq, D), lambda b, qi: (b, qi, 0)),
        compiler_params=_params(("parallel", "parallel")),
    )(q, kv)


# ----------------------------------------------------------------------------
# Standalone LayerNorm
# ----------------------------------------------------------------------------
def _layernorm_kernel(x_ref, g_ref, b_ref, o_ref, *, eps):
    x = x_ref[...].astype(jnp.float32)
    mu = jnp.mean(x, axis=-1, keepdims=True)
    var = jnp.mean(jnp.square(x - mu), axis=-1, keepdims=True)
    y = (x - mu) * jax.lax.rsqrt(var + eps)
    o_ref[...] = (y * g_ref[...].astype(jnp.float32)
                  + b_ref[...].astype(jnp.float32)).astype(o_ref.dtype)


def layernorm(x, g, b, eps=1e-5, out_dtype=ACT_DTYPE):
    M, D = x.shape
    tm = _m_tile(M)
    return pl.pallas_call(
        functools.partial(_layernorm_kernel, eps=eps),
        out_shape=jax.ShapeDtypeStruct((M, D), out_dtype),
        grid=(pl.cdiv(M, tm),),
        in_specs=[
            pl.BlockSpec((tm, D), lambda i: (i, 0)),
            pl.BlockSpec((1, D), lambda i: (0, 0)),
            pl.BlockSpec((1, D), lambda i: (0, 0)),
        ],
        out_specs=pl.BlockSpec((tm, D), lambda i: (i, 0)),
        compiler_params=_params(("parallel",)),
    )(x, g.reshape(1, D), b.reshape(1, D))


# ----------------------------------------------------------------------------
# Fused diff-prediction linear + masked MSE (prediction never leaves VMEM)
# ----------------------------------------------------------------------------
def _diff_loss_kernel(z_ref, w_ref, b_ref, t_ref, m_ref, o_ref, num_ref, den_ref,
                      *, n_rows, tm):
    i = pl.program_id(0)

    @pl.when(i == 0)
    def _():
        num_ref[...] = jnp.zeros_like(num_ref)
        den_ref[...] = jnp.zeros_like(den_ref)

    pred = jnp.dot(z_ref[...].astype(w_ref.dtype), w_ref[...],
                   preferred_element_type=jnp.float32) + b_ref[...].astype(jnp.float32)
    d = pred - t_ref[...].astype(jnp.float32)
    inv_c = 1.0 / t_ref.shape[-1]
    row_mse = jnp.sum(d * d, axis=-1, keepdims=True) * inv_c        # (tm, 1)
    m = m_ref[...].astype(jnp.float32)                              # (tm, 1)
    # mask out garbage rows of a boundary block
    rid = i * tm + jax.lax.broadcasted_iota(jnp.int32, (tm, 1), 0)
    valid = rid < n_rows
    num_ref[...] += jnp.sum(jnp.where(valid, row_mse * m, 0.0), axis=0, keepdims=True)
    den_ref[...] += jnp.sum(jnp.where(valid, m, 0.0), axis=0, keepdims=True)

    @pl.when(i == pl.num_programs(0) - 1)
    def _():
        o_ref[...] = num_ref[...] / den_ref[...]


def diff_loss_fused(z, w, b, target, mask):
    """sum(mask * mean((z@w+b - target)^2, -1)) / sum(mask), fully fused."""
    M, D = z.shape
    C = w.shape[1]
    tm = _m_tile(M)
    out = pl.pallas_call(
        functools.partial(_diff_loss_kernel, n_rows=M, tm=tm),
        out_shape=jax.ShapeDtypeStruct((1, 1), jnp.float32),
        grid=(pl.cdiv(M, tm),),
        in_specs=[
            pl.BlockSpec((tm, D), lambda i: (i, 0)),
            pl.BlockSpec((D, C), lambda i: (0, 0)),
            pl.BlockSpec((1, C), lambda i: (0, 0)),
            pl.BlockSpec((tm, C), lambda i: (i, 0)),
            pl.BlockSpec((tm, 1), lambda i: (i, 0)),
        ],
        out_specs=pl.BlockSpec((1, 1), lambda i: (0, 0)),
        scratch_shapes=[pltpu.VMEM((1, 1), jnp.float32),
                        pltpu.VMEM((1, 1), jnp.float32)],
        compiler_params=_params(("arbitrary",)),
    )(z, w, b.reshape(1, C), target, mask)
    return out[0, 0]


# ----------------------------------------------------------------------------
# Transformer blocks built from the fused Pallas kernels (timm-style pre-norm)
# ----------------------------------------------------------------------------
def self_attention_block(x, p, num_heads):
    B, S, D = x.shape
    x2 = x.reshape(B * S, D)
    qkv = ln_linear(x2, p["ln1_g"], p["ln1_b"], p["qkv_w"], p["qkv_b"]).reshape(B, S, 3 * D)
    o = self_attn(qkv, num_heads).reshape(B * S, D)
    x2 = linear(o, p["proj_w"], p["proj_b"], residual=x2)           # x + proj(attn)
    x2 = mlp_block(x2, p["ln2_g"], p["ln2_b"],
                   p["fc1_w"], p["fc1_b"], p["fc2_w"], p["fc2_b"])  # + mlp(ln2(x))
    return x2.reshape(B, S, D)


def cross_attention_block(x, ctx, p, num_heads):
    B, S, D = x.shape
    Sc = ctx.shape[1]
    x2 = x.reshape(B * S, D)
    q = ln_linear(x2, p["ln1_g"], p["ln1_b"], p["q_w"], p["q_b"]).reshape(B, S, D)
    kv = linear(ctx.reshape(B * Sc, D), p["kv_w"], p["kv_b"]).reshape(B, Sc, 2 * D)
    o = cross_attn(q, kv, num_heads).reshape(B * S, D)
    x2 = linear(o, p["proj_w"], p["proj_b"], residual=x2)
    x2 = mlp_block(x2, p["ln2_g"], p["ln2_b"],
                   p["fc1_w"], p["fc1_b"], p["fc2_w"], p["fc2_b"])
    return x2.reshape(B, S, D)


# ----------------------------------------------------------------------------
# Deterministic parameter init (mirrors FLUID.initialize_weights / _init_weights)
# ----------------------------------------------------------------------------
def _xavier(key, fan_in, fan_out):
    bound = math.sqrt(6.0 / (fan_in + fan_out))
    return jax.random.uniform(key, (fan_in, fan_out), jnp.float32, -bound, bound)


def _init_self_block(key, dim, mlp_ratio):
    ks = jax.random.split(key, 4)
    hidden = int(dim * mlp_ratio)
    z = lambda n: jnp.zeros((n,), jnp.float32)
    o = lambda n: jnp.ones((n,), jnp.float32)
    return dict(
        ln1_g=o(dim), ln1_b=z(dim),
        qkv_w=_xavier(ks[0], dim, 3 * dim), qkv_b=z(3 * dim),
        proj_w=_xavier(ks[1], dim, dim), proj_b=z(dim),
        ln2_g=o(dim), ln2_b=z(dim),
        fc1_w=_xavier(ks[2], dim, hidden), fc1_b=z(hidden),
        fc2_w=_xavier(ks[3], hidden, dim), fc2_b=z(dim),
    )


def _init_cross_block(key, dim, mlp_ratio):
    ks = jax.random.split(key, 5)
    hidden = int(dim * mlp_ratio)
    z = lambda n: jnp.zeros((n,), jnp.float32)
    o = lambda n: jnp.ones((n,), jnp.float32)
    return dict(
        ln1_g=o(dim), ln1_b=z(dim),
        q_w=_xavier(ks[0], dim, dim), q_b=z(dim),
        kv_w=_xavier(ks[1], dim, 2 * dim), kv_b=z(2 * dim),
        proj_w=_xavier(ks[2], dim, dim), proj_b=z(dim),
        ln2_g=o(dim), ln2_b=z(dim),
        fc1_w=_xavier(ks[3], dim, hidden), fc1_b=z(hidden),
        fc2_w=_xavier(ks[4], hidden, dim), fc2_b=z(dim),
    )


def init_fluid_params(key, cfg):
    D, S, td = cfg["embed_dim"], cfg["seq_len"], cfg["token_embed_dim"]
    mlp = cfg["mlp_ratio"]
    keys = iter(jax.random.split(key, 128))
    nk = lambda: next(keys)
    z = lambda n: jnp.zeros((n,), jnp.float32)
    o = lambda n: jnp.ones((n,), jnp.float32)
    p = {}
    # encoder
    p["z_proj_w"], p["z_proj_b"] = _xavier(nk(), td, D), z(D)
    p["z_proj_ln_g"], p["z_proj_ln_b"] = o(D), z(D)
    p["encoder_pos_embed"] = 0.02 * jax.random.normal(nk(), (1, S, D), jnp.float32)
    p["encoder_blocks"] = [_init_self_block(nk(), D, mlp) for _ in range(cfg["encoder_depth"])]
    p["encoder_norm_g"], p["encoder_norm_b"] = o(D), z(D)
    # decoder
    p["decoder_embed_w"], p["decoder_embed_b"] = _xavier(nk(), D, D), z(D)
    p["mask_token"] = 0.02 * jax.random.normal(nk(), (1, 1, D), jnp.float32)
    p["decoder_pos_embed"] = 0.02 * jax.random.normal(nk(), (1, S, D), jnp.float32)
    p["decoder_blocks"] = [_init_self_block(nk(), D, mlp) for _ in range(cfg["decoder_depth"])]
    p["decoder_norm_g"], p["decoder_norm_b"] = o(D), z(D)
    # text / cross decoder
    p["last_embed_w"], p["last_embed_b"] = _xavier(nk(), D, D), z(D)
    p["last_pos_embed"] = 0.02 * jax.random.normal(nk(), (1, S, D), jnp.float32)
    p["fake_latent"] = 0.02 * jax.random.normal(nk(), (1, 1, D), jnp.float32)
    p["cross_blocks"] = [_init_cross_block(nk(), D, mlp) for _ in range(cfg["cross_depth"])]
    p["cross_norm_g"], p["cross_norm_b"] = o(D), z(D)
    # Text_Embedding stand-in
    p["text_proj_w"], p["text_proj_b"] = _xavier(nk(), cfg["caption_channels"], D), z(D)
    p["text_blocks"] = [_init_self_block(nk(), D, mlp) for _ in range(cfg["text_depth"])]
    p["text_norm_g"], p["text_norm_b"] = o(D), z(D)
    # DiffLoss stand-in
    p["diff_w"], p["diff_b"] = _xavier(nk(), D, td), z(td)
    return p


def cast_matmul_weights(tree):
    """One-time cast of the 2-D matmul weights to bf16 (biases / LN params stay f32)."""
    if isinstance(tree, dict):
        return {k: (v.astype(ACT_DTYPE)
                    if (hasattr(v, "ndim") and v.ndim == 2 and k.endswith("_w"))
                    else cast_matmul_weights(v))
                for k, v in tree.items()}
    if isinstance(tree, list):
        return [cast_matmul_weights(v) for v in tree]
    return tree


# ----------------------------------------------------------------------------
# FLUID forward pieces (glue in plain JAX, compute in Pallas kernels above)
# ----------------------------------------------------------------------------
def patchify(x, p):
    B, C, H, W = x.shape
    h_, w_ = H // p, W // p
    x = x.reshape(B, C, h_, p, w_, p)
    x = jnp.transpose(x, (0, 2, 4, 1, 3, 5))  # nchpwq -> nhwcpq
    return x.reshape(B, h_ * w_, C * p * p)


def sample_orders(key, bsz, seq_len):
    keys = jax.random.split(key, bsz)
    return jnp.stack([jax.random.permutation(k, seq_len) for k in keys])


def random_masking(orders, bsz, seq_len, mask_rate):
    # TODO(synk): truncnorm mask-rate sampling replaced by a fixed deterministic rate.
    num_masked = int(math.ceil(seq_len * mask_rate))
    rows = jnp.arange(bsz)[:, None]
    mask = jnp.zeros((bsz, seq_len), jnp.float32)
    mask = mask.at[rows, orders[:, :num_masked]].set(1.0)
    return mask, num_masked


def forward_fluid_encoder(x, mask, num_masked, params, cfg):
    B, S, _ = x.shape
    D = cfg["embed_dim"]
    h = linear(x.reshape(B * S, -1), params["z_proj_w"], params["z_proj_b"]).reshape(B, S, D)
    h = h + params["encoder_pos_embed"]  # npatch == N -> no interpolation needed
    h = layernorm(h.reshape(B * S, D), params["z_proj_ln_g"], params["z_proj_ln_b"],
                  eps=1e-6).reshape(B, S, D)
    len_keep = S - num_masked
    # logical_not(mask).nonzero() equivalent: unmasked positions in ascending order per row
    ids_keep = jnp.argsort(mask, axis=-1, stable=True)[:, :len_keep]
    h = jnp.take_along_axis(h, ids_keep[:, :, None], axis=1)
    for blk in params["encoder_blocks"]:
        h = self_attention_block(h, blk, cfg["num_heads"])
    h = layernorm(h.reshape(B * len_keep, D), params["encoder_norm_g"],
                  params["encoder_norm_b"]).reshape(B, len_keep, D)
    return h, ids_keep


def forward_fluid_decoder(x_enc, ids_keep, params, cfg):
    B, Sk, _ = x_enc.shape
    D, S = cfg["embed_dim"], cfg["seq_len"]
    h = linear(x_enc.reshape(B * Sk, -1), params["decoder_embed_w"],
               params["decoder_embed_b"]).reshape(B, Sk, D)
    x_full = jnp.broadcast_to(params["mask_token"], (B, S, D)).astype(h.dtype)
    x_full = x_full.at[jnp.arange(B)[:, None], ids_keep].set(h)
    x = (x_full + params["decoder_pos_embed"]).astype(ACT_DTYPE)
    for blk in params["decoder_blocks"]:
        x = self_attention_block(x, blk, cfg["num_heads"])
    x = layernorm(x.reshape(B * S, D), params["decoder_norm_g"],
                  params["decoder_norm_b"]).reshape(B, S, D)
    return x


def forward_text_embedding(texts, params, cfg):
    # TODO(synk): Text_Embedding class is not defined in the reference file; stand-in =
    # caption projection + self-attention blocks + LayerNorm, built from the same kernels.
    B, L, C = texts.shape
    D = cfg["embed_dim"]
    h = linear(texts.reshape(B * L, C), params["text_proj_w"],
               params["text_proj_b"]).reshape(B, L, D)
    for blk in params["text_blocks"]:
        h = self_attention_block(h, blk, cfg["num_heads"])
    return layernorm(h.reshape(B * L, D), params["text_norm_g"],
                     params["text_norm_b"]).reshape(B, L, D)


def forward_fluid_text_decoder(x, text_embeddings, params, cfg):
    B, S, _ = x.shape
    D = cfg["embed_dim"]
    h = linear(x.reshape(B * S, -1), params["last_embed_w"],
               params["last_embed_b"]).reshape(B, S, D)
    h = (h + params["last_pos_embed"]).astype(ACT_DTYPE)
    # TODO(synk): training-time random text-drop (fake_latent mixing) + dropout use eval semantics.
    for blk in params["cross_blocks"]:
        h = cross_attention_block(h, text_embeddings, blk, cfg["num_heads"])
    return layernorm(h.reshape(B * S, D), params["cross_norm_g"],
                     params["cross_norm_b"]).reshape(B, S, D)


def forward_loss(z, target, mask, params, cfg):
    B, S, _ = target.shape
    zf = z.reshape(B * S, -1)
    tf = target.reshape(B * S, -1)
    mf = mask.reshape(B * S, 1)
    # diffusion_batch_mul replication is a no-op for this deterministic stand-in
    # (each replica contributes identically to the masked mean), so compute once
    # instead of jnp.tile-ing the activation slabs through HBM.
    # TODO(synk): DiffLoss (diffusion MLP loss) definition not provided; stand-in =
    # fused Pallas linear z->token_dim prediction + masked-MSE (pred stays in VMEM).
    return diff_loss_fused(zf, params["diff_w"], params["diff_b"], tf, mf)


def fluid_forward(params, imgs, texts, cfg, order_key):
    x = patchify(imgs, cfg["patch_size"])
    gt_latents = x
    orders = sample_orders(order_key, x.shape[0], cfg["seq_len"])
    mask, num_masked = random_masking(orders, x.shape[0], cfg["seq_len"], cfg["mask_rate"])
    h, ids_keep = forward_fluid_encoder(x, mask, num_masked, params, cfg)
    h = forward_fluid_decoder(h, ids_keep, params, cfg)
    text_embeddings = forward_text_embedding(texts, params, cfg)
    z = forward_fluid_text_decoder(h, text_embeddings, params, cfg)
    return forward_loss(z, gt_latents, mask, params, cfg)


# ----------------------------------------------------------------------------
if __name__ == "__main__":
    cfg = dict(
        bsz=2,
        vae_embed_dim=4, vae_stride=16, patch_size=1,
        height=64, width=64,
        embed_dim=32, num_heads=4, mlp_ratio=4.0,
        encoder_depth=2, decoder_depth=2, cross_depth=2, text_depth=1,
        caption_channels=64, max_length=8,
        diffusion_batch_mul=4,
        mask_rate=0.75,
    )
    cfg["seq_h"] = cfg["height"] // cfg["vae_stride"] // cfg["patch_size"]
    cfg["seq_w"] = cfg["width"] // cfg["vae_stride"] // cfg["patch_size"]
    cfg["seq_len"] = cfg["seq_h"] * cfg["seq_w"]
    cfg["token_embed_dim"] = cfg["vae_embed_dim"] * cfg["patch_size"] ** 2

    key = jax.random.PRNGKey(0)
    k_param, k_img, k_txt, k_ord = jax.random.split(key, 4)
    params = cast_matmul_weights(init_fluid_params(k_param, cfg))

    # imgs are VAE latents: NCHW = (bsz, vae_embed_dim, height/vae_stride, width/vae_stride)
    imgs = jax.random.normal(
        k_img, (cfg["bsz"], cfg["vae_embed_dim"],
                cfg["seq_h"] * cfg["patch_size"], cfg["seq_w"] * cfg["patch_size"]),
        jnp.float32)
    texts = jax.random.normal(
        k_txt, (cfg["bsz"], cfg["max_length"], cfg["caption_channels"]), jnp.float32)

    loss_fn = jax.jit(lambda p, im, tx, k: fluid_forward(p, im, tx, cfg, k))
    loss = loss_fn(params, imgs, texts, k_ord)
    jax.block_until_ready(loss)
    assert loss.shape == () and jnp.isfinite(loss)
    print("KERNEL_OK")
</pallas_src>

<mosaic_0001>
module attributes {stable_mosaic.version = 11 : i64} {
  func.func @_linear_kernel(%arg0: i32, %arg1: i32, %arg2: i32, %arg3: memref<32x4xf32, #tpu.memory_space<vmem>>, %arg4: memref<4x32xbf16, #tpu.memory_space<vmem>>, %arg5: memref<1x32xf32, #tpu.memory_space<vmem>>, %arg6: memref<32x32xbf16, #tpu.memory_space<vmem>>, %arg7: memref<32x32xf32, #tpu.memory_space<vmem>>) attributes {dimension_semantics = [#tpu.dimension_semantics<parallel>, #tpu.dimension_semantics<parallel>, #tpu.dimension_semantics<arbitrary>], iteration_bounds = array<i64: 1, 1, 1>, scalar_prefetch = 0 : i64, scratch_operands = 1 : i64, tpu.core_type = #tpu.core_type<tc>, window_params = [{transform_indices = @transform_0, window_bounds = array<i64: 32, 4>}, {transform_indices = @transform_1, window_bounds = array<i64: 4, 32>}, {transform_indices = @transform_2, window_bounds = array<i64: 1, 32>}, {transform_indices = @transform_3, window_bounds = array<i64: 32, 32>}]} {
    %c0_i32 = arith.constant 0 : i32
    %0 = arith.cmpi eq, %arg2, %c0_i32 : i32
    %1 = arith.extui %0 : i1 to i32
    %c0_i32_0 = arith.constant 0 : i32
    %2 = arith.cmpi ne, %1, %c0_i32_0 : i32
    scf.if %2 {
      %cst_10 = arith.constant 0.000000e+00 : f32
      %13 = vector.broadcast %cst_10 : f32 to vector<32x32xf32>
      %c0_11 = arith.constant 0 : index
      %c0_12 = arith.constant 0 : index
      %14 = vector.load %arg7[%c0_11, %c0_12] : memref<32x32xf32, #tpu.memory_space<vmem>>, vector<32x32xf32>
      tpu.vector_store %arg7[%c0_11, %c0_12], %13 {strides = array<i32>} : memref<32x32xf32, #tpu.memory_space<vmem>>, vector<32x32xf32>,
    } else {
    }
    %c0 = arith.constant 0 : index
    %c0_1 = arith.constant 0 : index
    %3 = vector.load %arg3[%c0, %c0_1] : memref<32x4xf32, #tpu.memory_space<vmem>>, vector<32x4xf32>
    %c0_2 = arith.constant 0 : index
    %c0_3 = arith.constant 0 : index
    %4 = vector.load %arg4[%c0_2, %c0_3] : memref<4x32xbf16, #tpu.memory_space<vmem>>, vector<4x32xbf16>
    %5 = arith.truncf %3 : vector<32x4xf32> to vector<32x4xbf16>
    %c0_4 = arith.constant 0 : index
    %c0_5 = arith.constant 0 : index
    %6 = vector.load %arg7[%c0_4, %c0_5] : memref<32x32xf32, #tpu.memory_space<vmem>>, vector<32x32xf32>
    %cst = arith.constant dense<0.000000e+00> : vector<32x32xf32>
    %7 = tpu.matmul %5, %4, %cst {dimension_numbers = #tpu.dot_dimension_numbers<[1], [0], [0], [1], [0, 0, 1, 1], [], []>} : vector<32x4xbf16>, vector<4x32xbf16>, vector<32x32xf32> -> vector<32x32xf32>
    %8 = arith.addf %6, %7 : vector<32x32xf32>
    %c0_6 = arith.constant 0 : index
    %c0_7 = arith.constant 0 : index
    %9 = vector.load %arg7[%c0_6, %c0_7] : memref<32x32xf32, #tpu.memory_space<vmem>>, vector<32x32xf32>
    tpu.vector_store %arg7[%c0_6, %c0_7], %8 {strides = array<i32>} : memref<32x32xf32, #tpu.memory_space<vmem>>, vector<32x32xf32>,
    %c0_i32_8 = arith.constant 0 : i32
    %10 = arith.cmpi eq, %arg2, %c0_i32_8 : i32
    %11 = arith.extui %10 : i1 to i32
    %c0_i32_9 = arith.constant 0 : i32
    %12 = arith.cmpi ne, %11, %c0_i32_9 : i32
    scf.if %12 {
      %c0_10 = arith.constant 0 : index
      %c0_11 = arith.constant 0 : index
      %13 = vector.load %arg7[%c0_10, %c0_11] : memref<32x32xf32, #tpu.memory_space<vmem>>, vector<32x32xf32>
      %c0_12 = arith.constant 0 : index
      %c0_13 = arith.constant 0 : index
      %14 = vector.load %arg5[%c0_12, %c0_13] : memref<1x32xf32, #tpu.memory_space<vmem>>, vector<1x32xf32>
      %15 = vector.broadcast %14 : vector<1x32xf32> to vector<32x32xf32>
      %16 = arith.addf %13, %15 : vector<32x32xf32>
      %17 = arith.truncf %16 : vector<32x32xf32> to vector<32x32xbf16>
      %c0_14 = arith.constant 0 : index
      %c0_15 = arith.constant 0 : index
      %18 = vector.load %arg6[%c0_14, %c0_15] : memref<32x32xbf16, #tpu.memory_space<vmem>>, vector<32x32xbf16>
      tpu.vector_store %arg6[%c0_14, %c0_15], %17 {strides = array<i32>} : memref<32x32xbf16, #tpu.memory_space<vmem>>, vector<32x32xbf16>,
    } else {
    }
    return
  }
  func.func @transform_0(%arg0: i32, %arg1: i32, %arg2: i32) -> (i32, i32) {
    %c0_i32 = arith.constant 0 : i32
    return %arg0, %arg2 : i32, i32
  }
  func.func @transform_1(%arg0: i32, %arg1: i32, %arg2: i32) -> (i32, i32) {
    %c0_i32 = arith.constant 0 : i32
    return %arg2, %arg1 : i32, i32
  }
  func.func @transform_2(%arg0: i32, %arg1: i32, %arg2: i32) -> (i32, i32) {
    %c0_i32 = arith.constant 0 : i32
    %c0_i32_0 = arith.constant 0 : i32
    return %c0_i32, %arg1 : i32, i32
  }
  func.func @transform_3(%arg0: i32, %arg1: i32, %arg2: i32) -> (i32, i32) {
    %c0_i32 = arith.constant 0 : i32
    return %arg0, %arg1 : i32, i32
  }
}

module attributes {stable_mosaic.version = 11 : i64} {
  func.func @_layernorm_kernel(%arg0: i32, %arg1: memref<32x32xf32, #tpu.memory_space<vmem>>, %arg2: memref<1x32xf32, #tpu.memory_space<vmem>>, %arg3: memref<1x32xf32, #tpu.memory_space<vmem>>, %arg4: memref<32x32xbf16, #tpu.memory_space<vmem>>) attributes {dimension_semantics = [#tpu.dimension_semantics<parallel>], iteration_bounds = array<i64: 1>, scalar_prefetch = 0 : i64, scratch_operands = 0 : i64, tpu.core_type = #tpu.core_type<tc>, window_params = [{transform_indices = @transform_0, window_bounds = array<i64: 32, 32>}, {pipeline_mode = #tpu.pipeline_mode<synchronous>, transform_indices = @transform_1, window_bounds = array<i64: 1, 32>}, {pipeline_mode = #tpu.pipeline_mode<synchronous>, transform_indices = @transform_2, window_bounds = array<i64: 1, 32>}, {transform_indices = @transform_3, window_bounds = array<i64: 32, 32>}]} {
    %c0 = arith.constant 0 : index
    %c0_0 = arith.constant 0 : index
    %0 = vector.load %arg1[%c0, %c0_0] : memref<32x32xf32, #tpu.memory_space<vmem>>, vector<32x32xf32>
    %cst = arith.constant dense<0.000000e+00> : vector<32xf32>
    %1 = vector.multi_reduction <add>, %0, %cst [1] : vector<32x32xf32> to vector<32xf32>
    %2 = vector.shape_cast %1 : vector<32xf32> to vector<32x1xf32>
    %cst_1 = arith.constant 3.200000e+01 : f32
    %3 = vector.broadcast %cst_1 : f32 to vector<32x1xf32>
    %4 = arith.divf %2, %3 : vector<32x1xf32>
    %5 = vector.broadcast %4 : vector<32x1xf32> to vector<32x32xf32>
    %6 = arith.subf %0, %5 : vector<32x32xf32>
    %7 = arith.mulf %6, %6 : vector<32x32xf32>
    %cst_2 = arith.constant dense<0.000000e+00> : vector<32xf32>
    %8 = vector.multi_reduction <add>, %7, %cst_2 [1] : vector<32x32xf32> to vector<32xf32>
    %9 = vector.shape_cast %8 : vector<32xf32> to vector<32x1xf32>
    %cst_3 = arith.constant 3.200000e+01 : f32
    %10 = vector.broadcast %cst_3 : f32 to vector<32x1xf32>
    %11 = arith.divf %9, %10 : vector<32x1xf32>
    %12 = vector.broadcast %4 : vector<32x1xf32> to vector<32x32xf32>
    %13 = arith.subf %0, %12 : vector<32x32xf32>
    %cst_4 = arith.constant 9.99999997E-7 : f32
    %14 = vector.broadcast %cst_4 : f32 to vector<32x1xf32>
    %15 = arith.addf %11, %14 : vector<32x1xf32>
    %16 = math.rsqrt %15 : vector<32x1xf32>
    %17 = vector.broadcast %16 : vector<32x1xf32> to vector<32x32xf32>
    %18 = arith.mulf %13, %17 : vector<32x32xf32>
    %c0_5 = arith.constant 0 : index
    %c0_6 = arith.constant 0 : index
    %19 = vector.load %arg2[%c0_5, %c0_6] : memref<1x32xf32, #tpu.memory_space<vmem>>, vector<1x32xf32>
    %20 = vector.broadcast %19 : vector<1x32xf32> to vector<32x32xf32>
    %21 = arith.mulf %18, %20 : vector<32x32xf32>
    %c0_7 = arith.constant 0 : index
    %c0_8 = arith.constant 0 : index
    %22 = vector.load %arg3[%c0_7, %c0_8] : memref<1x32xf32, #tpu.memory_space<vmem>>, vector<1x32xf32>
    %23 = vector.broadcast %22 : vector<1x32xf32> to vector<32x32xf32>
    %24 = arith.addf %21, %23 : vector<32x32xf32>
    %25 = arith.truncf %24 : vector<32x32xf32> to vector<32x32xbf16>
    %c0_9 = arith.constant 0 : index
    %c0_10 = arith.constant 0 : index
    %26 = vector.load %arg4[%c0_9, %c0_10] : memref<32x32xbf16, #tpu.memory_space<vmem>>, vector<32x32xbf16>
    tpu.vector_store %arg4[%c0_9, %c0_10], %25 {strides = array<i32>} : memref<32x32xbf16, #tpu.memory_space<vmem>>, vector<32x32xbf16>,
    return
  }
  func.func @transform_0(%arg0: i32) -> (i32, i32) {
    %c0_i32 = arith.constant 0 : i32
    %c0_i32_0 = arith.constant 0 : i32
    return %arg0, %c0_i32 : i32, i32
  }
  func.func @transform_1(%arg0: i32) -> (i32, i32) {
    %c0_i32 = arith.constant 0 : i32
    %c0_i32_0 = arith.constant 0 : i32
    %c0_i32_1 = arith.constant 0 : i32
    return %c0_i32, %c0_i32_0 : i32, i32
  }
  func.func @transform_2(%arg0: i32) -> (i32, i32) {
    %c0_i32 = arith.constant 0 : i32
    %c0_i32_0 = arith.constant 0 : i32
    %c0_i32_1 = arith.constant 0 : i32
    return %c0_i32, %c0_i32_0 : i32, i32
  }
  func.func @transform_3(%arg0: i32) -> (i32, i32) {
    %c0_i32 = arith.constant 0 : i32
    %c0_i32_0 = arith.constant 0 : i32
    return %arg0, %c0_i32 : i32, i32
  }
}

module attributes {stable_mosaic.version = 11 : i64} {
  func.func @_self_attn_kernel(%arg0: i32, %arg1: i32, %arg2: memref<1x4x96xbf16, #tpu.memory_space<vmem>>, %arg3: memref<1x4x96xbf16, #tpu.memory_space<vmem>>, %arg4: memref<1x4x32xbf16, #tpu.memory_space<vmem>>) attributes {dimension_semantics = [#tpu.dimension_semantics<parallel>, #tpu.dimension_semantics<parallel>], iteration_bounds = array<i64: 2, 1>, scalar_prefetch = 0 : i64, scratch_operands = 0 : i64, tpu.core_type = #tpu.core_type<tc>, window_params = [{transform_indices = @transform_0, window_bounds = array<i64: 1, 4, 96>}, {transform_indices = @transform_1, window_bounds = array<i64: 1, 4, 96>}, {transform_indices = @transform_2, window_bounds = array<i64: 1, 4, 32>}]} {
    %c0 = arith.constant 0 : index
    %c0_0 = arith.constant 0 : index
    %c0_1 = arith.constant 0 : index
    %0 = vector.load %arg2[%c0, %c0_0, %c0_1] : memref<1x4x96xbf16, #tpu.memory_space<vmem>>, vector<1x4x96xbf16>
    %1 = vector.shape_cast %0 : vector<1x4x96xbf16> to vector<4x96xbf16>
    %2 = vector.extract_strided_slice %1 {offsets = [0, 0], sizes = [4, 32], strides = [1, 1]} : vector<4x96xbf16> to vector<4x32xbf16>
    %c0_2 = arith.constant 0 : index
    %c0_3 = arith.constant 0 : index
    %c0_4 = arith.constant 0 : index
    %3 = vector.load %arg3[%c0_2, %c0_3, %c0_4] : memref<1x4x96xbf16, #tpu.memory_space<vmem>>, vector<1x4x96xbf16>
    %4 = vector.shape_cast %3 : vector<1x4x96xbf16> to vector<4x96xbf16>
    %5 = vector.extract_strided_slice %4 {offsets = [0, 32], sizes = [4, 32], strides = [1, 1]} : vector<4x96xbf16> to vector<4x32xbf16>
    %6 = vector.extract_strided_slice %4 {offsets = [0, 64], sizes = [4, 32], strides = [1, 1]} : vector<4x96xbf16> to vector<4x32xbf16>
    %7 = vector.shape_cast %2 : vector<4x32xbf16> to vector<4x4x8xbf16>
    %8 = tpu.transpose %7, [1, 0, 2] : vector<4x4x8xbf16> -> vector<4x4x8xbf16>
    %9 = vector.shape_cast %5 : vector<4x32xbf16> to vector<4x4x8xbf16>
    %10 = tpu.transpose %9, [1, 0, 2] : vector<4x4x8xbf16> -> vector<4x4x8xbf16>
    %11 = vector.shape_cast %6 : vector<4x32xbf16> to vector<4x4x8xbf16>
    %12 = tpu.transpose %11, [1, 0, 2] : vector<4x4x8xbf16> -> vector<4x4x8xbf16>
    "tpu.trace_start"() <{level = 10 : i32, message = "hqd,hkd->hqk"}> : () -> ()
    %cst = arith.constant dense<0.000000e+00> : vector<4x4x4xf32>
    %13 = tpu.matmul %8, %10, %cst {dimension_numbers = #tpu.dot_dimension_numbers<[2], [2], [1], [1], [0, 0, 0, 1, 1, 1], [0], [0]>} : vector<4x4x8xbf16>, vector<4x4x8xbf16>, vector<4x4x4xf32> -> vector<4x4x4xf32>
    "tpu.trace_stop"() : () -> ()
    %cst_5 = arith.constant 0.353553385 : f32
    %14 = vector.broadcast %cst_5 : f32 to vector<4x4x4xf32>
    %15 = arith.mulf %13, %14 : vector<4x4x4xf32>
    %cst_6 = arith.constant dense<0xFF800000> : vector<4x4xf32>
    %16 = vector.multi_reduction <maximumf>, %15, %cst_6 [2] : vector<4x4x4xf32> to vector<4x4xf32>
    %17 = vector.shape_cast %16 : vector<4x4xf32> to vector<4x4x1xf32>
    %18 = vector.broadcast %17 : vector<4x4x1xf32> to vector<4x4x4xf32>
    %19 = arith.subf %15, %18 : vector<4x4x4xf32>
    %20 = math.exp %19 : vector<4x4x4xf32>
    %cst_7 = arith.constant dense<0.000000e+00> : vector<4x4xf32>
    %21 = vector.multi_reduction <add>, %20, %cst_7 [2] : vector<4x4x4xf32> to vector<4x4xf32>
    %22 = vector.shape_cast %21 : vector<4x4xf32> to vector<4x4x1xf32>
    %23 = vector.broadcast %22 : vector<4x4x1xf32> to vector<4x4x4xf32>
    %24 = arith.divf %20, %23 : vector<4x4x4xf32>
    %25 = arith.truncf %24 : vector<4x4x4xf32> to vector<4x4x4xbf16>
    "tpu.trace_start"() <{level = 10 : i32, message = "hqk,hkd->hqd"}> : () -> ()
    %cst_8 = arith.constant dense<0.000000e+00> : vector<4x4x8xf32>
    %26 = tpu.matmul %25, %12, %cst_8 {dimension_numbers = #tpu.dot_dimension_numbers<[2], [1], [1], [2], [0, 0, 0, 1, 1, 2], [0], [0]>} : vector<4x4x4xbf16>, vector<4x4x8xbf16>, vector<4x4x8xf32> -> vector<4x4x8xf32>
    "tpu.trace_stop"() : () -> ()
    %27 = tpu.transpose %26, [1, 0, 2] : vector<4x4x8xf32> -> vector<4x4x8xf32>
    %28 = vector.shape_cast %27 : vector<4x4x8xf32> to vector<4x32xf32>
    %29 = arith.truncf %28 : vector<4x32xf32> to vector<4x32xbf16>
    %c0_9 = arith.constant 0 : index
    %c0_10 = arith.constant 0 : index
    %c0_11 = arith.constant 0 : index
    %30 = vector.load %arg4[%c0_9, %c0_10, %c0_11] : memref<1x4x32xbf16, #tpu.memory_space<vmem>>, vector<1x4x32xbf16>
    %31 = vector.shape_cast %30 : vector<1x4x32xbf16> to vector<4x32xbf16>
    %32 = vector.shape_cast %29 : vector<4x32xbf16> to vector<1x4x32xbf16>
    tpu.vector_store %arg4[%c0_9, %c0_10, %c0_11], %32 {strides = array<i32>} : memref<1x4x32xbf16, #tpu.memory_space<vmem>>, vector<1x4x32xbf16>,
    return
  }
  func.func @transform_0(%arg0: i32, %arg1: i32) -> (i32, i32, i32) {
    %c0_i32 = arith.constant 0 : i32
    %c0_i32_0 = arith.constant 0 : i32
    return %arg0, %arg1, %c0_i32 : i32, i32, i32
  }
  func.func @transform_1(%arg0: i32, %arg1: i32) -> (i32, i32, i32) {
    %c0_i32 = arith.constant 0 : i32
    %c0_i32_0 = arith.constant 0 : i32
    %c0_i32_1 = arith.constant 0 : i32
    return %arg0, %c0_i32, %c0_i32_0 : i32, i32, i32
  }
  func.func @transform_2(%arg0: i32, %arg1: i32) -> (i32, i32, i32) {
    %c0_i32 = arith.constant 0 : i32
    %c0_i32_0 = arith.constant 0 : i32
    return %arg0, %arg1, %c0_i32 : i32, i32, i32
  }
}

module attributes {stable_mosaic.version = 11 : i64} {
  func.func @_ln_linear_kernel(%arg0: i32, %arg1: i32, %arg2: memref<8x32xbf16, #tpu.memory_space<vmem>>, %arg3: memref<1x32xf32, #tpu.memory_space<vmem>>, %arg4: memref<1x32xf32, #tpu.memory_space<vmem>>, %arg5: memref<32x96xbf16, #tpu.memory_space<vmem>>, %arg6: memref<1x96xf32, #tpu.memory_space<vmem>>, %arg7: memref<8x96xbf16, #tpu.memory_space<vmem>>, %arg8: memref<8x32xbf16, #tpu.memory_space<vmem>>) attributes {dimension_semantics = [#tpu.dimension_semantics<parallel>, #tpu.dimension_semantics<arbitrary>], iteration_bounds = array<i64: 1, 1>, scalar_prefetch = 0 : i64, scratch_operands = 1 : i64, tpu.core_type = #tpu.core_type<tc>, window_params = [{transform_indices = @transform_0, window_bounds = array<i64: 8, 32>}, {pipeline_mode = #tpu.pipeline_mode<synchronous>, transform_indices = @transform_1, window_bounds = array<i64: 1, 32>}, {pipeline_mode = #tpu.pipeline_mode<synchronous>, transform_indices = @transform_2, window_bounds = array<i64: 1, 32>}, {transform_indices = @transform_3, window_bounds = array<i64: 32, 96>}, {transform_indices = @transform_4, window_bounds = array<i64: 1, 96>}, {transform_indices = @transform_5, window_bounds = array<i64: 8, 96>}]} {
    %c0_i32 = arith.constant 0 : i32
    %0 = arith.cmpi eq, %arg1, %c0_i32 : i32
    %1 = arith.extui %0 : i1 to i32
    %c0_i32_0 = arith.constant 0 : i32
    %2 = arith.cmpi ne, %1, %c0_i32_0 : i32
    scf.if %2 {
      %c0_8 = arith.constant 0 : index
      %c0_9 = arith.constant 0 : index
      %11 = vector.load %arg2[%c0_8, %c0_9] : memref<8x32xbf16, #tpu.memory_space<vmem>>, vector<8x32xbf16>
      %12 = arith.extf %11 : vector<8x32xbf16> to vector<8x32xf32>
      %cst_10 = arith.constant dense<0.000000e+00> : vector<8xf32>
      %13 = vector.multi_reduction <add>, %12, %cst_10 [1] : vector<8x32xf32> to vector<8xf32>
      %14 = vector.shape_cast %13 : vector<8xf32> to vector<8x1xf32>
      %cst_11 = arith.constant 3.200000e+01 : f32
      %15 = vector.broadcast %cst_11 : f32 to vector<8x1xf32>
      %16 = arith.divf %14, %15 : vector<8x1xf32>
      %17 = vector.broadcast %16 : vector<8x1xf32> to vector<8x32xf32>
      %18 = arith.subf %12, %17 : vector<8x32xf32>
      %19 = arith.mulf %18, %18 : vector<8x32xf32>
      %cst_12 = arith.constant dense<0.000000e+00> : vector<8xf32>
      %20 = vector.multi_reduction <add>, %19, %cst_12 [1] : vector<8x32xf32> to vector<8xf32>
      %21 = vector.shape_cast %20 : vector<8xf32> to vector<8x1xf32>
      %cst_13 = arith.constant 3.200000e+01 : f32
      %22 = vector.broadcast %cst_13 : f32 to vector<8x1xf32>
      %23 = arith.divf %21, %22 : vector<8x1xf32>
      %24 = vector.broadcast %16 : vector<8x1xf32> to vector<8x32xf32>
      %25 = arith.subf %12, %24 : vector<8x32xf32>
      %cst_14 = arith.constant 9.99999974E-6 : f32
      %26 = vector.broadcast %cst_14 : f32 to vector<8x1xf32>
      %27 = arith.addf %23, %26 : vector<8x1xf32>
      %28 = math.rsqrt %27 : vector<8x1xf32>
      %29 = vector.broadcast %28 : vector<8x1xf32> to vector<8x32xf32>
      %30 = arith.mulf %25, %29 : vector<8x32xf32>
      %c0_15 = arith.constant 0 : index
      %c0_16 = arith.constant 0 : index
      %31 = vector.load %arg3[%c0_15, %c0_16] : memref<1x32xf32, #tpu.memory_space<vmem>>, vector<1x32xf32>
      %32 = vector.broadcast %31 : vector<1x32xf32> to vector<8x32xf32>
      %33 = arith.mulf %30, %32 : vector<8x32xf32>
      %c0_17 = arith.constant 0 : index
      %c0_18 = arith.constant 0 : index
      %34 = vector.load %arg4[%c0_17, %c0_18] : memref<1x32xf32, #tpu.memory_space<vmem>>, vector<1x32xf32>
      %35 = vector.broadcast %34 : vector<1x32xf32> to vector<8x32xf32>
      %36 = arith.addf %33, %35 : vector<8x32xf32>
      %37 = arith.truncf %36 : vector<8x32xf32> to vector<8x32xbf16>
      %c0_19 = arith.constant 0 : index
      %c0_20 = arith.constant 0 : index
      %38 = vector.load %arg8[%c0_19, %c0_20] : memref<8x32xbf16, #tpu.memory_space<vmem>>, vector<8x32xbf16>
      tpu.vector_store %arg8[%c0_19, %c0_20], %37 {strides = array<i32>} : memref<8x32xbf16, #tpu.memory_space<vmem>>, vector<8x32xbf16>,
    } else {
    }
    %c0 = arith.constant 0 : index
    %c0_1 = arith.constant 0 : index
    %3 = vector.load %arg8[%c0, %c0_1] : memref<8x32xbf16, #tpu.memory_space<vmem>>, vector<8x32xbf16>
    %c0_2 = arith.constant 0 : index
    %c0_3 = arith.constant 0 : index
    %4 = vector.load %arg5[%c0_2, %c0_3] : memref<32x96xbf16, #tpu.memory_space<vmem>>, vector<32x96xbf16>
    %cst = arith.constant dense<0.000000e+00> : vector<8x96xf32>
    %5 = tpu.matmul %3, %4, %cst {dimension_numbers = #tpu.dot_dimension_numbers<[1], [0], [0], [1], [0, 0, 1, 1], [], []>} : vector<8x32xbf16>, vector<32x96xbf16>, vector<8x96xf32> -> vector<8x96xf32>
    %c0_4 = arith.constant 0 : index
    %c0_5 = arith.constant 0 : index
    %6 = vector.load %arg6[%c0_4, %c0_5] : memref<1x96xf32, #tpu.memory_space<vmem>>, vector<1x96xf32>
    %7 = vector.broadcast %6 : vector<1x96xf32> to vector<8x96xf32>
    %8 = arith.addf %5, %7 : vector<8x96xf32>
    %9 = arith.truncf %8 : vector<8x96xf32> to vector<8x96xbf16>
    %c0_6 = arith.constant 0 : index
    %c0_7 = arith.constant 0 : index
    %10 = vector.load %arg7[%c0_6, %c0_7] : memref<8x96xbf16, #tpu.memory_space<vmem>>, vector<8x96xbf16>
    tpu.vector_store %arg7[%c0_6, %c0_7], %9 {strides = array<i32>} : memref<8x96xbf16, #tpu.memory_space<vmem>>, vector<8x96xbf16>,
    return
  }
  func.func @transform_0(%arg0: i32, %arg1: i32) -> (i32, i32) {
    %c0_i32 = arith.constant 0 : i32
    %c0_i32_0 = arith.constant 0 : i32
    return %arg0, %c0_i32 : i32, i32
  }
  func.func @transform_1(%arg0: i32, %arg1: i32) -> (i32, i32) {
    %c0_i32 = arith.constant 0 : i32
    %c0_i32_0 = arith.constant 0 : i32
    %c0_i32_1 = arith.constant 0 : i32
    return %c0_i32, %c0_i32_0 : i32, i32
  }
  func.func @transform_2(%arg0: i32, %arg1: i32) -> (i32, i32) {
    %c0_i32 = arith.constant 0 : i32
    %c0_i32_0 = arith.constant 0 : i32
    %c0_i32_1 = arith.constant 0 : i32
    return %c0_i32, %c0_i32_0 : i32, i32
  }
  func.func @transform_3(%arg0: i32, %arg1: i32) -> (i32, i32) {
    %c0_i32 = arith.constant 0 : i32
    %c0_i32_0 = arith.constant 0 : i32
    return %c0_i32, %arg1 : i32, i32
  }
  func.func @transform_4(%arg0: i32, %arg1: i32) -> (i32, i32) {
    %c0_i32 = arith.constant 0 : i32
    %c0_i32_0 = arith.constant 0 : i32
    return %c0_i32, %arg1 : i32, i32
  }
  func.func @transform_5(%arg0: i32, %arg1: i32) -> (i32, i32) {
    %c0_i32 = arith.constant 0 : i32
    return %arg0, %arg1 : i32, i32
  }
}

module attributes {stable_mosaic.version = 11 : i64} {
  func.func @_linear_kernel(%arg0: i32, %arg1: i32, %arg2: i32, %arg3: memref<8x32xbf16, #tpu.memory_space<vmem>>, %arg4: memref<32x32xbf16, #tpu.memory_space<vmem>>, %arg5: memref<1x32xf32, #tpu.memory_space<vmem>>, %arg6: memref<8x32xbf16, #tpu.memory_space<vmem>>, %arg7: memref<8x32xbf16, #tpu.memory_space<vmem>>, %arg8: memref<8x32xf32, #tpu.memory_space<vmem>>) attributes {dimension_semantics = [#tpu.dimension_semantics<parallel>, #tpu.dimension_semantics<parallel>, #tpu.dimension_semantics<arbitrary>], iteration_bounds = array<i64: 1, 1, 1>, scalar_prefetch = 0 : i64, scratch_operands = 1 : i64, tpu.core_type = #tpu.core_type<tc>, window_params = [{transform_indices = @transform_0, window_bounds = array<i64: 8, 32>}, {transform_indices = @transform_1, window_bounds = array<i64: 32, 32>}, {transform_indices = @transform_2, window_bounds = array<i64: 1, 32>}, {transform_indices = @transform_3, window_bounds = array<i64: 8, 32>}, {transform_indices = @transform_4, window_bounds = array<i64: 8, 32>}]} {
    %c0_i32 = arith.constant 0 : i32
    %0 = arith.cmpi eq, %arg2, %c0_i32 : i32
    %1 = arith.extui %0 : i1 to i32
    %c0_i32_0 = arith.constant 0 : i32
    %2 = arith.cmpi ne, %1, %c0_i32_0 : i32
    scf.if %2 {
      %cst_10 = arith.constant 0.000000e+00 : f32
      %12 = vector.broadcast %cst_10 : f32 to vector<8x32xf32>
      %c0_11 = arith.constant 0 : index
      %c0_12 = arith.constant 0 : index
      %13 = vector.load %arg8[%c0_11, %c0_12] : memref<8x32xf32, #tpu.memory_space<vmem>>, vector<8x32xf32>
      tpu.vector_store %arg8[%c0_11, %c0_12], %12 {strides = array<i32>} : memref<8x32xf32, #tpu.memory_space<vmem>>, vector<8x32xf32>,
    } else {
    }
    %c0 = arith.constant 0 : index
    %c0_1 = arith.constant 0 : index
    %3 = vector.load %arg3[%c0, %c0_1] : memref<8x32xbf16, #tpu.memory_space<vmem>>, vector<8x32xbf16>
    %c0_2 = arith.constant 0 : index
    %c0_3 = arith.constant 0 : index
    %4 = vector.load %arg4[%c0_2, %c0_3] : memref<32x32xbf16, #tpu.memory_space<vmem>>, vector<32x32xbf16>
    %c0_4 = arith.constant 0 : index
    %c0_5 = arith.constant 0 : index
    %5 = vector.load %arg8[%c0_4, %c0_5] : memref<8x32xf32, #tpu.memory_space<vmem>>, vector<8x32xf32>
    %cst = arith.constant dense<0.000000e+00> : vector<8x32xf32>
    %6 = tpu.matmul %3, %4, %cst {dimension_numbers = #tpu.dot_dimension_numbers<[1], [0], [0], [1], [0, 0, 1, 1], [], []>} : vector<8x32xbf16>, vector<32x32xbf16>, vector<8x32xf32> -> vector<8x32xf32>
    %7 = arith.addf %5, %6 : vector<8x32xf32>
    %c0_6 = arith.constant 0 : index
    %c0_7 = arith.constant 0 : index
    %8 = vector.load %arg8[%c0_6, %c0_7] : memref<8x32xf32, #tpu.memory_space<vmem>>, vector<8x32xf32>
    tpu.vector_store %arg8[%c0_6, %c0_7], %7 {strides = array<i32>} : memref<8x32xf32, #tpu.memory_space<vmem>>, vector<8x32xf32>,
    %c0_i32_8 = arith.constant 0 : i32
    %9 = arith.cmpi eq, %arg2, %c0_i32_8 : i32
    %10 = arith.extui %9 : i1 to i32
    %c0_i32_9 = arith.constant 0 : i32
    %11 = arith.cmpi ne, %10, %c0_i32_9 : i32
    scf.if %11 {
      %c0_10 = arith.constant 0 : index
      %c0_11 = arith.constant 0 : index
      %12 = vector.load %arg8[%c0_10, %c0_11] : memref<8x32xf32, #tpu.memory_space<vmem>>, vector<8x32xf32>
      %c0_12 = arith.constant 0 : index
      %c0_13 = arith.constant 0 : index
      %13 = vector.load %arg5[%c0_12, %c0_13] : memref<1x32xf32, #tpu.memory_space<vmem>>, vector<1x32xf32>
      %14 = vector.broadcast %13 : vector<1x32xf32> to vector<8x32xf32>
      %15 = arith.addf %12, %14 : vector<8x32xf32>
      %c0_14 = arith.constant 0 : index
      %c0_15 = arith.constant 0 : index
      %16 = vector.load %arg6[%c0_14, %c0_15] : memref<8x32xbf16, #tpu.memory_space<vmem>>, vector<8x32xbf16>
      %17 = arith.extf %16 : vector<8x32xbf16> to vector<8x32xf32>
      %18 = arith.addf %15, %17 : vector<8x32xf32>
      %19 = arith.truncf %18 : vector<8x32xf32> to vector<8x32xbf16>
      %c0_16 = arith.constant 0 : index
      %c0_17 = arith.constant 0 : index
      %20 = vector.load %arg7[%c0_16, %c0_17] : memref<8x32xbf16, #tpu.memory_space<vmem>>, vector<8x32xbf16>
      tpu.vector_store %arg7[%c0_16, %c0_17], %19 {strides = array<i32>} : memref<8x32xbf16, #tpu.memory_space<vmem>>, vector<8x32xbf16>,
    } else {
    }
    return
  }
  func.func @transform_0(%arg0: i32, %arg1: i32, %arg2: i32) -> (i32, i32) {
    %c0_i32 = arith.constant 0 : i32
    return %arg0, %arg2 : i32, i32
  }
  func.func @transform_1(%arg0: i32, %arg1: i32, %arg2: i32) -> (i32, i32) {
    %c0_i32 = arith.constant 0 : i32
    return %arg2, %arg1 : i32, i32
  }
  func.func @transform_2(%arg0: i32, %arg1: i32, %arg2: i32) -> (i32, i32) {
    %c0_i32 = arith.constant 0 : i32
    %c0_i32_0 = arith.constant 0 : i32
    return %c0_i32, %arg1 : i32, i32
  }
  func.func @transform_3(%arg0: i32, %arg1: i32, %arg2: i32) -> (i32, i32) {
    %c0_i32 = arith.constant 0 : i32
    return %arg0, %arg1 : i32, i32
  }
  func.func @transform_4(%arg0: i32, %arg1: i32, %arg2: i32) -> (i32, i32) {
    %c0_i32 = arith.constant 0 : i32
    return %arg0, %arg1 : i32, i32
  }
}

module attributes {stable_mosaic.version = 11 : i64} {
  func.func @_mlp_kernel(%arg0: i32, %arg1: i32, %arg2: memref<8x32xbf16, #tpu.memory_space<vmem>>, %arg3: memref<1x32xf32, #tpu.memory_space<vmem>>, %arg4: memref<1x32xf32, #tpu.memory_space<vmem>>, %arg5: memref<32x128xbf16, #tpu.memory_space<vmem>>, %arg6: memref<1x128xf32, #tpu.memory_space<vmem>>, %arg7: memref<128x32xbf16, #tpu.memory_space<vmem>>, %arg8: memref<1x32xf32, #tpu.memory_space<vmem>>, %arg9: memref<8x32xbf16, #tpu.memory_space<vmem>>, %arg10: memref<8x32xf32, #tpu.memory_space<vmem>>, %arg11: memref<8x32xbf16, #tpu.memory_space<vmem>>) attributes {dimension_semantics = [#tpu.dimension_semantics<parallel>, #tpu.dimension_semantics<arbitrary>], iteration_bounds = array<i64: 1, 1>, scalar_prefetch = 0 : i64, scratch_operands = 2 : i64, tpu.core_type = #tpu.core_type<tc>, window_params = [{transform_indices = @transform_0, window_bounds = array<i64: 8, 32>}, {pipeline_mode = #tpu.pipeline_mode<synchronous>, transform_indices = @transform_1, window_bounds = array<i64: 1, 32>}, {pipeline_mode = #tpu.pipeline_mode<synchronous>, transform_indices = @transform_2, window_bounds = array<i64: 1, 32>}, {transform_indices = @transform_3, window_bounds = array<i64: 32, 128>}, {transform_indices = @transform_4, window_bounds = array<i64: 1, 128>}, {transform_indices = @transform_5, window_bounds = array<i64: 128, 32>}, {pipeline_mode = #tpu.pipeline_mode<synchronous>, transform_indices = @transform_6, window_bounds = array<i64: 1, 32>}, {transform_indices = @transform_7, window_bounds = array<i64: 8, 32>}]} {
    %c0_i32 = arith.constant 0 : i32
    %0 = arith.cmpi eq, %arg1, %c0_i32 : i32
    %1 = arith.extui %0 : i1 to i32
    %c0_i32_0 = arith.constant 0 : i32
    %2 = arith.cmpi ne, %1, %c0_i32_0 : i32
    scf.if %2 {
      %c0_19 = arith.constant 0 : index
      %c0_20 = arith.constant 0 : index
      %31 = vector.load %arg2[%c0_19, %c0_20] : memref<8x32xbf16, #tpu.memory_space<vmem>>, vector<8x32xbf16>
      %32 = arith.extf %31 : vector<8x32xbf16> to vector<8x32xf32>
      %cst_21 = arith.constant dense<0.000000e+00> : vector<8xf32>
      %33 = vector.multi_reduction <add>, %32, %cst_21 [1] : vector<8x32xf32> to vector<8xf32>
      %34 = vector.shape_cast %33 : vector<8xf32> to vector<8x1xf32>
      %cst_22 = arith.constant 3.200000e+01 : f32
      %35 = vector.broadcast %cst_22 : f32 to vector<8x1xf32>
      %36 = arith.divf %34, %35 : vector<8x1xf32>
      %37 = vector.broadcast %36 : vector<8x1xf32> to vector<8x32xf32>
      %38 = arith.subf %32, %37 : vector<8x32xf32>
      %39 = arith.mulf %38, %38 : vector<8x32xf32>
      %cst_23 = arith.constant dense<0.000000e+00> : vector<8xf32>
      %40 = vector.multi_reduction <add>, %39, %cst_23 [1] : vector<8x32xf32> to vector<8xf32>
      %41 = vector.shape_cast %40 : vector<8xf32> to vector<8x1xf32>
      %cst_24 = arith.constant 3.200000e+01 : f32
      %42 = vector.broadcast %cst_24 : f32 to vector<8x1xf32>
      %43 = arith.divf %41, %42 : vector<8x1xf32>
      %44 = vector.broadcast %36 : vector<8x1xf32> to vector<8x32xf32>
      %45 = arith.subf %32, %44 : vector<8x32xf32>
      %cst_25 = arith.constant 9.99999974E-6 : f32
      %46 = vector.broadcast %cst_25 : f32 to vector<8x1xf32>
      %47 = arith.addf %43, %46 : vector<8x1xf32>
      %48 = math.rsqrt %47 : vector<8x1xf32>
      %49 = vector.broadcast %48 : vector<8x1xf32> to vector<8x32xf32>
      %50 = arith.mulf %45, %49 : vector<8x32xf32>
      %c0_26 = arith.constant 0 : index
      %c0_27 = arith.constant 0 : index
      %51 = vector.load %arg3[%c0_26, %c0_27] : memref<1x32xf32, #tpu.memory_space<vmem>>, vector<1x32xf32>
      %52 = vector.broadcast %51 : vector<1x32xf32> to vector<8x32xf32>
      %53 = arith.mulf %50, %52 : vector<8x32xf32>
      %c0_28 = arith.constant 0 : index
      %c0_29 = arith.constant 0 : index
      %54 = vector.load %arg4[%c0_28, %c0_29] : memref<1x32xf32, #tpu.memory_space<vmem>>, vector<1x32xf32>
      %55 = vector.broadcast %54 : vector<1x32xf32> to vector<8x32xf32>
      %56 = arith.addf %53, %55 : vector<8x32xf32>
      %57 = arith.truncf %56 : vector<8x32xf32> to vector<8x32xbf16>
      %c0_30 = arith.constant 0 : index
      %c0_31 = arith.constant 0 : index
      %58 = vector.load %arg11[%c0_30, %c0_31] : memref<8x32xbf16, #tpu.memory_space<vmem>>, vector<8x32xbf16>
      tpu.vector_store %arg11[%c0_30, %c0_31], %57 {strides = array<i32>} : memref<8x32xbf16, #tpu.memory_space<vmem>>, vector<8x32xbf16>,
      %c0_32 = arith.constant 0 : index
      %c0_33 = arith.constant 0 : index
      %59 = vector.load %arg8[%c0_32, %c0_33] : memref<1x32xf32, #tpu.memory_space<vmem>>, vector<1x32xf32>
      %60 = vector.broadcast %59 : vector<1x32xf32> to vector<8x32xf32>
      %61 = arith.addf %32, %60 : vector<8x32xf32>
      %c0_34 = arith.constant 0 : index
      %c0_35 = arith.constant 0 : index
      %62 = vector.load %arg10[%c0_34, %c0_35] : memref<8x32xf32, #tpu.memory_space<vmem>>, vector<8x32xf32>
      tpu.vector_store %arg10[%c0_34, %c0_35], %61 {strides = array<i32>} : memref<8x32xf32, #tpu.memory_space<vmem>>, vector<8x32xf32>,
    } else {
    }
    %c0 = arith.constant 0 : index
    %c0_1 = arith.constant 0 : index
    %3 = vector.load %arg11[%c0, %c0_1] : memref<8x32xbf16, #tpu.memory_space<vmem>>, vector<8x32xbf16>
    %c0_2 = arith.constant 0 : index
    %c0_3 = arith.constant 0 : index
    %4 = vector.load %arg5[%c0_2, %c0_3] : memref<32x128xbf16, #tpu.memory_space<vmem>>, vector<32x128xbf16>
    %cst = arith.constant dense<0.000000e+00> : vector<8x128xf32>
    %5 = tpu.matmul %3, %4, %cst {dimension_numbers = #tpu.dot_dimension_numbers<[1], [0], [0], [1], [0, 0, 1, 1], [], []>} : vector<8x32xbf16>, vector<32x128xbf16>, vector<8x128xf32> -> vector<8x128xf32>
    %c0_4 = arith.constant 0 : index
    %c0_5 = arith.constant 0 : index
    %6 = vector.load %arg6[%c0_4, %c0_5] : memref<1x128xf32, #tpu.memory_space<vmem>>, vector<1x128xf32>
    %7 = vector.broadcast %6 : vector<1x128xf32> to vector<8x128xf32>
    %8 = arith.addf %5, %7 : vector<8x128xf32>
    %9 = arith.mulf %8, %8 : vector<8x128xf32>
    %10 = arith.mulf %8, %9 : vector<8x128xf32>
    %cst_6 = arith.constant 4.471500e-02 : f32
    %11 = vector.broadcast %cst_6 : f32 to vector<8x128xf32>
    %12 = arith.mulf %11, %10 : vector<8x128xf32>
    %13 = arith.addf %8, %12 : vector<8x128xf32>
    %cst_7 = arith.constant 0.797884583 : f32
    %14 = vector.broadcast %cst_7 : f32 to vector<8x128xf32>
    %15 = arith.mulf %14, %13 : vector<8x128xf32>
    %16 = math.tanh %15 : vector<8x128xf32>
    %cst_8 = arith.constant 1.000000e+00 : f32
    %17 = vector.broadcast %cst_8 : f32 to vector<8x128xf32>
    %18 = arith.addf %17, %16 : vector<8x128xf32>
    %cst_9 = arith.constant 5.000000e-01 : f32
    %19 = vector.broadcast %cst_9 : f32 to vector<8x128xf32>
    %20 = arith.mulf %19, %18 : vector<8x128xf32>
    %21 = arith.mulf %8, %20 : vector<8x128xf32>
    %c0_10 = arith.constant 0 : index
    %c0_11 = arith.constant 0 : index
    %22 = vector.load %arg10[%c0_10, %c0_11] : memref<8x32xf32, #tpu.memory_space<vmem>>, vector<8x32xf32>
    %23 = arith.truncf %21 : vector<8x128xf32> to vector<8x128xbf16>
    %c0_12 = arith.constant 0 : index
    %c0_13 = arith.constant 0 : index
    %24 = vector.load %arg7[%c0_12, %c0_13] : memref<128x32xbf16, #tpu.memory_space<vmem>>, vector<128x32xbf16>
    %cst_14 = arith.constant dense<0.000000e+00> : vector<8x32xf32>
    %25 = tpu.matmul %23, %24, %cst_14 {dimension_numbers = #tpu.dot_dimension_numbers<[1], [0], [0], [1], [0, 0, 1, 1], [], []>} : vector<8x128xbf16>, vector<128x32xbf16>, vector<8x32xf32> -> vector<8x32xf32>
    %26 = arith.addf %22, %25 : vector<8x32xf32>
    %c0_15 = arith.constant 0 : index
    %c0_16 = arith.constant 0 : index
    %27 = vector.load %arg10[%c0_15, %c0_16] : memref<8x32xf32, #tpu.memory_space<vmem>>, vector<8x32xf32>
    tpu.vector_store %arg10[%c0_15, %c0_16], %26 {strides = array<i32>} : memref<8x32xf32, #tpu.memory_space<vmem>>, vector<8x32xf32>,
    %c0_i32_17 = arith.constant 0 : i32
    %28 = arith.cmpi eq, %arg1, %c0_i32_17 : i32
    %29 = arith.extui %28 : i1 to i32
    %c0_i32_18 = arith.constant 0 : i32
    %30 = arith.cmpi ne, %29, %c0_i32_18 : i32
    scf.if %30 {
      %c0_19 = arith.constant 0 : index
      %c0_20 = arith.constant 0 : index
      %31 = vector.load %arg10[%c0_19, %c0_20] : memref<8x32xf32, #tpu.memory_space<vmem>>, vector<8x32xf32>
      %32 = arith.truncf %31 : vector<8x32xf32> to vector<8x32xbf16>
      %c0_21 = arith.constant 0 : index
      %c0_22 = arith.constant 0 : index
      %33 = vector.load %arg9[%c0_21, %c0_22] : memref<8x32xbf16, #tpu.memory_space<vmem>>, vector<8x32xbf16>
      tpu.vector_store %arg9[%c0_21, %c0_22], %32 {strides = array<i32>} : memref<8x32xbf16, #tpu.memory_space<vmem>>, vector<8x32xbf16>,
    } else {
    }
    return
  }
  func.func @transform_0(%arg0: i32, %arg1: i32) -> (i32, i32) {
    %c0_i32 = arith.constant 0 : i32
    %c0_i32_0 = arith.constant 0 : i32
    return %arg0, %c0_i32 : i32, i32
  }
  func.func @transform_1(%arg0: i32, %arg1: i32) -> (i32, i32) {
    %c0_i32 = arith.constant 0 : i32
    %c0_i32_0 = arith.constant 0 : i32
    %c0_i32_1 = arith.constant 0 : i32
    return %c0_i32, %c0_i32_0 : i32, i32
  }
  func.func @transform_2(%arg0: i32, %arg1: i32) -> (i32, i32) {
    %c0_i32 = arith.constant 0 : i32
    %c0_i32_0 = arith.constant 0 : i32
    %c0_i32_1 = arith.constant 0 : i32
    return %c0_i32, %c0_i32_0 : i32, i32
  }
  func.func @transform_3(%arg0: i32, %arg1: i32) -> (i32, i32) {
    %c0_i32 = arith.constant 0 : i32
    %c0_i32_0 = arith.constant 0 : i32
    return %c0_i32, %arg1 : i32, i32
  }
  func.func @transform_4(%arg0: i32, %arg1: i32) -> (i32, i32) {
    %c0_i32 = arith.constant 0 : i32
    %c0_i32_0 = arith.constant 0 : i32
    return %c0_i32, %arg1 : i32, i32
  }
  func.func @transform_5(%arg0: i32, %arg1: i32) -> (i32, i32) {
    %c0_i32 = arith.constant 0 : i32
    %c0_i32_0 = arith.constant 0 : i32
    return %arg1, %c0_i32 : i32, i32
  }
  func.func @transform_6(%arg0: i32, %arg1: i32) -> (i32, i32) {
    %c0_i32 = arith.constant 0 : i32
    %c0_i32_0 = arith.constant 0 : i32
    %c0_i32_1 = arith.constant 0 : i32
    return %c0_i32, %c0_i32_0 : i32, i32
  }
  func.func @transform_7(%arg0: i32, %arg1: i32) -> (i32, i32) {
    %c0_i32 = arith.constant 0 : i32
    %c0_i32_0 = arith.constant 0 : i32
    return %arg0, %c0_i32 : i32, i32
  }
}

module attributes {stable_mosaic.version = 11 : i64} {
  func.func @_layernorm_kernel(%arg0: i32, %arg1: memref<8x32xbf16, #tpu.memory_space<vmem>>, %arg2: memref<1x32xf32, #tpu.memory_space<vmem>>, %arg3: memref<1x32xf32, #tpu.memory_space<vmem>>, %arg4: memref<8x32xbf16, #tpu.memory_space<vmem>>) attributes {dimension_semantics = [#tpu.dimension_semantics<parallel>], iteration_bounds = array<i64: 1>, scalar_prefetch = 0 : i64, scratch_operands = 0 : i64, tpu.core_type = #tpu.core_type<tc>, window_params = [{transform_indices = @transform_0, window_bounds = array<i64: 8, 32>}, {pipeline_mode = #tpu.pipeline_mode<synchronous>, transform_indices = @transform_1, window_bounds = array<i64: 1, 32>}, {pipeline_mode = #tpu.pipeline_mode<synchronous>, transform_indices = @transform_2, window_bounds = array<i64: 1, 32>}, {transform_indices = @transform_3, window_bounds = array<i64: 8, 32>}]} {
    %c0 = arith.constant 0 : index
    %c0_0 = arith.constant 0 : index
    %0 = vector.load %arg1[%c0, %c0_0] : memref<8x32xbf16, #tpu.memory_space<vmem>>, vector<8x32xbf16>
    %1 = arith.extf %0 : vector<8x32xbf16> to vector<8x32xf32>
    %cst = arith.constant dense<0.000000e+00> : vector<8xf32>
    %2 = vector.multi_reduction <add>, %1, %cst [1] : vector<8x32xf32> to vector<8xf32>
    %3 = vector.shape_cast %2 : vector<8xf32> to vector<8x1xf32>
    %cst_1 = arith.constant 3.200000e+01 : f32
    %4 = vector.broadcast %cst_1 : f32 to vector<8x1xf32>
    %5 = arith.divf %3, %4 : vector<8x1xf32>
    %6 = vector.broadcast %5 : vector<8x1xf32> to vector<8x32xf32>
    %7 = arith.subf %1, %6 : vector<8x32xf32>
    %8 = arith.mulf %7, %7 : vector<8x32xf32>
    %cst_2 = arith.constant dense<0.000000e+00> : vector<8xf32>
    %9 = vector.multi_reduction <add>, %8, %cst_2 [1] : vector<8x32xf32> to vector<8xf32>
    %10 = vector.shape_cast %9 : vector<8xf32> to vector<8x1xf32>
    %cst_3 = arith.constant 3.200000e+01 : f32
    %11 = vector.broadcast %cst_3 : f32 to vector<8x1xf32>
    %12 = arith.divf %10, %11 : vector<8x1xf32>
    %13 = vector.broadcast %5 : vector<8x1xf32> to vector<8x32xf32>
    %14 = arith.subf %1, %13 : vector<8x32xf32>
    %cst_4 = arith.constant 9.99999974E-6 : f32
    %15 = vector.broadcast %cst_4 : f32 to vector<8x1xf32>
    %16 = arith.addf %12, %15 : vector<8x1xf32>
    %17 = math.rsqrt %16 : vector<8x1xf32>
    %18 = vector.broadcast %17 : vector<8x1xf32> to vector<8x32xf32>
    %19 = arith.mulf %14, %18 : vector<8x32xf32>
    %c0_5 = arith.constant 0 : index
    %c0_6 = arith.constant 0 : index
    %20 = vector.load %arg2[%c0_5, %c0_6] : memref<1x32xf32, #tpu.memory_space<vmem>>, vector<1x32xf32>
    %21 = vector.broadcast %20 : vector<1x32xf32> to vector<8x32xf32>
    %22 = arith.mulf %19, %21 : vector<8x32xf32>
    %c0_7 = arith.constant 0 : index
    %c0_8 = arith.constant 0 : index
    %23 = vector.load %arg3[%c0_7, %c0_8] : memref<1x32xf32, #tpu.memory_space<vmem>>, vector<1x32xf32>
    %24 = vector.broadcast %23 : vector<1x32xf32> to vector<8x32xf32>
    %25 = arith.addf %22, %24 : vector<8x32xf32>
    %26 = arith.truncf %25 : vector<8x32xf32> to vector<8x32xbf16>
    %c0_9 = arith.constant 0 : index
    %c0_10 = arith.constant 0 : index
    %27 = vector.load %arg4[%c0_9, %c0_10] : memref<8x32xbf16, #tpu.memory_space<vmem>>, vector<8x32xbf16>
    tpu.vector_store %arg4[%c0_9, %c0_10], %26 {strides = array<i32>} : memref<8x32xbf16, #tpu.memory_space<vmem>>, vector<8x32xbf16>,
    return
  }
  func.func @transform_0(%arg0: i32) -> (i32, i32) {
    %c0_i32 = arith.constant 0 : i32
    %c0_i32_0 = arith.constant 0 : i32
    return %arg0, %c0_i32 : i32, i32
  }
  func.func @transform_1(%arg0: i32) -> (i32, i32) {
    %c0_i32 = arith.constant 0 : i32
    %c0_i32_0 = arith.constant 0 : i32
    %c0_i32_1 = arith.constant 0 : i32
    return %c0_i32, %c0_i32_0 : i32, i32
  }
  func.func @transform_2(%arg0: i32) -> (i32, i32) {
    %c0_i32 = arith.constant 0 : i32
    %c0_i32_0 = arith.constant 0 : i32
    %c0_i32_1 = arith.constant 0 : i32
    return %c0_i32, %c0_i32_0 : i32, i32
  }
  func.func @transform_3(%arg0: i32) -> (i32, i32) {
    %c0_i32 = arith.constant 0 : i32
    %c0_i32_0 = arith.constant 0 : i32
    return %arg0, %c0_i32 : i32, i32
  }
}

module attributes {stable_mosaic.version = 11 : i64} {
  func.func @_linear_kernel(%arg0: i32, %arg1: i32, %arg2: i32, %arg3: memref<8x32xbf16, #tpu.memory_space<vmem>>, %arg4: memref<32x32xbf16, #tpu.memory_space<vmem>>, %arg5: memref<1x32xf32, #tpu.memory_space<vmem>>, %arg6: memref<8x32xbf16, #tpu.memory_space<vmem>>, %arg7: memref<8x32xf32, #tpu.memory_space<vmem>>) attributes {dimension_semantics = [#tpu.dimension_semantics<parallel>, #tpu.dimension_semantics<parallel>, #tpu.dimension_semantics<arbitrary>], iteration_bounds = array<i64: 1, 1, 1>, scalar_prefetch = 0 : i64, scratch_operands = 1 : i64, tpu.core_type = #tpu.core_type<tc>, window_params = [{transform_indices = @transform_0, window_bounds = array<i64: 8, 32>}, {transform_indices = @transform_1, window_bounds = array<i64: 32, 32>}, {transform_indices = @transform_2, window_bounds = array<i64: 1, 32>}, {transform_indices = @transform_3, window_bounds = array<i64: 8, 32>}]} {
    %c0_i32 = arith.constant 0 : i32
    %0 = arith.cmpi eq, %arg2, %c0_i32 : i32
    %1 = arith.extui %0 : i1 to i32
    %c0_i32_0 = arith.constant 0 : i32
    %2 = arith.cmpi ne, %1, %c0_i32_0 : i32
    scf.if %2 {
      %cst_10 = arith.constant 0.000000e+00 : f32
      %12 = vector.broadcast %cst_10 : f32 to vector<8x32xf32>
      %c0_11 = arith.constant 0 : index
      %c0_12 = arith.constant 0 : index
      %13 = vector.load %arg7[%c0_11, %c0_12] : memref<8x32xf32, #tpu.memory_space<vmem>>, vector<8x32xf32>
      tpu.vector_store %arg7[%c0_11, %c0_12], %12 {strides = array<i32>} : memref<8x32xf32, #tpu.memory_space<vmem>>, vector<8x32xf32>,
    } else {
    }
    %c0 = arith.constant 0 : index
    %c0_1 = arith.constant 0 : index
    %3 = vector.load %arg3[%c0, %c0_1] : memref<8x32xbf16, #tpu.memory_space<vmem>>, vector<8x32xbf16>
    %c0_2 = arith.constant 0 : index
    %c0_3 = arith.constant 0 : index
    %4 = vector.load %arg4[%c0_2, %c0_3] : memref<32x32xbf16, #tpu.memory_space<vmem>>, vector<32x32xbf16>
    %c0_4 = arith.constant 0 : index
    %c0_5 = arith.constant 0 : index
    %5 = vector.load %arg7[%c0_4, %c0_5] : memref<8x32xf32, #tpu.memory_space<vmem>>, vector<8x32xf32>
    %cst = arith.constant dense<0.000000e+00> : vector<8x32xf32>
    %6 = tpu.matmul %3, %4, %cst {dimension_numbers = #tpu.dot_dimension_numbers<[1], [0], [0], [1], [0, 0, 1, 1], [], []>} : vector<8x32xbf16>, vector<32x32xbf16>, vector<8x32xf32> -> vector<8x32xf32>
    %7 = arith.addf %5, %6 : vector<8x32xf32>
    %c0_6 = arith.constant 0 : index
    %c0_7 = arith.constant 0 : index
    %8 = vector.load %arg7[%c0_6, %c0_7] : memref<8x32xf32, #tpu.memory_space<vmem>>, vector<8x32xf32>
    tpu.vector_store %arg7[%c0_6, %c0_7], %7 {strides = array<i32>} : memref<8x32xf32, #tpu.memory_space<vmem>>, vector<8x32xf32>,
    %c0_i32_8 = arith.constant 0 : i32
    %9 = arith.cmpi eq, %arg2, %c0_i32_8 : i32
    %10 = arith.extui %9 : i1 to i32
    %c0_i32_9 = arith.constant 0 : i32
    %11 = arith.cmpi ne, %10, %c0_i32_9 : i32
    scf.if %11 {
      %c0_10 = arith.constant 0 : index
      %c0_11 = arith.constant 0 : index
      %12 = vector.load %arg7[%c0_10, %c0_11] : memref<8x32xf32, #tpu.memory_space<vmem>>, vector<8x32xf32>
      %c0_12 = arith.constant 0 : index
      %c0_13 = arith.constant 0 : index
      %13 = vector.load %arg5[%c0_12, %c0_13] : memref<1x32xf32, #tpu.memory_space<vmem>>, vector<1x32xf32>
      %14 = vector.broadcast %13 : vector<1x32xf32> to vector<8x32xf32>
      %15 = arith.addf %12, %14 : vector<8x32xf32>
      %16 = arith.truncf %15 : vector<8x32xf32> to vector<8x32xbf16>
      %c0_14 = arith.constant 0 : index
      %c0_15 = arith.constant 0 : index
      %17 = vector.load %arg6[%c0_14, %c0_15] : memref<8x32xbf16, #tpu.memory_space<vmem>>, vector<8x32xbf16>
      tpu.vector_store %arg6[%c0_14, %c0_15], %16 {strides = array<i32>} : memref<8x32xbf16, #tpu.memory_space<vmem>>, vector<8x32xbf16>,
    } else {
    }
    return
  }
  func.func @transform_0(%arg0: i32, %arg1: i32, %arg2: i32) -> (i32, i32) {
    %c0_i32 = arith.constant 0 : i32
    return %arg0, %arg2 : i32, i32
  }
  func.func @transform_1(%arg0: i32, %arg1: i32, %arg2: i32) -> (i32, i32) {
    %c0_i32 = arith.constant 0 : i32
    return %arg2, %arg1 : i32, i32
  }
  func.func @transform_2(%arg0: i32, %arg1: i32, %arg2: i32) -> (i32, i32) {
    %c0_i32 = arith.constant 0 : i32
    %c0_i32_0 = arith.constant 0 : i32
    return %c0_i32, %arg1 : i32, i32
  }
  func.func @transform_3(%arg0: i32, %arg1: i32, %arg2: i32) -> (i32, i32) {
    %c0_i32 = arith.constant 0 : i32
    return %arg0, %arg1 : i32, i32
  }
}

module attributes {stable_mosaic.version = 11 : i64} {
  func.func @_ln_linear_kernel(%arg0: i32, %arg1: i32, %arg2: memref<32x32xbf16, #tpu.memory_space<vmem>>, %arg3: memref<1x32xf32, #tpu.memory_space<vmem>>, %arg4: memref<1x32xf32, #tpu.memory_space<vmem>>, %arg5: memref<32x96xbf16, #tpu.memory_space<vmem>>, %arg6: memref<1x96xf32, #tpu.memory_space<vmem>>, %arg7: memref<32x96xbf16, #tpu.memory_space<vmem>>, %arg8: memref<32x32xbf16, #tpu.memory_space<vmem>>) attributes {dimension_semantics = [#tpu.dimension_semantics<parallel>, #tpu.dimension_semantics<arbitrary>], iteration_bounds = array<i64: 1, 1>, scalar_prefetch = 0 : i64, scratch_operands = 1 : i64, tpu.core_type = #tpu.core_type<tc>, window_params = [{transform_indices = @transform_0, window_bounds = array<i64: 32, 32>}, {pipeline_mode = #tpu.pipeline_mode<synchronous>, transform_indices = @transform_1, window_bounds = array<i64: 1, 32>}, {pipeline_mode = #tpu.pipeline_mode<synchronous>, transform_indices = @transform_2, window_bounds = array<i64: 1, 32>}, {transform_indices = @transform_3, window_bounds = array<i64: 32, 96>}, {transform_indices = @transform_4, window_bounds = array<i64: 1, 96>}, {transform_indices = @transform_5, window_bounds = array<i64: 32, 96>}]} {
    %c0_i32 = arith.constant 0 : i32
    %0 = arith.cmpi eq, %arg1, %c0_i32 : i32
    %1 = arith.extui %0 : i1 to i32
    %c0_i32_0 = arith.constant 0 : i32
    %2 = arith.cmpi ne, %1, %c0_i32_0 : i32
    scf.if %2 {
      %c0_8 = arith.constant 0 : index
      %c0_9 = arith.constant 0 : index
      %11 = vector.load %arg2[%c0_8, %c0_9] : memref<32x32xbf16, #tpu.memory_space<vmem>>, vector<32x32xbf16>
      %12 = arith.extf %11 : vector<32x32xbf16> to vector<32x32xf32>
      %cst_10 = arith.constant dense<0.000000e+00> : vector<32xf32>
      %13 = vector.multi_reduction <add>, %12, %cst_10 [1] : vector<32x32xf32> to vector<32xf32>
      %14 = vector.shape_cast %13 : vector<32xf32> to vector<32x1xf32>
      %cst_11 = arith.constant 3.200000e+01 : f32
      %15 = vector.broadcast %cst_11 : f32 to vector<32x1xf32>
      %16 = arith.divf %14, %15 : vector<32x1xf32>
      %17 = vector.broadcast %16 : vector<32x1xf32> to vector<32x32xf32>
      %18 = arith.subf %12, %17 : vector<32x32xf32>
      %19 = arith.mulf %18, %18 : vector<32x32xf32>
      %cst_12 = arith.constant dense<0.000000e+00> : vector<32xf32>
      %20 = vector.multi_reduction <add>, %19, %cst_12 [1] : vector<32x32xf32> to vector<32xf32>
      %21 = vector.shape_cast %20 : vector<32xf32> to vector<32x1xf32>
      %cst_13 = arith.constant 3.200000e+01 : f32
      %22 = vector.broadcast %cst_13 : f32 to vector<32x1xf32>
      %23 = arith.divf %21, %22 : vector<32x1xf32>
      %24 = vector.broadcast %16 : vector<32x1xf32> to vector<32x32xf32>
      %25 = arith.subf %12, %24 : vector<32x32xf32>
      %cst_14 = arith.constant 9.99999974E-6 : f32
      %26 = vector.broadcast %cst_14 : f32 to vector<32x1xf32>
      %27 = arith.addf %23, %26 : vector<32x1xf32>
      %28 = math.rsqrt %27 : vector<32x1xf32>
      %29 = vector.broadcast %28 : vector<32x1xf32> to vector<32x32xf32>
      %30 = arith.mulf %25, %29 : vector<32x32xf32>
      %c0_15 = arith.constant 0 : index
      %c0_16 = arith.constant 0 : index
      %31 = vector.load %arg3[%c0_15, %c0_16] : memref<1x32xf32, #tpu.memory_space<vmem>>, vector<1x32xf32>
      %32 = vector.broadcast %31 : vector<1x32xf32> to vector<32x32xf32>
      %33 = arith.mulf %30, %32 : vector<32x32xf32>
      %c0_17 = arith.constant 0 : index
      %c0_18 = arith.constant 0 : index
      %34 = vector.load %arg4[%c0_17, %c0_18] : memref<1x32xf32, #tpu.memory_space<vmem>>, vector<1x32xf32>
      %35 = vector.broadcast %34 : vector<1x32xf32> to vector<32x32xf32>
      %36 = arith.addf %33, %35 : vector<32x32xf32>
      %37 = arith.truncf %36 : vector<32x32xf32> to vector<32x32xbf16>
      %c0_19 = arith.constant 0 : index
      %c0_20 = arith.constant 0 : index
      %38 = vector.load %arg8[%c0_19, %c0_20] : memref<32x32xbf16, #tpu.memory_space<vmem>>, vector<32x32xbf16>
      tpu.vector_store %arg8[%c0_19, %c0_20], %37 {strides = array<i32>} : memref<32x32xbf16, #tpu.memory_space<vmem>>, vector<32x32xbf16>,
    } else {
    }
    %c0 = arith.constant 0 : index
    %c0_1 = arith.constant 0 : index
    %3 = vector.load %arg8[%c0, %c0_1] : memref<32x32xbf16, #tpu.memory_space<vmem>>, vector<32x32xbf16>
    %c0_2 = arith.constant 0 : index
    %c0_3 = arith.constant 0 : index
    %4 = vector.load %arg5[%c0_2, %c0_3] : memref<32x96xbf16, #tpu.memory_space<vmem>>, vector<32x96xbf16>
    %cst = arith.constant dense<0.000000e+00> : vector<32x96xf32>
    %5 = tpu.matmul %3, %4, %cst {dimension_numbers = #tpu.dot_dimension_numbers<[1], [0], [0], [1], [0, 0, 1, 1], [], []>} : vector<32x32xbf16>, vector<32x96xbf16>, vector<32x96xf32> -> vector<32x96xf32>
    %c0_4 = arith.constant 0 : index
    %c0_5 = arith.constant 0 : index
    %6 = vector.load %arg6[%c0_4, %c0_5] : memref<1x96xf32, #tpu.memory_space<vmem>>, vector<1x96xf32>
    %7 = vector.broadcast %6 : vector<1x96xf32> to vector<32x96xf32>
    %8 = arith.addf %5, %7 : vector<32x96xf32>
    %9 = arith.truncf %8 : vector<32x96xf32> to vector<32x96xbf16>
    %c0_6 = arith.constant 0 : index
    %c0_7 = arith.constant 0 : index
    %10 = vector.load %arg7[%c0_6, %c0_7] : memref<32x96xbf16, #tpu.memory_space<vmem>>, vector<32x96xbf16>
    tpu.vector_store %arg7[%c0_6, %c0_7], %9 {strides = array<i32>} : memref<32x96xbf16, #tpu.memory_space<vmem>>, vector<32x96xbf16>,
    return
  }
  func.func @transform_0(%arg0: i32, %arg1: i32) -> (i32, i32) {
    %c0_i32 = arith.constant 0 : i32
    %c0_i32_0 = arith.constant 0 : i32
    return %arg0, %c0_i32 : i32, i32
  }
  func.func @transform_1(%arg0: i32, %arg1: i32) -> (i32, i32) {
    %c0_i32 = arith.constant 0 : i32
    %c0_i32_0 = arith.constant 0 : i32
    %c0_i32_1 = arith.constant 0 : i32
    return %c0_i32, %c0_i32_0 : i32, i32
  }
  func.func @transform_2(%arg0: i32, %arg1: i32) -> (i32, i32) {
    %c0_i32 = arith.constant 0 : i32
    %c0_i32_0 = arith.constant 0 : i32
    %c0_i32_1 = arith.constant 0 : i32
    return %c0_i32, %c0_i32_0 : i32, i32
  }
  func.func @transform_3(%arg0: i32, %arg1: i32) -> (i32, i32) {
    %c0_i32 = arith.constant 0 : i32
    %c0_i32_0 = arith.constant 0 : i32
    return %c0_i32, %arg1 : i32, i32
  }
  func.func @transform_4(%arg0: i32, %arg1: i32) -> (i32, i32) {
    %c0_i32 = arith.constant 0 : i32
    %c0_i32_0 = arith.constant 0 : i32
    return %c0_i32, %arg1 : i32, i32
  }
  func.func @transform_5(%arg0: i32, %arg1: i32) -> (i32, i32) {
    %c0_i32 = arith.constant 0 : i32
    return %arg0, %arg1 : i32, i32
  }
}

module attributes {stable_mosaic.version = 11 : i64} {
  func.func @_self_attn_kernel(%arg0: i32, %arg1: i32, %arg2: memref<1x16x96xbf16, #tpu.memory_space<vmem>>, %arg3: memref<1x16x96xbf16, #tpu.memory_space<vmem>>, %arg4: memref<1x16x32xbf16, #tpu.memory_space<vmem>>) attributes {dimension_semantics = [#tpu.dimension_semantics<parallel>, #tpu.dimension_semantics<parallel>], iteration_bounds = array<i64: 2, 1>, scalar_prefetch = 0 : i64, scratch_operands = 0 : i64, tpu.core_type = #tpu.core_type<tc>, window_params = [{transform_indices = @transform_0, window_bounds = array<i64: 1, 16, 96>}, {transform_indices = @transform_1, window_bounds = array<i64: 1, 16, 96>}, {transform_indices = @transform_2, window_bounds = array<i64: 1, 16, 32>}]} {
    %c0 = arith.constant 0 : index
    %c0_0 = arith.constant 0 : index
    %c0_1 = arith.constant 0 : index
    %0 = vector.load %arg2[%c0, %c0_0, %c0_1] : memref<1x16x96xbf16, #tpu.memory_space<vmem>>, vector<1x16x96xbf16>
    %1 = vector.shape_cast %0 : vector<1x16x96xbf16> to vector<16x96xbf16>
    %2 = vector.extract_strided_slice %1 {offsets = [0, 0], sizes = [16, 32], strides = [1, 1]} : vector<16x96xbf16> to vector<16x32xbf16>
    %c0_2 = arith.constant 0 : index
    %c0_3 = arith.constant 0 : index
    %c0_4 = arith.constant 0 : index
    %3 = vector.load %arg3[%c0_2, %c0_3, %c0_4] : memref<1x16x96xbf16, #tpu.memory_space<vmem>>, vector<1x16x96xbf16>
    %4 = vector.shape_cast %3 : vector<1x16x96xbf16> to vector<16x96xbf16>
    %5 = vector.extract_strided_slice %4 {offsets = [0, 32], sizes = [16, 32], strides = [1, 1]} : vector<16x96xbf16> to vector<16x32xbf16>
    %6 = vector.extract_strided_slice %4 {offsets = [0, 64], sizes = [16, 32], strides = [1, 1]} : vector<16x96xbf16> to vector<16x32xbf16>
    %7 = vector.shape_cast %2 : vector<16x32xbf16> to vector<16x4x8xbf16>
    %8 = tpu.transpose %7, [1, 0, 2] : vector<16x4x8xbf16> -> vector<4x16x8xbf16>
    %9 = vector.shape_cast %5 : vector<16x32xbf16> to vector<16x4x8xbf16>
    %10 = tpu.transpose %9, [1, 0, 2] : vector<16x4x8xbf16> -> vector<4x16x8xbf16>
    %11 = vector.shape_cast %6 : vector<16x32xbf16> to vector<16x4x8xbf16>
    %12 = tpu.transpose %11, [1, 0, 2] : vector<16x4x8xbf16> -> vector<4x16x8xbf16>
    "tpu.trace_start"() <{level = 10 : i32, message = "hqd,hkd->hqk"}> : () -> ()
    %cst = arith.constant dense<0.000000e+00> : vector<4x16x16xf32>
    %13 = tpu.matmul %8, %10, %cst {dimension_numbers = #tpu.dot_dimension_numbers<[2], [2], [1], [1], [0, 0, 0, 1, 1, 1], [0], [0]>} : vector<4x16x8xbf16>, vector<4x16x8xbf16>, vector<4x16x16xf32> -> vector<4x16x16xf32>
    "tpu.trace_stop"() : () -> ()
    %cst_5 = arith.constant 0.353553385 : f32
    %14 = vector.broadcast %cst_5 : f32 to vector<4x16x16xf32>
    %15 = arith.mulf %13, %14 : vector<4x16x16xf32>
    %cst_6 = arith.constant dense<0xFF800000> : vector<4x16xf32>
    %16 = vector.multi_reduction <maximumf>, %15, %cst_6 [2] : vector<4x16x16xf32> to vector<4x16xf32>
    %17 = vector.shape_cast %16 : vector<4x16xf32> to vector<4x16x1xf32>
    %18 = vector.broadcast %17 : vector<4x16x1xf32> to vector<4x16x16xf32>
    %19 = arith.subf %15, %18 : vector<4x16x16xf32>
    %20 = math.exp %19 : vector<4x16x16xf32>
    %cst_7 = arith.constant dense<0.000000e+00> : vector<4x16xf32>
    %21 = vector.multi_reduction <add>, %20, %cst_7 [2] : vector<4x16x16xf32> to vector<4x16xf32>
    %22 = vector.shape_cast %21 : vector<4x16xf32> to vector<4x16x1xf32>
    %23 = vector.broadcast %22 : vector<4x16x1xf32> to vector<4x16x16xf32>
    %24 = arith.divf %20, %23 : vector<4x16x16xf32>
    %25 = arith.truncf %24 : vector<4x16x16xf32> to vector<4x16x16xbf16>
    "tpu.trace_start"() <{level = 10 : i32, message = "hqk,hkd->hqd"}> : () -> ()
    %cst_8 = arith.constant dense<0.000000e+00> : vector<4x16x8xf32>
    %26 = tpu.matmul %25, %12, %cst_8 {dimension_numbers = #tpu.dot_dimension_numbers<[2], [1], [1], [2], [0, 0, 0, 1, 1, 2], [0], [0]>} : vector<4x16x16xbf16>, vector<4x16x8xbf16>, vector<4x16x8xf32> -> vector<4x16x8xf32>
    "tpu.trace_stop"() : () -> ()
    %27 = tpu.transpose %26, [1, 0, 2] : vector<4x16x8xf32> -> vector<16x4x8xf32>
    %28 = vector.shape_cast %27 : vector<16x4x8xf32> to vector<16x32xf32>
    %29 = arith.truncf %28 : vector<16x32xf32> to vector<16x32xbf16>
    %c0_9 = arith.constant 0 : index
    %c0_10 = arith.constant 0 : index
    %c0_11 = arith.constant 0 : index
    %30 = vector.load %arg4[%c0_9, %c0_10, %c0_11] : memref<1x16x32xbf16, #tpu.memory_space<vmem>>, vector<1x16x32xbf16>
    %31 = vector.shape_cast %30 : vector<1x16x32xbf16> to vector<16x32xbf16>
    %32 = vector.shape_cast %29 : vector<16x32xbf16> to vector<1x16x32xbf16>
    tpu.vector_store %arg4[%c0_9, %c0_10, %c0_11], %32 {strides = array<i32>} : memref<1x16x32xbf16, #tpu.memory_space<vmem>>, vector<1x16x32xbf16>,
    return
  }
  func.func @transform_0(%arg0: i32, %arg1: i32) -> (i32, i32, i32) {
    %c0_i32 = arith.constant 0 : i32
    %c0_i32_0 = arith.constant 0 : i32
    return %arg0, %arg1, %c0_i32 : i32, i32, i32
  }
  func.func @transform_1(%arg0: i32, %arg1: i32) -> (i32, i32, i32) {
    %c0_i32 = arith.constant 0 : i32
    %c0_i32_0 = arith.constant 0 : i32
    %c0_i32_1 = arith.constant 0 : i32
    return %arg0, %c0_i32, %c0_i32_0 : i32, i32, i32
  }
  func.func @transform_2(%arg0: i32, %arg1: i32) -> (i32, i32, i32) {
    %c0_i32 = arith.constant 0 : i32
    %c0_i32_0 = arith.constant 0 : i32
    return %arg0, %arg1, %c0_i32 : i32, i32, i32
  }
}

module attributes {stable_mosaic.version = 11 : i64} {
  func.func @_linear_kernel(%arg0: i32, %arg1: i32, %arg2: i32, %arg3: memref<32x32xbf16, #tpu.memory_space<vmem>>, %arg4: memref<32x32xbf16, #tpu.memory_space<vmem>>, %arg5: memref<1x32xf32, #tpu.memory_space<vmem>>, %arg6: memref<32x32xbf16, #tpu.memory_space<vmem>>, %arg7: memref<32x32xbf16, #tpu.memory_space<vmem>>, %arg8: memref<32x32xf32, #tpu.memory_space<vmem>>) attributes {dimension_semantics = [#tpu.dimension_semantics<parallel>, #tpu.dimension_semantics<parallel>, #tpu.dimension_semantics<arbitrary>], iteration_bounds = array<i64: 1, 1, 1>, scalar_prefetch = 0 : i64, scratch_operands = 1 : i64, tpu.core_type = #tpu.core_type<tc>, window_params = [{transform_indices = @transform_0, window_bounds = array<i64: 32, 32>}, {transform_indices = @transform_1, window_bounds = array<i64: 32, 32>}, {transform_indices = @transform_2, window_bounds = array<i64: 1, 32>}, {transform_indices = @transform_3, window_bounds = array<i64: 32, 32>}, {transform_indices = @transform_4, window_bounds = array<i64: 32, 32>}]} {
    %c0_i32 = arith.constant 0 : i32
    %0 = arith.cmpi eq, %arg2, %c0_i32 : i32
    %1 = arith.extui %0 : i1 to i32
    %c0_i32_0 = arith.constant 0 : i32
    %2 = arith.cmpi ne, %1, %c0_i32_0 : i32
    scf.if %2 {
      %cst_10 = arith.constant 0.000000e+00 : f32
      %12 = vector.broadcast %cst_10 : f32 to vector<32x32xf32>
      %c0_11 = arith.constant 0 : index
      %c0_12 = arith.constant 0 : index
      %13 = vector.load %arg8[%c0_11, %c0_12] : memref<32x32xf32, #tpu.memory_space<vmem>>, vector<32x32xf32>
      tpu.vector_store %arg8[%c0_11, %c0_12], %12 {strides = array<i32>} : memref<32x32xf32, #tpu.memory_space<vmem>>, vector<32x32xf32>,
    } else {
    }
    %c0 = arith.constant 0 : index
    %c0_1 = arith.constant 0 : index
    %3 = vector.load %arg3[%c0, %c0_1] : memref<32x32xbf16, #tpu.memory_space<vmem>>, vector<32x32xbf16>
    %c0_2 = arith.constant 0 : index
    %c0_3 = arith.constant 0 : index
    %4 = vector.load %arg4[%c0_2, %c0_3] : memref<32x32xbf16, #tpu.memory_space<vmem>>, vector<32x32xbf16>
    %c0_4 = arith.constant 0 : index
    %c0_5 = arith.constant 0 : index
    %5 = vector.load %arg8[%c0_4, %c0_5] : memref<32x32xf32, #tpu.memory_space<vmem>>, vector<32x32xf32>
    %cst = arith.constant dense<0.000000e+00> : vector<32x32xf32>
    %6 = tpu.matmul %3, %4, %cst {dimension_numbers = #tpu.dot_dimension_numbers<[1], [0], [0], [1], [0, 0, 1, 1], [], []>} : vector<32x32xbf16>, vector<32x32xbf16>, vector<32x32xf32> -> vector<32x32xf32>
    %7 = arith.addf %5, %6 : vector<32x32xf32>
    %c0_6 = arith.constant 0 : index
    %c0_7 = arith.constant 0 : index
    %8 = vector.load %arg8[%c0_6, %c0_7] : memref<32x32xf32, #tpu.memory_space<vmem>>, vector<32x32xf32>
    tpu.vector_store %arg8[%c0_6, %c0_7], %7 {strides = array<i32>} : memref<32x32xf32, #tpu.memory_space<vmem>>, vector<32x32xf32>,
    %c0_i32_8 = arith.constant 0 : i32
    %9 = arith.cmpi eq, %arg2, %c0_i32_8 : i32
    %10 = arith.extui %9 : i1 to i32
    %c0_i32_9 = arith.constant 0 : i32
    %11 = arith.cmpi ne, %10, %c0_i32_9 : i32
    scf.if %11 {
      %c0_10 = arith.constant 0 : index
      %c0_11 = arith.constant 0 : index
      %12 = vector.load %arg8[%c0_10, %c0_11] : memref<32x32xf32, #tpu.memory_space<vmem>>, vector<32x32xf32>
      %c0_12 = arith.constant 0 : index
      %c0_13 = arith.constant 0 : index
      %13 = vector.load %arg5[%c0_12, %c0_13] : memref<1x32xf32, #tpu.memory_space<vmem>>, vector<1x32xf32>
      %14 = vector.broadcast %13 : vector<1x32xf32> to vector<32x32xf32>
      %15 = arith.addf %12, %14 : vector<32x32xf32>
      %c0_14 = arith.constant 0 : index
      %c0_15 = arith.constant 0 : index
      %16 = vector.load %arg6[%c0_14, %c0_15] : memref<32x32xbf16, #tpu.memory_space<vmem>>, vector<32x32xbf16>
      %17 = arith.extf %16 : vector<32x32xbf16> to vector<32x32xf32>
      %18 = arith.addf %15, %17 : vector<32x32xf32>
      %19 = arith.truncf %18 : vector<32x32xf32> to vector<32x32xbf16>
      %c0_16 = arith.constant 0 : index
      %c0_17 = arith.constant 0 : index
      %20 = vector.load %arg7[%c0_16, %c0_17] : memref<32x32xbf16, #tpu.memory_space<vmem>>, vector<32x32xbf16>
      tpu.vector_store %arg7[%c0_16, %c0_17], %19 {strides = array<i32>} : memref<32x32xbf16, #tpu.memory_space<vmem>>, vector<32x32xbf16>,
    } else {
    }
    return
  }
  func.func @transform_0(%arg0: i32, %arg1: i32, %arg2: i32) -> (i32, i32) {
    %c0_i32 = arith.constant 0 : i32
    return %arg0, %arg2 : i32, i32
  }
  func.func @transform_1(%arg0: i32, %arg1: i32, %arg2: i32) -> (i32, i32) {
    %c0_i32 = arith.constant 0 : i32
    return %arg2, %arg1 : i32, i32
  }
  func.func @transform_2(%arg0: i32, %arg1: i32, %arg2: i32) -> (i32, i32) {
    %c0_i32 = arith.constant 0 : i32
    %c0_i32_0 = arith.constant 0 : i32
    return %c0_i32, %arg1 : i32, i32
  }
  func.func @transform_3(%arg0: i32, %arg1: i32, %arg2: i32) -> (i32, i32) {
    %c0_i32 = arith.constant 0 : i32
    return %arg0, %arg1 : i32, i32
  }
  func.func @transform_4(%arg0: i32, %arg1: i32, %arg2: i32) -> (i32, i32) {
    %c0_i32 = arith.constant 0 : i32
    return %arg0, %arg1 : i32, i32
  }
}

module attributes {stable_mosaic.version = 11 : i64} {
  func.func @_mlp_kernel(%arg0: i32, %arg1: i32, %arg2: memref<32x32xbf16, #tpu.memory_space<vmem>>, %arg3: memref<1x32xf32, #tpu.memory_space<vmem>>, %arg4: memref<1x32xf32, #tpu.memory_space<vmem>>, %arg5: memref<32x128xbf16, #tpu.memory_space<vmem>>, %arg6: memref<1x128xf32, #tpu.memory_space<vmem>>, %arg7: memref<128x32xbf16, #tpu.memory_space<vmem>>, %arg8: memref<1x32xf32, #tpu.memory_space<vmem>>, %arg9: memref<32x32xbf16, #tpu.memory_space<vmem>>, %arg10: memref<32x32xf32, #tpu.memory_space<vmem>>, %arg11: memref<32x32xbf16, #tpu.memory_space<vmem>>) attributes {dimension_semantics = [#tpu.dimension_semantics<parallel>, #tpu.dimension_semantics<arbitrary>], iteration_bounds = array<i64: 1, 1>, scalar_prefetch = 0 : i64, scratch_operands = 2 : i64, tpu.core_type = #tpu.core_type<tc>, window_params = [{transform_indices = @transform_0, window_bounds = array<i64: 32, 32>}, {pipeline_mode = #tpu.pipeline_mode<synchronous>, transform_indices = @transform_1, window_bounds = array<i64: 1, 32>}, {pipeline_mode = #tpu.pipeline_mode<synchronous>, transform_indices = @transform_2, window_bounds = array<i64: 1, 32>}, {transform_indices = @transform_3, window_bounds = array<i64: 32, 128>}, {transform_indices = @transform_4, window_bounds = array<i64: 1, 128>}, {transform_indices = @transform_5, window_bounds = array<i64: 128, 32>}, {pipeline_mode = #tpu.pipeline_mode<synchronous>, transform_indices = @transform_6, window_bounds = array<i64: 1, 32>}, {transform_indices = @transform_7, window_bounds = array<i64: 32, 32>}]} {
    %c0_i32 = arith.constant 0 : i32
    %0 = arith.cmpi eq, %arg1, %c0_i32 : i32
    %1 = arith.extui %0 : i1 to i32
    %c0_i32_0 = arith.constant 0 : i32
    %2 = arith.cmpi ne, %1, %c0_i32_0 : i32
    scf.if %2 {
      %c0_19 = arith.constant 0 : index
      %c0_20 = arith.constant 0 : index
      %31 = vector.load %arg2[%c0_19, %c0_20] : memref<32x32xbf16, #tpu.memory_space<vmem>>, vector<32x32xbf16>
      %32 = arith.extf %31 : vector<32x32xbf16> to vector<32x32xf32>
      %cst_21 = arith.constant dense<0.000000e+00> : vector<32xf32>
      %33 = vector.multi_reduction <add>, %32, %cst_21 [1] : vector<32x32xf32> to vector<32xf32>
      %34 = vector.shape_cast %33 : vector<32xf32> to vector<32x1xf32>
      %cst_22 = arith.constant 3.200000e+01 : f32
      %35 = vector.broadcast %cst_22 : f32 to vector<32x1xf32>
      %36 = arith.divf %34, %35 : vector<32x1xf32>
      %37 = vector.broadcast %36 : vector<32x1xf32> to vector<32x32xf32>
      %38 = arith.subf %32, %37 : vector<32x32xf32>
      %39 = arith.mulf %38, %38 : vector<32x32xf32>
      %cst_23 = arith.constant dense<0.000000e+00> : vector<32xf32>
      %40 = vector.multi_reduction <add>, %39, %cst_23 [1] : vector<32x32xf32> to vector<32xf32>
      %41 = vector.shape_cast %40 : vector<32xf32> to vector<32x1xf32>
      %cst_24 = arith.constant 3.200000e+01 : f32
      %42 = vector.broadcast %cst_24 : f32 to vector<32x1xf32>
      %43 = arith.divf %41, %42 : vector<32x1xf32>
      %44 = vector.broadcast %36 : vector<32x1xf32> to vector<32x32xf32>
      %45 = arith.subf %32, %44 : vector<32x32xf32>
      %cst_25 = arith.constant 9.99999974E-6 : f32
      %46 = vector.broadcast %cst_25 : f32 to vector<32x1xf32>
      %47 = arith.addf %43, %46 : vector<32x1xf32>
      %48 = math.rsqrt %47 : vector<32x1xf32>
      %49 = vector.broadcast %48 : vector<32x1xf32> to vector<32x32xf32>
      %50 = arith.mulf %45, %49 : vector<32x32xf32>
      %c0_26 = arith.constant 0 : index
      %c0_27 = arith.constant 0 : index
      %51 = vector.load %arg3[%c0_26, %c0_27] : memref<1x32xf32, #tpu.memory_space<vmem>>, vector<1x32xf32>
      %52 = vector.broadcast %51 : vector<1x32xf32> to vector<32x32xf32>
      %53 = arith.mulf %50, %52 : vector<32x32xf32>
      %c0_28 = arith.constant 0 : index
      %c0_29 = arith.constant 0 : index
      %54 = vector.load %arg4[%c0_28, %c0_29] : memref<1x32xf32, #tpu.memory_space<vmem>>, vector<1x32xf32>
      %55 = vector.broadcast %54 : vector<1x32xf32> to vector<32x32xf32>
      %56 = arith.addf %53, %55 : vector<32x32xf32>
      %57 = arith.truncf %56 : vector<32x32xf32> to vector<32x32xbf16>
      %c0_30 = arith.constant 0 : index
      %c0_31 = arith.constant 0 : index
      %58 = vector.load %arg11[%c0_30, %c0_31] : memref<32x32xbf16, #tpu.memory_space<vmem>>, vector<32x32xbf16>
      tpu.vector_store %arg11[%c0_30, %c0_31], %57 {strides = array<i32>} : memref<32x32xbf16, #tpu.memory_space<vmem>>, vector<32x32xbf16>,
      %c0_32 = arith.constant 0 : index
      %c0_33 = arith.constant 0 : index
      %59 = vector.load %arg8[%c0_32, %c0_33] : memref<1x32xf32, #tpu.memory_space<vmem>>, vector<1x32xf32>
      %60 = vector.broadcast %59 : vector<1x32xf32> to vector<32x32xf32>
      %61 = arith.addf %32, %60 : vector<32x32xf32>
      %c0_34 = arith.constant 0 : index
      %c0_35 = arith.constant 0 : index
      %62 = vector.load %arg10[%c0_34, %c0_35] : memref<32x32xf32, #tpu.memory_space<vmem>>, vector<32x32xf32>
      tpu.vector_store %arg10[%c0_34, %c0_35], %61 {strides = array<i32>} : memref<32x32xf32, #tpu.memory_space<vmem>>, vector<32x32xf32>,
    } else {
    }
    %c0 = arith.constant 0 : index
    %c0_1 = arith.constant 0 : index
    %3 = vector.load %arg11[%c0, %c0_1] : memref<32x32xbf16, #tpu.memory_space<vmem>>, vector<32x32xbf16>
    %c0_2 = arith.constant 0 : index
    %c0_3 = arith.constant 0 : index
    %4 = vector.load %arg5[%c0_2, %c0_3] : memref<32x128xbf16, #tpu.memory_space<vmem>>, vector<32x128xbf16>
    %cst = arith.constant dense<0.000000e+00> : vector<32x128xf32>
    %5 = tpu.matmul %3, %4, %cst {dimension_numbers = #tpu.dot_dimension_numbers<[1], [0], [0], [1], [0, 0, 1, 1], [], []>} : vector<32x32xbf16>, vector<32x128xbf16>, vector<32x128xf32> -> vector<32x128xf32>
    %c0_4 = arith.constant 0 : index
    %c0_5 = arith.constant 0 : index
    %6 = vector.load %arg6[%c0_4, %c0_5] : memref<1x128xf32, #tpu.memory_space<vmem>>, vector<1x128xf32>
    %7 = vector.broadcast %6 : vector<1x128xf32> to vector<32x128xf32>
    %8 = arith.addf %5, %7 : vector<32x128xf32>
    %9 = arith.mulf %8, %8 : vector<32x128xf32>
    %10 = arith.mulf %8, %9 : vector<32x128xf32>
    %cst_6 = arith.constant 4.471500e-02 : f32
    %11 = vector.broadcast %cst_6 : f32 to vector<32x128xf32>
    %12 = arith.mulf %11, %10 : vector<32x128xf32>
    %13 = arith.addf %8, %12 : vector<32x128xf32>
    %cst_7 = arith.constant 0.797884583 : f32
    %14 = vector.broadcast %cst_7 : f32 to vector<32x128xf32>
    %15 = arith.mulf %14, %13 : vector<32x128xf32>
    %16 = math.tanh %15 : vector<32x128xf32>
    %cst_8 = arith.constant 1.000000e+00 : f32
    %17 = vector.broadcast %cst_8 : f32 to vector<32x128xf32>
    %18 = arith.addf %17, %16 : vector<32x128xf32>
    %cst_9 = arith.constant 5.000000e-01 : f32
    %19 = vector.broadcast %cst_9 : f32 to vector<32x128xf32>
    %20 = arith.mulf %19, %18 : vector<32x128xf32>
    %21 = arith.mulf %8, %20 : vector<32x128xf32>
    %c0_10 = arith.constant 0 : index
    %c0_11 = arith.constant 0 : index
    %22 = vector.load %arg10[%c0_10, %c0_11] : memref<32x32xf32, #tpu.memory_space<vmem>>, vector<32x32xf32>
    %23 = arith.truncf %21 : vector<32x128xf32> to vector<32x128xbf16>
    %c0_12 = arith.constant 0 : index
    %c0_13 = arith.constant 0 : index
    %24 = vector.load %arg7[%c0_12, %c0_13] : memref<128x32xbf16, #tpu.memory_space<vmem>>, vector<128x32xbf16>
    %cst_14 = arith.constant dense<0.000000e+00> : vector<32x32xf32>
    %25 = tpu.matmul %23, %24, %cst_14 {dimension_numbers = #tpu.dot_dimension_numbers<[1], [0], [0], [1], [0, 0, 1, 1], [], []>} : vector<32x128xbf16>, vector<128x32xbf16>, vector<32x32xf32> -> vector<32x32xf32>
    %26 = arith.addf %22, %25 : vector<32x32xf32>
    %c0_15 = arith.constant 0 : index
    %c0_16 = arith.constant 0 : index
    %27 = vector.load %arg10[%c0_15, %c0_16] : memref<32x32xf32, #tpu.memory_space<vmem>>, vector<32x32xf32>
    tpu.vector_store %arg10[%c0_15, %c0_16], %26 {strides = array<i32>} : memref<32x32xf32, #tpu.memory_space<vmem>>, vector<32x32xf32>,
    %c0_i32_17 = arith.constant 0 : i32
    %28 = arith.cmpi eq, %arg1, %c0_i32_17 : i32
    %29 = arith.extui %28 : i1 to i32
    %c0_i32_18 = arith.constant 0 : i32
    %30 = arith.cmpi ne, %29, %c0_i32_18 : i32
    scf.if %30 {
      %c0_19 = arith.constant 0 : index
      %c0_20 = arith.constant 0 : index
      %31 = vector.load %arg10[%c0_19, %c0_20] : memref<32x32xf32, #tpu.memory_space<vmem>>, vector<32x32xf32>
      %32 = arith.truncf %31 : vector<32x32xf32> to vector<32x32xbf16>
      %c0_21 = arith.constant 0 : index
      %c0_22 = arith.constant 0 : index
      %33 = vector.load %arg9[%c0_21, %c0_22] : memref<32x32xbf16, #tpu.memory_space<vmem>>, vector<32x32xbf16>
      tpu.vector_store %arg9[%c0_21, %c0_22], %32 {strides = array<i32>} : memref<32x32xbf16, #tpu.memory_space<vmem>>, vector<32x32xbf16>,
    } else {
    }
    return
  }
  func.func @transform_0(%arg0: i32, %arg1: i32) -> (i32, i32) {
    %c0_i32 = arith.constant 0 : i32
    %c0_i32_0 = arith.constant 0 : i32
    return %arg0, %c0_i32 : i32, i32
  }
  func.func @transform_1(%arg0: i32, %arg1: i32) -> (i32, i32) {
    %c0_i32 = arith.constant 0 : i32
    %c0_i32_0 = arith.constant 0 : i32
    %c0_i32_1 = arith.constant 0 : i32
    return %c0_i32, %c0_i32_0 : i32, i32
  }
  func.func @transform_2(%arg0: i32, %arg1: i32) -> (i32, i32) {
    %c0_i32 = arith.constant 0 : i32
    %c0_i32_0 = arith.constant 0 : i32
    %c0_i32_1 = arith.constant 0 : i32
    return %c0_i32, %c0_i32_0 : i32, i32
  }
  func.func @transform_3(%arg0: i32, %arg1: i32) -> (i32, i32) {
    %c0_i32 = arith.constant 0 : i32
    %c0_i32_0 = arith.constant 0 : i32
    return %c0_i32, %arg1 : i32, i32
  }
  func.func @transform_4(%arg0: i32, %arg1: i32) -> (i32, i32) {
    %c0_i32 = arith.constant 0 : i32
    %c0_i32_0 = arith.constant 0 : i32
    return %c0_i32, %arg1 : i32, i32
  }
  func.func @transform_5(%arg0: i32, %arg1: i32) -> (i32, i32) {
    %c0_i32 = arith.constant 0 : i32
    %c0_i32_0 = arith.constant 0 : i32
    return %arg1, %c0_i32 : i32, i32
  }
  func.func @transform_6(%arg0: i32, %arg1: i32) -> (i32, i32) {
    %c0_i32 = arith.constant 0 : i32
    %c0_i32_0 = arith.constant 0 : i32
    %c0_i32_1 = arith.constant 0 : i32
    return %c0_i32, %c0_i32_0 : i32, i32
  }
  func.func @transform_7(%arg0: i32, %arg1: i32) -> (i32, i32) {
    %c0_i32 = arith.constant 0 : i32
    %c0_i32_0 = arith.constant 0 : i32
    return %arg0, %c0_i32 : i32, i32
  }
}

module attributes {stable_mosaic.version = 11 : i64} {
  func.func @_layernorm_kernel(%arg0: i32, %arg1: memref<32x32xbf16, #tpu.memory_space<vmem>>, %arg2: memref<1x32xf32, #tpu.memory_space<vmem>>, %arg3: memref<1x32xf32, #tpu.memory_space<vmem>>, %arg4: memref<32x32xbf16, #tpu.memory_space<vmem>>) attributes {dimension_semantics = [#tpu.dimension_semantics<parallel>], iteration_bounds = array<i64: 1>, scalar_prefetch = 0 : i64, scratch_operands = 0 : i64, tpu.core_type = #tpu.core_type<tc>, window_params = [{transform_indices = @transform_0, window_bounds = array<i64: 32, 32>}, {pipeline_mode = #tpu.pipeline_mode<synchronous>, transform_indices = @transform_1, window_bounds = array<i64: 1, 32>}, {pipeline_mode = #tpu.pipeline_mode<synchronous>, transform_indices = @transform_2, window_bounds = array<i64: 1, 32>}, {transform_indices = @transform_3, window_bounds = array<i64: 32, 32>}]} {
    %c0 = arith.constant 0 : index
    %c0_0 = arith.constant 0 : index
    %0 = vector.load %arg1[%c0, %c0_0] : memref<32x32xbf16, #tpu.memory_space<vmem>>, vector<32x32xbf16>
    %1 = arith.extf %0 : vector<32x32xbf16> to vector<32x32xf32>
    %cst = arith.constant dense<0.000000e+00> : vector<32xf32>
    %2 = vector.multi_reduction <add>, %1, %cst [1] : vector<32x32xf32> to vector<32xf32>
    %3 = vector.shape_cast %2 : vector<32xf32> to vector<32x1xf32>
    %cst_1 = arith.constant 3.200000e+01 : f32
    %4 = vector.broadcast %cst_1 : f32 to vector<32x1xf32>
    %5 = arith.divf %3, %4 : vector<32x1xf32>
    %6 = vector.broadcast %5 : vector<32x1xf32> to vector<32x32xf32>
    %7 = arith.subf %1, %6 : vector<32x32xf32>
    %8 = arith.mulf %7, %7 : vector<32x32xf32>
    %cst_2 = arith.constant dense<0.000000e+00> : vector<32xf32>
    %9 = vector.multi_reduction <add>, %8, %cst_2 [1] : vector<32x32xf32> to vector<32xf32>
    %10 = vector.shape_cast %9 : vector<32xf32> to vector<32x1xf32>
    %cst_3 = arith.constant 3.200000e+01 : f32
    %11 = vector.broadcast %cst_3 : f32 to vector<32x1xf32>
    %12 = arith.divf %10, %11 : vector<32x1xf32>
    %13 = vector.broadcast %5 : vector<32x1xf32> to vector<32x32xf32>
    %14 = arith.subf %1, %13 : vector<32x32xf32>
    %cst_4 = arith.constant 9.99999974E-6 : f32
    %15 = vector.broadcast %cst_4 : f32 to vector<32x1xf32>
    %16 = arith.addf %12, %15 : vector<32x1xf32>
    %17 = math.rsqrt %16 : vector<32x1xf32>
    %18 = vector.broadcast %17 : vector<32x1xf32> to vector<32x32xf32>
    %19 = arith.mulf %14, %18 : vector<32x32xf32>
    %c0_5 = arith.constant 0 : index
    %c0_6 = arith.constant 0 : index
    %20 = vector.load %arg2[%c0_5, %c0_6] : memref<1x32xf32, #tpu.memory_space<vmem>>, vector<1x32xf32>
    %21 = vector.broadcast %20 : vector<1x32xf32> to vector<32x32xf32>
    %22 = arith.mulf %19, %21 : vector<32x32xf32>
    %c0_7 = arith.constant 0 : index
    %c0_8 = arith.constant 0 : index
    %23 = vector.load %arg3[%c0_7, %c0_8] : memref<1x32xf32, #tpu.memory_space<vmem>>, vector<1x32xf32>
    %24 = vector.broadcast %23 : vector<1x32xf32> to vector<32x32xf32>
    %25 = arith.addf %22, %24 : vector<32x32xf32>
    %26 = arith.truncf %25 : vector<32x32xf32> to vector<32x32xbf16>
    %c0_9 = arith.constant 0 : index
    %c0_10 = arith.constant 0 : index
    %27 = vector.load %arg4[%c0_9, %c0_10] : memref<32x32xbf16, #tpu.memory_space<vmem>>, vector<32x32xbf16>
    tpu.vector_store %arg4[%c0_9, %c0_10], %26 {strides = array<i32>} : memref<32x32xbf16, #tpu.memory_space<vmem>>, vector<32x32xbf16>,
    return
  }
  func.func @transform_0(%arg0: i32) -> (i32, i32) {
    %c0_i32 = arith.constant 0 : i32
    %c0_i32_0 = arith.constant 0 : i32
    return %arg0, %c0_i32 : i32, i32
  }
  func.func @transform_1(%arg0: i32) -> (i32, i32) {
    %c0_i32 = arith.constant 0 : i32
    %c0_i32_0 = arith.constant 0 : i32
    %c0_i32_1 = arith.constant 0 : i32
    return %c0_i32, %c0_i32_0 : i32, i32
  }
  func.func @transform_2(%arg0: i32) -> (i32, i32) {
    %c0_i32 = arith.constant 0 : i32
    %c0_i32_0 = arith.constant 0 : i32
    %c0_i32_1 = arith.constant 0 : i32
    return %c0_i32, %c0_i32_0 : i32, i32
  }
  func.func @transform_3(%arg0: i32) -> (i32, i32) {
    %c0_i32 = arith.constant 0 : i32
    %c0_i32_0 = arith.constant 0 : i32
    return %arg0, %c0_i32 : i32, i32
  }
}

module attributes {stable_mosaic.version = 11 : i64} {
  func.func @_linear_kernel(%arg0: i32, %arg1: i32, %arg2: i32, %arg3: memref<32x32xbf16, #tpu.memory_space<vmem>>, %arg4: memref<32x32xbf16, #tpu.memory_space<vmem>>, %arg5: memref<1x32xf32, #tpu.memory_space<vmem>>, %arg6: memref<32x32xbf16, #tpu.memory_space<vmem>>, %arg7: memref<32x32xf32, #tpu.memory_space<vmem>>) attributes {dimension_semantics = [#tpu.dimension_semantics<parallel>, #tpu.dimension_semantics<parallel>, #tpu.dimension_semantics<arbitrary>], iteration_bounds = array<i64: 1, 1, 1>, scalar_prefetch = 0 : i64, scratch_operands = 1 : i64, tpu.core_type = #tpu.core_type<tc>, window_params = [{transform_indices = @transform_0, window_bounds = array<i64: 32, 32>}, {transform_indices = @transform_1, window_bounds = array<i64: 32, 32>}, {transform_indices = @transform_2, window_bounds = array<i64: 1, 32>}, {transform_indices = @transform_3, window_bounds = array<i64: 32, 32>}]} {
    %c0_i32 = arith.constant 0 : i32
    %0 = arith.cmpi eq, %arg2, %c0_i32 : i32
    %1 = arith.extui %0 : i1 to i32
    %c0_i32_0 = arith.constant 0 : i32
    %2 = arith.cmpi ne, %1, %c0_i32_0 : i32
    scf.if %2 {
      %cst_10 = arith.constant 0.000000e+00 : f32
      %12 = vector.broadcast %cst_10 : f32 to vector<32x32xf32>
      %c0_11 = arith.constant 0 : index
      %c0_12 = arith.constant 0 : index
      %13 = vector.load %arg7[%c0_11, %c0_12] : memref<32x32xf32, #tpu.memory_space<vmem>>, vector<32x32xf32>
      tpu.vector_store %arg7[%c0_11, %c0_12], %12 {strides = array<i32>} : memref<32x32xf32, #tpu.memory_space<vmem>>, vector<32x32xf32>,
    } else {
    }
    %c0 = arith.constant 0 : index
    %c0_1 = arith.constant 0 : index
    %3 = vector.load %arg3[%c0, %c0_1] : memref<32x32xbf16, #tpu.memory_space<vmem>>, vector<32x32xbf16>
    %c0_2 = arith.constant 0 : index
    %c0_3 = arith.constant 0 : index
    %4 = vector.load %arg4[%c0_2, %c0_3] : memref<32x32xbf16, #tpu.memory_space<vmem>>, vector<32x32xbf16>
    %c0_4 = arith.constant 0 : index
    %c0_5 = arith.constant 0 : index
    %5 = vector.load %arg7[%c0_4, %c0_5] : memref<32x32xf32, #tpu.memory_space<vmem>>, vector<32x32xf32>
    %cst = arith.constant dense<0.000000e+00> : vector<32x32xf32>
    %6 = tpu.matmul %3, %4, %cst {dimension_numbers = #tpu.dot_dimension_numbers<[1], [0], [0], [1], [0, 0, 1, 1], [], []>} : vector<32x32xbf16>, vector<32x32xbf16>, vector<32x32xf32> -> vector<32x32xf32>
    %7 = arith.addf %5, %6 : vector<32x32xf32>
    %c0_6 = arith.constant 0 : index
    %c0_7 = arith.constant 0 : index
    %8 = vector.load %arg7[%c0_6, %c0_7] : memref<32x32xf32, #tpu.memory_space<vmem>>, vector<32x32xf32>
    tpu.vector_store %arg7[%c0_6, %c0_7], %7 {strides = array<i32>} : memref<32x32xf32, #tpu.memory_space<vmem>>, vector<32x32xf32>,
    %c0_i32_8 = arith.constant 0 : i32
    %9 = arith.cmpi eq, %arg2, %c0_i32_8 : i32
    %10 = arith.extui %9 : i1 to i32
    %c0_i32_9 = arith.constant 0 : i32
    %11 = arith.cmpi ne, %10, %c0_i32_9 : i32
    scf.if %11 {
      %c0_10 = arith.constant 0 : index
      %c0_11 = arith.constant 0 : index
      %12 = vector.load %arg7[%c0_10, %c0_11] : memref<32x32xf32, #tpu.memory_space<vmem>>, vector<32x32xf32>
      %c0_12 = arith.constant 0 : index
      %c0_13 = arith.constant 0 : index
      %13 = vector.load %arg5[%c0_12, %c0_13] : memref<1x32xf32, #tpu.memory_space<vmem>>, vector<1x32xf32>
      %14 = vector.broadcast %13 : vector<1x32xf32> to vector<32x32xf32>
      %15 = arith.addf %12, %14 : vector<32x32xf32>
      %16 = arith.truncf %15 : vector<32x32xf32> to vector<32x32xbf16>
      %c0_14 = arith.constant 0 : index
      %c0_15 = arith.constant 0 : index
      %17 = vector.load %arg6[%c0_14, %c0_15] : memref<32x32xbf16, #tpu.memory_space<vmem>>, vector<32x32xbf16>
      tpu.vector_store %arg6[%c0_14, %c0_15], %16 {strides = array<i32>} : memref<32x32xbf16, #tpu.memory_space<vmem>>, vector<32x32xbf16>,
    } else {
    }
    return
  }
  func.func @transform_0(%arg0: i32, %arg1: i32, %arg2: i32) -> (i32, i32) {
    %c0_i32 = arith.constant 0 : i32
    return %arg0, %arg2 : i32, i32
  }
  func.func @transform_1(%arg0: i32, %arg1: i32, %arg2: i32) -> (i32, i32) {
    %c0_i32 = arith.constant 0 : i32
    return %arg2, %arg1 : i32, i32
  }
  func.func @transform_2(%arg0: i32, %arg1: i32, %arg2: i32) -> (i32, i32) {
    %c0_i32 = arith.constant 0 : i32
    %c0_i32_0 = arith.constant 0 : i32
    return %c0_i32, %arg1 : i32, i32
  }
  func.func @transform_3(%arg0: i32, %arg1: i32, %arg2: i32) -> (i32, i32) {
    %c0_i32 = arith.constant 0 : i32
    return %arg0, %arg1 : i32, i32
  }
}

module attributes {stable_mosaic.version = 11 : i64} {
  func.func @_ln_linear_kernel(%arg0: i32, %arg1: i32, %arg2: memref<32x32xbf16, #tpu.memory_space<vmem>>, %arg3: memref<1x32xf32, #tpu.memory_space<vmem>>, %arg4: memref<1x32xf32, #tpu.memory_space<vmem>>, %arg5: memref<32x32xbf16, #tpu.memory_space<vmem>>, %arg6: memref<1x32xf32, #tpu.memory_space<vmem>>, %arg7: memref<32x32xbf16, #tpu.memory_space<vmem>>, %arg8: memref<32x32xbf16, #tpu.memory_space<vmem>>) attributes {dimension_semantics = [#tpu.dimension_semantics<parallel>, #tpu.dimension_semantics<arbitrary>], iteration_bounds = array<i64: 1, 1>, scalar_prefetch = 0 : i64, scratch_operands = 1 : i64, tpu.core_type = #tpu.core_type<tc>, window_params = [{transform_indices = @transform_0, window_bounds = array<i64: 32, 32>}, {pipeline_mode = #tpu.pipeline_mode<synchronous>, transform_indices = @transform_1, window_bounds = array<i64: 1, 32>}, {pipeline_mode = #tpu.pipeline_mode<synchronous>, transform_indices = @transform_2, window_bounds = array<i64: 1, 32>}, {transform_indices = @transform_3, window_bounds = array<i64: 32, 32>}, {transform_indices = @transform_4, window_bounds = array<i64: 1, 32>}, {transform_indices = @transform_5, window_bounds = array<i64: 32, 32>}]} {
    %c0_i32 = arith.constant 0 : i32
    %0 = arith.cmpi eq, %arg1, %c0_i32 : i32
    %1 = arith.extui %0 : i1 to i32
    %c0_i32_0 = arith.constant 0 : i32
    %2 = arith.cmpi ne, %1, %c0_i32_0 : i32
    scf.if %2 {
      %c0_8 = arith.constant 0 : index
      %c0_9 = arith.constant 0 : index
      %11 = vector.load %arg2[%c0_8, %c0_9] : memref<32x32xbf16, #tpu.memory_space<vmem>>, vector<32x32xbf16>
      %12 = arith.extf %11 : vector<32x32xbf16> to vector<32x32xf32>
      %cst_10 = arith.constant dense<0.000000e+00> : vector<32xf32>
      %13 = vector.multi_reduction <add>, %12, %cst_10 [1] : vector<32x32xf32> to vector<32xf32>
      %14 = vector.shape_cast %13 : vector<32xf32> to vector<32x1xf32>
      %cst_11 = arith.constant 3.200000e+01 : f32
      %15 = vector.broadcast %cst_11 : f32 to vector<32x1xf32>
      %16 = arith.divf %14, %15 : vector<32x1xf32>
      %17 = vector.broadcast %16 : vector<32x1xf32> to vector<32x32xf32>
      %18 = arith.subf %12, %17 : vector<32x32xf32>
      %19 = arith.mulf %18, %18 : vector<32x32xf32>
      %cst_12 = arith.constant dense<0.000000e+00> : vector<32xf32>
      %20 = vector.multi_reduction <add>, %19, %cst_12 [1] : vector<32x32xf32> to vector<32xf32>
      %21 = vector.shape_cast %20 : vector<32xf32> to vector<32x1xf32>
      %cst_13 = arith.constant 3.200000e+01 : f32
      %22 = vector.broadcast %cst_13 : f32 to vector<32x1xf32>
      %23 = arith.divf %21, %22 : vector<32x1xf32>
      %24 = vector.broadcast %16 : vector<32x1xf32> to vector<32x32xf32>
      %25 = arith.subf %12, %24 : vector<32x32xf32>
      %cst_14 = arith.constant 9.99999974E-6 : f32
      %26 = vector.broadcast %cst_14 : f32 to vector<32x1xf32>
      %27 = arith.addf %23, %26 : vector<32x1xf32>
      %28 = math.rsqrt %27 : vector<32x1xf32>
      %29 = vector.broadcast %28 : vector<32x1xf32> to vector<32x32xf32>
      %30 = arith.mulf %25, %29 : vector<32x32xf32>
      %c0_15 = arith.constant 0 : index
      %c0_16 = arith.constant 0 : index
      %31 = vector.load %arg3[%c0_15, %c0_16] : memref<1x32xf32, #tpu.memory_space<vmem>>, vector<1x32xf32>
      %32 = vector.broadcast %31 : vector<1x32xf32> to vector<32x32xf32>
      %33 = arith.mulf %30, %32 : vector<32x32xf32>
      %c0_17 = arith.constant 0 : index
      %c0_18 = arith.constant 0 : index
      %34 = vector.load %arg4[%c0_17, %c0_18] : memref<1x32xf32, #tpu.memory_space<vmem>>, vector<1x32xf32>
      %35 = vector.broadcast %34 : vector<1x32xf32> to vector<32x32xf32>
      %36 = arith.addf %33, %35 : vector<32x32xf32>
      %37 = arith.truncf %36 : vector<32x32xf32> to vector<32x32xbf16>
      %c0_19 = arith.constant 0 : index
      %c0_20 = arith.constant 0 : index
      %38 = vector.load %arg8[%c0_19, %c0_20] : memref<32x32xbf16, #tpu.memory_space<vmem>>, vector<32x32xbf16>
      tpu.vector_store %arg8[%c0_19, %c0_20], %37 {strides = array<i32>} : memref<32x32xbf16, #tpu.memory_space<vmem>>, vector<32x32xbf16>,
    } else {
    }
    %c0 = arith.constant 0 : index
    %c0_1 = arith.constant 0 : index
    %3 = vector.load %arg8[%c0, %c0_1] : memref<32x32xbf16, #tpu.memory_space<vmem>>, vector<32x32xbf16>
    %c0_2 = arith.constant 0 : index
    %c0_3 = arith.constant 0 : index
    %4 = vector.load %arg5[%c0_2, %c0_3] : memref<32x32xbf16, #tpu.memory_space<vmem>>, vector<32x32xbf16>
    %cst = arith.constant dense<0.000000e+00> : vector<32x32xf32>
    %5 = tpu.matmul %3, %4, %cst {dimension_numbers = #tpu.dot_dimension_numbers<[1], [0], [0], [1], [0, 0, 1, 1], [], []>} : vector<32x32xbf16>, vector<32x32xbf16>, vector<32x32xf32> -> vector<32x32xf32>
    %c0_4 = arith.constant 0 : index
    %c0_5 = arith.constant 0 : index
    %6 = vector.load %arg6[%c0_4, %c0_5] : memref<1x32xf32, #tpu.memory_space<vmem>>, vector<1x32xf32>
    %7 = vector.broadcast %6 : vector<1x32xf32> to vector<32x32xf32>
    %8 = arith.addf %5, %7 : vector<32x32xf32>
    %9 = arith.truncf %8 : vector<32x32xf32> to vector<32x32xbf16>
    %c0_6 = arith.constant 0 : index
    %c0_7 = arith.constant 0 : index
    %10 = vector.load %arg7[%c0_6, %c0_7] : memref<32x32xbf16, #tpu.memory_space<vmem>>, vector<32x32xbf16>
    tpu.vector_store %arg7[%c0_6, %c0_7], %9 {strides = array<i32>} : memref<32x32xbf16, #tpu.memory_space<vmem>>, vector<32x32xbf16>,
    return
  }
  func.func @transform_0(%arg0: i32, %arg1: i32) -> (i32, i32) {
    %c0_i32 = arith.constant 0 : i32
    %c0_i32_0 = arith.constant 0 : i32
    return %arg0, %c0_i32 : i32, i32
  }
  func.func @transform_1(%arg0: i32, %arg1: i32) -> (i32, i32) {
    %c0_i32 = arith.constant 0 : i32
    %c0_i32_0 = arith.constant 0 : i32
    %c0_i32_1 = arith.constant 0 : i32
    return %c0_i32, %c0_i32_0 : i32, i32
  }
  func.func @transform_2(%arg0: i32, %arg1: i32) -> (i32, i32) {
    %c0_i32 = arith.constant 0 : i32
    %c0_i32_0 = arith.constant 0 : i32
    %c0_i32_1 = arith.constant 0 : i32
    return %c0_i32, %c0_i32_0 : i32, i32
  }
  func.func @transform_3(%arg0: i32, %arg1: i32) -> (i32, i32) {
    %c0_i32 = arith.constant 0 : i32
    %c0_i32_0 = arith.constant 0 : i32
    return %c0_i32, %arg1 : i32, i32
  }
  func.func @transform_4(%arg0: i32, %arg1: i32) -> (i32, i32) {
    %c0_i32 = arith.constant 0 : i32
    %c0_i32_0 = arith.constant 0 : i32
    return %c0_i32, %arg1 : i32, i32
  }
  func.func @transform_5(%arg0: i32, %arg1: i32) -> (i32, i32) {
    %c0_i32 = arith.constant 0 : i32
    return %arg0, %arg1 : i32, i32
  }
}

module attributes {stable_mosaic.version = 11 : i64} {
  func.func @_linear_kernel(%arg0: i32, %arg1: i32, %arg2: i32, %arg3: memref<16x64xf32, #tpu.memory_space<vmem>>, %arg4: memref<64x32xbf16, #tpu.memory_space<vmem>>, %arg5: memref<1x32xf32, #tpu.memory_space<vmem>>, %arg6: memref<16x32xbf16, #tpu.memory_space<vmem>>, %arg7: memref<16x32xf32, #tpu.memory_space<vmem>>) attributes {dimension_semantics = [#tpu.dimension_semantics<parallel>, #tpu.dimension_semantics<parallel>, #tpu.dimension_semantics<arbitrary>], iteration_bounds = array<i64: 1, 1, 1>, scalar_prefetch = 0 : i64, scratch_operands = 1 : i64, tpu.core_type = #tpu.core_type<tc>, window_params = [{transform_indices = @transform_0, window_bounds = array<i64: 16, 64>}, {transform_indices = @transform_1, window_bounds = array<i64: 64, 32>}, {transform_indices = @transform_2, window_bounds = array<i64: 1, 32>}, {transform_indices = @transform_3, window_bounds = array<i64: 16, 32>}]} {
    %c0_i32 = arith.constant 0 : i32
    %0 = arith.cmpi eq, %arg2, %c0_i32 : i32
    %1 = arith.extui %0 : i1 to i32
    %c0_i32_0 = arith.constant 0 : i32
    %2 = arith.cmpi ne, %1, %c0_i32_0 : i32
    scf.if %2 {
      %cst_10 = arith.constant 0.000000e+00 : f32
      %13 = vector.broadcast %cst_10 : f32 to vector<16x32xf32>
      %c0_11 = arith.constant 0 : index
      %c0_12 = arith.constant 0 : index
      %14 = vector.load %arg7[%c0_11, %c0_12] : memref<16x32xf32, #tpu.memory_space<vmem>>, vector<16x32xf32>
      tpu.vector_store %arg7[%c0_11, %c0_12], %13 {strides = array<i32>} : memref<16x32xf32, #tpu.memory_space<vmem>>, vector<16x32xf32>,
    } else {
    }
    %c0 = arith.constant 0 : index
    %c0_1 = arith.constant 0 : index
    %3 = vector.load %arg3[%c0, %c0_1] : memref<16x64xf32, #tpu.memory_space<vmem>>, vector<16x64xf32>
    %c0_2 = arith.constant 0 : index
    %c0_3 = arith.constant 0 : index
    %4 = vector.load %arg4[%c0_2, %c0_3] : memref<64x32xbf16, #tpu.memory_space<vmem>>, vector<64x32xbf16>
    %5 = arith.truncf %3 : vector<16x64xf32> to vector<16x64xbf16>
    %c0_4 = arith.constant 0 : index
    %c0_5 = arith.constant 0 : index
    %6 = vector.load %arg7[%c0_4, %c0_5] : memref<16x32xf32, #tpu.memory_space<vmem>>, vector<16x32xf32>
    %cst = arith.constant dense<0.000000e+00> : vector<16x32xf32>
    %7 = tpu.matmul %5, %4, %cst {dimension_numbers = #tpu.dot_dimension_numbers<[1], [0], [0], [1], [0, 0, 1, 1], [], []>} : vector<16x64xbf16>, vector<64x32xbf16>, vector<16x32xf32> -> vector<16x32xf32>
    %8 = arith.addf %6, %7 : vector<16x32xf32>
    %c0_6 = arith.constant 0 : index
    %c0_7 = arith.constant 0 : index
    %9 = vector.load %arg7[%c0_6, %c0_7] : memref<16x32xf32, #tpu.memory_space<vmem>>, vector<16x32xf32>
    tpu.vector_store %arg7[%c0_6, %c0_7], %8 {strides = array<i32>} : memref<16x32xf32, #tpu.memory_space<vmem>>, vector<16x32xf32>,
    %c0_i32_8 = arith.constant 0 : i32
    %10 = arith.cmpi eq, %arg2, %c0_i32_8 : i32
    %11 = arith.extui %10 : i1 to i32
    %c0_i32_9 = arith.constant 0 : i32
    %12 = arith.cmpi ne, %11, %c0_i32_9 : i32
    scf.if %12 {
      %c0_10 = arith.constant 0 : index
      %c0_11 = arith.constant 0 : index
      %13 = vector.load %arg7[%c0_10, %c0_11] : memref<16x32xf32, #tpu.memory_space<vmem>>, vector<16x32xf32>
      %c0_12 = arith.constant 0 : index
      %c0_13 = arith.constant 0 : index
      %14 = vector.load %arg5[%c0_12, %c0_13] : memref<1x32xf32, #tpu.memory_space<vmem>>, vector<1x32xf32>
      %15 = vector.broadcast %14 : vector<1x32xf32> to vector<16x32xf32>
      %16 = arith.addf %13, %15 : vector<16x32xf32>
      %17 = arith.truncf %16 : vector<16x32xf32> to vector<16x32xbf16>
      %c0_14 = arith.constant 0 : index
      %c0_15 = arith.constant 0 : index
      %18 = vector.load %arg6[%c0_14, %c0_15] : memref<16x32xbf16, #tpu.memory_space<vmem>>, vector<16x32xbf16>
      tpu.vector_store %arg6[%c0_14, %c0_15], %17 {strides = array<i32>} : memref<16x32xbf16, #tpu.memory_space<vmem>>, vector<16x32xbf16>,
    } else {
    }
    return
  }
  func.func @transform_0(%arg0: i32, %arg1: i32, %arg2: i32) -> (i32, i32) {
    %c0_i32 = arith.constant 0 : i32
    return %arg0, %arg2 : i32, i32
  }
  func.func @transform_1(%arg0: i32, %arg1: i32, %arg2: i32) -> (i32, i32) {
    %c0_i32 = arith.constant 0 : i32
    return %arg2, %arg1 : i32, i32
  }
  func.func @transform_2(%arg0: i32, %arg1: i32, %arg2: i32) -> (i32, i32) {
    %c0_i32 = arith.constant 0 : i32
    %c0_i32_0 = arith.constant 0 : i32
    return %c0_i32, %arg1 : i32, i32
  }
  func.func @transform_3(%arg0: i32, %arg1: i32, %arg2: i32) -> (i32, i32) {
    %c0_i32 = arith.constant 0 : i32
    return %arg0, %arg1 : i32, i32
  }
}

module attributes {stable_mosaic.version = 11 : i64} {
  func.func @_self_attn_kernel(%arg0: i32, %arg1: i32, %arg2: memref<1x8x96xbf16, #tpu.memory_space<vmem>>, %arg3: memref<1x8x96xbf16, #tpu.memory_space<vmem>>, %arg4: memref<1x8x32xbf16, #tpu.memory_space<vmem>>) attributes {dimension_semantics = [#tpu.dimension_semantics<parallel>, #tpu.dimension_semantics<parallel>], iteration_bounds = array<i64: 2, 1>, scalar_prefetch = 0 : i64, scratch_operands = 0 : i64, tpu.core_type = #tpu.core_type<tc>, window_params = [{transform_indices = @transform_0, window_bounds = array<i64: 1, 8, 96>}, {transform_indices = @transform_1, window_bounds = array<i64: 1, 8, 96>}, {transform_indices = @transform_2, window_bounds = array<i64: 1, 8, 32>}]} {
    %c0 = arith.constant 0 : index
    %c0_0 = arith.constant 0 : index
    %c0_1 = arith.constant 0 : index
    %0 = vector.load %arg2[%c0, %c0_0, %c0_1] : memref<1x8x96xbf16, #tpu.memory_space<vmem>>, vector<1x8x96xbf16>
    %1 = vector.shape_cast %0 : vector<1x8x96xbf16> to vector<8x96xbf16>
    %2 = vector.extract_strided_slice %1 {offsets = [0, 0], sizes = [8, 32], strides = [1, 1]} : vector<8x96xbf16> to vector<8x32xbf16>
    %c0_2 = arith.constant 0 : index
    %c0_3 = arith.constant 0 : index
    %c0_4 = arith.constant 0 : index
    %3 = vector.load %arg3[%c0_2, %c0_3, %c0_4] : memref<1x8x96xbf16, #tpu.memory_space<vmem>>, vector<1x8x96xbf16>
    %4 = vector.shape_cast %3 : vector<1x8x96xbf16> to vector<8x96xbf16>
    %5 = vector.extract_strided_slice %4 {offsets = [0, 32], sizes = [8, 32], strides = [1, 1]} : vector<8x96xbf16> to vector<8x32xbf16>
    %6 = vector.extract_strided_slice %4 {offsets = [0, 64], sizes = [8, 32], strides = [1, 1]} : vector<8x96xbf16> to vector<8x32xbf16>
    %7 = vector.shape_cast %2 : vector<8x32xbf16> to vector<8x4x8xbf16>
    %8 = tpu.transpose %7, [1, 0, 2] : vector<8x4x8xbf16> -> vector<4x8x8xbf16>
    %9 = vector.shape_cast %5 : vector<8x32xbf16> to vector<8x4x8xbf16>
    %10 = tpu.transpose %9, [1, 0, 2] : vector<8x4x8xbf16> -> vector<4x8x8xbf16>
    %11 = vector.shape_cast %6 : vector<8x32xbf16> to vector<8x4x8xbf16>
    %12 = tpu.transpose %11, [1, 0, 2] : vector<8x4x8xbf16> -> vector<4x8x8xbf16>
    "tpu.trace_start"() <{level = 10 : i32, message = "hqd,hkd->hqk"}> : () -> ()
    %cst = arith.constant dense<0.000000e+00> : vector<4x8x8xf32>
    %13 = tpu.matmul %8, %10, %cst {dimension_numbers = #tpu.dot_dimension_numbers<[2], [2], [1], [1], [0, 0, 0, 1, 1, 1], [0], [0]>} : vector<4x8x8xbf16>, vector<4x8x8xbf16>, vector<4x8x8xf32> -> vector<4x8x8xf32>
    "tpu.trace_stop"() : () -> ()
    %cst_5 = arith.constant 0.353553385 : f32
    %14 = vector.broadcast %cst_5 : f32 to vector<4x8x8xf32>
    %15 = arith.mulf %13, %14 : vector<4x8x8xf32>
    %cst_6 = arith.constant dense<0xFF800000> : vector<4x8xf32>
    %16 = vector.multi_reduction <maximumf>, %15, %cst_6 [2] : vector<4x8x8xf32> to vector<4x8xf32>
    %17 = vector.shape_cast %16 : vector<4x8xf32> to vector<4x8x1xf32>
    %18 = vector.broadcast %17 : vector<4x8x1xf32> to vector<4x8x8xf32>
    %19 = arith.subf %15, %18 : vector<4x8x8xf32>
    %20 = math.exp %19 : vector<4x8x8xf32>
    %cst_7 = arith.constant dense<0.000000e+00> : vector<4x8xf32>
    %21 = vector.multi_reduction <add>, %20, %cst_7 [2] : vector<4x8x8xf32> to vector<4x8xf32>
    %22 = vector.shape_cast %21 : vector<4x8xf32> to vector<4x8x1xf32>
    %23 = vector.broadcast %22 : vector<4x8x1xf32> to vector<4x8x8xf32>
    %24 = arith.divf %20, %23 : vector<4x8x8xf32>
    %25 = arith.truncf %24 : vector<4x8x8xf32> to vector<4x8x8xbf16>
    "tpu.trace_start"() <{level = 10 : i32, message = "hqk,hkd->hqd"}> : () -> ()
    %cst_8 = arith.constant dense<0.000000e+00> : vector<4x8x8xf32>
    %26 = tpu.matmul %25, %12, %cst_8 {dimension_numbers = #tpu.dot_dimension_numbers<[2], [1], [1], [2], [0, 0, 0, 1, 1, 2], [0], [0]>} : vector<4x8x8xbf16>, vector<4x8x8xbf16>, vector<4x8x8xf32> -> vector<4x8x8xf32>
    "tpu.trace_stop"() : () -> ()
    %27 = tpu.transpose %26, [1, 0, 2] : vector<4x8x8xf32> -> vector<8x4x8xf32>
    %28 = vector.shape_cast %27 : vector<8x4x8xf32> to vector<8x32xf32>
    %29 = arith.truncf %28 : vector<8x32xf32> to vector<8x32xbf16>
    %c0_9 = arith.constant 0 : index
    %c0_10 = arith.constant 0 : index
    %c0_11 = arith.constant 0 : index
    %30 = vector.load %arg4[%c0_9, %c0_10, %c0_11] : memref<1x8x32xbf16, #tpu.memory_space<vmem>>, vector<1x8x32xbf16>
    %31 = vector.shape_cast %30 : vector<1x8x32xbf16> to vector<8x32xbf16>
    %32 = vector.shape_cast %29 : vector<8x32xbf16> to vector<1x8x32xbf16>
    tpu.vector_store %arg4[%c0_9, %c0_10, %c0_11], %32 {strides = array<i32>} : memref<1x8x32xbf16, #tpu.memory_space<vmem>>, vector<1x8x32xbf16>,
    return
  }
  func.func @transform_0(%arg0: i32, %arg1: i32) -> (i32, i32, i32) {
    %c0_i32 = arith.constant 0 : i32
    %c0_i32_0 = arith.constant 0 : i32
    return %arg0, %arg1, %c0_i32 : i32, i32, i32
  }
  func.func @transform_1(%arg0: i32, %arg1: i32) -> (i32, i32, i32) {
    %c0_i32 = arith.constant 0 : i32
    %c0_i32_0 = arith.constant 0 : i32
    %c0_i32_1 = arith.constant 0 : i32
    return %arg0, %c0_i32, %c0_i32_0 : i32, i32, i32
  }
  func.func @transform_2(%arg0: i32, %arg1: i32) -> (i32, i32, i32) {
    %c0_i32 = arith.constant 0 : i32
    %c0_i32_0 = arith.constant 0 : i32
    return %arg0, %arg1, %c0_i32 : i32, i32, i32
  }
}

module attributes {stable_mosaic.version = 11 : i64} {
  func.func @_ln_linear_kernel(%arg0: i32, %arg1: i32, %arg2: memref<16x32xbf16, #tpu.memory_space<vmem>>, %arg3: memref<1x32xf32, #tpu.memory_space<vmem>>, %arg4: memref<1x32xf32, #tpu.memory_space<vmem>>, %arg5: memref<32x96xbf16, #tpu.memory_space<vmem>>, %arg6: memref<1x96xf32, #tpu.memory_space<vmem>>, %arg7: memref<16x96xbf16, #tpu.memory_space<vmem>>, %arg8: memref<16x32xbf16, #tpu.memory_space<vmem>>) attributes {dimension_semantics = [#tpu.dimension_semantics<parallel>, #tpu.dimension_semantics<arbitrary>], iteration_bounds = array<i64: 1, 1>, scalar_prefetch = 0 : i64, scratch_operands = 1 : i64, tpu.core_type = #tpu.core_type<tc>, window_params = [{transform_indices = @transform_0, window_bounds = array<i64: 16, 32>}, {pipeline_mode = #tpu.pipeline_mode<synchronous>, transform_indices = @transform_1, window_bounds = array<i64: 1, 32>}, {pipeline_mode = #tpu.pipeline_mode<synchronous>, transform_indices = @transform_2, window_bounds = array<i64: 1, 32>}, {transform_indices = @transform_3, window_bounds = array<i64: 32, 96>}, {transform_indices = @transform_4, window_bounds = array<i64: 1, 96>}, {transform_indices = @transform_5, window_bounds = array<i64: 16, 96>}]} {
    %c0_i32 = arith.constant 0 : i32
    %0 = arith.cmpi eq, %arg1, %c0_i32 : i32
    %1 = arith.extui %0 : i1 to i32
    %c0_i32_0 = arith.constant 0 : i32
    %2 = arith.cmpi ne, %1, %c0_i32_0 : i32
    scf.if %2 {
      %c0_8 = arith.constant 0 : index
      %c0_9 = arith.constant 0 : index
      %11 = vector.load %arg2[%c0_8, %c0_9] : memref<16x32xbf16, #tpu.memory_space<vmem>>, vector<16x32xbf16>
      %12 = arith.extf %11 : vector<16x32xbf16> to vector<16x32xf32>
      %cst_10 = arith.constant dense<0.000000e+00> : vector<16xf32>
      %13 = vector.multi_reduction <add>, %12, %cst_10 [1] : vector<16x32xf32> to vector<16xf32>
      %14 = vector.shape_cast %13 : vector<16xf32> to vector<16x1xf32>
      %cst_11 = arith.constant 3.200000e+01 : f32
      %15 = vector.broadcast %cst_11 : f32 to vector<16x1xf32>
      %16 = arith.divf %14, %15 : vector<16x1xf32>
      %17 = vector.broadcast %16 : vector<16x1xf32> to vector<16x32xf32>
      %18 = arith.subf %12, %17 : vector<16x32xf32>
      %19 = arith.mulf %18, %18 : vector<16x32xf32>
      %cst_12 = arith.constant dense<0.000000e+00> : vector<16xf32>
      %20 = vector.multi_reduction <add>, %19, %cst_12 [1] : vector<16x32xf32> to vector<16xf32>
      %21 = vector.shape_cast %20 : vector<16xf32> to vector<16x1xf32>
      %cst_13 = arith.constant 3.200000e+01 : f32
      %22 = vector.broadcast %cst_13 : f32 to vector<16x1xf32>
      %23 = arith.divf %21, %22 : vector<16x1xf32>
      %24 = vector.broadcast %16 : vector<16x1xf32> to vector<16x32xf32>
      %25 = arith.subf %12, %24 : vector<16x32xf32>
      %cst_14 = arith.constant 9.99999974E-6 : f32
      %26 = vector.broadcast %cst_14 : f32 to vector<16x1xf32>
      %27 = arith.addf %23, %26 : vector<16x1xf32>
      %28 = math.rsqrt %27 : vector<16x1xf32>
      %29 = vector.broadcast %28 : vector<16x1xf32> to vector<16x32xf32>
      %30 = arith.mulf %25, %29 : vector<16x32xf32>
      %c0_15 = arith.constant 0 : index
      %c0_16 = arith.constant 0 : index
      %31 = vector.load %arg3[%c0_15, %c0_16] : memref<1x32xf32, #tpu.memory_space<vmem>>, vector<1x32xf32>
      %32 = vector.broadcast %31 : vector<1x32xf32> to vector<16x32xf32>
      %33 = arith.mulf %30, %32 : vector<16x32xf32>
      %c0_17 = arith.constant 0 : index
      %c0_18 = arith.constant 0 : index
      %34 = vector.load %arg4[%c0_17, %c0_18] : memref<1x32xf32, #tpu.memory_space<vmem>>, vector<1x32xf32>
      %35 = vector.broadcast %34 : vector<1x32xf32> to vector<16x32xf32>
      %36 = arith.addf %33, %35 : vector<16x32xf32>
      %37 = arith.truncf %36 : vector<16x32xf32> to vector<16x32xbf16>
      %c0_19 = arith.constant 0 : index
      %c0_20 = arith.constant 0 : index
      %38 = vector.load %arg8[%c0_19, %c0_20] : memref<16x32xbf16, #tpu.memory_space<vmem>>, vector<16x32xbf16>
      tpu.vector_store %arg8[%c0_19, %c0_20], %37 {strides = array<i32>} : memref<16x32xbf16, #tpu.memory_space<vmem>>, vector<16x32xbf16>,
    } else {
    }
    %c0 = arith.constant 0 : index
    %c0_1 = arith.constant 0 : index
    %3 = vector.load %arg8[%c0, %c0_1] : memref<16x32xbf16, #tpu.memory_space<vmem>>, vector<16x32xbf16>
    %c0_2 = arith.constant 0 : index
    %c0_3 = arith.constant 0 : index
    %4 = vector.load %arg5[%c0_2, %c0_3] : memref<32x96xbf16, #tpu.memory_space<vmem>>, vector<32x96xbf16>
    %cst = arith.constant dense<0.000000e+00> : vector<16x96xf32>
    %5 = tpu.matmul %3, %4, %cst {dimension_numbers = #tpu.dot_dimension_numbers<[1], [0], [0], [1], [0, 0, 1, 1], [], []>} : vector<16x32xbf16>, vector<32x96xbf16>, vector<16x96xf32> -> vector<16x96xf32>
    %c0_4 = arith.constant 0 : index
    %c0_5 = arith.constant 0 : index
    %6 = vector.load %arg6[%c0_4, %c0_5] : memref<1x96xf32, #tpu.memory_space<vmem>>, vector<1x96xf32>
    %7 = vector.broadcast %6 : vector<1x96xf32> to vector<16x96xf32>
    %8 = arith.addf %5, %7 : vector<16x96xf32>
    %9 = arith.truncf %8 : vector<16x96xf32> to vector<16x96xbf16>
    %c0_6 = arith.constant 0 : index
    %c0_7 = arith.constant 0 : index
    %10 = vector.load %arg7[%c0_6, %c0_7] : memref<16x96xbf16, #tpu.memory_space<vmem>>, vector<16x96xbf16>
    tpu.vector_store %arg7[%c0_6, %c0_7], %9 {strides = array<i32>} : memref<16x96xbf16, #tpu.memory_space<vmem>>, vector<16x96xbf16>,
    return
  }
  func.func @transform_0(%arg0: i32, %arg1: i32) -> (i32, i32) {
    %c0_i32 = arith.constant 0 : i32
    %c0_i32_0 = arith.constant 0 : i32
    return %arg0, %c0_i32 : i32, i32
  }
  func.func @transform_1(%arg0: i32, %arg1: i32) -> (i32, i32) {
    %c0_i32 = arith.constant 0 : i32
    %c0_i32_0 = arith.constant 0 : i32
    %c0_i32_1 = arith.constant 0 : i32
    return %c0_i32, %c0_i32_0 : i32, i32
  }
  func.func @transform_2(%arg0: i32, %arg1: i32) -> (i32, i32) {
    %c0_i32 = arith.constant 0 : i32
    %c0_i32_0 = arith.constant 0 : i32
    %c0_i32_1 = arith.constant 0 : i32
    return %c0_i32, %c0_i32_0 : i32, i32
  }
  func.func @transform_3(%arg0: i32, %arg1: i32) -> (i32, i32) {
    %c0_i32 = arith.constant 0 : i32
    %c0_i32_0 = arith.constant 0 : i32
    return %c0_i32, %arg1 : i32, i32
  }
  func.func @transform_4(%arg0: i32, %arg1: i32) -> (i32, i32) {
    %c0_i32 = arith.constant 0 : i32
    %c0_i32_0 = arith.constant 0 : i32
    return %c0_i32, %arg1 : i32, i32
  }
  func.func @transform_5(%arg0: i32, %arg1: i32) -> (i32, i32) {
    %c0_i32 = arith.constant 0 : i32
    return %arg0, %arg1 : i32, i32
  }
}

module attributes {stable_mosaic.version = 11 : i64} {
  func.func @_linear_kernel(%arg0: i32, %arg1: i32, %arg2: i32, %arg3: memref<16x32xbf16, #tpu.memory_space<vmem>>, %arg4: memref<32x32xbf16, #tpu.memory_space<vmem>>, %arg5: memref<1x32xf32, #tpu.memory_space<vmem>>, %arg6: memref<16x32xbf16, #tpu.memory_space<vmem>>, %arg7: memref<16x32xbf16, #tpu.memory_space<vmem>>, %arg8: memref<16x32xf32, #tpu.memory_space<vmem>>) attributes {dimension_semantics = [#tpu.dimension_semantics<parallel>, #tpu.dimension_semantics<parallel>, #tpu.dimension_semantics<arbitrary>], iteration_bounds = array<i64: 1, 1, 1>, scalar_prefetch = 0 : i64, scratch_operands = 1 : i64, tpu.core_type = #tpu.core_type<tc>, window_params = [{transform_indices = @transform_0, window_bounds = array<i64: 16, 32>}, {transform_indices = @transform_1, window_bounds = array<i64: 32, 32>}, {transform_indices = @transform_2, window_bounds = array<i64: 1, 32>}, {transform_indices = @transform_3, window_bounds = array<i64: 16, 32>}, {transform_indices = @transform_4, window_bounds = array<i64: 16, 32>}]} {
    %c0_i32 = arith.constant 0 : i32
    %0 = arith.cmpi eq, %arg2, %c0_i32 : i32
    %1 = arith.extui %0 : i1 to i32
    %c0_i32_0 = arith.constant 0 : i32
    %2 = arith.cmpi ne, %1, %c0_i32_0 : i32
    scf.if %2 {
      %cst_10 = arith.constant 0.000000e+00 : f32
      %12 = vector.broadcast %cst_10 : f32 to vector<16x32xf32>
      %c0_11 = arith.constant 0 : index
      %c0_12 = arith.constant 0 : index
      %13 = vector.load %arg8[%c0_11, %c0_12] : memref<16x32xf32, #tpu.memory_space<vmem>>, vector<16x32xf32>
      tpu.vector_store %arg8[%c0_11, %c0_12], %12 {strides = array<i32>} : memref<16x32xf32, #tpu.memory_space<vmem>>, vector<16x32xf32>,
    } else {
    }
    %c0 = arith.constant 0 : index
    %c0_1 = arith.constant 0 : index
    %3 = vector.load %arg3[%c0, %c0_1] : memref<16x32xbf16, #tpu.memory_space<vmem>>, vector<16x32xbf16>
    %c0_2 = arith.constant 0 : index
    %c0_3 = arith.constant 0 : index
    %4 = vector.load %arg4[%c0_2, %c0_3] : memref<32x32xbf16, #tpu.memory_space<vmem>>, vector<32x32xbf16>
    %c0_4 = arith.constant 0 : index
    %c0_5 = arith.constant 0 : index
    %5 = vector.load %arg8[%c0_4, %c0_5] : memref<16x32xf32, #tpu.memory_space<vmem>>, vector<16x32xf32>
    %cst = arith.constant dense<0.000000e+00> : vector<16x32xf32>
    %6 = tpu.matmul %3, %4, %cst {dimension_numbers = #tpu.dot_dimension_numbers<[1], [0], [0], [1], [0, 0, 1, 1], [], []>} : vector<16x32xbf16>, vector<32x32xbf16>, vector<16x32xf32> -> vector<16x32xf32>
    %7 = arith.addf %5, %6 : vector<16x32xf32>
    %c0_6 = arith.constant 0 : index
    %c0_7 = arith.constant 0 : index
    %8 = vector.load %arg8[%c0_6, %c0_7] : memref<16x32xf32, #tpu.memory_space<vmem>>, vector<16x32xf32>
    tpu.vector_store %arg8[%c0_6, %c0_7], %7 {strides = array<i32>} : memref<16x32xf32, #tpu.memory_space<vmem>>, vector<16x32xf32>,
    %c0_i32_8 = arith.constant 0 : i32
    %9 = arith.cmpi eq, %arg2, %c0_i32_8 : i32
    %10 = arith.extui %9 : i1 to i32
    %c0_i32_9 = arith.constant 0 : i32
    %11 = arith.cmpi ne, %10, %c0_i32_9 : i32
    scf.if %11 {
      %c0_10 = arith.constant 0 : index
      %c0_11 = arith.constant 0 : index
      %12 = vector.load %arg8[%c0_10, %c0_11] : memref<16x32xf32, #tpu.memory_space<vmem>>, vector<16x32xf32>
      %c0_12 = arith.constant 0 : index
      %c0_13 = arith.constant 0 : index
      %13 = vector.load %arg5[%c0_12, %c0_13] : memref<1x32xf32, #tpu.memory_space<vmem>>, vector<1x32xf32>
      %14 = vector.broadcast %13 : vector<1x32xf32> to vector<16x32xf32>
      %15 = arith.addf %12, %14 : vector<16x32xf32>
      %c0_14 = arith.constant 0 : index
      %c0_15 = arith.constant 0 : index
      %16 = vector.load %arg6[%c0_14, %c0_15] : memref<16x32xbf16, #tpu.memory_space<vmem>>, vector<16x32xbf16>
      %17 = arith.extf %16 : vector<16x32xbf16> to vector<16x32xf32>
      %18 = arith.addf %15, %17 : vector<16x32xf32>
      %19 = arith.truncf %18 : vector<16x32xf32> to vector<16x32xbf16>
      %c0_16 = arith.constant 0 : index
      %c0_17 = arith.constant 0 : index
      %20 = vector.load %arg7[%c0_16, %c0_17] : memref<16x32xbf16, #tpu.memory_space<vmem>>, vector<16x32xbf16>
      tpu.vector_store %arg7[%c0_16, %c0_17], %19 {strides = array<i32>} : memref<16x32xbf16, #tpu.memory_space<vmem>>, vector<16x32xbf16>,
    } else {
    }
    return
  }
  func.func @transform_0(%arg0: i32, %arg1: i32, %arg2: i32) -> (i32, i32) {
    %c0_i32 = arith.constant 0 : i32
    return %arg0, %arg2 : i32, i32
  }
  func.func @transform_1(%arg0: i32, %arg1: i32, %arg2: i32) -> (i32, i32) {
    %c0_i32 = arith.constant 0 : i32
    return %arg2, %arg1 : i32, i32
  }
  func.func @transform_2(%arg0: i32, %arg1: i32, %arg2: i32) -> (i32, i32) {
    %c0_i32 = arith.constant 0 : i32
    %c0_i32_0 = arith.constant 0 : i32
    return %c0_i32, %arg1 : i32, i32
  }
  func.func @transform_3(%arg0: i32, %arg1: i32, %arg2: i32) -> (i32, i32) {
    %c0_i32 = arith.constant 0 : i32
    return %arg0, %arg1 : i32, i32
  }
  func.func @transform_4(%arg0: i32, %arg1: i32, %arg2: i32) -> (i32, i32) {
    %c0_i32 = arith.constant 0 : i32
    return %arg0, %arg1 : i32, i32
  }
}

module attributes {stable_mosaic.version = 11 : i64} {
  func.func @_mlp_kernel(%arg0: i32, %arg1: i32, %arg2: memref<16x32xbf16, #tpu.memory_space<vmem>>, %arg3: memref<1x32xf32, #tpu.memory_space<vmem>>, %arg4: memref<1x32xf32, #tpu.memory_space<vmem>>, %arg5: memref<32x128xbf16, #tpu.memory_space<vmem>>, %arg6: memref<1x128xf32, #tpu.memory_space<vmem>>, %arg7: memref<128x32xbf16, #tpu.memory_space<vmem>>, %arg8: memref<1x32xf32, #tpu.memory_space<vmem>>, %arg9: memref<16x32xbf16, #tpu.memory_space<vmem>>, %arg10: memref<16x32xf32, #tpu.memory_space<vmem>>, %arg11: memref<16x32xbf16, #tpu.memory_space<vmem>>) attributes {dimension_semantics = [#tpu.dimension_semantics<parallel>, #tpu.dimension_semantics<arbitrary>], iteration_bounds = array<i64: 1, 1>, scalar_prefetch = 0 : i64, scratch_operands = 2 : i64, tpu.core_type = #tpu.core_type<tc>, window_params = [{transform_indices = @transform_0, window_bounds = array<i64: 16, 32>}, {pipeline_mode = #tpu.pipeline_mode<synchronous>, transform_indices = @transform_1, window_bounds = array<i64: 1, 32>}, {pipeline_mode = #tpu.pipeline_mode<synchronous>, transform_indices = @transform_2, window_bounds = array<i64: 1, 32>}, {transform_indices = @transform_3, window_bounds = array<i64: 32, 128>}, {transform_indices = @transform_4, window_bounds = array<i64: 1, 128>}, {transform_indices = @transform_5, window_bounds = array<i64: 128, 32>}, {pipeline_mode = #tpu.pipeline_mode<synchronous>, transform_indices = @transform_6, window_bounds = array<i64: 1, 32>}, {transform_indices = @transform_7, window_bounds = array<i64: 16, 32>}]} {
    %c0_i32 = arith.constant 0 : i32
    %0 = arith.cmpi eq, %arg1, %c0_i32 : i32
    %1 = arith.extui %0 : i1 to i32
    %c0_i32_0 = arith.constant 0 : i32
    %2 = arith.cmpi ne, %1, %c0_i32_0 : i32
    scf.if %2 {
      %c0_19 = arith.constant 0 : index
      %c0_20 = arith.constant 0 : index
      %31 = vector.load %arg2[%c0_19, %c0_20] : memref<16x32xbf16, #tpu.memory_space<vmem>>, vector<16x32xbf16>
      %32 = arith.extf %31 : vector<16x32xbf16> to vector<16x32xf32>
      %cst_21 = arith.constant dense<0.000000e+00> : vector<16xf32>
      %33 = vector.multi_reduction <add>, %32, %cst_21 [1] : vector<16x32xf32> to vector<16xf32>
      %34 = vector.shape_cast %33 : vector<16xf32> to vector<16x1xf32>
      %cst_22 = arith.constant 3.200000e+01 : f32
      %35 = vector.broadcast %cst_22 : f32 to vector<16x1xf32>
      %36 = arith.divf %34, %35 : vector<16x1xf32>
      %37 = vector.broadcast %36 : vector<16x1xf32> to vector<16x32xf32>
      %38 = arith.subf %32, %37 : vector<16x32xf32>
      %39 = arith.mulf %38, %38 : vector<16x32xf32>
      %cst_23 = arith.constant dense<0.000000e+00> : vector<16xf32>
      %40 = vector.multi_reduction <add>, %39, %cst_23 [1] : vector<16x32xf32> to vector<16xf32>
      %41 = vector.shape_cast %40 : vector<16xf32> to vector<16x1xf32>
      %cst_24 = arith.constant 3.200000e+01 : f32
      %42 = vector.broadcast %cst_24 : f32 to vector<16x1xf32>
      %43 = arith.divf %41, %42 : vector<16x1xf32>
      %44 = vector.broadcast %36 : vector<16x1xf32> to vector<16x32xf32>
      %45 = arith.subf %32, %44 : vector<16x32xf32>
      %cst_25 = arith.constant 9.99999974E-6 : f32
      %46 = vector.broadcast %cst_25 : f32 to vector<16x1xf32>
      %47 = arith.addf %43, %46 : vector<16x1xf32>
      %48 = math.rsqrt %47 : vector<16x1xf32>
      %49 = vector.broadcast %48 : vector<16x1xf32> to vector<16x32xf32>
      %50 = arith.mulf %45, %49 : vector<16x32xf32>
      %c0_26 = arith.constant 0 : index
      %c0_27 = arith.constant 0 : index
      %51 = vector.load %arg3[%c0_26, %c0_27] : memref<1x32xf32, #tpu.memory_space<vmem>>, vector<1x32xf32>
      %52 = vector.broadcast %51 : vector<1x32xf32> to vector<16x32xf32>
      %53 = arith.mulf %50, %52 : vector<16x32xf32>
      %c0_28 = arith.constant 0 : index
      %c0_29 = arith.constant 0 : index
      %54 = vector.load %arg4[%c0_28, %c0_29] : memref<1x32xf32, #tpu.memory_space<vmem>>, vector<1x32xf32>
      %55 = vector.broadcast %54 : vector<1x32xf32> to vector<16x32xf32>
      %56 = arith.addf %53, %55 : vector<16x32xf32>
      %57 = arith.truncf %56 : vector<16x32xf32> to vector<16x32xbf16>
      %c0_30 = arith.constant 0 : index
      %c0_31 = arith.constant 0 : index
      %58 = vector.load %arg11[%c0_30, %c0_31] : memref<16x32xbf16, #tpu.memory_space<vmem>>, vector<16x32xbf16>
      tpu.vector_store %arg11[%c0_30, %c0_31], %57 {strides = array<i32>} : memref<16x32xbf16, #tpu.memory_space<vmem>>, vector<16x32xbf16>,
      %c0_32 = arith.constant 0 : index
      %c0_33 = arith.constant 0 : index
      %59 = vector.load %arg8[%c0_32, %c0_33] : memref<1x32xf32, #tpu.memory_space<vmem>>, vector<1x32xf32>
      %60 = vector.broadcast %59 : vector<1x32xf32> to vector<16x32xf32>
      %61 = arith.addf %32, %60 : vector<16x32xf32>
      %c0_34 = arith.constant 0 : index
      %c0_35 = arith.constant 0 : index
      %62 = vector.load %arg10[%c0_34, %c0_35] : memref<16x32xf32, #tpu.memory_space<vmem>>, vector<16x32xf32>
      tpu.vector_store %arg10[%c0_34, %c0_35], %61 {strides = array<i32>} : memref<16x32xf32, #tpu.memory_space<vmem>>, vector<16x32xf32>,
    } else {
    }
    %c0 = arith.constant 0 : index
    %c0_1 = arith.constant 0 : index
    %3 = vector.load %arg11[%c0, %c0_1] : memref<16x32xbf16, #tpu.memory_space<vmem>>, vector<16x32xbf16>
    %c0_2 = arith.constant 0 : index
    %c0_3 = arith.constant 0 : index
    %4 = vector.load %arg5[%c0_2, %c0_3] : memref<32x128xbf16, #tpu.memory_space<vmem>>, vector<32x128xbf16>
    %cst = arith.constant dense<0.000000e+00> : vector<16x128xf32>
    %5 = tpu.matmul %3, %4, %cst {dimension_numbers = #tpu.dot_dimension_numbers<[1], [0], [0], [1], [0, 0, 1, 1], [], []>} : vector<16x32xbf16>, vector<32x128xbf16>, vector<16x128xf32> -> vector<16x128xf32>
    %c0_4 = arith.constant 0 : index
    %c0_5 = arith.constant 0 : index
    %6 = vector.load %arg6[%c0_4, %c0_5] : memref<1x128xf32, #tpu.memory_space<vmem>>, vector<1x128xf32>
    %7 = vector.broadcast %6 : vector<1x128xf32> to vector<16x128xf32>
    %8 = arith.addf %5, %7 : vector<16x128xf32>
    %9 = arith.mulf %8, %8 : vector<16x128xf32>
    %10 = arith.mulf %8, %9 : vector<16x128xf32>
    %cst_6 = arith.constant 4.471500e-02 : f32
    %11 = vector.broadcast %cst_6 : f32 to vector<16x128xf32>
    %12 = arith.mulf %11, %10 : vector<16x128xf32>
    %13 = arith.addf %8, %12 : vector<16x128xf32>
    %cst_7 = arith.constant 0.797884583 : f32
    %14 = vector.broadcast %cst_7 : f32 to vector<16x128xf32>
    %15 = arith.mulf %14, %13 : vector<16x128xf32>
    %16 = math.tanh %15 : vector<16x128xf32>
    %cst_8 = arith.constant 1.000000e+00 : f32
    %17 = vector.broadcast %cst_8 : f32 to vector<16x128xf32>
    %18 = arith.addf %17, %16 : vector<16x128xf32>
    %cst_9 = arith.constant 5.000000e-01 : f32
    %19 = vector.broadcast %cst_9 : f32 to vector<16x128xf32>
    %20 = arith.mulf %19, %18 : vector<16x128xf32>
    %21 = arith.mulf %8, %20 : vector<16x128xf32>
    %c0_10 = arith.constant 0 : index
    %c0_11 = arith.constant 0 : index
    %22 = vector.load %arg10[%c0_10, %c0_11] : memref<16x32xf32, #tpu.memory_space<vmem>>, vector<16x32xf32>
    %23 = arith.truncf %21 : vector<16x128xf32> to vector<16x128xbf16>
    %c0_12 = arith.constant 0 : index
    %c0_13 = arith.constant 0 : index
    %24 = vector.load %arg7[%c0_12, %c0_13] : memref<128x32xbf16, #tpu.memory_space<vmem>>, vector<128x32xbf16>
    %cst_14 = arith.constant dense<0.000000e+00> : vector<16x32xf32>
    %25 = tpu.matmul %23, %24, %cst_14 {dimension_numbers = #tpu.dot_dimension_numbers<[1], [0], [0], [1], [0, 0, 1, 1], [], []>} : vector<16x128xbf16>, vector<128x32xbf16>, vector<16x32xf32> -> vector<16x32xf32>
    %26 = arith.addf %22, %25 : vector<16x32xf32>
    %c0_15 = arith.constant 0 : index
    %c0_16 = arith.constant 0 : index
    %27 = vector.load %arg10[%c0_15, %c0_16] : memref<16x32xf32, #tpu.memory_space<vmem>>, vector<16x32xf32>
    tpu.vector_store %arg10[%c0_15, %c0_16], %26 {strides = array<i32>} : memref<16x32xf32, #tpu.memory_space<vmem>>, vector<16x32xf32>,
    %c0_i32_17 = arith.constant 0 : i32
    %28 = arith.cmpi eq, %arg1, %c0_i32_17 : i32
    %29 = arith.extui %28 : i1 to i32
    %c0_i32_18 = arith.constant 0 : i32
    %30 = arith.cmpi ne, %29, %c0_i32_18 : i32
    scf.if %30 {
      %c0_19 = arith.constant 0 : index
      %c0_20 = arith.constant 0 : index
      %31 = vector.load %arg10[%c0_19, %c0_20] : memref<16x32xf32, #tpu.memory_space<vmem>>, vector<16x32xf32>
      %32 = arith.truncf %31 : vector<16x32xf32> to vector<16x32xbf16>
      %c0_21 = arith.constant 0 : index
      %c0_22 = arith.constant 0 : index
      %33 = vector.load %arg9[%c0_21, %c0_22] : memref<16x32xbf16, #tpu.memory_space<vmem>>, vector<16x32xbf16>
      tpu.vector_store %arg9[%c0_21, %c0_22], %32 {strides = array<i32>} : memref<16x32xbf16, #tpu.memory_space<vmem>>, vector<16x32xbf16>,
    } else {
    }
    return
  }
  func.func @transform_0(%arg0: i32, %arg1: i32) -> (i32, i32) {
    %c0_i32 = arith.constant 0 : i32
    %c0_i32_0 = arith.constant 0 : i32
    return %arg0, %c0_i32 : i32, i32
  }
  func.func @transform_1(%arg0: i32, %arg1: i32) -> (i32, i32) {
    %c0_i32 = arith.constant 0 : i32
    %c0_i32_0 = arith.constant 0 : i32
    %c0_i32_1 = arith.constant 0 : i32
    return %c0_i32, %c0_i32_0 : i32, i32
  }
  func.func @transform_2(%arg0: i32, %arg1: i32) -> (i32, i32) {
    %c0_i32 = arith.constant 0 : i32
    %c0_i32_0 = arith.constant 0 : i32
    %c0_i32_1 = arith.constant 0 : i32
    return %c0_i32, %c0_i32_0 : i32, i32
  }
  func.func @transform_3(%arg0: i32, %arg1: i32) -> (i32, i32) {
    %c0_i32 = arith.constant 0 : i32
    %c0_i32_0 = arith.constant 0 : i32
    return %c0_i32, %arg1 : i32, i32
  }
  func.func @transform_4(%arg0: i32, %arg1: i32) -> (i32, i32) {
    %c0_i32 = arith.constant 0 : i32
    %c0_i32_0 = arith.constant 0 : i32
    return %c0_i32, %arg1 : i32, i32
  }
  func.func @transform_5(%arg0: i32, %arg1: i32) -> (i32, i32) {
    %c0_i32 = arith.constant 0 : i32
    %c0_i32_0 = arith.constant 0 : i32
    return %arg1, %c0_i32 : i32, i32
  }
  func.func @transform_6(%arg0: i32, %arg1: i32) -> (i32, i32) {
    %c0_i32 = arith.constant 0 : i32
    %c0_i32_0 = arith.constant 0 : i32
    %c0_i32_1 = arith.constant 0 : i32
    return %c0_i32, %c0_i32_0 : i32, i32
  }
  func.func @transform_7(%arg0: i32, %arg1: i32) -> (i32, i32) {
    %c0_i32 = arith.constant 0 : i32
    %c0_i32_0 = arith.constant 0 : i32
    return %arg0, %c0_i32 : i32, i32
  }
}

module attributes {stable_mosaic.version = 11 : i64} {
  func.func @_layernorm_kernel(%arg0: i32, %arg1: memref<16x32xbf16, #tpu.memory_space<vmem>>, %arg2: memref<1x32xf32, #tpu.memory_space<vmem>>, %arg3: memref<1x32xf32, #tpu.memory_space<vmem>>, %arg4: memref<16x32xbf16, #tpu.memory_space<vmem>>) attributes {dimension_semantics = [#tpu.dimension_semantics<parallel>], iteration_bounds = array<i64: 1>, scalar_prefetch = 0 : i64, scratch_operands = 0 : i64, tpu.core_type = #tpu.core_type<tc>, window_params = [{transform_indices = @transform_0, window_bounds = array<i64: 16, 32>}, {pipeline_mode = #tpu.pipeline_mode<synchronous>, transform_indices = @transform_1, window_bounds = array<i64: 1, 32>}, {pipeline_mode = #tpu.pipeline_mode<synchronous>, transform_indices = @transform_2, window_bounds = array<i64: 1, 32>}, {transform_indices = @transform_3, window_bounds = array<i64: 16, 32>}]} {
    %c0 = arith.constant 0 : index
    %c0_0 = arith.constant 0 : index
    %0 = vector.load %arg1[%c0, %c0_0] : memref<16x32xbf16, #tpu.memory_space<vmem>>, vector<16x32xbf16>
    %1 = arith.extf %0 : vector<16x32xbf16> to vector<16x32xf32>
    %cst = arith.constant dense<0.000000e+00> : vector<16xf32>
    %2 = vector.multi_reduction <add>, %1, %cst [1] : vector<16x32xf32> to vector<16xf32>
    %3 = vector.shape_cast %2 : vector<16xf32> to vector<16x1xf32>
    %cst_1 = arith.constant 3.200000e+01 : f32
    %4 = vector.broadcast %cst_1 : f32 to vector<16x1xf32>
    %5 = arith.divf %3, %4 : vector<16x1xf32>
    %6 = vector.broadcast %5 : vector<16x1xf32> to vector<16x32xf32>
    %7 = arith.subf %1, %6 : vector<16x32xf32>
    %8 = arith.mulf %7, %7 : vector<16x32xf32>
    %cst_2 = arith.constant dense<0.000000e+00> : vector<16xf32>
    %9 = vector.multi_reduction <add>, %8, %cst_2 [1] : vector<16x32xf32> to vector<16xf32>
    %10 = vector.shape_cast %9 : vector<16xf32> to vector<16x1xf32>
    %cst_3 = arith.constant 3.200000e+01 : f32
    %11 = vector.broadcast %cst_3 : f32 to vector<16x1xf32>
    %12 = arith.divf %10, %11 : vector<16x1xf32>
    %13 = vector.broadcast %5 : vector<16x1xf32> to vector<16x32xf32>
    %14 = arith.subf %1, %13 : vector<16x32xf32>
    %cst_4 = arith.constant 9.99999974E-6 : f32
    %15 = vector.broadcast %cst_4 : f32 to vector<16x1xf32>
    %16 = arith.addf %12, %15 : vector<16x1xf32>
    %17 = math.rsqrt %16 : vector<16x1xf32>
    %18 = vector.broadcast %17 : vector<16x1xf32> to vector<16x32xf32>
    %19 = arith.mulf %14, %18 : vector<16x32xf32>
    %c0_5 = arith.constant 0 : index
    %c0_6 = arith.constant 0 : index
    %20 = vector.load %arg2[%c0_5, %c0_6] : memref<1x32xf32, #tpu.memory_space<vmem>>, vector<1x32xf32>
    %21 = vector.broadcast %20 : vector<1x32xf32> to vector<16x32xf32>
    %22 = arith.mulf %19, %21 : vector<16x32xf32>
    %c0_7 = arith.constant 0 : index
    %c0_8 = arith.constant 0 : index
    %23 = vector.load %arg3[%c0_7, %c0_8] : memref<1x32xf32, #tpu.memory_space<vmem>>, vector<1x32xf32>
    %24 = vector.broadcast %23 : vector<1x32xf32> to vector<16x32xf32>
    %25 = arith.addf %22, %24 : vector<16x32xf32>
    %26 = arith.truncf %25 : vector<16x32xf32> to vector<16x32xbf16>
    %c0_9 = arith.constant 0 : index
    %c0_10 = arith.constant 0 : index
    %27 = vector.load %arg4[%c0_9, %c0_10] : memref<16x32xbf16, #tpu.memory_space<vmem>>, vector<16x32xbf16>
    tpu.vector_store %arg4[%c0_9, %c0_10], %26 {strides = array<i32>} : memref<16x32xbf16, #tpu.memory_space<vmem>>, vector<16x32xbf16>,
    return
  }
  func.func @transform_0(%arg0: i32) -> (i32, i32) {
    %c0_i32 = arith.constant 0 : i32
    %c0_i32_0 = arith.constant 0 : i32
    return %arg0, %c0_i32 : i32, i32
  }
  func.func @transform_1(%arg0: i32) -> (i32, i32) {
    %c0_i32 = arith.constant 0 : i32
    %c0_i32_0 = arith.constant 0 : i32
    %c0_i32_1 = arith.constant 0 : i32
    return %c0_i32, %c0_i32_0 : i32, i32
  }
  func.func @transform_2(%arg0: i32) -> (i32, i32) {
    %c0_i32 = arith.constant 0 : i32
    %c0_i32_0 = arith.constant 0 : i32
    %c0_i32_1 = arith.constant 0 : i32
    return %c0_i32, %c0_i32_0 : i32, i32
  }
  func.func @transform_3(%arg0: i32) -> (i32, i32) {
    %c0_i32 = arith.constant 0 : i32
    %c0_i32_0 = arith.constant 0 : i32
    return %arg0, %c0_i32 : i32, i32
  }
}

module attributes {stable_mosaic.version = 11 : i64} {
  func.func @_linear_kernel(%arg0: i32, %arg1: i32, %arg2: i32, %arg3: memref<16x32xbf16, #tpu.memory_space<vmem>>, %arg4: memref<32x64xbf16, #tpu.memory_space<vmem>>, %arg5: memref<1x64xf32, #tpu.memory_space<vmem>>, %arg6: memref<16x64xbf16, #tpu.memory_space<vmem>>, %arg7: memref<16x64xf32, #tpu.memory_space<vmem>>) attributes {dimension_semantics = [#tpu.dimension_semantics<parallel>, #tpu.dimension_semantics<parallel>, #tpu.dimension_semantics<arbitrary>], iteration_bounds = array<i64: 1, 1, 1>, scalar_prefetch = 0 : i64, scratch_operands = 1 : i64, tpu.core_type = #tpu.core_type<tc>, window_params = [{transform_indices = @transform_0, window_bounds = array<i64: 16, 32>}, {transform_indices = @transform_1, window_bounds = array<i64: 32, 64>}, {transform_indices = @transform_2, window_bounds = array<i64: 1, 64>}, {transform_indices = @transform_3, window_bounds = array<i64: 16, 64>}]} {
    %c0_i32 = arith.constant 0 : i32
    %0 = arith.cmpi eq, %arg2, %c0_i32 : i32
    %1 = arith.extui %0 : i1 to i32
    %c0_i32_0 = arith.constant 0 : i32
    %2 = arith.cmpi ne, %1, %c0_i32_0 : i32
    scf.if %2 {
      %cst_10 = arith.constant 0.000000e+00 : f32
      %12 = vector.broadcast %cst_10 : f32 to vector<16x64xf32>
      %c0_11 = arith.constant 0 : index
      %c0_12 = arith.constant 0 : index
      %13 = vector.load %arg7[%c0_11, %c0_12] : memref<16x64xf32, #tpu.memory_space<vmem>>, vector<16x64xf32>
      tpu.vector_store %arg7[%c0_11, %c0_12], %12 {strides = array<i32>} : memref<16x64xf32, #tpu.memory_space<vmem>>, vector<16x64xf32>,
    } else {
    }
    %c0 = arith.constant 0 : index
    %c0_1 = arith.constant 0 : index
    %3 = vector.load %arg3[%c0, %c0_1] : memref<16x32xbf16, #tpu.memory_space<vmem>>, vector<16x32xbf16>
    %c0_2 = arith.constant 0 : index
    %c0_3 = arith.constant 0 : index
    %4 = vector.load %arg4[%c0_2, %c0_3] : memref<32x64xbf16, #tpu.memory_space<vmem>>, vector<32x64xbf16>
    %c0_4 = arith.constant 0 : index
    %c0_5 = arith.constant 0 : index
    %5 = vector.load %arg7[%c0_4, %c0_5] : memref<16x64xf32, #tpu.memory_space<vmem>>, vector<16x64xf32>
    %cst = arith.constant dense<0.000000e+00> : vector<16x64xf32>
    %6 = tpu.matmul %3, %4, %cst {dimension_numbers = #tpu.dot_dimension_numbers<[1], [0], [0], [1], [0, 0, 1, 1], [], []>} : vector<16x32xbf16>, vector<32x64xbf16>, vector<16x64xf32> -> vector<16x64xf32>
    %7 = arith.addf %5, %6 : vector<16x64xf32>
    %c0_6 = arith.constant 0 : index
    %c0_7 = arith.constant 0 : index
    %8 = vector.load %arg7[%c0_6, %c0_7] : memref<16x64xf32, #tpu.memory_space<vmem>>, vector<16x64xf32>
    tpu.vector_store %arg7[%c0_6, %c0_7], %7 {strides = array<i32>} : memref<16x64xf32, #tpu.memory_space<vmem>>, vector<16x64xf32>,
    %c0_i32_8 = arith.constant 0 : i32
    %9 = arith.cmpi eq, %arg2, %c0_i32_8 : i32
    %10 = arith.extui %9 : i1 to i32
    %c0_i32_9 = arith.constant 0 : i32
    %11 = arith.cmpi ne, %10, %c0_i32_9 : i32
    scf.if %11 {
      %c0_10 = arith.constant 0 : index
      %c0_11 = arith.constant 0 : index
      %12 = vector.load %arg7[%c0_10, %c0_11] : memref<16x64xf32, #tpu.memory_space<vmem>>, vector<16x64xf32>
      %c0_12 = arith.constant 0 : index
      %c0_13 = arith.constant 0 : index
      %13 = vector.load %arg5[%c0_12, %c0_13] : memref<1x64xf32, #tpu.memory_space<vmem>>, vector<1x64xf32>
      %14 = vector.broadcast %13 : vector<1x64xf32> to vector<16x64xf32>
      %15 = arith.addf %12, %14 : vector<16x64xf32>
      %16 = arith.truncf %15 : vector<16x64xf32> to vector<16x64xbf16>
      %c0_14 = arith.constant 0 : index
      %c0_15 = arith.constant 0 : index
      %17 = vector.load %arg6[%c0_14, %c0_15] : memref<16x64xbf16, #tpu.memory_space<vmem>>, vector<16x64xbf16>
      tpu.vector_store %arg6[%c0_14, %c0_15], %16 {strides = array<i32>} : memref<16x64xbf16, #tpu.memory_space<vmem>>, vector<16x64xbf16>,
    } else {
    }
    return
  }
  func.func @transform_0(%arg0: i32, %arg1: i32, %arg2: i32) -> (i32, i32) {
    %c0_i32 = arith.constant 0 : i32
    return %arg0, %arg2 : i32, i32
  }
  func.func @transform_1(%arg0: i32, %arg1: i32, %arg2: i32) -> (i32, i32) {
    %c0_i32 = arith.constant 0 : i32
    return %arg2, %arg1 : i32, i32
  }
  func.func @transform_2(%arg0: i32, %arg1: i32, %arg2: i32) -> (i32, i32) {
    %c0_i32 = arith.constant 0 : i32
    %c0_i32_0 = arith.constant 0 : i32
    return %c0_i32, %arg1 : i32, i32
  }
  func.func @transform_3(%arg0: i32, %arg1: i32, %arg2: i32) -> (i32, i32) {
    %c0_i32 = arith.constant 0 : i32
    return %arg0, %arg1 : i32, i32
  }
}

module attributes {stable_mosaic.version = 11 : i64} {
  func.func @_cross_attn_kernel(%arg0: i32, %arg1: i32, %arg2: memref<1x16x32xbf16, #tpu.memory_space<vmem>>, %arg3: memref<1x8x64xbf16, #tpu.memory_space<vmem>>, %arg4: memref<1x16x32xbf16, #tpu.memory_space<vmem>>) attributes {dimension_semantics = [#tpu.dimension_semantics<parallel>, #tpu.dimension_semantics<parallel>], iteration_bounds = array<i64: 2, 1>, scalar_prefetch = 0 : i64, scratch_operands = 0 : i64, tpu.core_type = #tpu.core_type<tc>, window_params = [{transform_indices = @transform_0, window_bounds = array<i64: 1, 16, 32>}, {transform_indices = @transform_1, window_bounds = array<i64: 1, 8, 64>}, {transform_indices = @transform_2, window_bounds = array<i64: 1, 16, 32>}]} {
    %c0 = arith.constant 0 : index
    %c0_0 = arith.constant 0 : index
    %c0_1 = arith.constant 0 : index
    %0 = vector.load %arg2[%c0, %c0_0, %c0_1] : memref<1x16x32xbf16, #tpu.memory_space<vmem>>, vector<1x16x32xbf16>
    %1 = vector.shape_cast %0 : vector<1x16x32xbf16> to vector<16x32xbf16>
    %c0_2 = arith.constant 0 : index
    %c0_3 = arith.constant 0 : index
    %c0_4 = arith.constant 0 : index
    %2 = vector.load %arg3[%c0_2, %c0_3, %c0_4] : memref<1x8x64xbf16, #tpu.memory_space<vmem>>, vector<1x8x64xbf16>
    %3 = vector.shape_cast %2 : vector<1x8x64xbf16> to vector<8x64xbf16>
    %4 = vector.extract_strided_slice %3 {offsets = [0, 0], sizes = [8, 32], strides = [1, 1]} : vector<8x64xbf16> to vector<8x32xbf16>
    %5 = vector.extract_strided_slice %3 {offsets = [0, 32], sizes = [8, 32], strides = [1, 1]} : vector<8x64xbf16> to vector<8x32xbf16>
    %6 = vector.shape_cast %1 : vector<16x32xbf16> to vector<16x4x8xbf16>
    %7 = tpu.transpose %6, [1, 0, 2] : vector<16x4x8xbf16> -> vector<4x16x8xbf16>
    %8 = vector.shape_cast %4 : vector<8x32xbf16> to vector<8x4x8xbf16>
    %9 = tpu.transpose %8, [1, 0, 2] : vector<8x4x8xbf16> -> vector<4x8x8xbf16>
    %10 = vector.shape_cast %5 : vector<8x32xbf16> to vector<8x4x8xbf16>
    %11 = tpu.transpose %10, [1, 0, 2] : vector<8x4x8xbf16> -> vector<4x8x8xbf16>
    "tpu.trace_start"() <{level = 10 : i32, message = "hqd,hkd->hqk"}> : () -> ()
    %cst = arith.constant dense<0.000000e+00> : vector<4x16x8xf32>
    %12 = tpu.matmul %7, %9, %cst {dimension_numbers = #tpu.dot_dimension_numbers<[2], [2], [1], [1], [0, 0, 0, 1, 1, 1], [0], [0]>} : vector<4x16x8xbf16>, vector<4x8x8xbf16>, vector<4x16x8xf32> -> vector<4x16x8xf32>
    "tpu.trace_stop"() : () -> ()
    %cst_5 = arith.constant 0.353553385 : f32
    %13 = vector.broadcast %cst_5 : f32 to vector<4x16x8xf32>
    %14 = arith.mulf %12, %13 : vector<4x16x8xf32>
    %cst_6 = arith.constant dense<0xFF800000> : vector<4x16xf32>
    %15 = vector.multi_reduction <maximumf>, %14, %cst_6 [2] : vector<4x16x8xf32> to vector<4x16xf32>
    %16 = vector.shape_cast %15 : vector<4x16xf32> to vector<4x16x1xf32>
    %17 = vector.broadcast %16 : vector<4x16x1xf32> to vector<4x16x8xf32>
    %18 = arith.subf %14, %17 : vector<4x16x8xf32>
    %19 = math.exp %18 : vector<4x16x8xf32>
    %cst_7 = arith.constant dense<0.000000e+00> : vector<4x16xf32>
    %20 = vector.multi_reduction <add>, %19, %cst_7 [2] : vector<4x16x8xf32> to vector<4x16xf32>
    %21 = vector.shape_cast %20 : vector<4x16xf32> to vector<4x16x1xf32>
    %22 = vector.broadcast %21 : vector<4x16x1xf32> to vector<4x16x8xf32>
    %23 = arith.divf %19, %22 : vector<4x16x8xf32>
    %24 = arith.truncf %23 : vector<4x16x8xf32> to vector<4x16x8xbf16>
    "tpu.trace_start"() <{level = 10 : i32, message = "hqk,hkd->hqd"}> : () -> ()
    %cst_8 = arith.constant dense<0.000000e+00> : vector<4x16x8xf32>
    %25 = tpu.matmul %24, %11, %cst_8 {dimension_numbers = #tpu.dot_dimension_numbers<[2], [1], [1], [2], [0, 0, 0, 1, 1, 2], [0], [0]>} : vector<4x16x8xbf16>, vector<4x8x8xbf16>, vector<4x16x8xf32> -> vector<4x16x8xf32>
    "tpu.trace_stop"() : () -> ()
    %26 = tpu.transpose %25, [1, 0, 2] : vector<4x16x8xf32> -> vector<16x4x8xf32>
    %27 = vector.shape_cast %26 : vector<16x4x8xf32> to vector<16x32xf32>
    %28 = arith.truncf %27 : vector<16x32xf32> to vector<16x32xbf16>
    %c0_9 = arith.constant 0 : index
    %c0_10 = arith.constant 0 : index
    %c0_11 = arith.constant 0 : index
    %29 = vector.load %arg4[%c0_9, %c0_10, %c0_11] : memref<1x16x32xbf16, #tpu.memory_space<vmem>>, vector<1x16x32xbf16>
    %30 = vector.shape_cast %29 : vector<1x16x32xbf16> to vector<16x32xbf16>
    %31 = vector.shape_cast %28 : vector<16x32xbf16> to vector<1x16x32xbf16>
    tpu.vector_store %arg4[%c0_9, %c0_10, %c0_11], %31 {strides = array<i32>} : memref<1x16x32xbf16, #tpu.memory_space<vmem>>, vector<1x16x32xbf16>,
    return
  }
  func.func @transform_0(%arg0: i32, %arg1: i32) -> (i32, i32, i32) {
    %c0_i32 = arith.constant 0 : i32
    %c0_i32_0 = arith.constant 0 : i32
    return %arg0, %arg1, %c0_i32 : i32, i32, i32
  }
  func.func @transform_1(%arg0: i32, %arg1: i32) -> (i32, i32, i32) {
    %c0_i32 = arith.constant 0 : i32
    %c0_i32_0 = arith.constant 0 : i32
    %c0_i32_1 = arith.constant 0 : i32
    return %arg0, %c0_i32, %c0_i32_0 : i32, i32, i32
  }
  func.func @transform_2(%arg0: i32, %arg1: i32) -> (i32, i32, i32) {
    %c0_i32 = arith.constant 0 : i32
    %c0_i32_0 = arith.constant 0 : i32
    return %arg0, %arg1, %c0_i32 : i32, i32, i32
  }
}

module attributes {stable_mosaic.version = 11 : i64} {
  func.func @_diff_loss_kernel(%arg0: i32, %arg1: memref<32x32xbf16, #tpu.memory_space<vmem>>, %arg2: memref<32x4xbf16, #tpu.memory_space<vmem>>, %arg3: memref<1x4xf32, #tpu.memory_space<vmem>>, %arg4: memref<32x4xf32, #tpu.memory_space<vmem>>, %arg5: memref<32x1xf32, #tpu.memory_space<vmem>>, %arg6: memref<1x1xf32, #tpu.memory_space<vmem>>, %arg7: memref<1x1xf32, #tpu.memory_space<vmem>>, %arg8: memref<1x1xf32, #tpu.memory_space<vmem>>) attributes {dimension_semantics = [#tpu.dimension_semantics<arbitrary>], iteration_bounds = array<i64: 1>, scalar_prefetch = 0 : i64, scratch_operands = 2 : i64, tpu.core_type = #tpu.core_type<tc>, window_params = [{transform_indices = @transform_0, window_bounds = array<i64: 32, 32>}, {pipeline_mode = #tpu.pipeline_mode<synchronous>, transform_indices = @transform_1, window_bounds = array<i64: 32, 4>}, {pipeline_mode = #tpu.pipeline_mode<synchronous>, transform_indices = @transform_2, window_bounds = array<i64: 1, 4>}, {transform_indices = @transform_3, window_bounds = array<i64: 32, 4>}, {transform_indices = @transform_4, window_bounds = array<i64: 32, 1>}, {pipeline_mode = #tpu.pipeline_mode<synchronous>, transform_indices = @transform_5, window_bounds = array<i64: 1, 1>}]} {
    %c0_i32 = arith.constant 0 : i32
    %0 = arith.cmpi eq, %arg0, %c0_i32 : i32
    %1 = arith.extui %0 : i1 to i32
    %c0_i32_0 = arith.constant 0 : i32
    %2 = arith.cmpi ne, %1, %c0_i32_0 : i32
    scf.if %2 {
      %cst_27 = arith.constant 0.000000e+00 : f32
      %41 = vector.broadcast %cst_27 : f32 to vector<1x1xf32>
      %c0_28 = arith.constant 0 : index
      %c0_29 = arith.constant 0 : index
      %42 = vector.load %arg7[%c0_28, %c0_29] : memref<1x1xf32, #tpu.memory_space<vmem>>, vector<1x1xf32>
      tpu.vector_store %arg7[%c0_28, %c0_29], %41 {strides = array<i32>} : memref<1x1xf32, #tpu.memory_space<vmem>>, vector<1x1xf32>,
      %cst_30 = arith.constant 0.000000e+00 : f32
      %43 = vector.broadcast %cst_30 : f32 to vector<1x1xf32>
      %c0_31 = arith.constant 0 : index
      %c0_32 = arith.constant 0 : index
      %44 = vector.load %arg8[%c0_31, %c0_32] : memref<1x1xf32, #tpu.memory_space<vmem>>, vector<1x1xf32>
      tpu.vector_store %arg8[%c0_31, %c0_32], %43 {strides = array<i32>} : memref<1x1xf32, #tpu.memory_space<vmem>>, vector<1x1xf32>,
    } else {
    }
    %c0 = arith.constant 0 : index
    %c0_1 = arith.constant 0 : index
    %3 = vector.load %arg1[%c0, %c0_1] : memref<32x32xbf16, #tpu.memory_space<vmem>>, vector<32x32xbf16>
    %c0_2 = arith.constant 0 : index
    %c0_3 = arith.constant 0 : index
    %4 = vector.load %arg2[%c0_2, %c0_3] : memref<32x4xbf16, #tpu.memory_space<vmem>>, vector<32x4xbf16>
    %cst = arith.constant dense<0.000000e+00> : vector<32x4xf32>
    %5 = tpu.matmul %3, %4, %cst {dimension_numbers = #tpu.dot_dimension_numbers<[1], [0], [0], [1], [0, 0, 1, 1], [], []>} : vector<32x32xbf16>, vector<32x4xbf16>, vector<32x4xf32> -> vector<32x4xf32>
    %c0_4 = arith.constant 0 : index
    %c0_5 = arith.constant 0 : index
    %6 = vector.load %arg3[%c0_4, %c0_5] : memref<1x4xf32, #tpu.memory_space<vmem>>, vector<1x4xf32>
    %7 = vector.broadcast %6 : vector<1x4xf32> to vector<32x4xf32>
    %8 = arith.addf %5, %7 : vector<32x4xf32>
    %c0_6 = arith.constant 0 : index
    %c0_7 = arith.constant 0 : index
    %9 = vector.load %arg4[%c0_6, %c0_7] : memref<32x4xf32, #tpu.memory_space<vmem>>, vector<32x4xf32>
    %10 = arith.subf %8, %9 : vector<32x4xf32>
    %11 = arith.mulf %10, %10 : vector<32x4xf32>
    %cst_8 = arith.constant dense<0.000000e+00> : vector<32xf32>
    %12 = vector.multi_reduction <add>, %11, %cst_8 [1] : vector<32x4xf32> to vector<32xf32>
    %13 = vector.shape_cast %12 : vector<32xf32> to vector<32x1xf32>
    %cst_9 = arith.constant 2.500000e-01 : f32
    %14 = vector.broadcast %cst_9 : f32 to vector<32x1xf32>
    %15 = arith.mulf %13, %14 : vector<32x1xf32>
    %c0_10 = arith.constant 0 : index
    %c0_11 = arith.constant 0 : index
    %16 = vector.load %arg5[%c0_10, %c0_11] : memref<32x1xf32, #tpu.memory_space<vmem>>, vector<32x1xf32>
    %c32_i32 = arith.constant 32 : i32
    %17 = arith.muli %arg0, %c32_i32 : i32
    %18 = tpu.iota {dimensions = array<i32: 0>} : vector<32x1xi32>
    %19 = vector.broadcast %17 : i32 to vector<32x1xi32>
    %20 = arith.addi %19, %18 : vector<32x1xi32>
    %c32_i32_12 = arith.constant 32 : i32
    %21 = vector.broadcast %c32_i32_12 : i32 to vector<32x1xi32>
    %22 = arith.cmpi slt, %20, %21 : vector<32x1xi32>
    %c0_13 = arith.constant 0 : index
    %c0_14 = arith.constant 0 : index
    %23 = vector.load %arg7[%c0_13, %c0_14] : memref<1x1xf32, #tpu.memory_space<vmem>>, vector<1x1xf32>
    %24 = arith.mulf %15, %16 : vector<32x1xf32>
    %cst_15 = arith.constant 0.000000e+00 : f32
    %25 = vector.broadcast %cst_15 : f32 to vector<32x1xf32>
    %26 = arith.select %22, %24, %25 : vector<32x1xi1>, vector<32x1xf32>
    %cst_16 = arith.constant dense<0.000000e+00> : vector<1xf32>
    %27 = vector.multi_reduction <add>, %26, %cst_16 [0] : vector<32x1xf32> to vector<1xf32>
    %28 = vector.shape_cast %27 : vector<1xf32> to vector<1x1xf32>
    %29 = arith.addf %23, %28 : vector<1x1xf32>
    %c0_17 = arith.constant 0 : index
    %c0_18 = arith.constant 0 : index
    %30 = vector.load %arg7[%c0_17, %c0_18] : memref<1x1xf32, #tpu.memory_space<vmem>>, vector<1x1xf32>
    tpu.vector_store %arg7[%c0_17, %c0_18], %29 {strides = array<i32>} : memref<1x1xf32, #tpu.memory_space<vmem>>, vector<1x1xf32>,
    %c0_19 = arith.constant 0 : index
    %c0_20 = arith.constant 0 : index
    %31 = vector.load %arg8[%c0_19, %c0_20] : memref<1x1xf32, #tpu.memory_space<vmem>>, vector<1x1xf32>
    %cst_21 = arith.constant 0.000000e+00 : f32
    %32 = vector.broadcast %cst_21 : f32 to vector<32x1xf32>
    %33 = arith.select %22, %16, %32 : vector<32x1xi1>, vector<32x1xf32>
    %cst_22 = arith.constant dense<0.000000e+00> : vector<1xf32>
    %34 = vector.multi_reduction <add>, %33, %cst_22 [0] : vector<32x1xf32> to vector<1xf32>
    %35 = vector.shape_cast %34 : vector<1xf32> to vector<1x1xf32>
    %36 = arith.addf %31, %35 : vector<1x1xf32>
    %c0_23 = arith.constant 0 : index
    %c0_24 = arith.constant 0 : index
    %37 = vector.load %arg8[%c0_23, %c0_24] : memref<1x1xf32, #tpu.memory_space<vmem>>, vector<1x1xf32>
    tpu.vector_store %arg8[%c0_23, %c0_24], %36 {strides = array<i32>} : memref<1x1xf32, #tpu.memory_space<vmem>>, vector<1x1xf32>,
    %c0_i32_25 = arith.constant 0 : i32
    %38 = arith.cmpi eq, %arg0, %c0_i32_25 : i32
    %39 = arith.extui %38 : i1 to i32
    %c0_i32_26 = arith.constant 0 : i32
    %40 = arith.cmpi ne, %39, %c0_i32_26 : i32
    scf.if %40 {
      %c0_27 = arith.constant 0 : index
      %c0_28 = arith.constant 0 : index
      %41 = vector.load %arg7[%c0_27, %c0_28] : memref<1x1xf32, #tpu.memory_space<vmem>>, vector<1x1xf32>
      %c0_29 = arith.constant 0 : index
      %c0_30 = arith.constant 0 : index
      %42 = vector.load %arg8[%c0_29, %c0_30] : memref<1x1xf32, #tpu.memory_space<vmem>>, vector<1x1xf32>
      %43 = arith.divf %41, %42 : vector<1x1xf32>
      %c0_31 = arith.constant 0 : index
      %c0_32 = arith.constant 0 : index
      %44 = vector.load %arg6[%c0_31, %c0_32] : memref<1x1xf32, #tpu.memory_space<vmem>>, vector<1x1xf32>
      tpu.vector_store %arg6[%c0_31, %c0_32], %43 {strides = array<i32>} : memref<1x1xf32, #tpu.memory_space<vmem>>, vector<1x1xf32>,
    } else {
    }
    return
  }
  func.func @transform_0(%arg0: i32) -> (i32, i32) {
    %c0_i32 = arith.constant 0 : i32
    %c0_i32_0 = arith.constant 0 : i32
    return %arg0, %c0_i32 : i32, i32
  }
  func.func @transform_1(%arg0: i32) -> (i32, i32) {
    %c0_i32 = arith.constant 0 : i32
    %c0_i32_0 = arith.constant 0 : i32
    %c0_i32_1 = arith.constant 0 : i32
    return %c0_i32, %c0_i32_0 : i32, i32
  }
  func.func @transform_2(%arg0: i32) -> (i32, i32) {
    %c0_i32 = arith.constant 0 : i32
    %c0_i32_0 = arith.constant 0 : i32
    %c0_i32_1 = arith.constant 0 : i32
    return %c0_i32, %c0_i32_0 : i32, i32
  }
  func.func @transform_3(%arg0: i32) -> (i32, i32) {
    %c0_i32 = arith.constant 0 : i32
    %c0_i32_0 = arith.constant 0 : i32
    return %arg0, %c0_i32 : i32, i32
  }
  func.func @transform_4(%arg0: i32) -> (i32, i32) {
    %c0_i32 = arith.constant 0 : i32
    %c0_i32_0 = arith.constant 0 : i32
    return %arg0, %c0_i32 : i32, i32
  }
  func.func @transform_5(%arg0: i32) -> (i32, i32) {
    %c0_i32 = arith.constant 0 : i32
    %c0_i32_0 = arith.constant 0 : i32
    %c0_i32_1 = arith.constant 0 : i32
    return %c0_i32, %c0_i32_0 : i32, i32
  }
}

</mosaic_0001>

<bundles_post_ra>
// kernel: _lambda_.40
= control target key start
LH: loop header
LB: loop body
LE: loop exit
PB: predicated region body
PF: predicated region fallthrough
CT: control target
= control target key end

     0   :  { %vm42_vm0 = vcmask 1041408   ;;  %vm19_vm1 = vcmask 261120   ;;  %vm35_vm2 = vcmask 31744   ;;  %v169_v3 = vmov 0.0   ;;  %s228_s1 = inlined_call_operand.vmem [shape: bf16[4,32], index: 1, kind: input, shape index: {}]   ;;  %s229_s0 = inlined_call_operand.vmem [shape: f32[32,4], index: 0, kind: input, shape index: {}]   ;;  %s230_s2 = inlined_call_operand.vmem [shape: f32[1,32], index: 2, kind: input, shape index: {}]   ;;  %s231_s3 = inlined_call_operand.vmem [shape: bf16[32,32], index: 3, kind: output, shape index: {}]  }
   0x1   :  { %v28_v0 = vld [vmem:[%s228_s1] sm:$0x3]  ;;  %v25_v2 = vld [vmem:[%s229_s0 + $0x8] sm:$0xff]  ;;  %22 = vst.msk [vmem:[#allocation2 + $0x10] sm:$0xff] %vm19_vm1, %v169_v3  ;;  %20 = vst.msk [vmem:[#allocation2] sm:$0xff] %vm19_vm1, %v169_v3  ;;  %vm138_vm3 = vcmask 257024  }
   0x2   :  { %v24_v1 = vld [vmem:[%s229_s0] sm:$0xff]  ;;  %21 = vst.msk [vmem:[#allocation2 + $0x8] sm:$0xff] %vm19_vm1, %v169_v3  ;;  %23 = vst.msk [vmem:[#allocation2 + $0x18] sm:$0xff] %vm19_vm1, %v169_v3  ;;  %167 = vmatprep.subr.msk.bf16.mxu0 %vm42_vm0, %v28_v0  ;;  %v44_v4 = vsel %vm42_vm0, %v28_v0, 0  ;;  %v26_v6 = vld [vmem:[%s229_s0 + $0x10] sm:$0xff] }
   0x3   :  { %v29_v5 = vpack.c.bf16 %v25_v2, %v24_v1  ;;  %v27_v7 = vld [vmem:[%s229_s0 + $0x18] sm:$0xff]  ;;  %162 = vmatpush3.bf16.msra.mxu0 %v44_v4  ;;  %v149_v21 = vld [vmem:[%s230_s2] ss:$0 sm:$0xff] }
   0x4   :  { %v30_v8 = vpack.c.bf16 %v27_v7, %v26_v6 }
   0x5   :  { %163 = vmatprep.mubr.msk.bf16.mxu0 %vm35_vm2, %v29_v5 }
   0x6   :  { %164 = vmatmul.mubr.msk.bf16.vlgmr.msra.gmra.mrb[0].mxu0 %vm35_vm2, %v30_v8 }
   0x8   :  { %v33_v9 = vld [vmem:[#allocation2 + $0x10] sm:$0xff]  ;;  %v31_v10 = vld [vmem:[#allocation2] sm:$0xff] }
   0x9   :  { %v34_v12 = vld [vmem:[#allocation2 + $0x18] sm:$0xff]  ;;  %v32_v15 = vld [vmem:[#allocation2 + $0x8] sm:$0xff] }
  0xd9   :  { %v165_v11 = vpop.f32.mrb[0].mxu0 }
  0xda   :  { %v97_v13 = vadd.f32 %v165_v11, %v33_v9  ;;  %v80_v14 = vpop.f32.mrb[1].mxu0 }
  0xdb   :  { %v95_v16 = vadd.f32 %v80_v14, %v31_v10  ;;  %v166_v17 = vpop.f32.mrb[2].mxu0 }
  0xdc   :  { %102 = vst.msk [vmem:[#allocation2 + $0x10] sm:$0xff] %vm19_vm1, %v97_v13  ;;  %v98_v18 = vadd.f32 %v166_v17, %v34_v12  ;;  %v83_v19 = vpop.f32.mrb[3].mxu0 }
  0xdd   :  { %100 = vst.msk [vmem:[#allocation2] sm:$0xff] %vm19_vm1, %v95_v16  ;;  %v96_v20 = vadd.f32 %v83_v19, %v32_v15 }
  0xde   :  { %103 = vst.msk [vmem:[#allocation2 + $0x18] sm:$0xff] %vm19_vm1, %v98_v18 }
  0xdf   :  { %101 = vst.msk [vmem:[#allocation2 + $0x8] sm:$0xff] %vm19_vm1, %v96_v20 }
  0xe3   :  { %v109_v22 = vld [vmem:[#allocation2 + $0x10] sm:$0xff] }
  0xe4   :  { %v120_v23 = vadd.f32 %v149_v21, %v109_v22  ;;  %v107_v24 = vld [vmem:[#allocation2] sm:$0xff] }
  0xe5   :  { %v118_v25 = vadd.f32 %v149_v21, %v107_v24  ;;  %v110_v26 = vld [vmem:[#allocation2 + $0x18] sm:$0xff] }
  0xe6   :  { %v156_v27 = vpack.c.bf16 %v120_v23, %v120_v23  ;;  %v121_v28 = vadd.f32 %v149_v21, %v110_v26  ;;  %v108_v29 = vld [vmem:[#allocation2 + $0x8] sm:$0xff] }
  0xe7   :  { %v154_v30 = vpack.c.bf16 %v118_v25, %v118_v25  ;;  %v119_v31 = vadd.f32 %v149_v21, %v108_v29 }
  0xe8   :  { %141 = vst.msk [vmem:[%s231_s3 + $0x8] sm:$0xf] %vm138_vm3, %v156_v27  ;;  %v157_v32 = vpack.c.bf16 %v121_v28, %v121_v28 }
  0xe9   :  { %139 = vst.msk [vmem:[%s231_s3] sm:$0xf] %vm138_vm3, %v154_v30  ;;  %v155_v33 = vpack.c.bf16 %v119_v31, %v119_v31 }
  0xea   :  { %142 = vst.msk [vmem:[%s231_s3 + $0xc] sm:$0xf] %vm138_vm3, %v157_v32 }
  0xeb   :  { %140 = vst.msk [vmem:[%s231_s3 + $0x4] sm:$0xf] %vm138_vm3, %v155_v33 }

// kernel: _lambda_.41
= control target key start
LH: loop header
LB: loop body
LE: loop exit
PB: predicated region body
PF: predicated region fallthrough
CT: control target
= control target key end

     0   :  { %vm18_vm0 = vcmask 261120   ;;  %vm110_vm1 = vcmask 257024   ;;  %s199_s0 = inlined_call_operand.vmem [shape: f32[32,32], index: 0, kind: input, shape index: {}]   ;;  %s200_s1 = inlined_call_operand.vmem [shape: f32[1,32], index: 1, kind: input, shape index: {}]   ;;  %s201_s2 = inlined_call_operand.vmem [shape: f32[1,32], index: 2, kind: input, shape index: {}]   ;;  %s202_s3 = inlined_call_operand.vmem [shape: bf16[32,32], index: 3, kind: output, shape index: {}]  }
   0x1   :  { %v14_v0 = vld [vmem:[%s199_s0] sm:$0xff]  ;;  %v16_v1 = vld [vmem:[%s199_s0 + $0x10] sm:$0xff]  ;;  %v15_v2 = vld [vmem:[%s199_s0 + $0x8] sm:$0xff] }
   0x2   :  { %v19_v3 = vsel %vm18_vm0, %v14_v0, 0.0  ;;  %v25_v4 = vsel %vm18_vm0, %v16_v1, 0.0  ;;  %v17_v5 = vld [vmem:[%s199_s0 + $0x18] sm:$0xff]  ;;  %v22_v6 = vsel %vm18_vm0, %v15_v2, 0.0  ;;  %v119_v41 = vld [vmem:[%s200_s1] ss:$0 sm:$0xff] }
   0x3   :  { %20 = vadd.xlane.f32.xlu0 %v19_v3  ;;  %26 = vadd.xlane.f32.xlu1 %v25_v4  ;;  %v28_v7 = vsel %vm18_vm0, %v17_v5, 0.0  ;;  %v120_v43 = vld [vmem:[%s201_s2] ss:$0 sm:$0xff] }
   0x7   :  { %23 = vadd.xlane.f32.xlu0 %v22_v6  ;;  %29 = vadd.xlane.f32.xlu1 %v28_v7 }
  0x90   :  { %v21_v8 = vpop.xlane.xlu0 %20  ;;  %v27_v9 = vpop.xlane.xlu1 %26 }
  0x91   :  { %v32_v10 = vmul.f32 0.03125, %v21_v8  ;;  %v34_v11 = vmul.f32 0.03125, %v27_v9 }
  0x93   :  { %v36_v12 = vsub.f32 %v14_v0, %v32_v10  ;;  %v38_v13 = vsub.f32 %v16_v1, %v34_v11 }
  0x94   :  { %v24_v14 = vpop.xlane.xlu0 %23  ;;  %v30_v15 = vpop.xlane.xlu1 %29 }
  0x95   :  { %v33_v16 = vmul.f32 0.03125, %v24_v14  ;;  %v35_v17 = vmul.f32 0.03125, %v30_v15  ;;  %v40_v18 = vmul.f32 %v36_v12, %v36_v12  ;;  %v42_v19 = vmul.f32 %v38_v13, %v38_v13 }
  0x97   :  { %v37_v20 = vsub.f32 %v15_v2, %v33_v16  ;;  %v39_v21 = vsub.f32 %v17_v5, %v35_v17  ;;  %v44_v22 = vsel %vm18_vm0, %v40_v18, 0.0  ;;  %v50_v23 = vsel %vm18_vm0, %v42_v19, 0.0 }
  0x98   :  { %45 = vadd.xlane.f32.xlu0 %v44_v22 }
  0x99   :  { %v41_v24 = vmul.f32 %v37_v20, %v37_v20  ;;  %v43_v25 = vmul.f32 %v39_v21, %v39_v21 }
  0x9b   :  { %v47_v26 = vsel %vm18_vm0, %v41_v24, 0.0  ;;  %v53_v27 = vsel %vm18_vm0, %v43_v25, 0.0 }
  0x9c   :  { %51 = vadd.xlane.f32.xlu0 %v50_v23  ;;  %48 = vadd.xlane.f32.xlu1 %v47_v26 }
  0xa0   :  { %54 = vadd.xlane.f32.xlu1 %v53_v27 }
 0x125   :  { %v46_v28 = vpop.xlane.xlu0 %45 }
 0x126   :  { %v56_v29 = vmul.f32 0.03125, %v46_v28 }
 0x128   :  { %v60_v30 = vadd.f32 1e-06, %v56_v29 }
 0x129   :  { %v49_v31 = vpop.xlane.xlu1 %48  ;;  %v52_v32 = vpop.xlane.xlu0 %51 }
 0x12a   :  { %129 = vrsqrt.f32 %v60_v30  ;;  %v57_v33 = vmul.f32 0.03125, %v49_v31  ;;  %v58_v34 = vmul.f32 0.03125, %v52_v32 }
 0x12c   :  { %v61_v35 = vadd.f32 1e-06, %v57_v33  ;;  %v62_v36 = vadd.f32 1e-06, %v58_v34 }
 0x12d   :  { %v55_v37 = vpop.xlane.xlu1 %54 }
 0x12e   :  { %131 = vrsqrt.f32 %v61_v35  ;;  %v59_v38 = vmul.f32 0.03125, %v55_v37 }
 0x12f   :  { %133 = vrsqrt.f32 %v62_v36 }
 0x130   :  { %v63_v39 = vadd.f32 1e-06, %v59_v38 }
 0x132   :  { %135 = vrsqrt.f32 %v63_v39 }
 0x134   :  { %v130_v40 = vpop.eup %129 }
 0x135   :  { %v68_v42 = vmul.f32 %v130_v40, %v36_v12 }
 0x137   :  { %v79_v44 = vmul.f32 %v119_v41, %v68_v42 }
 0x138   :  { %v132_v45 = vpop.eup %131 }
 0x139   :  { %v134_v46 = vpop.eup %133  ;;  %v90_v47 = vadd.f32 %v120_v43, %v79_v44  ;;  %v69_v48 = vmul.f32 %v132_v45, %v37_v20 }
 0x13a   :  { %v70_v49 = vmul.f32 %v134_v46, %v38_v13 }
 0x13b   :  { %v125_v50 = vpack.c.bf16 %v90_v47, %v90_v47  ;;  %v80_v51 = vmul.f32 %v119_v41, %v69_v48 }
 0x13c   :  { %v136_v52 = vpop.eup %135  ;;  %v81_v53 = vmul.f32 %v119_v41, %v70_v49 }
 0x13d   :  { %111 = vst.msk [vmem:[%s202_s3] sm:$0xf] %vm110_vm1, %v125_v50  ;;  %v91_v54 = vadd.f32 %v120_v43, %v80_v51  ;;  %v71_v55 = vmul.f32 %v136_v52, %v39_v21 }
 0x13e   :  { %v92_v56 = vadd.f32 %v120_v43, %v81_v53 }
 0x13f   :  { %v126_v57 = vpack.c.bf16 %v91_v54, %v91_v54  ;;  %v82_v58 = vmul.f32 %v119_v41, %v71_v55 }
 0x140   :  { %v127_v59 = vpack.c.bf16 %v92_v56, %v92_v56 }
 0x141   :  { %112 = vst.msk [vmem:[%s202_s3 + $0x4] sm:$0xf] %vm110_vm1, %v126_v57  ;;  %v93_v60 = vadd.f32 %v120_v43, %v82_v58 }
 0x142   :  { %113 = vst.msk [vmem:[%s202_s3 + $0x8] sm:$0xf] %vm110_vm1, %v127_v59 }
 0x143   :  { %v128_v61 = vpack.c.bf16 %v93_v60, %v93_v60 }
 0x145   :  { %114 = vst.msk [vmem:[%s202_s3 + $0xc] sm:$0xf] %vm110_vm1, %v128_v61 }

// kernel: _lambda_.44
= control target key start
LH: loop header
LB: loop body
LE: loop exit
PB: predicated region body
PF: predicated region fallthrough
CT: control target
= control target key end

     0   :  { %vm22_vm0 = vcmask 261120   ;;  %v129_v0 = vmov 0.0   ;;  %vm130_vm1 = vmmov 0   ;;  %vm104_vm2 = vcmask 257024   ;;  %s177_s1 = inlined_call_operand.vmem [shape: bf16[32,32], index: 1, kind: input, shape index: {}]   ;;  %s178_s0 = inlined_call_operand.vmem [shape: bf16[8,32], index: 0, kind: input, shape index: {}]   ;;  %s179_s3 = inlined_call_operand.vmem [shape: bf16[8,32], index: 3, kind: input, shape index: {}]   ;;  %s180_s2 = inlined_call_operand.vmem [shape: f32[1,32], index: 2, kind: input, shape index: {}]   ;;  %s181_s4 = inlined_call_operand.vmem [shape: bf16[8,32], index: 4, kind: output, shape index: {}]  }
   0x1   :  { %117 = vmatprep.subr.bf16.mxu0 %v129_v0  ;;  %v127_v1 = vld [vmem:[%s177_s1] sm:$0xff]   ;;  %121 = vmatprep.mubr.msk.bf16.mxu0 %vm130_vm1, %v129_v0  ;;  %23 = vst.msk [vmem:[#allocation2] sm:$0xff] %vm22_vm0, %v129_v0  ;;  %v128_v2 = vld [vmem:[%s177_s1 + $0x8] sm:$0xff]  }
   0x2   :  { %118 = vmatpush3.bf16.msra.mxu0 %v127_v1  ;;  %v24_v3 = vld [vmem:[%s178_s0] sm:$0xf] }
   0x3   :  { %119 = vmatprep.subr.bf16.mxu0 %v129_v0  ;;  %v100_v10 = vld [vmem:[%s179_s3] sm:$0xf] }
   0x4   :  { %v113_v11 = vld [vmem:[%s180_s2] ss:$0 sm:$0xff]  ;;  %v101_v12 = vunpack.c.l.bf16 %v100_v10 }
   0x6   :  { %120 = vmatpush3.bf16.msra.mxu0 %v128_v2 }
   0x8   :  { %v29_v4 = vld [vmem:[#allocation2] sm:$0xff] }
   0x9   :  { %122 = vmatmul.mubr.msk.bf16.vlgmr.msra.gmra.mrb[0].mxu0 %vm22_vm0, %v24_v3 }
  0xdc   :  { %v80_v5 = vpop.f32.mrb[0].mxu0 }
  0xdd   :  { %v86_v6 = vadd.f32 %v80_v5, %v29_v4  ;;  %v123_v7 = vpop.f32.mrb[1].mxu0 }
  0xde   :  { %v83_v8 = vpop.f32.mrb[2].mxu0 }
  0xdf   :  { %87 = vst.msk [vmem:[#allocation2] sm:$0xff] %vm22_vm0, %v86_v6  ;;  %v124_v9 = vpop.f32.mrb[3].mxu0 }
  0xe6   :  { %v91_v13 = vld [vmem:[#allocation2] sm:$0xff] }
  0xe7   :  { %v99_v14 = vadd.f32 %v113_v11, %v91_v13 }
  0xe9   :  { %v102_v15 = vadd.f32 %v101_v12, %v99_v14 }
  0xeb   :  { %v103_v16 = vpack.c.bf16 %v102_v15, %v102_v15 }
  0xed   :  { %105 = vst.msk [vmem:[%s181_s4] sm:$0xf] %vm104_vm2, %v103_v16 }

// kernel: _lambda_.42
= control target key start
LH: loop header
LB: loop body
LE: loop exit
PB: predicated region body
PF: predicated region fallthrough
CT: control target
= control target key end

     0   :  { %vm27_vm0 = vcmask 261120   ;;  %v159_v9 = vmov 0.0   ;;  %vm160_vm1 = vmmov 0   ;;  %vm59_vm2 = vcmask 257024   ;;  %s215_s0 = inlined_call_operand.vmem [shape: bf16[8,32], index: 0, kind: input, shape index: {}]   ;;  %s216_s3 = inlined_call_operand.vmem [shape: bf16[32,96], index: 3, kind: input, shape index: {}]   ;;  %s217_s1 = inlined_call_operand.vmem [shape: f32[1,32], index: 1, kind: input, shape index: {}]   ;;  %s218_s2 = inlined_call_operand.vmem [shape: f32[1,32], index: 2, kind: input, shape index: {}]   ;;  %s219_s4 = inlined_call_operand.vmem [shape: f32[1,96], index: 4, kind: input, shape index: {}]   ;;  %s220_s5 = inlined_call_operand.vmem [shape: bf16[8,96], index: 5, kind: output, shape index: {}]  }
   0x1   :  { %v25_v0 = vld [vmem:[%s215_s0] sm:$0xf]  ;;  %145 = vmatprep.subr.bf16.mxu0 %v159_v9  ;;  %v156_v10 = vld [vmem:[%s216_s3 + $0x8] sm:$0xff]   ;;  %149 = vmatprep.mubr.msk.bf16.mxu0 %vm160_vm1, %v159_v9  ;;  %vm130_vm3 = vcmask 781312  }
   0x2   :  { %v26_v1 = vunpack.c.l.bf16 %v25_v0  ;;  %v155_v8 = vld [vmem:[%s216_s3] sm:$0xff]  }
   0x3   :  { %146 = vmatpush3.bf16.msra.mxu0 %v155_v8  ;;  %v136_v15 = vld [vmem:[%s217_s1] ss:$0 sm:$0xff] }
   0x4   :  { %v28_v2 = vsel %vm27_vm0, %v26_v1, 0.0  ;;  %147 = vmatprep.subr.bf16.mxu0 %v159_v9  ;;  %v137_v17 = vld [vmem:[%s218_s2] ss:$0 sm:$0xff] }
   0x5   :  { %29 = vadd.xlane.f32.xlu0 %v28_v2  ;;  %v138_v22 = vld [vmem:[%s219_s4] ss:$0 sm:$0xff] }
   0x7   :  { %148 = vmatpush3.bf16.msra.mxu0 %v156_v10 }
  0x92   :  { %v30_v3 = vpop.xlane.xlu0 %29 }
  0x93   :  { %v32_v4 = vmul.f32 0.03125, %v30_v3 }
  0x95   :  { %v33_v5 = vsub.f32 %v26_v1, %v32_v4 }
  0x97   :  { %v34_v6 = vmul.f32 %v33_v5, %v33_v5 }
  0x99   :  { %v35_v7 = vsel %vm27_vm0, %v34_v6, 0.0 }
  0x9a   :  { %36 = vadd.xlane.f32.xlu0 %v35_v7 }
 0x127   :  { %v37_v11 = vpop.xlane.xlu0 %36 }
 0x128   :  { %v38_v12 = vmul.f32 0.03125, %v37_v11 }
 0x12a   :  { %v39_v13 = vadd.f32 1e-05, %v38_v12 }
 0x12c   :  { %157 = vrsqrt.f32 %v39_v13 }
 0x136   :  { %v158_v14 = vpop.eup %157 }
 0x137   :  { %v41_v16 = vmul.f32 %v158_v14, %v33_v5 }
 0x139   :  { %v49_v18 = vmul.f32 %v136_v15, %v41_v16 }
 0x13b   :  { %v57_v19 = vadd.f32 %v137_v17, %v49_v18 }
 0x13d   :  { %v58_v20 = vpack.c.bf16 %v57_v19, %v57_v19 }
 0x13f   :  { %60 = vst.msk [vmem:[#allocation2] sm:$0xf] %vm59_vm2, %v58_v20 }
 0x146   :  { %v61_v21 = vld [vmem:[#allocation2] sm:$0xf] }
 0x147   :  { %150 = vmatmul.mubr.msk.bf16.vlgmr.msra.gmra.mrb[0].mxu0 %vm27_vm0, %v61_v21 }
 0x21a   :  { %v123_v23 = vpop.f32.mrb[0].mxu0 }
 0x21b   :  { %v124_v24 = vadd.f32 %v138_v22, %v123_v23  ;;  %v151_v25 = vpop.f32.mrb[1].mxu0 }
 0x21c   :  { %v126_v26 = vpop.f32.mrb[2].mxu0 }
 0x21d   :  { %v129_v27 = vpack.c.bf16 %v124_v24, %v124_v24  ;;  %v152_v28 = vpop.f32.mrb[3].mxu0 }
 0x21f   :  { %131 = vst.msk [vmem:[%s220_s5] sm:$0xf] %vm130_vm3, %v129_v27 }

// kernel: _lambda_.43
= control target key start
LH: loop header
LB: loop body
LE: loop exit
PB: predicated region body
PF: predicated region fallthrough
CT: control target
= control target key end

     0   :  { %s1209_s9 = smov 0   ;;  %s1211_s10 = smov 0   ;;  %s1362_s0 = inlined_call_operand.vmem [shape: bf16[2,4,96], index: 0, kind: input, shape index: {}, may-alias: {0,1}]   ;;  %s1363_s1 = inlined_call_operand.vmem [shape: bf16[2,4,96], index: 1, kind: input, shape index: {}, may-alias: {0,1}]   ;;  %s1364_s2 = inlined_call_operand.vmem [shape: bf16[2,4,32], index: 2, kind: output, shape index: {}]  }
   0x1   :  { %s1213_s11 = smov 0  }
   0x2 LB: > { %s24_s12 = sadd.s32 1, %s1175_s10  ;;  %p1025_p0 = scmp.ge.s32.totalorder %s1179_s11, 1  ;;  %s1179_s11 = sphi %s1213_s11, %s12_s11   ;;  %s1175_s10 = sphi %s1211_s10, %s1366_s10   ;;  %s1171_s9 = sphi %s1209_s9, %s1365_s9  }
   0x3   : > { %p26_p1 = scmp.ge.s32.totalorder %s24_s12, 2  ;;  %p139_p2 = scmp.lt.s32.totalorder %s1179_s11, 3 }
   0x5   : > { %s1368_s12 = smov (%p26_p1, %s24_s12), 0  ;;  %p140_p3 = pnand %p1025_p0, %p139_p2 }
   0x6   : > { %p169_p4 = scmp.lt.s32.totalorder (!%p140_p3), %s1171_s9, 1  ;;  %s1181_s17 = smov (!%p140_p3), 120   ;;  %v1185_v5 = vmov (!%p140_p3), 0.0   ;;  %vm1186_vm0 = vmmov (!%p140_p3), 0   ;;  %v1187_v6 = vmov (!%p140_p3), 1934713408   ;;  %v204_v8 = vlaneseq (!%p140_p3) }
   0x7   : > { %143 = sbr.rel (%p140_p3) target bundleno = 1216 (0x4c0), region = 28  ;;  %s1182_s18 = smov (!%p140_p3), 104   ;;  %1056 = vmatprep.subr.bf16.mxu0 (!%p140_p3), %v1185_v5  ;;  %1062 = vmatprep.subr.bf16.mxu1 (!%p140_p3), %v1185_v5  ;;  %v202_v7 = vunpack.c.l.s4 (!%p140_p3), %v1187_v6  ;;  %v1188_v22 = vmov (!%p140_p3), 0   ;;  %vm423_vm1 = vcmask (!%p140_p3), 64512   ;;  %vm612_vm2 = vcmask (!%p140_p3), 27648  }
   0x8   : > { %s1183_s19 = smov (!%p140_p3), 112   ;;  %s1184_s20 = smov (!%p140_p3), 96   ;;  %1058 = vmatprep.mubr.msk.bf16.mxu0 (!%p140_p3), %vm1186_vm0, %v1185_v5  ;;  %1064 = vmatprep.mubr.msk.bf16.mxu1 (!%p140_p3), %vm1186_vm0, %v1185_v5  ;;  %v1258_v11 = vshrl.u32 (!%p140_p3), %v204_v8, 7  ;;  %vm665_vm3 = vcmask (!%p140_p3), 1041408   ;;  %vm661_vm4 = vcmask (!%p140_p3), 31744   ;;  %vm928_vm5 = vcmask (!%p140_p3), 130048  }
   0x9   : > { %v203_v10 = vunpack.c.0.s8 (!%p140_p3), %v202_v7  ;;  %s1189_s24 = smov (!%p140_p3), 64   ;;  %s1191_s25 = smov (!%p140_p3), 16   ;;  %vm930_vm6 = vcmask (!%p140_p3), 195584   ;;  %vm933_vm7 = vcmask (!%p140_p3), 254976  }
   0xa   : > { %s1192_s26 = smov (!%p140_p3), 8   ;;  %s1193_s27 = smov (!%p140_p3), 24  }
   0xb   : > { %v1261_v13 = vsub.s32 (!%p140_p3), %v203_v10, %v1258_v11 }
   0xe   : > { %s1370_s9 = smov (!%p169_p4, %s1171_s9), 1 }
   0xf   : > { %s1227_s13 = sshll.u32 %s1370_s9, 1 }
  0x10   : > { %s179_s16 = scalar_lea.vmem %s1363_s1, %s1227_s13  ;;  %s175_s23 = scalar_lea.vmem %s1362_s0, %s1227_s13 }
  0x11   : > { %v1233_v0 = vld [vmem:[%s179_s16] sm:$0x3]  ;;  %s186_s30 = scalar_lea.vmem %s1364_s2, %s1227_s13 }
  0x12   : > { %265 = vrot.lane.b32.xlu0 %v1233_v0, %s1181_s17  ;;  %269 = vrot.lane.b32.xlu1 %v1233_v0, %s1182_s18  ;;  %v188_v4 = vld [vmem:[%s175_s23] sm:$0x3] }
  0x16   : > { %267 = vrot.lane.b32.xlu0 %v1233_v0, %s1183_s19  ;;  %271 = vrot.lane.b32.xlu1 %v1233_v0, %s1184_s20 }
  0x84   : > { %v1239_v1 = vpop.permute.xlu0 %265  ;;  %v1242_v2 = vpop.permute.xlu1 %269 }
  0x85   : > { %273 = vrot.lane.b32.xlu0 %v1239_v1, %s1184_s20 }
  0x88   : > { %v1248_v3 = vpop.permute.xlu0 %267  ;;  %v272_v9 = vpop.permute.xlu1 %271 }
  0x89   : > { %277 = vrot.lane.b32.xlu0 %v1242_v2, %s1184_s20  ;;  %275 = vrot.lane.b32.xlu1 %v1248_v3, %s1184_s20 }
  0x8d   : > { %191 = vrot.lane.b32.xlu1 %v188_v4, %s1181_s17  ;;  %194 = vrot.lane.b32.xlu0 %v188_v4, %s1183_s19 }
  0x91   : > { %197 = vrot.lane.b32.xlu1 %v188_v4, %s1182_s18 }
  0xf7   : > { %v274_v12 = vpop.permute.xlu0 %273 }
  0xfb   : > { %v276_v14 = vpop.permute.xlu1 %275  ;;  %v278_v15 = vpop.permute.xlu0 %277 }
  0xfc   : > { %v283_v16 = vcombine.low %v272_v9, %v276_v14  ;;  %v292_v17 = vcombine.low %v274_v12, %v278_v15 }
  0xfe   : > { %v290_v18 = vrot.slane %v283_v16, %v1261_v13  ;;  %v299_v19 = vrot.slane %v292_v17, %v1261_v13 }
  0xff   : > { %v192_v20 = vpop.permute.xlu1 %191  ;;  %v195_v21 = vpop.permute.xlu0 %194 }
 0x100   : > { %v291_v23 = vcombine.high %v290_v18, %v1188_v22  ;;  %v305_v24 = vshrl.u32 %v290_v18, 16  ;;  %v300_v25 = vcombine.high %v299_v19, %v1188_v22  ;;  %v306_v26 = vshrl.u32 %v299_v19, 16 }
 0x101   : > { %v200_v27 = vcombine.low %v188_v4, %v195_v21  ;;  %v303_v29 = vpack.i.b16 %v299_v19, %v290_v18 }
 0x102   : > { %v313_v28 = vshrl.u32 %v291_v23, 16  ;;  %v311_v30 = vpack.i.b16 %v300_v25, %v291_v23  ;;  %v314_v31 = vshrl.u32 %v300_v25, 16  ;;  %v307_v34 = vpack.i.b16 %v306_v26, %v305_v24 }
 0x103   : > { %v207_v32 = vrot.slane %v200_v27, %v1261_v13  ;;  %v198_v33 = vpop.permute.xlu1 %197 }
 0x104   : > { %v209_v35 = vcombine.low %v192_v20, %v198_v33  ;;  %v315_v36 = vpack.i.b16 %v314_v31, %v313_v28  ;;  %v317_v37 = vcombine.low %v303_v29, %v311_v30 }
 0x105   : > { %v208_v38 = vcombine.high %v207_v32, %v1188_v22  ;;  %v222_v41 = vshrl.u32 %v207_v32, 16 }
 0x106   : > { %v216_v39 = vrot.slane %v209_v35, %v1261_v13  ;;  %v326_v40 = vcombine.low %v307_v34, %v315_v36  ;;  %v324_v42 = vrot.slane %v317_v37, %v1261_v13 }
 0x107   : > { %v230_v43 = vshrl.u32 %v208_v38, 16 }
 0x108   : > { %v217_v44 = vcombine.high %v216_v39, %v1188_v22  ;;  %v223_v45 = vshrl.u32 %v216_v39, 16  ;;  %v333_v46 = vrot.slane %v326_v40, %v1261_v13  ;;  %v220_v47 = vpack.i.b16 %v216_v39, %v207_v32 }
 0x109   : > { %v338_v51 = vshrl.u32 %v324_v42, 16  ;;  %v325_v59 = vcombine.high %v324_v42, %v1188_v22 }
 0x10a   : > { %v228_v48 = vpack.i.b16 %v217_v44, %v208_v38  ;;  %v231_v49 = vshrl.u32 %v217_v44, 16  ;;  %v337_v50 = vpack.i.b16 %v333_v46, %v324_v42  ;;  %v339_v52 = vshrl.u32 %v333_v46, 16 }
 0x10b   : > { %v334_v53 = vcombine.high %v333_v46, %v1188_v22  ;;  %v224_v54 = vpack.i.b16 %v223_v45, %v222_v41  ;;  %v344_v7 = vshrl.u32 %v325_v59, 16 }
 0x10c   : > { %v232_v55 = vpack.i.b16 %v231_v49, %v230_v43  ;;  %v234_v56 = vcombine.low %v220_v47, %v228_v48  ;;  %v428_v57 = vsel %vm423_vm1, %v337_v50, 0  ;;  %v340_v58 = vpack.i.b16 %v339_v52, %v338_v51 }
 0x10d   : > { %1057 = vmatpush3.bf16.xpose.msra.mxu0 %v428_v57  ;;  %v345_v63 = vshrl.u32 %v334_v53, 16  ;;  %v343_v6 = vpack.i.b16 %v334_v53, %v325_v59 }
 0x10e   : > { %v241_v60 = vrot.slane %v234_v56, %v1261_v13  ;;  %v243_v61 = vcombine.low %v224_v54, %v232_v55  ;;  %1068 = vmatprep.subr.bf16.mxu0 %v1185_v5  ;;  %v474_v62 = vsel %vm423_vm1, %v340_v58, 0 }
 0x10f   : > { %1063 = vmatpush3.bf16.xpose.msra.mxu1 %v474_v62  ;;  %v346_v12 = vpack.i.b16 %v345_v63, %v344_v7  ;;  %v520_v14 = vsel %vm423_vm1, %v343_v6, 0 }
 0x110   : > { %v250_v4 = vrot.slane %v243_v61, %v1261_v13  ;;  %1074 = vmatprep.subr.bf16.mxu1 %v1185_v5  ;;  %v255_v9 = vshrl.u32 %v241_v60, 16  ;;  %v242_v18 = vcombine.high %v241_v60, %v1188_v22 }
 0x111   : > { %v566_v17 = vsel %vm423_vm1, %v346_v12, 0 }
 0x112   : > { %v254_v8 = vpack.i.b16 %v250_v4, %v241_v60  ;;  %v256_v10 = vshrl.u32 %v250_v4, 16  ;;  %v251_v16 = vcombine.high %v250_v4, %v1188_v22  ;;  %v261_v21 = vshrl.u32 %v242_v18, 16 }
 0x114   : > { %1059 = vmatmul.mubr.msk.bf16.vlgmr.msra.gmra.mrb[0].mxu0 %vm423_vm1, %v254_v8  ;;  %v257_v15 = vpack.i.b16 %v256_v10, %v255_v9  ;;  %v262_v19 = vshrl.u32 %v251_v16, 16  ;;  %v260_v20 = vpack.i.b16 %v251_v16, %v242_v18 }
 0x115   : > { %1069 = vmatpush3.bf16.xpose.msra.mxu0 %v520_v14  ;;  %1070 = vmatprep.mubr.msk.bf16.mxu0 %vm1186_vm0, %v1185_v5 }
 0x116   : > { %1080 = vmatprep.subr.bf16.mxu0 %v1185_v5  ;;  %1065 = vmatmul.mubr.msk.bf16.vlgmr.msra.gmra.mrb[0].mxu1 %vm423_vm1, %v257_v15  ;;  %v263_v23 = vpack.i.b16 %v262_v19, %v261_v21 }
 0x117   : > { %1075 = vmatpush3.bf16.xpose.msra.mxu1 %v566_v17  ;;  %1076 = vmatprep.mubr.msk.bf16.mxu1 %vm1186_vm0, %v1185_v5 }
 0x118   : > { %1086 = vmatprep.subr.bf16.mxu1 %v1185_v5 }
 0x11c   : > { %1071 = vmatmul.mubr.msk.bf16.vlgmr.msra.gmra.mrb[4].mxu0 %vm423_vm1, %v260_v20 }
 0x11d   : > { %1082 = vmatprep.mubr.msk.bf16.mxu0 %vm1186_vm0, %v1185_v5 }
 0x11e   : > { %1077 = vmatmul.mubr.msk.bf16.vlgmr.msra.gmra.mrb[4].mxu1 %vm423_vm1, %v263_v23 }
 0x11f   : > { %1088 = vmatprep.mubr.msk.bf16.mxu1 %vm1186_vm0, %v1185_v5 }
 0x1e7   : > { %v464_v24 = vpop.f32.mrb[0].mxu0 }
 0x1e8   : > { %v608_v25 = vmul.f32 0.35355338, %v464_v24  ;;  %v1060_v26 = vpop.f32.mrb[1].mxu0 }
 0x1e9   : > { %v467_v27 = vpop.f32.mrb[2].mxu0  ;;  %v510_v28 = vpop.f32.mrb[0].mxu1 }
 0x1ea   : > { %v1061_v29 = vpop.f32.mrb[3].mxu0  ;;  %v613_v30 = vsel %vm612_vm2, %v608_v25, -inf  ;;  %v609_v31 = vmul.f32 0.35355338, %v510_v28  ;;  %v1066_v32 = vpop.f32.mrb[1].mxu1 }
 0x1eb   : > { %614 = vmax.xlane.f32.xlu0 %v613_v30  ;;  %v513_v33 = vpop.f32.mrb[2].mxu1 }
 0x1ec   : > { %v1067_v34 = vpop.f32.mrb[3].mxu1  ;;  %v616_v35 = vsel %vm612_vm2, %v609_v31, -inf }
 0x1ed   : > { %617 = vmax.xlane.f32.xlu1 %v616_v35 }
 0x1ef   : > { %v556_v36 = vpop.f32.mrb[4].mxu0 }
 0x1f0   : > { %v610_v37 = vmul.f32 0.35355338, %v556_v36  ;;  %v1072_v38 = vpop.f32.mrb[5].mxu0 }
 0x1f1   : > { %v559_v39 = vpop.f32.mrb[6].mxu0  ;;  %v602_v40 = vpop.f32.mrb[4].mxu1 }
 0x1f2   : > { %v1073_v41 = vpop.f32.mrb[7].mxu0  ;;  %v619_v42 = vsel %vm612_vm2, %v610_v37, -inf  ;;  %v611_v43 = vmul.f32 0.35355338, %v602_v40  ;;  %v1078_v44 = vpop.f32.mrb[5].mxu1 }
 0x1f3   : > { %620 = vmax.xlane.f32.xlu0 %v619_v42  ;;  %v605_v45 = vpop.f32.mrb[6].mxu1 }
 0x1f4   : > { %v1079_v46 = vpop.f32.mrb[7].mxu1  ;;  %v622_v47 = vsel %vm612_vm2, %v611_v43, -inf }
 0x1f7   : > { %623 = vmax.xlane.f32.xlu0 %v622_v47 }
 0x1fe   : > { %347 = vrot.lane.b32.xlu1 %v1233_v0, %s1189_s24 }
 0x278   : > { %v615_v48 = vpop.xlane.xlu0 %614 }
 0x279   : > { %v625_v49 = vsub.f32 %v608_v25, %v615_v48 }
 0x27a   : > { %v618_v51 = vpop.xlane.xlu1 %617 }
 0x27b   : > { %v629_v50 = vmul.f32 1.442695, %v625_v49  ;;  %v626_v52 = vsub.f32 %v609_v31, %v618_v51 }
 0x27d   : > { %1141 = vpow2.f32 %v629_v50  ;;  %v631_v53 = vmul.f32 1.442695, %v626_v52 }
 0x27f   : > { %1143 = vpow2.f32 %v631_v53 }
 0x280   : > { %v621_v0 = vpop.xlane.xlu0 %620 }
 0x281   : > { %v627_v59 = vsub.f32 %v610_v37, %v621_v0 }
 0x283   : > { %v633_v61 = vmul.f32 1.442695, %v627_v59 }
 0x284   : > { %v624_v58 = vpop.xlane.xlu0 %623 }
 0x285   : > { %v628_v60 = vsub.f32 %v611_v43, %v624_v58  ;;  %1145 = vpow2.f32 %v633_v61 }
 0x287   : > { %v1142_v54 = vpop.eup %1141  ;;  %v635_v62 = vmul.f32 1.442695, %v628_v60 }
 0x288   : > { %v637_v55 = vsel %vm612_vm2, %v1142_v54, 0.0 }
 0x289   : > { %638 = vadd.xlane.f32.xlu1 %v637_v55  ;;  %v1144_v56 = vpop.eup %1143  ;;  %1147 = vpow2.f32 %v635_v62 }
 0x28a   : > { %v640_v57 = vsel %vm612_vm2, %v1144_v56, 0.0 }
 0x28b   : > { %641 = vadd.xlane.f32.xlu0 %v640_v57 }
 0x28f   : > { %v1309_v63 = vpop.eup %1145 }
 0x290   : > { %v643_v6 = vsel %vm612_vm2, %v1309_v63, 0.0 }
 0x293   : > { %v1311_v4 = vpop.eup %1147 }
 0x29a   : > { %351 = vrot.lane.b32.xlu1 %v1248_v3, %s1189_s24 }
 0x29e   : > { %353 = vrot.lane.b32.xlu1 %v1242_v2, %s1189_s24  ;;  %v646_v2 = vsel %vm612_vm2, %v1311_v4, 0.0 }
 0x2a1   : > { %349 = vrot.lane.b32.xlu0 %v1239_v1, %s1189_s24  ;;  %v348_v1 = vpop.permute.xlu1 %347 }
 0x2c0   : > { %644 = vadd.xlane.f32.xlu0 %v643_v6 }
 0x2c2   : > { %647 = vadd.xlane.f32.xlu1 %v646_v2 }
 0x316   : > { %v639_v3 = vpop.xlane.xlu1 %638 }
 0x317   : > { %1149 = vrcp.f32 %v639_v3  ;;  %v1190_v3 = vmov 1983009808  }
 0x318   : > { %v642_v7 = vpop.xlane.xlu0 %641 }
 0x319   : > { %1151 = vrcp.f32 %v642_v7  ;;  %v849_v7 = vunpack.c.l.s4 %v1190_v3 }
 0x31a   : > { %v352_v8 = vpop.permute.xlu1 %351 }
 0x31b   : > { %v359_v9 = vcombine.low %v348_v1, %v352_v8  ;;  %v850_v8 = vunpack.c.0.s8 %v849_v7 }
 0x31c   : > { %v350_v12 = vpop.permute.xlu0 %349 }
 0x31d   : > { %v366_v10 = vrot.slane %v359_v9, %v1261_v13 }
 0x31e   : > { %v354_v14 = vpop.permute.xlu1 %353 }
 0x31f   : > { %v368_v15 = vcombine.low %v350_v12, %v354_v14  ;;  %v367_v16 = vcombine.high %v366_v10, %v1188_v22  ;;  %v381_v20 = vshrl.u32 %v366_v10, 16 }
 0x321   : > { %v375_v17 = vrot.slane %v368_v15, %v1261_v13  ;;  %v389_v21 = vshrl.u32 %v367_v16, 16  ;;  %v1150_v29 = vpop.eup %1149 }
 0x322   : > { %v650_v35 = vmul.f32 %v1150_v29, %v1142_v54 }
 0x323   : > { %v376_v18 = vcombine.high %v375_v17, %v1188_v22  ;;  %v382_v19 = vshrl.u32 %v375_v17, 16  ;;  %v379_v23 = vpack.i.b16 %v375_v17, %v366_v10  ;;  %v1152_v32 = vpop.eup %1151 }
 0x324   : > { %v652_v40 = vmul.f32 %v1152_v32, %v1144_v56  ;;  %v657_v47 = vpack.c.bf16 %v650_v35, %v650_v35 }
 0x325   : > { %v387_v24 = vpack.i.b16 %v376_v18, %v367_v16  ;;  %v390_v25 = vshrl.u32 %v376_v18, 16  ;;  %v383_v26 = vpack.i.b16 %v382_v19, %v381_v20 }
 0x326   : > { %v658_v49 = vpack.c.bf16 %v652_v40, %v652_v40 }
 0x327   : > { %v391_v27 = vpack.i.b16 %v390_v25, %v389_v21  ;;  %v393_v28 = vcombine.low %v379_v23, %v387_v24 }
 0x329   : > { %v402_v30 = vcombine.low %v383_v26, %v391_v27  ;;  %v400_v31 = vrot.slane %v393_v28, %v1261_v13 }
 0x32b   : > { %v409_v33 = vrot.slane %v402_v30, %v1261_v13  ;;  %v401_v34 = vcombine.high %v400_v31, %v1188_v22  ;;  %v414_v37 = vshrl.u32 %v400_v31, 16 }
 0x32d   : > { %v413_v36 = vpack.i.b16 %v409_v33, %v400_v31  ;;  %v415_v38 = vshrl.u32 %v409_v33, 16  ;;  %v410_v39 = vcombine.high %v409_v33, %v1188_v22  ;;  %v420_v41 = vshrl.u32 %v401_v34, 16 }
 0x32f   : > { %v667_v42 = vsel %vm665_vm3, %v413_v36, 0  ;;  %v416_v43 = vpack.i.b16 %v415_v38, %v414_v37  ;;  %v419_v44 = vpack.i.b16 %v410_v39, %v401_v34  ;;  %v421_v45 = vshrl.u32 %v410_v39, 16 }
 0x330   : > { %1081 = vmatpush3.bf16.msra.mxu0 %v667_v42 }
 0x331   : > { %v713_v46 = vsel %vm665_vm3, %v416_v43, 0  ;;  %1092 = vmatprep.subr.bf16.mxu0 %v1185_v5  ;;  %v422_v48 = vpack.i.b16 %v421_v45, %v420_v41  ;;  %v759_v22 = vsel %vm665_vm3, %v419_v44, 0 }
 0x332   : > { %1087 = vmatpush3.bf16.msra.mxu1 %v713_v46 }
 0x333   : > { %1083 = vmatmul.mubr.msk.bf16.vlgmr.msra.gmra.mrb[8].mxu0 %vm661_vm4, %v657_v47  ;;  %1098 = vmatprep.subr.bf16.mxu1 %v1185_v5  ;;  %v805_v50 = vsel %vm665_vm3, %v422_v48, 0 }
 0x334   : > { %1093 = vmatpush3.bf16.msra.mxu0 %v759_v22  ;;  %1094 = vmatprep.mubr.msk.bf16.mxu0 %vm1186_vm0, %v1185_v5 }
 0x335   : > { %1089 = vmatmul.mubr.msk.bf16.vlgmr.msra.gmra.mrb[8].mxu1 %vm661_vm4, %v658_v49 }
 0x336   : > { %1099 = vmatpush3.bf16.msra.mxu1 %v805_v50  ;;  %1100 = vmatprep.mubr.msk.bf16.mxu1 %vm1186_vm0, %v1185_v5 }
 0x34d   : > { %v645_v51 = vpop.xlane.xlu0 %644 }
 0x34e   : > { %1153 = vrcp.f32 %v645_v51 }
 0x34f   : > { %v648_v52 = vpop.xlane.xlu1 %647 }
 0x350   : > { %1155 = vrcp.f32 %v648_v52 }
 0x358   : > { %v1154_v53 = vpop.eup %1153 }
 0x359   : > { %v654_v55 = vmul.f32 %v1154_v53, %v1309_v63 }
 0x35a   : > { %v1156_v54 = vpop.eup %1155 }
 0x35b   : > { %v656_v56 = vmul.f32 %v1156_v54, %v1311_v4  ;;  %v659_v57 = vpack.c.bf16 %v654_v55, %v654_v55  ;;  %v853_v4 = vsub.s32 %v850_v8, %v1258_v11 }
 0x35d   : > { %v660_v0 = vpack.c.bf16 %v656_v56, %v656_v56  ;;  %1095 = vmatmul.mubr.msk.bf16.vlgmr.msra.gmra.mrb[12].mxu0 %vm661_vm4, %v659_v57 }
 0x35f   : > { %1101 = vmatmul.mubr.msk.bf16.vlgmr.msra.gmra.mrb[12].mxu1 %vm661_vm4, %v660_v0 }
 0x406   : > { %v703_v58 = vpop.f32.mrb[8].mxu0 }
 0x407   : > { %v1084_v59 = vpop.f32.mrb[9].mxu0 }
 0x408   : > { %v706_v60 = vpop.f32.mrb[10].mxu0  ;;  %v749_v61 = vpop.f32.mrb[8].mxu1 }
 0x409   : > { %v1085_v62 = vpop.f32.mrb[11].mxu0  ;;  %v1090_v6 = vpop.f32.mrb[9].mxu1 }
 0x40a   : > { %v752_v2 = vpop.f32.mrb[10].mxu1 }
 0x40b   : > { %v1091_v1 = vpop.f32.mrb[11].mxu1 }
 0x430   : > { %v795_v63 = vpop.f32.mrb[12].mxu0 }
 0x431   : > { %v847_v9 = vcombine.low %v703_v58, %v795_v63  ;;  %v1096_v10 = vpop.f32.mrb[13].mxu0 }
 0x432   : > { %v841_v12 = vpop.f32.mrb[12].mxu1  ;;  %v798_v14 = vpop.f32.mrb[14].mxu0 }
 0x433   : > { %v855_v15 = vcombine.low %v749_v61, %v841_v12  ;;  %v1102_v16 = vpop.f32.mrb[13].mxu1  ;;  %v1097_v17 = vpop.f32.mrb[15].mxu0  ;;  %v854_v19 = vrot.slane %v847_v9, %v853_v4 }
 0x434   : > { %v844_v18 = vpop.f32.mrb[14].mxu1 }
 0x435   : > { %v862_v20 = vrot.slane %v855_v15, %v853_v4  ;;  %v1103_v21 = vpop.f32.mrb[15].mxu1 }
 0x437   : > { %v863_v23 = vcombine.low %v854_v19, %v862_v20  ;;  %v864_v24 = vcombine.high %v854_v19, %v862_v20 }
 0x439   : > { %v871_v25 = vrot.slane %v863_v23, %v1261_v13  ;;  %v878_v26 = vrot.slane %v864_v24, %v1261_v13 }
 0x43b   : > { %v881_v27 = vcombine.low %v871_v25, %v878_v26  ;;  %v1037_v28 = vcombine.high %v871_v25, %v878_v26 }
 0x43d   : > { %v888_v11 = vrot.slane %v881_v27, %v853_v4  ;;  %v896_v29 = vrot.slane %v1037_v28, %v853_v4 }
 0x43f   : > { %v898_v30 = vcombine.high %v888_v11, %v896_v29  ;;  %v897_v31 = vcombine.low %v888_v11, %v896_v29 }
 0x441   : > { %v912_v32 = vrot.slane %v898_v30, %v1261_v13  ;;  %v905_v33 = vrot.slane %v897_v31, %v1261_v13 }
 0x443   : > { %920 = vrot.lane.b32.xlu1 %v912_v32, %s1191_s25  ;;  %v913_v34 = vcombine.high %v905_v33, %v1185_v5  ;;  %v914_v35 = vcombine.high %v912_v32, %v1185_v5 }
 0x445   : > { %916 = vrot.lane.b32.xlu0 %v913_v34, %s1192_s26 }
 0x449   : > { %924 = vrot.lane.b32.xlu0 %v914_v35, %s1193_s27 }
 0x4b5   : > { %v921_v38 = vpop.permute.xlu1 %920 }
 0x4b7   : > { %v917_v36 = vpop.permute.xlu0 %916 }
 0x4b8   : > { %v927_v37 = vsel %vm423_vm1, %v905_v33, %v917_v36 }
 0x4b9   : > { %v929_v39 = vsel %vm928_vm5, %v927_v37, %v921_v38 }
 0x4bb   : > { %v925_v40 = vpop.permute.xlu0 %924 }
 0x4bc   : > { %v931_v13 = vsel %vm930_vm6, %v929_v39, %v925_v40 }
 0x4bd   : > { %v932_v41 = vpack.c.bf16 %v931_v13, %v931_v13 }
 0x4bf   : > { %934 = vst.msk [vmem:[%s186_s30] sm:$0x3] %vm933_vm7, %v932_v41 }
 0x4c0 PF: > { %s12_s11 = sadd.s32 1, %s1179_s11   ;;  %s1365_s9 = smov %s1175_s10 }
 0x4c1   : > { %p9_p5 = scmp.ge.s32.totalorder %s12_s11, 4   ;;  %s1366_s10 = smov %s1368_s12 }
 0x4c3   :  { %11 = sbr.rel (!%p9_p5) target bundleno = 2 (0x2), region = 61 }

// kernel: _lambda_.45
= control target key start
LH: loop header
LB: loop body
LE: loop exit
PB: predicated region body
PF: predicated region fallthrough
CT: control target
= control target key end

     0   :  { %vm33_vm0 = vcmask 261120   ;;  %v343_v11 = vmov 0.0   ;;  %vm344_vm1 = vmmov 0   ;;  %vm65_vm2 = vcmask 257024   ;;  %s440_s0 = inlined_call_operand.vmem [shape: bf16[8,32], index: 0, kind: input, shape index: {}]   ;;  %s441_s6 = inlined_call_operand.vmem [shape: f32[1,32], index: 6, kind: input, shape index: {}]   ;;  %s442_s3 = inlined_call_operand.vmem [shape: bf16[32,128], index: 3, kind: input, shape index: {}]   ;;  %s443_s1 = inlined_call_operand.vmem [shape: f32[1,32], index: 1, kind: input, shape index: {}]   ;;  %s444_s2 = inlined_call_operand.vmem [shape: f32[1,32], index: 2, kind: input, shape index: {}]   ;;  %s445_s5 = inlined_call_operand.vmem [shape: bf16[128,32], index: 5, kind: input, shape index: {}]   ;;  %s446_s4 = inlined_call_operand.vmem [shape: f32[1,128], index: 4, kind: input, shape index: {}]   ;;  %s447_s7 = inlined_call_operand.vmem [shape: bf16[8,32], index: 7, kind: output, shape index: {}]  }
   0x1   :  { %v31_v0 = vld [vmem:[%s440_s0] sm:$0xf]  ;;  %299 = vmatprep.subr.bf16.mxu0 %v343_v11  ;;  %307 = vmatprep.subr.bf16.mxu1 %v343_v11  ;;  %v330_v12 = vld [vmem:[%s442_s3 + $0x8] sm:$0xff]   ;;  %v333_v26 = vld [vmem:[%s445_s5 + $0x10] sm:$0xff]  }
   0x2   :  { %v274_v1 = vld [vmem:[%s441_s6] ss:$0 sm:$0xff]  ;;  %v32_v2 = vunpack.c.l.bf16 %v31_v0  ;;  %303 = vmatprep.mubr.msk.bf16.mxu0 %vm344_vm1, %v343_v11  ;;  %323 = vmatprep.mubr.msk.bf16.mxu1 %vm344_vm1, %v343_v11  ;;  %v332_v25 = vld [vmem:[%s445_s5 + $0x8] sm:$0xff]   ;;  %v334_v27 = vld [vmem:[%s445_s5 + $0x18] sm:$0xff]  }
   0x3   :  { %v329_v10 = vld [vmem:[%s442_s3] sm:$0xff]   ;;  %v336_v29 = vld [vmem:[%s445_s5 + $0x28] sm:$0xff]   ;;  %v337_v30 = vld [vmem:[%s445_s5 + $0x30] sm:$0xff]  }
   0x4   :  { %v34_v3 = vsel %vm33_vm0, %v32_v2, 0.0  ;;  %v74_v4 = vadd.f32 %v274_v1, %v32_v2  ;;  %300 = vmatpush3.bf16.msra.mxu0 %v329_v10  ;;  %v272_v17 = vld [vmem:[%s443_s1] ss:$0 sm:$0xff]  ;;  %v338_v31 = vld [vmem:[%s445_s5 + $0x38] sm:$0xff]  }
   0x5   :  { %35 = vadd.xlane.f32.xlu0 %v34_v3  ;;  %301 = vmatprep.subr.bf16.mxu0 %v343_v11  ;;  %v273_v19 = vld [vmem:[%s444_s2] ss:$0 sm:$0xff] }
   0x6   :  { %75 = vst.msk [vmem:[#allocation2] sm:$0xff] %vm33_vm0, %v74_v4  ;;  %v331_v24 = vld [vmem:[%s445_s5] sm:$0xff]  }
   0x7   :  { %308 = vmatpush3.bf16.msra.mxu1 %v331_v24  ;;  %v335_v28 = vld [vmem:[%s445_s5 + $0x20] sm:$0xff]  }
   0x8   :  { %302 = vmatpush3.bf16.msra.mxu0 %v330_v12  ;;  %309 = vmatprep.subr.bf16.mxu1 %v343_v11  ;;  %v275_v32 = vld [vmem:[%s446_s4] ss:$0 sm:$0xff] }
   0xb   :  { %310 = vmatpush3.bf16.msra.mxu1 %v332_v25 }
   0xc   :  { %311 = vmatprep.subr.bf16.mxu1 %v343_v11 }
   0xd   :  { %v153_v48 = vld [vmem:[#allocation2] sm:$0xff] }
   0xf   :  { %312 = vmatpush3.bf16.msra.mxu1 %v333_v26 }
  0x10   :  { %313 = vmatprep.subr.bf16.mxu1 %v343_v11 }
  0x13   :  { %314 = vmatpush3.bf16.msra.mxu1 %v334_v27 }
  0x14   :  { %315 = vmatprep.subr.bf16.mxu1 %v343_v11 }
  0x17   :  { %316 = vmatpush3.bf16.msra.mxu1 %v335_v28 }
  0x18   :  { %317 = vmatprep.subr.bf16.mxu1 %v343_v11 }
  0x1b   :  { %318 = vmatpush3.bf16.msra.mxu1 %v336_v29 }
  0x1c   :  { %319 = vmatprep.subr.bf16.mxu1 %v343_v11 }
  0x1f   :  { %320 = vmatpush3.bf16.msra.mxu1 %v337_v30 }
  0x20   :  { %321 = vmatprep.subr.bf16.mxu1 %v343_v11 }
  0x23   :  { %322 = vmatpush3.bf16.msra.mxu1 %v338_v31 }
  0x92   :  { %v36_v5 = vpop.xlane.xlu0 %35 }
  0x93   :  { %v38_v6 = vmul.f32 0.03125, %v36_v5 }
  0x95   :  { %v39_v7 = vsub.f32 %v32_v2, %v38_v6 }
  0x97   :  { %v40_v8 = vmul.f32 %v39_v7, %v39_v7 }
  0x99   :  { %v41_v9 = vsel %vm33_vm0, %v40_v8, 0.0 }
  0x9a   :  { %42 = vadd.xlane.f32.xlu0 %v41_v9 }
 0x127   :  { %v43_v13 = vpop.xlane.xlu0 %42 }
 0x128   :  { %v44_v14 = vmul.f32 0.03125, %v43_v13 }
 0x12a   :  { %v45_v15 = vadd.f32 1e-05, %v44_v14 }
 0x12c   :  { %339 = vrsqrt.f32 %v45_v15 }
 0x136   :  { %v340_v16 = vpop.eup %339 }
 0x137   :  { %v47_v18 = vmul.f32 %v340_v16, %v39_v7 }
 0x139   :  { %v55_v20 = vmul.f32 %v272_v17, %v47_v18 }
 0x13b   :  { %v63_v21 = vadd.f32 %v273_v19, %v55_v20 }
 0x13d   :  { %v64_v22 = vpack.c.bf16 %v63_v21, %v63_v21 }
 0x13f   :  { %66 = vst.msk [vmem:[#allocation3] sm:$0xf] %vm65_vm2, %v64_v22 }
 0x146   :  { %v76_v23 = vld [vmem:[#allocation3] sm:$0xf] }
 0x147   :  { %304 = vmatmul.mubr.msk.bf16.vlgmr.msra.gmra.mrb[0].mxu0 %vm33_vm0, %v76_v23 }
 0x21a   :  { %v138_v33 = vpop.f32.mrb[0].mxu0 }
 0x21b   :  { %v139_v34 = vadd.f32 %v275_v32, %v138_v33  ;;  %v305_v35 = vpop.f32.mrb[1].mxu0 }
 0x21c   :  { %v141_v36 = vpop.f32.mrb[2].mxu0 }
 0x21d   :  { %v144_v37 = vmul.f32 %v139_v34, %v139_v34  ;;  %v306_v38 = vpop.f32.mrb[3].mxu0 }
 0x21f   :  { %v145_v39 = vmul.f32 %v144_v37, %v139_v34 }
 0x221   :  { %v146_v40 = vmul.f32 0.044715, %v145_v39 }
 0x223   :  { %v147_v41 = vadd.f32 %v146_v40, %v139_v34 }
 0x225   :  { %v148_v42 = vmul.f32 0.7978846, %v147_v41 }
 0x227   :  { %341 = vtanh.f32 %v148_v42 }
 0x231   :  { %v342_v43 = vpop.eup %341 }
 0x232   :  { %v150_v44 = vadd.f32 1.0, %v342_v43 }
 0x234   :  { %v151_v45 = vmul.f32 0.5, %v150_v44 }
 0x236   :  { %v152_v46 = vmul.f32 %v151_v45, %v139_v34 }
 0x238   :  { %v154_v47 = vpack.c.bf16 %v152_v46, %v152_v46 }
 0x23a   :  { %324 = vmatmul.mubr.bf16.vlgmr.msra.gmra.mrb[0].mxu1 %v154_v47 }
 0x30d   :  { %v253_v49 = vpop.f32.mrb[0].mxu1 }
 0x30e   :  { %v259_v50 = vadd.f32 %v253_v49, %v153_v48  ;;  %v325_v51 = vpop.f32.mrb[1].mxu1 }
 0x30f   :  { %v256_v52 = vpop.f32.mrb[2].mxu1 }
 0x310   :  { %260 = vst.msk [vmem:[#allocation2] sm:$0xff] %vm33_vm0, %v259_v50  ;;  %v326_v53 = vpop.f32.mrb[3].mxu1 }
 0x317   :  { %v264_v54 = vld [vmem:[#allocation2] sm:$0xff] }
 0x318   :  { %v265_v55 = vpack.c.bf16 %v264_v54, %v264_v54 }
 0x31a   :  { %267 = vst.msk [vmem:[%s447_s7] sm:$0xf] %vm65_vm2, %v265_v55 }

// kernel: _lambda_.50
= control target key start
LH: loop header
LB: loop body
LE: loop exit
PB: predicated region body
PF: predicated region fallthrough
CT: control target
= control target key end

     0   :  { %vm16_vm0 = vcmask 261120   ;;  %vm48_vm1 = vcmask 257024   ;;  %s90_s0 = inlined_call_operand.vmem [shape: bf16[8,32], index: 0, kind: input, shape index: {}]   ;;  %s91_s1 = inlined_call_operand.vmem [shape: f32[1,32], index: 1, kind: input, shape index: {}]   ;;  %s92_s2 = inlined_call_operand.vmem [shape: f32[1,32], index: 2, kind: input, shape index: {}]   ;;  %s93_s3 = inlined_call_operand.vmem [shape: bf16[8,32], index: 3, kind: output, shape index: {}]  }
   0x1   :  { %v14_v0 = vld [vmem:[%s90_s0] sm:$0xf] }
   0x2   :  { %v15_v1 = vunpack.c.l.bf16 %v14_v0  ;;  %v54_v12 = vld [vmem:[%s91_s1] ss:$0 sm:$0xff] }
   0x3   :  { %v55_v14 = vld [vmem:[%s92_s2] ss:$0 sm:$0xff] }
   0x4   :  { %v17_v2 = vsel %vm16_vm0, %v15_v1, 0.0 }
   0x5   :  { %18 = vadd.xlane.f32.xlu0 %v17_v2 }
  0x92   :  { %v19_v3 = vpop.xlane.xlu0 %18 }
  0x93   :  { %v21_v4 = vmul.f32 0.03125, %v19_v3 }
  0x95   :  { %v22_v5 = vsub.f32 %v15_v1, %v21_v4 }
  0x97   :  { %v23_v6 = vmul.f32 %v22_v5, %v22_v5 }
  0x99   :  { %v24_v7 = vsel %vm16_vm0, %v23_v6, 0.0 }
  0x9a   :  { %25 = vadd.xlane.f32.xlu0 %v24_v7 }
 0x127   :  { %v26_v8 = vpop.xlane.xlu0 %25 }
 0x128   :  { %v27_v9 = vmul.f32 0.03125, %v26_v8 }
 0x12a   :  { %v28_v10 = vadd.f32 1e-05, %v27_v9 }
 0x12c   :  { %56 = vrsqrt.f32 %v28_v10 }
 0x136   :  { %v57_v11 = vpop.eup %56 }
 0x137   :  { %v30_v13 = vmul.f32 %v57_v11, %v22_v5 }
 0x139   :  { %v38_v15 = vmul.f32 %v54_v12, %v30_v13 }
 0x13b   :  { %v46_v16 = vadd.f32 %v55_v14, %v38_v15 }
 0x13d   :  { %v47_v17 = vpack.c.bf16 %v46_v16, %v46_v16 }
 0x13f   :  { %49 = vst.msk [vmem:[%s93_s3] sm:$0xf] %vm48_vm1, %v47_v17 }

// kernel: _lambda_.51
= control target key start
LH: loop header
LB: loop body
LE: loop exit
PB: predicated region body
PF: predicated region fallthrough
CT: control target
= control target key end

     0   :  { %vm19_vm0 = vcmask 261120   ;;  %v123_v0 = vmov 0.0   ;;  %vm124_vm1 = vmmov 0   ;;  %vm98_vm2 = vcmask 257024   ;;  %s163_s1 = inlined_call_operand.vmem [shape: bf16[32,32], index: 1, kind: input, shape index: {}]   ;;  %s164_s0 = inlined_call_operand.vmem [shape: bf16[8,32], index: 0, kind: input, shape index: {}]   ;;  %s165_s2 = inlined_call_operand.vmem [shape: f32[1,32], index: 2, kind: input, shape index: {}]   ;;  %s166_s3 = inlined_call_operand.vmem [shape: bf16[8,32], index: 3, kind: output, shape index: {}]  }
   0x1   :  { %111 = vmatprep.subr.bf16.mxu0 %v123_v0  ;;  %v121_v1 = vld [vmem:[%s163_s1] sm:$0xff]   ;;  %115 = vmatprep.mubr.msk.bf16.mxu0 %vm124_vm1, %v123_v0  ;;  %20 = vst.msk [vmem:[#allocation2] sm:$0xff] %vm19_vm0, %v123_v0  ;;  %v122_v2 = vld [vmem:[%s163_s1 + $0x8] sm:$0xff]  }
   0x2   :  { %112 = vmatpush3.bf16.msra.mxu0 %v121_v1  ;;  %v21_v3 = vld [vmem:[%s164_s0] sm:$0xf] }
   0x3   :  { %113 = vmatprep.subr.bf16.mxu0 %v123_v0  ;;  %v107_v10 = vld [vmem:[%s165_s2] ss:$0 sm:$0xff] }
   0x6   :  { %114 = vmatpush3.bf16.msra.mxu0 %v122_v2 }
   0x8   :  { %v26_v4 = vld [vmem:[#allocation2] sm:$0xff] }
   0x9   :  { %116 = vmatmul.mubr.msk.bf16.vlgmr.msra.gmra.mrb[0].mxu0 %vm19_vm0, %v21_v3 }
  0xdc   :  { %v77_v5 = vpop.f32.mrb[0].mxu0 }
  0xdd   :  { %v83_v6 = vadd.f32 %v77_v5, %v26_v4  ;;  %v117_v7 = vpop.f32.mrb[1].mxu0 }
  0xde   :  { %v80_v8 = vpop.f32.mrb[2].mxu0 }
  0xdf   :  { %84 = vst.msk [vmem:[#allocation2] sm:$0xff] %vm19_vm0, %v83_v6  ;;  %v118_v9 = vpop.f32.mrb[3].mxu0 }
  0xe6   :  { %v88_v11 = vld [vmem:[#allocation2] sm:$0xff] }
  0xe7   :  { %v96_v12 = vadd.f32 %v107_v10, %v88_v11 }
  0xe9   :  { %v97_v13 = vpack.c.bf16 %v96_v12, %v96_v12 }
  0xeb   :  { %99 = vst.msk [vmem:[%s166_s3] sm:$0xf] %vm98_vm2, %v97_v13 }

// kernel: _lambda_.52
= control target key start
LH: loop header
LB: loop body
LE: loop exit
PB: predicated region body
PF: predicated region fallthrough
CT: control target
= control target key end

     0   :  { %vm33_vm0 = vcmask 261120   ;;  %vm210_vm1 = vcmask 781312   ;;  %s340_s0 = inlined_call_operand.vmem [shape: bf16[32,32], index: 0, kind: input, shape index: {}]   ;;  %s341_s3 = inlined_call_operand.vmem [shape: bf16[32,96], index: 3, kind: input, shape index: {}]   ;;  %s342_s1 = inlined_call_operand.vmem [shape: f32[1,32], index: 1, kind: input, shape index: {}]   ;;  %s343_s2 = inlined_call_operand.vmem [shape: f32[1,32], index: 2, kind: input, shape index: {}]   ;;  %s344_s4 = inlined_call_operand.vmem [shape: f32[1,96], index: 4, kind: input, shape index: {}]   ;;  %s345_s5 = inlined_call_operand.vmem [shape: bf16[32,96], index: 5, kind: output, shape index: {}]  }
   0x1   :  { %v235_v0 = vld [vmem:[%s340_s0] sm:$0xff]   ;;  %v242_v1 = vld [vmem:[%s340_s0 + $0x8] sm:$0xff]  }
   0x2   :  { %v236_v2 = vunpack.c.l.bf16 %v235_v0  ;;  %v240_v3 = vunpack.c.l.bf16 %v242_v1  ;;  %v237_v4 = vunpack.c.h.bf16 %v235_v0  ;;  %v241_v5 = vunpack.c.h.bf16 %v242_v1  ;;  %v255_v30 = vld [vmem:[%s341_s3] sm:$0xff]   ;;  %v256_v31 = vld [vmem:[%s341_s3 + $0x8] sm:$0xff]  }
   0x3   :  { %247 = vmatprep.subr.bf16.mxu0 %v255_v30  ;;  %v219_v46 = vld [vmem:[%s342_s1] ss:$0 sm:$0xff] }
   0x4   :  { %v34_v6 = vsel %vm33_vm0, %v236_v2, 0.0  ;;  %v40_v7 = vsel %vm33_vm0, %v240_v3, 0.0  ;;  %v37_v8 = vsel %vm33_vm0, %v237_v4, 0.0  ;;  %v43_v9 = vsel %vm33_vm0, %v241_v5, 0.0  ;;  %248 = vmatpush3.bf16.msra.mxu0 %v255_v30  ;;  %v220_v51 = vld [vmem:[%s343_s2] ss:$0 sm:$0xff] }
   0x5   :  { %35 = vadd.xlane.f32.xlu0 %v34_v6  ;;  %41 = vadd.xlane.f32.xlu1 %v40_v7 }
   0x6   :  { %249 = vmatprep.subr.bf16.mxu0 %v256_v31 }
   0x8   :  { %250 = vmatpush3.bf16.msra.mxu0 %v256_v31 }
   0x9   :  { %38 = vadd.xlane.f32.xlu0 %v37_v8  ;;  %44 = vadd.xlane.f32.xlu1 %v43_v9 }
  0x92   :  { %v36_v10 = vpop.xlane.xlu0 %35  ;;  %v42_v11 = vpop.xlane.xlu1 %41 }
  0x93   :  { %v47_v12 = vmul.f32 0.03125, %v36_v10  ;;  %v49_v13 = vmul.f32 0.03125, %v42_v11 }
  0x95   :  { %v51_v14 = vsub.f32 %v236_v2, %v47_v12  ;;  %v53_v15 = vsub.f32 %v240_v3, %v49_v13  ;;  %v221_v2 = vld [vmem:[%s344_s4] ss:$0 sm:$0xff] }
  0x96   :  { %v39_v16 = vpop.xlane.xlu0 %38  ;;  %v45_v17 = vpop.xlane.xlu1 %44 }
  0x97   :  { %v48_v18 = vmul.f32 0.03125, %v39_v16  ;;  %v50_v19 = vmul.f32 0.03125, %v45_v17  ;;  %v55_v20 = vmul.f32 %v51_v14, %v51_v14  ;;  %v57_v21 = vmul.f32 %v53_v15, %v53_v15 }
  0x99   :  { %v52_v22 = vsub.f32 %v237_v4, %v48_v18  ;;  %v54_v23 = vsub.f32 %v241_v5, %v50_v19  ;;  %v59_v24 = vsel %vm33_vm0, %v55_v20, 0.0  ;;  %v65_v25 = vsel %vm33_vm0, %v57_v21, 0.0 }
  0x9a   :  { %60 = vadd.xlane.f32.xlu0 %v59_v24 }
  0x9b   :  { %v56_v26 = vmul.f32 %v52_v22, %v52_v22  ;;  %v58_v27 = vmul.f32 %v54_v23, %v54_v23 }
  0x9d   :  { %v62_v28 = vsel %vm33_vm0, %v56_v26, 0.0  ;;  %v68_v29 = vsel %vm33_vm0, %v58_v27, 0.0 }
  0x9e   :  { %66 = vadd.xlane.f32.xlu0 %v65_v25  ;;  %63 = vadd.xlane.f32.xlu1 %v62_v28 }
  0xa2   :  { %69 = vadd.xlane.f32.xlu1 %v68_v29 }
 0x127   :  { %v61_v32 = vpop.xlane.xlu0 %60 }
 0x128   :  { %v71_v33 = vmul.f32 0.03125, %v61_v32 }
 0x12a   :  { %v75_v34 = vadd.f32 1e-05, %v71_v33 }
 0x12b   :  { %v64_v35 = vpop.xlane.xlu1 %63  ;;  %v67_v36 = vpop.xlane.xlu0 %66 }
 0x12c   :  { %257 = vrsqrt.f32 %v75_v34  ;;  %v72_v37 = vmul.f32 0.03125, %v64_v35  ;;  %v73_v38 = vmul.f32 0.03125, %v67_v36 }
 0x12e   :  { %v76_v39 = vadd.f32 1e-05, %v72_v37  ;;  %v77_v40 = vadd.f32 1e-05, %v73_v38 }
 0x12f   :  { %v70_v41 = vpop.xlane.xlu1 %69 }
 0x130   :  { %259 = vrsqrt.f32 %v76_v39  ;;  %v74_v42 = vmul.f32 0.03125, %v70_v41 }
 0x131   :  { %261 = vrsqrt.f32 %v77_v40 }
 0x132   :  { %v78_v43 = vadd.f32 1e-05, %v74_v42 }
 0x134   :  { %263 = vrsqrt.f32 %v78_v43 }
 0x136   :  { %v258_v44 = vpop.eup %257 }
 0x137   :  { %v83_v45 = vmul.f32 %v258_v44, %v51_v14 }
 0x139   :  { %v94_v49 = vmul.f32 %v219_v46, %v83_v45 }
 0x13a   :  { %v260_v47 = vpop.eup %259 }
 0x13b   :  { %v262_v48 = vpop.eup %261  ;;  %v84_v50 = vmul.f32 %v260_v47, %v52_v22  ;;  %v105_v55 = vadd.f32 %v220_v51, %v94_v49 }
 0x13c   :  { %v85_v52 = vmul.f32 %v262_v48, %v53_v15 }
 0x13d   :  { %v95_v53 = vmul.f32 %v219_v46, %v84_v50 }
 0x13e   :  { %v264_v54 = vpop.eup %263  ;;  %v96_v57 = vmul.f32 %v219_v46, %v85_v52 }
 0x13f   :  { %v106_v56 = vadd.f32 %v220_v51, %v95_v53  ;;  %v86_v58 = vmul.f32 %v264_v54, %v54_v23 }
 0x140   :  { %v107_v61 = vadd.f32 %v220_v51, %v96_v57 }
 0x141   :  { %v109_v59 = vpack.c.bf16 %v106_v56, %v105_v55  ;;  %v97_v60 = vmul.f32 %v219_v46, %v86_v58 }
 0x143   :  { %111 = vst.msk [vmem:[#allocation2] sm:$0xff] %vm33_vm0, %v109_v59  ;;  %v108_v62 = vadd.f32 %v220_v51, %v97_v60 }
 0x145   :  { %v110_v63 = vpack.c.bf16 %v108_v62, %v107_v61 }
 0x147   :  { %112 = vst.msk [vmem:[#allocation2 + $0x8] sm:$0xff] %vm33_vm0, %v110_v63 }
 0x14a   :  { %v113_v0 = vld [vmem:[#allocation2] sm:$0xff] }
 0x14b   :  { %251 = vmatprep.mubr.msk.bf16.mxu0 %vm33_vm0, %v113_v0 }
 0x14e   :  { %v114_v1 = vld [vmem:[#allocation2 + $0x8] sm:$0xff] }
 0x14f   :  { %252 = vmatmul.mubr.msk.bf16.vlgmr.msra.gmra.mrb[0].mxu0 %vm33_vm0, %v114_v1 }
 0x222   :  { %v253_v3 = vpop.f32.mrb[0].mxu0 }
 0x223   :  { %v188_v4 = vadd.f32 %v253_v3, %v221_v2  ;;  %v179_v5 = vpop.f32.mrb[1].mxu0 }
 0x224   :  { %v180_v6 = vadd.f32 %v221_v2, %v179_v5  ;;  %v254_v7 = vpop.f32.mrb[2].mxu0 }
 0x225   :  { %v232_v8 = vpack.c.bf16 %v188_v4, %v188_v4  ;;  %v191_v9 = vadd.f32 %v254_v7, %v221_v2  ;;  %v182_v10 = vpop.f32.mrb[3].mxu0 }
 0x226   :  { %v230_v11 = vpack.c.bf16 %v180_v6, %v180_v6  ;;  %v183_v12 = vadd.f32 %v221_v2, %v182_v10 }
 0x227   :  { %213 = vst.msk [vmem:[%s345_s5 + $0x8] sm:$0xf] %vm210_vm1, %v232_v8  ;;  %v233_v13 = vpack.c.bf16 %v191_v9, %v191_v9 }
 0x228   :  { %211 = vst.msk [vmem:[%s345_s5] sm:$0xf] %vm210_vm1, %v230_v11  ;;  %v231_v14 = vpack.c.bf16 %v183_v12, %v183_v12 }
 0x229   :  { %214 = vst.msk [vmem:[%s345_s5 + $0xc] sm:$0xf] %vm210_vm1, %v233_v13 }
 0x22a   :  { %212 = vst.msk [vmem:[%s345_s5 + $0x4] sm:$0xf] %vm210_vm1, %v231_v14 }

// kernel: _lambda_.54
= control target key start
LH: loop header
LB: loop body
LE: loop exit
PB: predicated region body
PF: predicated region fallthrough
CT: control target
= control target key end

     0   :  { %vm22_vm0 = vcmask 261120   ;;  %v221_v1 = vmov 0.0   ;;  %vm171_vm1 = vcmask 257024   ;;  %s290_s1 = inlined_call_operand.vmem [shape: bf16[32,32], index: 1, kind: input, shape index: {}]   ;;  %s291_s0 = inlined_call_operand.vmem [shape: bf16[32,32], index: 0, kind: input, shape index: {}]   ;;  %s292_s3 = inlined_call_operand.vmem [shape: bf16[32,32], index: 3, kind: input, shape index: {}]   ;;  %s293_s2 = inlined_call_operand.vmem [shape: f32[1,32], index: 2, kind: input, shape index: {}]   ;;  %s294_s4 = inlined_call_operand.vmem [shape: bf16[32,32], index: 4, kind: output, shape index: {}]  }
   0x1   :  { %v217_v0 = vld [vmem:[%s290_s1] sm:$0xff]   ;;  %25 = vst.msk [vmem:[#allocation2 + $0x10] sm:$0xff] %vm22_vm0, %v221_v1  ;;  %23 = vst.msk [vmem:[#allocation2] sm:$0xff] %vm22_vm0, %v221_v1  ;;  %v218_v2 = vld [vmem:[%s290_s1 + $0x8] sm:$0xff]  }
   0x2   :  { %24 = vst.msk [vmem:[#allocation2 + $0x8] sm:$0xff] %vm22_vm0, %v221_v1  ;;  %26 = vst.msk [vmem:[#allocation2 + $0x18] sm:$0xff] %vm22_vm0, %v221_v1  ;;  %208 = vmatprep.subr.bf16.mxu0 %v217_v0  ;;  %v219_v3 = vld [vmem:[%s291_s0] sm:$0xff]   ;;  %v220_v4 = vld [vmem:[%s291_s0 + $0x8] sm:$0xff]  }
   0x3   :  { %209 = vmatpush3.bf16.msra.mxu0 %v217_v0  ;;  %212 = vmatprep.mubr.msk.bf16.mxu0 %vm22_vm0, %v219_v3  ;;  %v203_v17 = vld [vmem:[%s292_s3 + $0x8] sm:$0xff]   ;;  %v196_v18 = vld [vmem:[%s292_s3] sm:$0xff]  }
   0x4   :  { %210 = vmatprep.subr.bf16.mxu0 %v218_v2  ;;  %v186_v19 = vld [vmem:[%s293_s2] ss:$0 sm:$0xff]  ;;  %v201_v20 = vunpack.c.l.bf16 %v203_v17  ;;  %v197_v22 = vunpack.c.l.bf16 %v196_v18  ;;  %v202_v25 = vunpack.c.h.bf16 %v203_v17  ;;  %v198_v28 = vunpack.c.h.bf16 %v196_v18 }
   0x7   :  { %211 = vmatpush3.bf16.msra.mxu0 %v218_v2 }
   0x8   :  { %v37_v5 = vld [vmem:[#allocation2 + $0x10] sm:$0xff]  ;;  %v35_v6 = vld [vmem:[#allocation2] sm:$0xff] }
   0x9   :  { %v38_v8 = vld [vmem:[#allocation2 + $0x18] sm:$0xff]  ;;  %v36_v11 = vld [vmem:[#allocation2 + $0x8] sm:$0xff] }
   0xa   :  { %213 = vmatmul.mubr.msk.bf16.vlgmr.msra.gmra.mrb[0].mxu0 %vm22_vm0, %v220_v4 }
  0xdd   :  { %v214_v7 = vpop.f32.mrb[0].mxu0 }
  0xde   :  { %v119_v9 = vadd.f32 %v214_v7, %v37_v5  ;;  %v102_v10 = vpop.f32.mrb[1].mxu0 }
  0xdf   :  { %v117_v12 = vadd.f32 %v102_v10, %v35_v6  ;;  %v215_v13 = vpop.f32.mrb[2].mxu0 }
  0xe0   :  { %123 = vst.msk [vmem:[#allocation2 + $0x10] sm:$0xff] %vm22_vm0, %v119_v9  ;;  %v120_v14 = vadd.f32 %v215_v13, %v38_v8  ;;  %v105_v15 = vpop.f32.mrb[3].mxu0 }
  0xe1   :  { %121 = vst.msk [vmem:[#allocation2] sm:$0xff] %vm22_vm0, %v117_v12  ;;  %v118_v16 = vadd.f32 %v105_v15, %v36_v11 }
  0xe2   :  { %124 = vst.msk [vmem:[#allocation2 + $0x18] sm:$0xff] %vm22_vm0, %v120_v14 }
  0xe3   :  { %122 = vst.msk [vmem:[#allocation2 + $0x8] sm:$0xff] %vm22_vm0, %v118_v16 }
  0xe7   :  { %v130_v21 = vld [vmem:[#allocation2 + $0x10] sm:$0xff] }
  0xe8   :  { %v141_v23 = vadd.f32 %v186_v19, %v130_v21  ;;  %v128_v24 = vld [vmem:[#allocation2] sm:$0xff] }
  0xe9   :  { %v139_v26 = vadd.f32 %v186_v19, %v128_v24  ;;  %v131_v27 = vld [vmem:[#allocation2 + $0x18] sm:$0xff] }
  0xea   :  { %v153_v29 = vadd.f32 %v201_v20, %v141_v23  ;;  %v142_v30 = vadd.f32 %v186_v19, %v131_v27  ;;  %v129_v31 = vld [vmem:[#allocation2 + $0x8] sm:$0xff] }
  0xeb   :  { %v151_v32 = vadd.f32 %v197_v22, %v139_v26  ;;  %v140_v33 = vadd.f32 %v186_v19, %v129_v31 }
  0xec   :  { %v193_v34 = vpack.c.bf16 %v153_v29, %v153_v29  ;;  %v154_v35 = vadd.f32 %v202_v25, %v142_v30 }
  0xed   :  { %v191_v36 = vpack.c.bf16 %v151_v32, %v151_v32  ;;  %v152_v37 = vadd.f32 %v198_v28, %v140_v33 }
  0xee   :  { %174 = vst.msk [vmem:[%s294_s4 + $0x8] sm:$0xf] %vm171_vm1, %v193_v34  ;;  %v194_v38 = vpack.c.bf16 %v154_v35, %v154_v35 }
  0xef   :  { %172 = vst.msk [vmem:[%s294_s4] sm:$0xf] %vm171_vm1, %v191_v36  ;;  %v192_v39 = vpack.c.bf16 %v152_v37, %v152_v37 }
  0xf0   :  { %175 = vst.msk [vmem:[%s294_s4 + $0xc] sm:$0xf] %vm171_vm1, %v194_v38 }
  0xf1   :  { %173 = vst.msk [vmem:[%s294_s4 + $0x4] sm:$0xf] %vm171_vm1, %v192_v39 }

// kernel: _lambda_.53
= control target key start
LH: loop header
LB: loop body
LE: loop exit
PB: predicated region body
PF: predicated region fallthrough
CT: control target
= control target key end

     0   :  { %s2295_s9 = smov 0   ;;  %s2297_s10 = smov 0   ;;  %s2647_s0 = inlined_call_operand.vmem [shape: bf16[2,16,96], index: 0, kind: input, shape index: {}, may-alias: {0,1}]   ;;  %s2648_s1 = inlined_call_operand.vmem [shape: bf16[2,16,96], index: 1, kind: input, shape index: {}, may-alias: {0,1}]   ;;  %s2649_s2 = inlined_call_operand.vmem [shape: bf16[2,16,32], index: 2, kind: output, shape index: {}]  }
   0x1   :  { %s2299_s11 = smov 0  }
   0x2 LB: > { %s24_s12 = sadd.s32 1, %s2261_s10  ;;  %p2043_p0 = scmp.ge.s32.totalorder %s2265_s11, 1  ;;  %s2265_s11 = sphi %s2299_s11, %s12_s11   ;;  %s2261_s10 = sphi %s2297_s10, %s2651_s10   ;;  %s2257_s9 = sphi %s2295_s9, %s2650_s9  }
   0x3   : > { %p26_p1 = scmp.ge.s32.totalorder %s24_s12, 2  ;;  %p143_p2 = scmp.lt.s32.totalorder %s2265_s11, 3 }
   0x5   : > { %s2653_s12 = smov (%p26_p1, %s24_s12), 0  ;;  %p144_p3 = pnand %p2043_p0, %p143_p2 }
   0x6   : > { %p179_p4 = scmp.lt.s32.totalorder (!%p144_p3), %s2257_s9, 1  ;;  %s2267_s17 = smov (!%p144_p3), 120   ;;  %v2271_v10 = vmov (!%p144_p3), 0.0   ;;  %vm2272_vm0 = vmmov (!%p144_p3), 0   ;;  %v2273_v15 = vmov (!%p144_p3), 1983009808   ;;  %v250_v17 = vlaneseq (!%p144_p3) }
   0x7   : > { %147 = sbr.rel (%p144_p3) target bundleno = 1248 (0x4e0), region = 28  ;;  %s2268_s18 = smov (!%p144_p3), 112   ;;  %2111 = vmatprep.subr.bf16.mxu0 (!%p144_p3), %v2271_v10  ;;  %2117 = vmatprep.subr.bf16.mxu1 (!%p144_p3), %v2271_v10  ;;  %v248_v16 = vunpack.c.l.s4 (!%p144_p3), %v2273_v15  ;;  %v2274_v19 = vmov (!%p144_p3), 1934713408   ;;  %vm1126_vm1 = vcmask (!%p144_p3), 64512   ;;  %vm1341_vm2 = vcmask (!%p144_p3), 130048  }
   0x8   : > { %s2269_s19 = smov (!%p144_p3), 104   ;;  %s2270_s23 = smov (!%p144_p3), 96   ;;  %2113 = vmatprep.mubr.msk.bf16.mxu0 (!%p144_p3), %vm2272_vm0, %v2271_v10  ;;  %2119 = vmatprep.mubr.msk.bf16.mxu1 (!%p144_p3), %vm2272_vm0, %v2271_v10  ;;  %v265_v20 = vunpack.c.l.s4 (!%p144_p3), %v2274_v19  ;;  %v251_v22 = vshrl.u32 (!%p144_p3), %v250_v17, 7  ;;  %vm1926_vm3 = vcmask (!%p144_p3), 195584   ;;  %vm1937_vm4 = vcmask (!%p144_p3), 257024  }
   0x9   : > { %v249_v21 = vunpack.c.0.s8 (!%p144_p3), %v248_v16  ;;  %s2276_s24 = smov (!%p144_p3), 64   ;;  %s2277_s25 = smov (!%p144_p3), 16  }
   0xa   : > { %v266_v31 = vunpack.c.0.s8 (!%p144_p3), %v265_v20  ;;  %s2278_s26 = smov (!%p144_p3), 8   ;;  %s2279_s27 = smov (!%p144_p3), 24  }
   0xb   : > { %v2371_v32 = vsub.s32 (!%p144_p3), %v249_v21, %v251_v22 }
   0xc   : > { %v2375_v46 = vsub.s32 (!%p144_p3), %v266_v31, %v251_v22 }
   0xe   : > { %s2655_s9 = smov (!%p179_p4, %s2257_s9), 1 }
   0xf   : > { %s2313_s13 = sshll.u32 %s2655_s9, 3 }
  0x10   : > { %s192_s16 = scalar_lea.vmem %s2648_s1, %s2313_s13  ;;  %s186_s22 = scalar_lea.vmem %s2647_s0, %s2313_s13 }
  0x11   : > { %v2319_v0 = vld [vmem:[%s192_s16] sm:$0xf]  ;;  %v2323_v1 = vld [vmem:[%s192_s16 + $0x4] sm:$0xf]  ;;  %s201_s30 = scalar_lea.vmem %s2649_s2, %s2313_s13 }
  0x12   : > { %508 = vrot.lane.b32.xlu0 %v2319_v0, %s2267_s17  ;;  %512 = vrot.lane.b32.xlu1 %v2319_v0, %s2268_s18  ;;  %v2335_v2 = vld [vmem:[%s186_s22] sm:$0xf]  ;;  %v2337_v3 = vld [vmem:[%s186_s22 + $0x4] sm:$0xf] }
  0x13   : > { %v225_v26 = vshrl.u32 %v2335_v2, 16  ;;  %v237_v27 = vshrl.u32 %v2337_v3, 16 }
  0x16   : > { %510 = vrot.lane.b32.xlu0 %v2323_v1, %s2267_s17  ;;  %514 = vrot.lane.b32.xlu1 %v2323_v1, %s2268_s18 }
  0x1a   : > { %516 = vrot.lane.b32.xlu0 %v2319_v0, %s2269_s19  ;;  %518 = vrot.lane.b32.xlu1 %v2323_v1, %s2269_s19 }
  0x1e   : > { %520 = vrot.lane.b32.xlu0 %v2319_v0, %s2270_s23  ;;  %522 = vrot.lane.b32.xlu1 %v2323_v1, %s2270_s23 }
  0x22   : > { %210 = vrot.lane.b32.xlu0 %v2335_v2, %s2267_s17  ;;  %212 = vrot.lane.b32.xlu1 %v2337_v3, %s2267_s17 }
  0x84   : > { %v2341_v4 = vpop.permute.xlu0 %508  ;;  %v2343_v5 = vpop.permute.xlu1 %512 }
  0x85   : > { %524 = vrot.lane.b32.xlu0 %v2341_v4, %s2270_s23 }
  0x88   : > { %v2346_v6 = vpop.permute.xlu0 %510  ;;  %v2348_v7 = vpop.permute.xlu1 %514 }
  0x89   : > { %526 = vrot.lane.b32.xlu1 %v2346_v6, %s2270_s23  ;;  %528 = vrot.lane.b32.xlu0 %v2343_v5, %s2270_s23 }
  0x8c   : > { %v2352_v8 = vpop.permute.xlu0 %516  ;;  %v2356_v9 = vpop.permute.xlu1 %518 }
  0x8d   : > { %530 = vrot.lane.b32.xlu1 %v2348_v7, %s2270_s23  ;;  %532 = vrot.lane.b32.xlu0 %v2352_v8, %s2270_s23 }
  0x90   : > { %v521_v11 = vpop.permute.xlu0 %520  ;;  %v523_v12 = vpop.permute.xlu1 %522 }
  0x91   : > { %534 = vrot.lane.b32.xlu1 %v2356_v9, %s2270_s23  ;;  %214 = vrot.lane.b32.xlu0 %v2335_v2, %s2268_s18  ;;  %v539_v28 = vshrl.u32 %v521_v11, 16  ;;  %v551_v43 = vshrl.u32 %v523_v12, 16 }
  0x94   : > { %v211_v13 = vpop.permute.xlu0 %210  ;;  %v213_v14 = vpop.permute.xlu1 %212 }
  0x95   : > { %216 = vrot.lane.b32.xlu1 %v2337_v3, %s2268_s18  ;;  %218 = vrot.lane.b32.xlu0 %v2335_v2, %s2269_s19  ;;  %v226_v29 = vshrl.u32 %v211_v13, 16  ;;  %v238_v30 = vshrl.u32 %v213_v14, 16  ;;  %v224_v33 = vpack.i.b16 %v211_v13, %v2335_v2  ;;  %v236_v35 = vpack.i.b16 %v213_v14, %v2337_v3 }
  0x97   : > { %v227_v44 = vpack.i.b16 %v226_v29, %v225_v26  ;;  %v239_v45 = vpack.i.b16 %v238_v30, %v237_v27  ;;  %v2378_v47 = vrot.slane %v224_v33, %v2371_v32  ;;  %v2383_v51 = vrot.slane %v236_v35, %v2371_v32 }
  0x99   : > { %220 = vrot.lane.b32.xlu1 %v2337_v3, %s2269_s19  ;;  %v2388_v61 = vrot.slane %v227_v44, %v2371_v32  ;;  %v2391_v62 = vrot.slane %v239_v45, %v2371_v32 }
  0xf7   : > { %v525_v18 = vpop.permute.xlu0 %524 }
  0xf8   : > { %v540_v23 = vshrl.u32 %v525_v18, 16  ;;  %v538_v34 = vpack.i.b16 %v525_v18, %v521_v11 }
  0xfa   : > { %v541_v36 = vpack.i.b16 %v540_v23, %v539_v28  ;;  %v567_v48 = vrot.slane %v538_v34, %v2371_v32 }
  0xfb   : > { %v527_v24 = vpop.permute.xlu1 %526  ;;  %v529_v25 = vpop.permute.xlu0 %528 }
  0xfc   : > { %v552_v37 = vshrl.u32 %v527_v24, 16  ;;  %v545_v40 = vshrl.u32 %v529_v25, 16  ;;  %v601_v52 = vrot.slane %v541_v36, %v2371_v32  ;;  %v550_v53 = vpack.i.b16 %v527_v24, %v523_v12 }
  0xfe   : > { %v553_v54 = vpack.i.b16 %v552_v37, %v551_v43  ;;  %v635_v14 = vrot.slane %v550_v53, %v2371_v32 }
  0xff   : > { %v531_v38 = vpop.permute.xlu1 %530  ;;  %v533_v39 = vpop.permute.xlu0 %532 }
 0x100   : > { %v544_v41 = vpack.i.b16 %v533_v39, %v529_v25  ;;  %v546_v42 = vshrl.u32 %v533_v39, 16  ;;  %v557_v63 = vshrl.u32 %v531_v38, 16  ;;  %v669_v15 = vrot.slane %v553_v54, %v2371_v32 }
 0x102   : > { %v547_v49 = vpack.i.b16 %v546_v42, %v545_v40  ;;  %v575_v50 = vrot.slane %v544_v41, %v2371_v32 }
 0x103   : > { %v535_v55 = vpop.permute.xlu1 %534  ;;  %v215_v56 = vpop.permute.xlu0 %214 }
 0x104   : > { %v576_v57 = vcombine.low %v567_v48, %v575_v50  ;;  %v577_v58 = vcombine.high %v567_v48, %v575_v50  ;;  %v609_v59 = vrot.slane %v547_v49, %v2371_v32  ;;  %v556_v60 = vpack.i.b16 %v535_v55, %v531_v38 }
 0x105   : > { %v558_v2 = vshrl.u32 %v535_v55, 16  ;;  %v231_v26 = vshrl.u32 %v215_v56, 16 }
 0x106   : > { %v584_v3 = vrot.slane %v576_v57, %v2375_v46  ;;  %v591_v11 = vrot.slane %v577_v58, %v2375_v46  ;;  %v610_v12 = vcombine.low %v601_v52, %v609_v59  ;;  %v611_v13 = vcombine.high %v601_v52, %v609_v59 }
 0x107   : > { %v559_v16 = vpack.i.b16 %v558_v2, %v557_v63  ;;  %v643_v17 = vrot.slane %v556_v60, %v2371_v32  ;;  %v217_v18 = vpop.permute.xlu1 %216  ;;  %v219_v27 = vpop.permute.xlu0 %218 }
 0x108   : > { %v2399_v19 = vrot.slane %v610_v12, %v2375_v46  ;;  %v2402_v20 = vrot.slane %v611_v13, %v2375_v46  ;;  %v696_v21 = vcombine.low %v584_v3, %v591_v11  ;;  %v2054_v22 = vcombine.high %v584_v3, %v591_v11 }
 0x109   : > { %v644_v23 = vcombine.low %v635_v14, %v643_v17  ;;  %v645_v24 = vcombine.high %v635_v14, %v643_v17  ;;  %v677_v25 = vrot.slane %v559_v16, %v2371_v32  ;;  %v243_v31 = vshrl.u32 %v217_v18, 16 }
 0x10a   : > { %v703_v28 = vrot.slane %v696_v21, %v2371_v32  ;;  %v711_v29 = vrot.slane %v2054_v22, %v2371_v32  ;;  %v721_v30 = vcombine.low %v2399_v19, %v2402_v20  ;;  %v230_v38 = vpack.i.b16 %v219_v27, %v215_v56 }
 0x10b   : > { %v652_v33 = vrot.slane %v644_v23, %v2375_v46  ;;  %v659_v34 = vrot.slane %v645_v24, %v2375_v46  ;;  %v678_v35 = vcombine.low %v669_v15, %v677_v25  ;;  %v679_v36 = vcombine.high %v669_v15, %v677_v25  ;;  %v221_v37 = vpop.permute.xlu1 %220 }
 0x10c   : > { %v232_v39 = vshrl.u32 %v219_v27, 16  ;;  %v242_v40 = vpack.i.b16 %v221_v37, %v217_v18  ;;  %v244_v41 = vshrl.u32 %v221_v37, 16  ;;  %v261_v49 = vrot.slane %v230_v38, %v2371_v32 }
 0x10d   : > { %v686_v42 = vrot.slane %v678_v35, %v2375_v46  ;;  %v693_v43 = vrot.slane %v679_v36, %v2375_v46  ;;  %v746_v44 = vcombine.low %v652_v33, %v659_v34  ;;  %v2056_v45 = vcombine.high %v652_v33, %v659_v34 }
 0x10e   : > { %v233_v48 = vpack.i.b16 %v232_v39, %v231_v26  ;;  %v245_v50 = vpack.i.b16 %v244_v41, %v243_v31  ;;  %v329_v52 = vrot.slane %v242_v40, %v2371_v32  ;;  %v2055_v53 = vcombine.high %v2399_v19, %v2402_v20 }
 0x10f   : > { %v753_v54 = vrot.slane %v746_v44, %v2371_v32  ;;  %v761_v55 = vrot.slane %v2056_v45, %v2371_v32  ;;  %v771_v56 = vcombine.low %v686_v42, %v693_v43  ;;  %v262_v57 = vcombine.low %v2378_v47, %v261_v49 }
 0x110   : > { %v263_v58 = vcombine.high %v2378_v47, %v261_v49  ;;  %v295_v59 = vrot.slane %v233_v48, %v2371_v32  ;;  %v330_v60 = vcombine.low %v2383_v51, %v329_v52  ;;  %v2057_v63 = vcombine.high %v686_v42, %v693_v43 }
 0x111   : > { %v331_v2 = vcombine.high %v2383_v51, %v329_v52  ;;  %v363_v3 = vrot.slane %v245_v50, %v2371_v32  ;;  %v712_v11 = vcombine.low %v703_v28, %v711_v29  ;;  %v270_v12 = vrot.slane %v262_v57, %v2375_v46 }
 0x112   : > { %v277_v13 = vrot.slane %v263_v58, %v2375_v46  ;;  %v296_v14 = vcombine.low %v2388_v61, %v295_v59  ;;  %v297_v15 = vcombine.high %v2388_v61, %v295_v59  ;;  %v338_v47 = vrot.slane %v330_v60, %v2375_v46 }
 0x113   : > { %v345_v16 = vrot.slane %v331_v2, %v2375_v46  ;;  %v364_v17 = vcombine.low %v2391_v62, %v363_v3  ;;  %v365_v18 = vcombine.high %v2391_v62, %v363_v3  ;;  %v728_v28 = vrot.slane %v721_v30, %v2371_v32 }
 0x114   : > { %v304_v51 = vrot.slane %v296_v14, %v2375_v46  ;;  %v311_v19 = vrot.slane %v297_v15, %v2375_v46  ;;  %v382_v20 = vcombine.low %v270_v12, %v277_v13  ;;  %v2050_v21 = vcombine.high %v270_v12, %v277_v13 }
 0x115   : > { %v372_v22 = vrot.slane %v364_v17, %v2375_v46  ;;  %v379_v23 = vrot.slane %v365_v18, %v2375_v46  ;;  %v432_v24 = vcombine.low %v338_v47, %v345_v16  ;;  %v2052_v61 = vcombine.high %v338_v47, %v345_v16 }
 0x116   : > { %v389_v25 = vrot.slane %v382_v20, %v2371_v32  ;;  %v407_v26 = vcombine.low %v304_v51, %v311_v19  ;;  %v2051_v27 = vcombine.high %v304_v51, %v311_v19  ;;  %v397_v34 = vrot.slane %v2050_v21, %v2371_v32 }
 0x117   : > { %v439_v62 = vrot.slane %v432_v24, %v2371_v32  ;;  %v447_v29 = vrot.slane %v2052_v61, %v2371_v32  ;;  %v457_v31 = vcombine.low %v372_v22, %v379_v23  ;;  %v2053_v33 = vcombine.high %v372_v22, %v379_v23 }
 0x118   : > { %v414_v35 = vrot.slane %v407_v26, %v2371_v32  ;;  %v422_v36 = vrot.slane %v2051_v27, %v2371_v32  ;;  %v719_v37 = vrot.slane %v712_v11, %v2375_v46  ;;  %v736_v30 = vrot.slane %v2055_v53, %v2371_v32 }
 0x119   : > { %v448_v38 = vcombine.low %v439_v62, %v447_v29  ;;  %v464_v39 = vrot.slane %v457_v31, %v2371_v32  ;;  %v472_v40 = vrot.slane %v2053_v33, %v2371_v32  ;;  %v762_v42 = vcombine.low %v753_v54, %v761_v55 }
 0x11a   : > { %v423_v41 = vcombine.low %v414_v35, %v422_v36  ;;  %v778_v43 = vrot.slane %v771_v56, %v2371_v32  ;;  %v786_v44 = vrot.slane %v2057_v63, %v2371_v32  ;;  %v737_v48 = vcombine.low %v728_v28, %v736_v30 }
 0x11b   : > { %v473_v45 = vcombine.low %v464_v39, %v472_v40  ;;  %v769_v49 = vrot.slane %v762_v42, %v2375_v46  ;;  %v398_v52 = vcombine.low %v389_v25, %v397_v34  ;;  %v799_v60 = vshrl.u32 %v719_v37, 16 }
 0x11c   : > { %v787_v50 = vcombine.low %v778_v43, %v786_v44  ;;  %v744_v57 = vrot.slane %v737_v48, %v2375_v46  ;;  %v430_v53 = vrot.slane %v423_v41, %v2375_v46  ;;  %v455_v54 = vrot.slane %v448_v38, %v2375_v46 }
 0x11d   : > { %v480_v58 = vrot.slane %v473_v45, %v2375_v46  ;;  %v811_v56 = vshrl.u32 %v769_v49, 16  ;;  %v2275_v63 = vmov 0   ;;  %v405_v15 = vrot.slane %v398_v52, %v2375_v46 }
 0x11e   : > { %v794_v59 = vrot.slane %v787_v50, %v2375_v46  ;;  %v800_v55 = vshrl.u32 %v744_v57, 16  ;;  %v745_v2 = vcombine.high %v744_v57, %v2275_v63  ;;  %v770_v3 = vcombine.high %v769_v49, %v2275_v63 }
 0x11f   : > { %v798_v11 = vpack.i.b16 %v744_v57, %v719_v37  ;;  %v496_v47 = vpack.i.b16 %v480_v58, %v455_v54  ;;  %v720_v16 = vcombine.high %v719_v37, %v2275_v63  ;;  %v486_v19 = vshrl.u32 %v430_v53, 16 }
 0x120   : > { %v810_v12 = vpack.i.b16 %v794_v59, %v769_v49  ;;  %v812_v13 = vshrl.u32 %v794_v59, 16  ;;  %v795_v14 = vcombine.high %v794_v59, %v2275_v63  ;;  %v801_v18 = vpack.i.b16 %v800_v55, %v799_v60 }
 0x121   : > { %v497_v21 = vshrl.u32 %v455_v54, 16  ;;  %v498_v22 = vshrl.u32 %v480_v58, 16  ;;  %v806_v23 = vshrl.u32 %v745_v2, 16  ;;  %v817_v25 = vshrl.u32 %v770_v3, 16 }
 0x122   : > { %v2063_v17 = vcombine.low %v798_v11, %v810_v12  ;;  %v813_v51 = vpack.i.b16 %v812_v13, %v811_v56  ;;  %v816_v20 = vpack.i.b16 %v795_v14, %v770_v3  ;;  %v818_v26 = vshrl.u32 %v795_v14, 16 }
 0x123   : > { %v484_v27 = vpack.i.b16 %v430_v53, %v405_v15  ;;  %v804_v28 = vpack.i.b16 %v745_v2, %v720_v16  ;;  %v485_v62 = vshrl.u32 %v405_v15, 16  ;;  %v499_v31 = vpack.i.b16 %v498_v22, %v497_v21 }
 0x124   : > { %v1131_v24 = vsel %vm1126_vm1, %v2063_v17, 0  ;;  %v2066_v61 = vcombine.low %v801_v18, %v813_v51  ;;  %v805_v33 = vshrl.u32 %v720_v16, 16  ;;  %v819_v34 = vpack.i.b16 %v818_v26, %v817_v25 }
 0x125   : > { %2112 = vmatpush3.bf16.xpose.msra.mxu0 %v1131_v24  ;;  %v2062_v35 = vcombine.low %v484_v27, %v496_v47  ;;  %v2069_v36 = vcombine.low %v804_v28, %v816_v20  ;;  %v487_v37 = vpack.i.b16 %v486_v19, %v485_v62  ;;  %v481_v39 = vcombine.high %v480_v58, %v2275_v63 }
 0x126   : > { %v1184_v29 = vsel %vm1126_vm1, %v2066_v61, 0  ;;  %2123 = vmatprep.subr.bf16.mxu0 %v2271_v10  ;;  %v807_v38 = vpack.i.b16 %v806_v23, %v805_v33  ;;  %v431_v41 = vcombine.high %v430_v53, %v2275_v63  ;;  %v456_v42 = vcombine.high %v455_v54, %v2275_v63 }
 0x127   : > { %2118 = vmatpush3.bf16.xpose.msra.mxu1 %v1184_v29  ;;  %v2065_v40 = vcombine.low %v487_v37, %v499_v31  ;;  %v1237_v43 = vsel %vm1126_vm1, %v2069_v36, 0  ;;  %v406_v44 = vcombine.high %v405_v15, %v2275_v63  ;;  %v504_v45 = vshrl.u32 %v481_v39, 16 }
 0x128   : > { %2129 = vmatprep.subr.bf16.mxu1 %v2271_v10  ;;  %v2072_v30 = vcombine.low %v807_v38, %v819_v34  ;;  %v502_v49 = vpack.i.b16 %v481_v39, %v456_v42  ;;  %v492_v50 = vshrl.u32 %v431_v41, 16  ;;  %v503_v52 = vshrl.u32 %v456_v42, 16 }
 0x129   : > { %v490_v57 = vpack.i.b16 %v431_v41, %v406_v44  ;;  %v491_v58 = vshrl.u32 %v406_v44, 16 }
 0x12a   : > { %v1290_v48 = vsel %vm1126_vm1, %v2072_v30, 0  ;;  %v505_v59 = vpack.i.b16 %v504_v45, %v503_v52 }
 0x12b   : > { %v2068_v60 = vcombine.low %v490_v57, %v502_v49  ;;  %v493_v53 = vpack.i.b16 %v492_v50, %v491_v58 }
 0x12c   : > { %2114 = vmatmul.mubr.msk.bf16.vlgmr.msra.gmra.mrb[0].mxu0 %vm1126_vm1, %v2062_v35 }
 0x12d   : > { %2124 = vmatpush3.bf16.xpose.msra.mxu0 %v1237_v43  ;;  %2125 = vmatprep.mubr.msk.bf16.mxu0 %vm2272_vm0, %v2271_v10  ;;  %v2071_v54 = vcombine.low %v493_v53, %v505_v59 }
 0x12e   : > { %2120 = vmatmul.mubr.msk.bf16.vlgmr.msra.gmra.mrb[0].mxu1 %vm1126_vm1, %v2065_v40  ;;  %2135 = vmatprep.subr.bf16.mxu0 %v2271_v10 }
 0x12f   : > { %2130 = vmatpush3.bf16.xpose.msra.mxu1 %v1290_v48  ;;  %2131 = vmatprep.mubr.msk.bf16.mxu1 %vm2272_vm0, %v2271_v10 }
 0x130   : > { %2141 = vmatprep.subr.bf16.mxu1 %v2271_v10 }
 0x134   : > { %2126 = vmatmul.mubr.msk.bf16.vlgmr.msra.gmra.mrb[4].mxu0 %vm1126_vm1, %v2068_v60 }
 0x135   : > { %2137 = vmatprep.mubr.msk.bf16.mxu0 %vm2272_vm0, %v2271_v10 }
 0x136   : > { %2132 = vmatmul.mubr.msk.bf16.vlgmr.msra.gmra.mrb[4].mxu1 %vm1126_vm1, %v2071_v54 }
 0x137   : > { %2143 = vmatprep.mubr.msk.bf16.mxu1 %vm2272_vm0, %v2271_v10 }
 0x1ff   : > { %v1167_v55 = vpop.f32.mrb[0].mxu0 }
 0x200   : > { %v1333_v56 = vmul.f32 0.35355338, %v1167_v55  ;;  %v2115_v2 = vpop.f32.mrb[1].mxu0 }
 0x201   : > { %v1170_v3 = vpop.f32.mrb[2].mxu0  ;;  %v1220_v11 = vpop.f32.mrb[0].mxu1 }
 0x202   : > { %v1334_v12 = vmul.f32 0.35355338, %v1170_v3  ;;  %v2116_v13 = vpop.f32.mrb[3].mxu0  ;;  %v2121_v14 = vpop.f32.mrb[1].mxu1  ;;  %v1335_v15 = vmul.f32 0.35355338, %v1220_v11 }
 0x203   : > { %v1223_v47 = vpop.f32.mrb[2].mxu1  ;;  %v1342_v16 = vsel %vm1341_vm2, %v1333_v56, -inf }
 0x204   : > { %1343 = vmax.xlane.f32.xlu0 %v1342_v16  ;;  %v2122_v17 = vpop.f32.mrb[3].mxu1  ;;  %v1345_v18 = vsel %vm1341_vm2, %v1334_v12, -inf  ;;  %v1336_v51 = vmul.f32 0.35355338, %v1223_v47  ;;  %v1348_v19 = vsel %vm1341_vm2, %v1335_v15, -inf }
 0x205   : > { %1346 = vmax.xlane.f32.xlu1 %v1345_v18 }
 0x206   : > { %v1351_v26 = vsel %vm1341_vm2, %v1336_v51, -inf }
 0x207   : > { %v1273_v20 = vpop.f32.mrb[4].mxu0 }
 0x208   : > { %1349 = vmax.xlane.f32.xlu0 %v1348_v19  ;;  %v1337_v21 = vmul.f32 0.35355338, %v1273_v20  ;;  %v2127_v22 = vpop.f32.mrb[5].mxu0 }
 0x209   : > { %v1276_v23 = vpop.f32.mrb[6].mxu0  ;;  %v1326_v24 = vpop.f32.mrb[4].mxu1 }
 0x20a   : > { %v2128_v61 = vpop.f32.mrb[7].mxu0  ;;  %v2133_v25 = vpop.f32.mrb[5].mxu1  ;;  %v2489_v27 = vmul.f32 0.35355338, %v1276_v23  ;;  %v1339_v28 = vmul.f32 0.35355338, %v1326_v24 }
 0x20b   : > { %v1329_v62 = vpop.f32.mrb[6].mxu1  ;;  %v1354_v29 = vsel %vm1341_vm2, %v1337_v21, -inf }
 0x20c   : > { %1352 = vmax.xlane.f32.xlu0 %v1351_v26  ;;  %1355 = vmax.xlane.f32.xlu1 %v1354_v29  ;;  %v2134_v31 = vpop.f32.mrb[7].mxu1  ;;  %v1340_v33 = vmul.f32 0.35355338, %v1329_v62  ;;  %v1360_v34 = vsel %vm1341_vm2, %v1339_v28, -inf  ;;  %v1357_v35 = vsel %vm1341_vm2, %v2489_v27, -inf }
 0x20e   : > { %v1363_v36 = vsel %vm1341_vm2, %v1340_v33, -inf }
 0x210   : > { %1361 = vmax.xlane.f32.xlu1 %v1360_v34  ;;  %1358 = vmax.xlane.f32.xlu0 %v1357_v35 }
 0x214   : > { %1364 = vmax.xlane.f32.xlu0 %v1363_v36 }
 0x221   : > { %820 = vrot.lane.b32.xlu1 %v2319_v0, %s2276_s24 }
 0x225   : > { %824 = vrot.lane.b32.xlu1 %v2341_v4, %s2276_s24 }
 0x229   : > { %826 = vrot.lane.b32.xlu1 %v2346_v6, %s2276_s24 }
 0x22a   : > { %822 = vrot.lane.b32.xlu0 %v2323_v1, %s2276_s24 }
 0x22d   : > { %830 = vrot.lane.b32.xlu1 %v2348_v7, %s2276_s24 }
 0x22e   : > { %828 = vrot.lane.b32.xlu0 %v2343_v5, %s2276_s24 }
 0x232   : > { %832 = vrot.lane.b32.xlu0 %v2352_v8, %s2276_s24 }
 0x291   : > { %v1344_v37 = vpop.xlane.xlu0 %1343 }
 0x292   : > { %v1366_v0 = vsub.f32 %v1333_v56, %v1344_v37  ;;  %v1347_v38 = vpop.xlane.xlu1 %1346 }
 0x293   : > { %v1367_v39 = vsub.f32 %v1334_v12, %v1347_v38 }
 0x294   : > { %v1374_v4 = vmul.f32 1.442695, %v1366_v0 }
 0x295   : > { %v1376_v40 = vmul.f32 1.442695, %v1367_v39  ;;  %v1350_v30 = vpop.xlane.xlu0 %1349 }
 0x296   : > { %2211 = vpow2.f32 %v1374_v4  ;;  %v1368_v6 = vsub.f32 %v1335_v15, %v1350_v30 }
 0x297   : > { %2213 = vpow2.f32 %v1376_v40 }
 0x298   : > { %v1378_v1 = vmul.f32 1.442695, %v1368_v6 }
 0x299   : > { %v1353_v41 = vpop.xlane.xlu0 %1352  ;;  %v1356_v42 = vpop.xlane.xlu1 %1355 }
 0x29a   : > { %2215 = vpow2.f32 %v1378_v1  ;;  %v1369_v7 = vsub.f32 %v1336_v51, %v1353_v41  ;;  %v1370_v43 = vsub.f32 %v1337_v21, %v1356_v42 }
 0x29c   : > { %v1380_v5 = vmul.f32 1.442695, %v1369_v7  ;;  %v1382_v44 = vmul.f32 1.442695, %v1370_v43 }
 0x29d   : > { %v1362_v45 = vpop.xlane.xlu1 %1361  ;;  %v1359_v8 = vpop.xlane.xlu0 %1358 }
 0x29e   : > { %2217 = vpow2.f32 %v1380_v5  ;;  %v1372_v48 = vsub.f32 %v1339_v28, %v1362_v45  ;;  %v1371_v47 = vsub.f32 %v2489_v27, %v1359_v8 }
 0x29f   : > { %2219 = vpow2.f32 %v1382_v44 }
 0x2a0   : > { %v2510_v49 = vpop.eup %2211  ;;  %v1386_v50 = vmul.f32 1.442695, %v1372_v48  ;;  %v1384_v16 = vmul.f32 1.442695, %v1371_v47 }
 0x2a1   : > { %v2512_v52 = vpop.eup %2213  ;;  %v1365_v57 = vpop.xlane.xlu0 %1364  ;;  %v1390_v58 = vsel %vm1341_vm2, %v2510_v49, 0.0 }
 0x2a2   : > { %v1373_v59 = vsub.f32 %v1340_v33, %v1365_v57  ;;  %1391 = vadd.xlane.f32.xlu1 %v1390_v58  ;;  %v1393_v60 = vsel %vm1341_vm2, %v2512_v52, 0.0  ;;  %2221 = vpow2.f32 %v1386_v50  ;;  %v821_v19 = vpop.permute.xlu1 %820 }
 0x2a3   : > { %1394 = vadd.xlane.f32.xlu0 %v1393_v60  ;;  %v839_v24 = vshrl.u32 %v821_v19, 16 }
 0x2a4   : > { %v2518_v53 = vpop.eup %2215  ;;  %v1388_v54 = vmul.f32 1.442695, %v1373_v59 }
 0x2a5   : > { %v1396_v55 = vsel %vm1341_vm2, %v2518_v53, 0.0  ;;  %v823_v51 = vpop.permute.xlu0 %822 }
 0x2a6   : > { %1397 = vadd.xlane.f32.xlu1 %v1396_v55  ;;  %2223 = vpow2.f32 %v1388_v54  ;;  %v825_v21 = vpop.permute.xlu1 %824  ;;  %v851_v4 = vshrl.u32 %v823_v51, 16 }
 0x2a7   : > { %2225 = vpow2.f32 %v1384_v16  ;;  %v840_v61 = vshrl.u32 %v825_v21, 16  ;;  %v838_v28 = vpack.i.b16 %v825_v21, %v821_v19 }
 0x2a8   : > { %v2522_v56 = vpop.eup %2217 }
 0x2a9   : > { %v1399_v2 = vsel %vm1341_vm2, %v2522_v56, 0.0  ;;  %v2526_v3 = vpop.eup %2219  ;;  %v829_v20 = vpop.permute.xlu0 %828  ;;  %v841_v62 = vpack.i.b16 %v840_v61, %v839_v24  ;;  %v867_v34 = vrot.slane %v838_v28, %v2371_v32 }
 0x2aa   : > { %1400 = vadd.xlane.f32.xlu0 %v1399_v2  ;;  %v1402_v11 = vsel %vm1341_vm2, %v2526_v3, 0.0  ;;  %v827_v25 = vpop.permute.xlu1 %826 }
 0x2ab   : > { %v901_v35 = vrot.slane %v841_v62, %v2371_v32  ;;  %v852_v40 = vshrl.u32 %v827_v25, 16  ;;  %v850_v43 = vpack.i.b16 %v827_v25, %v823_v51 }
 0x2ac   : > { %v2530_v12 = vpop.eup %2221 }
 0x2ad   : > { %v1408_v13 = vsel %vm1341_vm2, %v2530_v12, 0.0  ;;  %v833_v22 = vpop.permute.xlu0 %832  ;;  %v853_v5 = vpack.i.b16 %v852_v40, %v851_v4  ;;  %v935_v54 = vrot.slane %v850_v43, %v2371_v32 }
 0x2ae   : > { %1403 = vadd.xlane.f32.xlu0 %v1402_v11  ;;  %v846_v23 = vshrl.u32 %v833_v22, 16  ;;  %v844_v26 = vpack.i.b16 %v833_v22, %v829_v20  ;;  %v831_v29 = vpop.permute.xlu1 %830 }
 0x2af   : > { %v857_v58 = vshrl.u32 %v831_v29, 16  ;;  %v969_v55 = vrot.slane %v853_v5, %v2371_v32 }
 0x2b0   : > { %v2534_v14 = vpop.eup %2223  ;;  %v875_v31 = vrot.slane %v844_v26, %v2371_v32 }
 0x2b1   : > { %v1411_v15 = vsel %vm1341_vm2, %v2534_v14, 0.0  ;;  %v2541_v17 = vpop.eup %2225 }
 0x2b2   : > { %1409 = vadd.xlane.f32.xlu0 %v1408_v13  ;;  %v1405_v18 = vsel %vm1341_vm2, %v2541_v17, 0.0  ;;  %v876_v36 = vcombine.low %v867_v34, %v875_v31  ;;  %v877_v37 = vcombine.high %v867_v34, %v875_v31 }
 0x2b4   : > { %v884_v30 = vrot.slane %v876_v36, %v2375_v46  ;;  %v891_v6 = vrot.slane %v877_v37, %v2375_v46 }
 0x2b6   : > { %1412 = vadd.xlane.f32.xlu0 %v1411_v15  ;;  %v996_v44 = vcombine.low %v884_v30, %v891_v6  ;;  %v2058_v45 = vcombine.high %v884_v30, %v891_v6 }
 0x2b7   : > { %834 = vrot.lane.b32.xlu1 %v2356_v9, %s2276_s24  ;;  %v845_v9 = vshrl.u32 %v829_v20, 16 }
 0x2b8   : > { %v1003_v13 = vrot.slane %v996_v44, %v2371_v32  ;;  %v1011_v15 = vrot.slane %v2058_v45, %v2371_v32 }
 0x2b9   : > { %v847_v27 = vpack.i.b16 %v846_v23, %v845_v9 }
 0x2ba   : > { %v1012_v61 = vcombine.low %v1003_v13, %v1011_v15 }
 0x2bb   : > { %v909_v33 = vrot.slane %v847_v27, %v2371_v32 }
 0x2bd   : > { %v910_v0 = vcombine.low %v901_v35, %v909_v33  ;;  %v911_v38 = vcombine.high %v901_v35, %v909_v33 }
 0x2bf   : > { %v918_v1 = vrot.slane %v910_v0, %v2375_v46  ;;  %v925_v41 = vrot.slane %v911_v38, %v2375_v46  ;;  %v1019_v38 = vrot.slane %v1012_v61, %v2375_v46 }
 0x2c1   : > { %v1021_v8 = vcombine.low %v918_v1, %v925_v41  ;;  %v2059_v48 = vcombine.high %v918_v1, %v925_v41  ;;  %v1020_v44 = vcombine.high %v1019_v38, %v2275_v63 }
 0x2c3   : > { %v1028_v47 = vrot.slane %v1021_v8, %v2371_v32  ;;  %v1036_v16 = vrot.slane %v2059_v48, %v2371_v32 }
 0x2c5   : > { %v1037_v25 = vcombine.low %v1028_v47, %v1036_v16 }
 0x2c7   : > { %v1044_v35 = vrot.slane %v1037_v25, %v2375_v46 }
 0x2c9   : > { %v1100_v1 = vshrl.u32 %v1044_v35, 16  ;;  %v1098_v5 = vpack.i.b16 %v1044_v35, %v1019_v38 }
 0x2db   : > { %1406 = vadd.xlane.f32.xlu1 %v1405_v18 }
 0x32f   : > { %v1392_v39 = vpop.xlane.xlu1 %1391 }
 0x330   : > { %v1395_v42 = vpop.xlane.xlu0 %1394  ;;  %2227 = vrcp.f32 %v1392_v39 }
 0x331   : > { %2229 = vrcp.f32 %v1395_v42  ;;  %v1099_v42 = vshrl.u32 %v1019_v38, 16 }
 0x333   : > { %v1398_v7 = vpop.xlane.xlu1 %1397 }
 0x337   : > { %v835_v50 = vpop.permute.xlu1 %834  ;;  %v1401_v57 = vpop.xlane.xlu0 %1400 }
 0x338   : > { %v856_v59 = vpack.i.b16 %v835_v50, %v831_v29  ;;  %v858_v60 = vshrl.u32 %v835_v50, 16  ;;  %2231 = vrcp.f32 %v1401_v57 }
 0x339   : > { %2233 = vrcp.f32 %v1398_v7  ;;  %v1045_v7 = vcombine.high %v1044_v35, %v2275_v63 }
 0x33a   : > { %v859_v2 = vpack.i.b16 %v858_v60, %v857_v58  ;;  %v943_v11 = vrot.slane %v856_v59, %v2371_v32  ;;  %v2228_v4 = vpop.eup %2227  ;;  %v1101_v60 = vpack.i.b16 %v1100_v1, %v1099_v42 }
 0x33b   : > { %v2560_v18 = vpop.xlane.xlu0 %1403  ;;  %v2230_v6 = vpop.eup %2229  ;;  %v1415_v13 = vmul.f32 %v2228_v4, %v2510_v49 }
 0x33c   : > { %v944_v51 = vcombine.low %v935_v54, %v943_v11  ;;  %v945_v19 = vcombine.high %v935_v54, %v943_v11  ;;  %v977_v20 = vrot.slane %v859_v2, %v2371_v32  ;;  %v1417_v59 = vmul.f32 %v2230_v6, %v2512_v52 }
 0x33d   : > { %v1106_v11 = vshrl.u32 %v1045_v7, 16 }
 0x33e   : > { %v952_v21 = vrot.slane %v944_v51, %v2375_v46  ;;  %v959_v22 = vrot.slane %v945_v19, %v2375_v46  ;;  %v978_v23 = vcombine.low %v969_v55, %v977_v20  ;;  %v979_v24 = vcombine.high %v969_v55, %v977_v20 }
 0x33f   : > { %v1410_v9 = vpop.xlane.xlu0 %1409  ;;  %v1104_v19 = vpack.i.b16 %v1045_v7, %v1020_v44  ;;  %v1105_v20 = vshrl.u32 %v1020_v44, 16 }
 0x340   : > { %v986_v26 = vrot.slane %v978_v23, %v2375_v46  ;;  %v993_v27 = vrot.slane %v979_v24, %v2375_v46  ;;  %v1046_v28 = vcombine.low %v952_v21, %v959_v22  ;;  %v2060_v62 = vcombine.high %v952_v21, %v959_v22 }
 0x341   : > { %v1430_v21 = vpack.c.bf16 %v1417_v59, %v1415_v13  ;;  %v1107_v23 = vpack.i.b16 %v1106_v11, %v1105_v20 }
 0x342   : > { %v1053_v29 = vrot.slane %v1046_v28, %v2371_v32  ;;  %v1061_v31 = vrot.slane %v2060_v62, %v2371_v32  ;;  %v1071_v33 = vcombine.low %v986_v26, %v993_v27  ;;  %v2061_v34 = vcombine.high %v986_v26, %v993_v27  ;;  %v2232_v43 = vpop.eup %2231 }
 0x343   : > { %v1413_v39 = vpop.xlane.xlu0 %1412  ;;  %v2234_v58 = vpop.eup %2233  ;;  %v1421_v15 = vmul.f32 %v2232_v43, %v2522_v56 }
 0x344   : > { %v1062_v36 = vcombine.low %v1053_v29, %v1061_v31  ;;  %v1078_v37 = vrot.slane %v1071_v33, %v2371_v32  ;;  %v1086_v0 = vrot.slane %v2061_v34, %v2371_v32  ;;  %2235 = vrcp.f32 %v1413_v39 }
 0x345   : > { %2237 = vrcp.f32 %v1410_v9 }
 0x346   : > { %v1087_v40 = vcombine.low %v1078_v37, %v1086_v0  ;;  %v1069_v30 = vrot.slane %v1062_v36, %v2375_v46  ;;  %2239 = vrcp.f32 %v2560_v18 }
 0x348   : > { %v1094_v41 = vrot.slane %v1087_v40, %v2375_v46  ;;  %v1070_v45 = vcombine.high %v1069_v30, %v2275_v63  ;;  %v1111_v48 = vshrl.u32 %v1069_v30, 16 }
 0x34a   : > { %v1110_v8 = vpack.i.b16 %v1094_v41, %v1069_v30  ;;  %v1112_v50 = vshrl.u32 %v1094_v41, 16  ;;  %v1095_v57 = vcombine.high %v1094_v41, %v2275_v63  ;;  %v1117_v47 = vshrl.u32 %v1070_v45, 16 }
 0x34b   : > { %v1419_v63 = vmul.f32 %v2234_v58, %v2518_v53 }
 0x34c   : > { %v2074_v54 = vcombine.low %v1098_v5, %v1110_v8  ;;  %v1113_v55 = vpack.i.b16 %v1112_v50, %v1111_v48  ;;  %v1116_v2 = vpack.i.b16 %v1095_v57, %v1070_v45  ;;  %v1118_v16 = vshrl.u32 %v1095_v57, 16 }
 0x34d   : > { %v1431_v49 = vpack.c.bf16 %v1421_v15, %v1419_v63 }
 0x34e   : > { %2136 = vmatpush3.bf16.msra.mxu0 %v2074_v54  ;;  %v2076_v51 = vcombine.low %v1101_v60, %v1113_v55  ;;  %v1119_v52 = vpack.i.b16 %v1118_v16, %v1117_v47  ;;  %v2078_v22 = vcombine.low %v1104_v19, %v1116_v2  ;;  %v2236_v56 = vpop.eup %2235 }
 0x34f   : > { %2147 = vmatprep.subr.bf16.mxu0 %v2271_v10  ;;  %v2238_v61 = vpop.eup %2237  ;;  %v1429_v53 = vmul.f32 %v2236_v56, %v2534_v14 }
 0x350   : > { %2142 = vmatpush3.bf16.msra.mxu1 %v2076_v51  ;;  %v2080_v24 = vcombine.low %v1107_v23, %v1119_v52  ;;  %v1427_v25 = vmul.f32 %v2238_v61, %v2530_v12  ;;  %v2240_v27 = vpop.eup %2239 }
 0x351   : > { %2138 = vmatmul.mubr.msk.bf16.vlgmr.msra.gmra.mrb[8].mxu0 %vm1341_vm2, %v1430_v21  ;;  %2153 = vmatprep.subr.bf16.mxu1 %v2271_v10  ;;  %v1423_v62 = vmul.f32 %v2240_v27, %v2526_v3 }
 0x352   : > { %2148 = vmatpush3.bf16.msra.mxu0 %v2078_v22  ;;  %2149 = vmatprep.mubr.msk.bf16.mxu0 %vm2272_vm0, %v2271_v10  ;;  %v1433_v9 = vpack.c.bf16 %v1429_v53, %v1427_v25 }
 0x353   : > { %2144 = vmatmul.mubr.msk.bf16.vlgmr.msra.gmra.mrb[8].mxu1 %vm1341_vm2, %v1431_v49 }
 0x354   : > { %2154 = vmatpush3.bf16.msra.mxu1 %v2080_v24  ;;  %2155 = vmatprep.mubr.msk.bf16.mxu1 %vm2272_vm0, %v2271_v10 }
 0x35b   : > { %2156 = vmatmul.mubr.msk.bf16.vlgmr.msra.gmra.mrb[12].mxu1 %vm1341_vm2, %v1433_v9 }
 0x368   : > { %v1407_v26 = vpop.xlane.xlu1 %1406 }
 0x369   : > { %2241 = vrcp.f32 %v1407_v26 }
 0x373   : > { %v2242_v28 = vpop.eup %2241 }
 0x374   : > { %v1425_v29 = vmul.f32 %v2242_v28, %v2541_v17 }
 0x376   : > { %v1432_v31 = vpack.c.bf16 %v1425_v29, %v1423_v62 }
 0x378   : > { %2150 = vmatmul.mubr.msk.bf16.vlgmr.msra.gmra.mrb[12].mxu0 %vm1341_vm2, %v1432_v31 }
 0x424   : > { %v1475_v10 = vpop.f32.mrb[8].mxu0 }
 0x425   : > { %v2139_v14 = vpop.f32.mrb[9].mxu0 }
 0x426   : > { %v1478_v33 = vpop.f32.mrb[10].mxu0  ;;  %v1523_v12 = vpop.f32.mrb[8].mxu1 }
 0x427   : > { %v2140_v34 = vpop.f32.mrb[11].mxu0  ;;  %v2145_v35 = vpop.f32.mrb[9].mxu1 }
 0x428   : > { %v1526_v36 = vpop.f32.mrb[10].mxu1 }
 0x429   : > { %v2146_v37 = vpop.f32.mrb[11].mxu1 }
 0x42e   : > { %v1619_v18 = vpop.f32.mrb[12].mxu1 }
 0x42f   : > { %v1642_v0 = vcombine.low %v1523_v12, %v1619_v18  ;;  %v1643_v38 = vcombine.high %v1523_v12, %v1619_v18  ;;  %v2157_v39 = vpop.f32.mrb[13].mxu1 }
 0x430   : > { %v1622_v4 = vpop.f32.mrb[14].mxu1 }
 0x431   : > { %v1710_v40 = vcombine.low %v1526_v36, %v1622_v4  ;;  %v1711_v3 = vcombine.high %v1526_v36, %v1622_v4  ;;  %v2158_v30 = vpop.f32.mrb[15].mxu1  ;;  %v1650_v42 = vrot.slane %v1642_v0, %v2371_v32  ;;  %v1657_v7 = vrot.slane %v1643_v38, %v2371_v32 }
 0x433   : > { %v1718_v60 = vrot.slane %v1710_v40, %v2371_v32  ;;  %v1725_v54 = vrot.slane %v1711_v3, %v2371_v32 }
 0x44b   : > { %v1571_v17 = vpop.f32.mrb[12].mxu0 }
 0x44c   : > { %v1626_v6 = vcombine.low %v1475_v10, %v1571_v17  ;;  %v1627_v1 = vcombine.high %v1475_v10, %v1571_v17  ;;  %v2151_v41 = vpop.f32.mrb[13].mxu0 }
 0x44d   : > { %v1574_v43 = vpop.f32.mrb[14].mxu0 }
 0x44e   : > { %v1634_v5 = vrot.slane %v1626_v6, %v2371_v32  ;;  %v1641_v44 = vrot.slane %v1627_v1, %v2371_v32  ;;  %v1694_v45 = vcombine.low %v1478_v33, %v1574_v43  ;;  %v1695_v8 = vcombine.high %v1478_v33, %v1574_v43  ;;  %v2152_v48 = vpop.f32.mrb[15].mxu0 }
 0x450   : > { %v1658_v50 = vcombine.low %v1634_v5, %v1650_v42  ;;  %v1659_v57 = vcombine.high %v1634_v5, %v1650_v42  ;;  %v1674_v58 = vcombine.low %v1641_v44, %v1657_v7  ;;  %v1675_v59 = vcombine.high %v1641_v44, %v1657_v7 }
 0x451   : > { %v1702_v55 = vrot.slane %v1694_v45, %v2371_v32  ;;  %v1709_v2 = vrot.slane %v1695_v8, %v2371_v32 }
 0x452   : > { %v1666_v11 = vrot.slane %v1658_v50, %v2375_v46  ;;  %v1673_v13 = vrot.slane %v1659_v57, %v2375_v46  ;;  %v1682_v15 = vrot.slane %v1674_v58, %v2375_v46  ;;  %v1689_v47 = vrot.slane %v1675_v59, %v2375_v46 }
 0x453   : > { %v1726_v16 = vcombine.low %v1702_v55, %v1718_v60  ;;  %v1727_v51 = vcombine.high %v1702_v55, %v1718_v60  ;;  %v1742_v19 = vcombine.low %v1709_v2, %v1725_v54  ;;  %v1743_v20 = vcombine.high %v1709_v2, %v1725_v54 }
 0x454   : > { %v1762_v63 = vcombine.low %v1666_v11, %v1673_v13  ;;  %v2082_v21 = vcombine.high %v1666_v11, %v1673_v13  ;;  %v1778_v52 = vcombine.low %v1682_v15, %v1689_v47  ;;  %v2083_v22 = vcombine.high %v1682_v15, %v1689_v47 }
 0x455   : > { %v1734_v23 = vrot.slane %v1726_v16, %v2375_v46  ;;  %v1741_v49 = vrot.slane %v1727_v51, %v2375_v46  ;;  %v1750_v56 = vrot.slane %v1742_v19, %v2375_v46  ;;  %v1757_v24 = vrot.slane %v1743_v20, %v2375_v46 }
 0x456   : > { %v1769_v61 = vrot.slane %v1762_v63, %v2371_v32  ;;  %v1777_v53 = vrot.slane %v2082_v21, %v2371_v32  ;;  %v1785_v25 = vrot.slane %v1778_v52, %v2371_v32  ;;  %v1793_v9 = vrot.slane %v2083_v22, %v2371_v32 }
 0x457   : > { %v1830_v26 = vcombine.low %v1734_v23, %v1741_v49  ;;  %v2084_v27 = vcombine.high %v1734_v23, %v1741_v49  ;;  %v1846_v28 = vcombine.low %v1750_v56, %v1757_v24  ;;  %v2085_v62 = vcombine.high %v1750_v56, %v1757_v24 }
 0x458   : > { %v1795_v29 = vcombine.high %v1769_v61, %v1777_v53  ;;  %v1811_v31 = vcombine.high %v1785_v25, %v1793_v9  ;;  %v1794_v10 = vcombine.low %v1769_v61, %v1777_v53  ;;  %v1810_v14 = vcombine.low %v1785_v25, %v1793_v9 }
 0x459   : > { %v1837_v33 = vrot.slane %v1830_v26, %v2371_v32  ;;  %v1845_v12 = vrot.slane %v2084_v27, %v2371_v32  ;;  %v1853_v34 = vrot.slane %v1846_v28, %v2371_v32  ;;  %v1861_v35 = vrot.slane %v2085_v62, %v2371_v32 }
 0x45a   : > { %v1809_v36 = vrot.slane %v1795_v29, %v2375_v46  ;;  %v1825_v37 = vrot.slane %v1811_v31, %v2375_v46  ;;  %v1802_v18 = vrot.slane %v1794_v10, %v2375_v46  ;;  %v1818_v0 = vrot.slane %v1810_v14, %v2375_v46 }
 0x45b   : > { %v1863_v38 = vcombine.high %v1837_v33, %v1845_v12  ;;  %v1879_v39 = vcombine.high %v1853_v34, %v1861_v35  ;;  %v1862_v4 = vcombine.low %v1837_v33, %v1845_v12  ;;  %v1878_v40 = vcombine.low %v1853_v34, %v1861_v35 }
 0x45c   : > { %v1828_v3 = vcombine.low %v1809_v36, %v1825_v37  ;;  %v1826_v30 = vcombine.low %v1802_v18, %v1818_v0  ;;  %v1827_v17 = vcombine.high %v1802_v18, %v1818_v0  ;;  %v1829_v6 = vcombine.high %v1809_v36, %v1825_v37 }
 0x45d   : > { %v1877_v1 = vrot.slane %v1863_v38, %v2375_v46  ;;  %v1893_v32 = vrot.slane %v1879_v39, %v2375_v46  ;;  %v1870_v41 = vrot.slane %v1862_v4, %v2375_v46  ;;  %v1886_v42 = vrot.slane %v1878_v40, %v2375_v46 }
 0x45f   : > { %v1896_v7 = vcombine.low %v1877_v1, %v1893_v32  ;;  %v1895_v43 = vcombine.high %v1870_v41, %v1886_v42  ;;  %v1894_v5 = vcombine.low %v1870_v41, %v1886_v42  ;;  %v1897_v44 = vcombine.high %v1877_v1, %v1893_v32 }
 0x461   : > { %v2201_v45 = vpack.i.bf16 %v1896_v7, %v1828_v3  ;;  %v2196_v8 = vpack.i.bf16 %v1895_v43, %v1827_v17  ;;  %v2206_v48 = vpack.i.bf16 %v1897_v44, %v1829_v6 }
 0x463   : > { %2202 = vrot.lane.b32.xlu0 %v2201_v45, %s2277_s25  ;;  %2197 = vrot.lane.b32.xlu1 %v2196_v8, %s2278_s26 }
 0x467   : > { %2207 = vrot.lane.b32.xlu1 %v2206_v48, %s2279_s27 }
 0x4d5   : > { %v2203_v50 = vpop.permute.xlu0 %2202  ;;  %v2198_v57 = vpop.permute.xlu1 %2197 }
 0x4d6   : > { %v2200_v58 = vunpack.i.h.bf16 %v2198_v57  ;;  %v2199_v59 = vunpack.i.l.bf16 %v2198_v57  ;;  %v2205_v60 = vunpack.i.h.bf16 %v2203_v50  ;;  %v2204_v46 = vunpack.i.l.bf16 %v2203_v50 }
 0x4d8   : > { %v1922_v54 = vsel %vm1126_vm1, %v1826_v30, %v2199_v59  ;;  %v1923_v55 = vsel %vm1126_vm1, %v1894_v5, %v2200_v58 }
 0x4d9   : > { %v2208_v2 = vpop.permute.xlu1 %2207  ;;  %v1924_v15 = vsel %vm1341_vm2, %v1922_v54, %v2204_v46  ;;  %v1925_v47 = vsel %vm1341_vm2, %v1923_v55, %v2205_v60 }
 0x4da   : > { %v2210_v11 = vunpack.i.h.bf16 %v2208_v2  ;;  %v2209_v13 = vunpack.i.l.bf16 %v2208_v2 }
 0x4dc   : > { %v1927_v16 = vsel %vm1926_vm3, %v1924_v15, %v2209_v13  ;;  %v1928_v51 = vsel %vm1926_vm3, %v1925_v47, %v2210_v11 }
 0x4dd   : > { %v2093_v19 = vpack.c.bf16 %v1927_v16, %v1927_v16  ;;  %v2094_v20 = vpack.c.bf16 %v1928_v51, %v1928_v51 }
 0x4df   : > { %1938 = vst.msk [vmem:[%s201_s30] sm:$0xf] %vm1937_vm4, %v2093_v19  ;;  %1939 = vst.msk [vmem:[%s201_s30 + $0x4] sm:$0xf] %vm1937_vm4, %v2094_v20 }
 0x4e0 PF: > { %s12_s11 = sadd.s32 1, %s2265_s11   ;;  %s2650_s9 = smov %s2261_s10 }
 0x4e1   : > { %p9_p5 = scmp.ge.s32.totalorder %s12_s11, 4   ;;  %s2651_s10 = smov %s2653_s12 }
 0x4e3   :  { %11 = sbr.rel (!%p9_p5) target bundleno = 2 (0x2), region = 61 }

// kernel: _lambda_.55
= control target key start
LH: loop header
LB: loop body
LE: loop exit
PB: predicated region body
PF: predicated region fallthrough
CT: control target
= control target key end

     0   :  { %vm39_vm0 = vcmask 261120   ;;  %vm401_vm1 = vcmask 257024   ;;  %s631_s0 = inlined_call_operand.vmem [shape: bf16[32,32], index: 0, kind: input, shape index: {}]   ;;  %s632_s6 = inlined_call_operand.vmem [shape: f32[1,32], index: 6, kind: input, shape index: {}]   ;;  %s633_s3 = inlined_call_operand.vmem [shape: bf16[32,128], index: 3, kind: input, shape index: {}]   ;;  %s634_s1 = inlined_call_operand.vmem [shape: f32[1,32], index: 1, kind: input, shape index: {}]   ;;  %s635_s2 = inlined_call_operand.vmem [shape: f32[1,32], index: 2, kind: input, shape index: {}]   ;;  %s636_s5 = inlined_call_operand.vmem [shape: bf16[128,32], index: 5, kind: input, shape index: {}]   ;;  %s637_s4 = inlined_call_operand.vmem [shape: f32[1,128], index: 4, kind: input, shape index: {}]   ;;  %s638_s7 = inlined_call_operand.vmem [shape: bf16[32,32], index: 7, kind: output, shape index: {}]  }
   0x1   :  { %v435_v0 = vld [vmem:[%s631_s0] sm:$0xff]   ;;  %v442_v2 = vld [vmem:[%s631_s0 + $0x8] sm:$0xff]  }
   0x2   :  { %v412_v1 = vld [vmem:[%s632_s6] ss:$0 sm:$0xff]  ;;  %v436_v3 = vunpack.c.l.bf16 %v435_v0  ;;  %v440_v4 = vunpack.c.l.bf16 %v442_v2  ;;  %v437_v5 = vunpack.c.h.bf16 %v435_v0  ;;  %v441_v6 = vunpack.c.h.bf16 %v442_v2  ;;  %v486_v36 = vld [vmem:[%s633_s3 + $0x8] sm:$0xff]  }
   0x3   :  { %v485_v35 = vld [vmem:[%s633_s3] sm:$0xff]  }
   0x4   :  { %v40_v7 = vsel %vm39_vm0, %v436_v3, 0.0  ;;  %v126_v8 = vadd.f32 %v436_v3, %v412_v1  ;;  %v46_v9 = vsel %vm39_vm0, %v440_v4, 0.0  ;;  %v128_v10 = vadd.f32 %v440_v4, %v412_v1  ;;  %457 = vmatprep.subr.bf16.mxu0 %v485_v35  ;;  %v410_v51 = vld [vmem:[%s634_s1] ss:$0 sm:$0xff] }
   0x5   :  { %41 = vadd.xlane.f32.xlu0 %v40_v7  ;;  %47 = vadd.xlane.f32.xlu1 %v46_v9  ;;  %v127_v11 = vadd.f32 %v437_v5, %v412_v1  ;;  %v129_v12 = vadd.f32 %v441_v6, %v412_v1  ;;  %v43_v13 = vsel %vm39_vm0, %v437_v5, 0.0  ;;  %v49_v14 = vsel %vm39_vm0, %v441_v6, 0.0  ;;  %v411_v56 = vld [vmem:[%s635_s2] ss:$0 sm:$0xff]  ;;  %v489_v9 = vld [vmem:[%s636_s5 + $0x10] sm:$0xff]  }
   0x6   :  { %130 = vst.msk [vmem:[#allocation2] sm:$0xff] %vm39_vm0, %v126_v8  ;;  %132 = vst.msk [vmem:[#allocation2 + $0x10] sm:$0xff] %vm39_vm0, %v128_v10  ;;  %458 = vmatpush3.bf16.msra.mxu0 %v485_v35  ;;  %v487_v7 = vld [vmem:[%s636_s5] sm:$0xff]   ;;  %v488_v8 = vld [vmem:[%s636_s5 + $0x8] sm:$0xff]  }
   0x7   :  { %131 = vst.msk [vmem:[#allocation2 + $0x8] sm:$0xff] %vm39_vm0, %v127_v11  ;;  %133 = vst.msk [vmem:[#allocation2 + $0x18] sm:$0xff] %vm39_vm0, %v129_v12  ;;  %459 = vmatprep.subr.bf16.mxu0 %v486_v36  ;;  %465 = vmatprep.subr.bf16.mxu1 %v487_v7  ;;  %v490_v10 = vld [vmem:[%s636_s5 + $0x18] sm:$0xff]   ;;  %v491_v11 = vld [vmem:[%s636_s5 + $0x20] sm:$0xff]  }
   0x8   :  { %466 = vmatpush3.bf16.msra.mxu1 %v487_v7  ;;  %v492_v12 = vld [vmem:[%s636_s5 + $0x28] sm:$0xff]  }
   0x9   :  { %44 = vadd.xlane.f32.xlu0 %v43_v13  ;;  %50 = vadd.xlane.f32.xlu1 %v49_v14  ;;  %v493_v13 = vld [vmem:[%s636_s5 + $0x30] sm:$0xff]   ;;  %v494_v14 = vld [vmem:[%s636_s5 + $0x38] sm:$0xff]  }
   0xa   :  { %460 = vmatpush3.bf16.msra.mxu0 %v486_v36  ;;  %467 = vmatprep.subr.bf16.mxu1 %v488_v8 }
   0xc   :  { %468 = vmatpush3.bf16.msra.mxu1 %v488_v8 }
   0xd   :  { %469 = vmatprep.subr.bf16.mxu1 %v489_v9 }
  0x10   :  { %470 = vmatpush3.bf16.msra.mxu1 %v489_v9 }
  0x11   :  { %471 = vmatprep.subr.bf16.mxu1 %v490_v10 }
  0x14   :  { %472 = vmatpush3.bf16.msra.mxu1 %v490_v10 }
  0x15   :  { %473 = vmatprep.subr.bf16.mxu1 %v491_v11 }
  0x18   :  { %474 = vmatpush3.bf16.msra.mxu1 %v491_v11 }
  0x19   :  { %475 = vmatprep.subr.bf16.mxu1 %v492_v12 }
  0x1c   :  { %476 = vmatpush3.bf16.msra.mxu1 %v492_v12 }
  0x1d   :  { %477 = vmatprep.subr.bf16.mxu1 %v493_v13 }
  0x20   :  { %478 = vmatpush3.bf16.msra.mxu1 %v493_v13 }
  0x21   :  { %479 = vmatprep.subr.bf16.mxu1 %v494_v14 }
  0x24   :  { %480 = vmatpush3.bf16.msra.mxu1 %v494_v14 }
  0x92   :  { %v42_v15 = vpop.xlane.xlu0 %41  ;;  %v48_v16 = vpop.xlane.xlu1 %47 }
  0x93   :  { %v53_v17 = vmul.f32 0.03125, %v42_v15  ;;  %v55_v18 = vmul.f32 0.03125, %v48_v16  ;;  %v413_v15 = vld [vmem:[%s637_s4] ss:$0 sm:$0xff] }
  0x95   :  { %v57_v19 = vsub.f32 %v436_v3, %v53_v17  ;;  %v59_v20 = vsub.f32 %v440_v4, %v55_v18 }
  0x96   :  { %v45_v21 = vpop.xlane.xlu0 %44  ;;  %v51_v22 = vpop.xlane.xlu1 %50 }
  0x97   :  { %v54_v23 = vmul.f32 0.03125, %v45_v21  ;;  %v56_v24 = vmul.f32 0.03125, %v51_v22  ;;  %v61_v25 = vmul.f32 %v57_v19, %v57_v19  ;;  %v63_v26 = vmul.f32 %v59_v20, %v59_v20 }
  0x99   :  { %v58_v27 = vsub.f32 %v437_v5, %v54_v23  ;;  %v60_v28 = vsub.f32 %v441_v6, %v56_v24  ;;  %v65_v29 = vsel %vm39_vm0, %v61_v25, 0.0  ;;  %v71_v30 = vsel %vm39_vm0, %v63_v26, 0.0 }
  0x9a   :  { %66 = vadd.xlane.f32.xlu0 %v65_v29 }
  0x9b   :  { %v62_v31 = vmul.f32 %v58_v27, %v58_v27  ;;  %v64_v32 = vmul.f32 %v60_v28, %v60_v28 }
  0x9d   :  { %v68_v33 = vsel %vm39_vm0, %v62_v31, 0.0  ;;  %v74_v34 = vsel %vm39_vm0, %v64_v32, 0.0 }
  0x9e   :  { %72 = vadd.xlane.f32.xlu0 %v71_v30  ;;  %69 = vadd.xlane.f32.xlu1 %v68_v33 }
  0xa2   :  { %75 = vadd.xlane.f32.xlu1 %v74_v34 }
 0x127   :  { %v67_v37 = vpop.xlane.xlu0 %66 }
 0x128   :  { %v77_v38 = vmul.f32 0.03125, %v67_v37 }
 0x12a   :  { %v81_v39 = vadd.f32 1e-05, %v77_v38 }
 0x12b   :  { %v70_v40 = vpop.xlane.xlu1 %69  ;;  %v73_v41 = vpop.xlane.xlu0 %72 }
 0x12c   :  { %495 = vrsqrt.f32 %v81_v39  ;;  %v78_v42 = vmul.f32 0.03125, %v70_v40  ;;  %v79_v43 = vmul.f32 0.03125, %v73_v41 }
 0x12e   :  { %v82_v44 = vadd.f32 1e-05, %v78_v42  ;;  %v83_v45 = vadd.f32 1e-05, %v79_v43 }
 0x12f   :  { %v76_v46 = vpop.xlane.xlu1 %75 }
 0x130   :  { %497 = vrsqrt.f32 %v82_v44  ;;  %v80_v47 = vmul.f32 0.03125, %v76_v46 }
 0x131   :  { %499 = vrsqrt.f32 %v83_v45 }
 0x132   :  { %v84_v48 = vadd.f32 1e-05, %v80_v47 }
 0x134   :  { %501 = vrsqrt.f32 %v84_v48 }
 0x136   :  { %v496_v49 = vpop.eup %495 }
 0x137   :  { %v89_v50 = vmul.f32 %v496_v49, %v57_v19 }
 0x139   :  { %v100_v54 = vmul.f32 %v410_v51, %v89_v50 }
 0x13a   :  { %v498_v52 = vpop.eup %497 }
 0x13b   :  { %v500_v53 = vpop.eup %499  ;;  %v90_v55 = vmul.f32 %v498_v52, %v58_v27  ;;  %v111_v60 = vadd.f32 %v411_v56, %v100_v54 }
 0x13c   :  { %v91_v57 = vmul.f32 %v500_v53, %v59_v20 }
 0x13d   :  { %v101_v58 = vmul.f32 %v410_v51, %v90_v55 }
 0x13e   :  { %v502_v59 = vpop.eup %501  ;;  %v102_v62 = vmul.f32 %v410_v51, %v91_v57 }
 0x13f   :  { %v112_v61 = vadd.f32 %v411_v56, %v101_v58  ;;  %v92_v63 = vmul.f32 %v502_v59, %v60_v28 }
 0x140   :  { %v113_v2 = vadd.f32 %v411_v56, %v102_v62  ;;  %v253_v62 = vld [vmem:[#allocation2 + $0x10] sm:$0xff] }
 0x141   :  { %v115_v0 = vpack.c.bf16 %v112_v61, %v111_v60  ;;  %v103_v1 = vmul.f32 %v410_v51, %v92_v63  ;;  %v251_v63 = vld [vmem:[#allocation2] sm:$0xff] }
 0x143   :  { %117 = vst.msk [vmem:[#allocation3] sm:$0xff] %vm39_vm0, %v115_v0  ;;  %v114_v3 = vadd.f32 %v411_v56, %v103_v1  ;;  %v254_v1 = vld [vmem:[#allocation2 + $0x18] sm:$0xff] }
 0x145   :  { %v116_v4 = vpack.c.bf16 %v114_v3, %v113_v2 }
 0x147   :  { %118 = vst.msk [vmem:[#allocation3 + $0x8] sm:$0xff] %vm39_vm0, %v116_v4  ;;  %v252_v4 = vld [vmem:[#allocation2 + $0x8] sm:$0xff] }
 0x14a   :  { %v134_v5 = vld [vmem:[#allocation3] sm:$0xff] }
 0x14b   :  { %461 = vmatprep.mubr.msk.bf16.mxu0 %vm39_vm0, %v134_v5 }
 0x14e   :  { %v135_v6 = vld [vmem:[#allocation3 + $0x8] sm:$0xff] }
 0x14f   :  { %462 = vmatmul.mubr.msk.bf16.vlgmr.msra.gmra.mrb[0].mxu0 %vm39_vm0, %v135_v6 }
 0x222   :  { %v463_v16 = vpop.f32.mrb[0].mxu0 }
 0x223   :  { %v209_v17 = vadd.f32 %v463_v16, %v413_v15  ;;  %v200_v18 = vpop.f32.mrb[1].mxu0 }
 0x224   :  { %v201_v19 = vadd.f32 %v413_v15, %v200_v18  ;;  %v464_v20 = vpop.f32.mrb[2].mxu0 }
 0x225   :  { %v217_v21 = vmul.f32 %v209_v17, %v209_v17  ;;  %v212_v22 = vadd.f32 %v464_v20, %v413_v15  ;;  %v203_v23 = vpop.f32.mrb[3].mxu0 }
 0x226   :  { %v215_v24 = vmul.f32 %v201_v19, %v201_v19  ;;  %v204_v25 = vadd.f32 %v413_v15, %v203_v23 }
 0x227   :  { %v221_v26 = vmul.f32 %v217_v21, %v209_v17  ;;  %v218_v27 = vmul.f32 %v212_v22, %v212_v22 }
 0x228   :  { %v219_v28 = vmul.f32 %v215_v24, %v201_v19  ;;  %v216_v29 = vmul.f32 %v204_v25, %v204_v25 }
 0x229   :  { %v225_v30 = vmul.f32 0.044715, %v221_v26  ;;  %v222_v31 = vmul.f32 %v218_v27, %v212_v22 }
 0x22a   :  { %v223_v32 = vmul.f32 0.044715, %v219_v28  ;;  %v220_v33 = vmul.f32 %v216_v29, %v204_v25 }
 0x22b   :  { %v229_v34 = vadd.f32 %v225_v30, %v209_v17  ;;  %v226_v35 = vmul.f32 0.044715, %v222_v31 }
 0x22c   :  { %v224_v36 = vmul.f32 0.044715, %v220_v33  ;;  %v227_v37 = vadd.f32 %v223_v32, %v201_v19 }
 0x22d   :  { %v233_v38 = vmul.f32 0.7978846, %v229_v34  ;;  %v230_v39 = vadd.f32 %v226_v35, %v212_v22 }
 0x22e   :  { %v228_v40 = vadd.f32 %v224_v36, %v204_v25  ;;  %v231_v41 = vmul.f32 0.7978846, %v227_v37 }
 0x22f   :  { %503 = vtanh.f32 %v233_v38  ;;  %v234_v42 = vmul.f32 0.7978846, %v230_v39 }
 0x230   :  { %v232_v43 = vmul.f32 0.7978846, %v228_v40  ;;  %505 = vtanh.f32 %v231_v41 }
 0x231   :  { %507 = vtanh.f32 %v234_v42 }
 0x232   :  { %509 = vtanh.f32 %v232_v43 }
 0x239   :  { %v504_v44 = vpop.eup %503 }
 0x23a   :  { %v506_v45 = vpop.eup %505  ;;  %v241_v46 = vadd.f32 1.0, %v504_v44 }
 0x23b   :  { %v508_v47 = vpop.eup %507  ;;  %v239_v48 = vadd.f32 1.0, %v506_v45 }
 0x23c   :  { %v510_v49 = vpop.eup %509  ;;  %v242_v50 = vadd.f32 1.0, %v508_v47  ;;  %v245_v51 = vmul.f32 0.5, %v241_v46 }
 0x23d   :  { %v240_v52 = vadd.f32 1.0, %v510_v49  ;;  %v243_v53 = vmul.f32 0.5, %v239_v48 }
 0x23e   :  { %v246_v54 = vmul.f32 0.5, %v242_v50  ;;  %v249_v56 = vmul.f32 %v245_v51, %v209_v17 }
 0x23f   :  { %v244_v55 = vmul.f32 0.5, %v240_v52  ;;  %v247_v58 = vmul.f32 %v243_v53, %v201_v19 }
 0x240   :  { %v250_v57 = vmul.f32 %v246_v54, %v212_v22 }
 0x241   :  { %v248_v59 = vmul.f32 %v244_v55, %v204_v25 }
 0x242   :  { %v256_v60 = vpack.c.bf16 %v250_v57, %v249_v56 }
 0x243   :  { %v255_v61 = vpack.c.bf16 %v248_v59, %v247_v58 }
 0x245   :  { %481 = vmatprep.mubr.bf16.mxu1 %v255_v61 }
 0x246   :  { %482 = vmatmul.mubr.bf16.vlgmr.msra.gmra.mrb[0].mxu1 %v256_v60 }
 0x319   :  { %v483_v0 = vpop.f32.mrb[0].mxu1 }
 0x31a   :  { %v372_v2 = vadd.f32 %v483_v0, %v253_v62  ;;  %v355_v3 = vpop.f32.mrb[1].mxu1 }
 0x31b   :  { %v370_v5 = vadd.f32 %v355_v3, %v251_v63  ;;  %v484_v6 = vpop.f32.mrb[2].mxu1 }
 0x31c   :  { %376 = vst.msk [vmem:[#allocation2 + $0x10] sm:$0xff] %vm39_vm0, %v372_v2  ;;  %v373_v7 = vadd.f32 %v484_v6, %v254_v1  ;;  %v358_v8 = vpop.f32.mrb[3].mxu1 }
 0x31d   :  { %374 = vst.msk [vmem:[#allocation2] sm:$0xff] %vm39_vm0, %v370_v5  ;;  %v371_v9 = vadd.f32 %v358_v8, %v252_v4 }
 0x31e   :  { %377 = vst.msk [vmem:[#allocation2 + $0x18] sm:$0xff] %vm39_vm0, %v373_v7 }
 0x31f   :  { %375 = vst.msk [vmem:[#allocation2 + $0x8] sm:$0xff] %vm39_vm0, %v371_v9 }
 0x323   :  { %v383_v10 = vld [vmem:[#allocation2 + $0x10] sm:$0xff] }
 0x324   :  { %v432_v11 = vpack.c.bf16 %v383_v10, %v383_v10  ;;  %v381_v12 = vld [vmem:[#allocation2] sm:$0xff] }
 0x325   :  { %v430_v13 = vpack.c.bf16 %v381_v12, %v381_v12  ;;  %v384_v14 = vld [vmem:[#allocation2 + $0x18] sm:$0xff] }
 0x326   :  { %404 = vst.msk [vmem:[%s638_s7 + $0x8] sm:$0xf] %vm401_vm1, %v432_v11  ;;  %v433_v15 = vpack.c.bf16 %v384_v14, %v384_v14  ;;  %v382_v16 = vld [vmem:[#allocation2 + $0x8] sm:$0xff] }
 0x327   :  { %402 = vst.msk [vmem:[%s638_s7] sm:$0xf] %vm401_vm1, %v430_v13  ;;  %v431_v17 = vpack.c.bf16 %v382_v16, %v382_v16 }
 0x328   :  { %405 = vst.msk [vmem:[%s638_s7 + $0xc] sm:$0xf] %vm401_vm1, %v433_v15 }
 0x329   :  { %403 = vst.msk [vmem:[%s638_s7 + $0x4] sm:$0xf] %vm401_vm1, %v431_v17 }

// kernel: _lambda_.60
= control target key start
LH: loop header
LB: loop body
LE: loop exit
PB: predicated region body
PF: predicated region fallthrough
CT: control target
= control target key end

     0   :  { %vm22_vm0 = vcmask 261120   ;;  %vm114_vm1 = vcmask 257024   ;;  %s206_s0 = inlined_call_operand.vmem [shape: bf16[32,32], index: 0, kind: input, shape index: {}]   ;;  %s207_s1 = inlined_call_operand.vmem [shape: f32[1,32], index: 1, kind: input, shape index: {}]   ;;  %s208_s2 = inlined_call_operand.vmem [shape: f32[1,32], index: 2, kind: input, shape index: {}]   ;;  %s209_s3 = inlined_call_operand.vmem [shape: bf16[32,32], index: 3, kind: output, shape index: {}]  }
   0x1   :  { %v134_v0 = vld [vmem:[%s206_s0] sm:$0xff]   ;;  %v141_v1 = vld [vmem:[%s206_s0 + $0x8] sm:$0xff]  }
   0x2   :  { %v135_v2 = vunpack.c.l.bf16 %v134_v0  ;;  %v139_v3 = vunpack.c.l.bf16 %v141_v1  ;;  %v136_v4 = vunpack.c.h.bf16 %v134_v0  ;;  %v140_v5 = vunpack.c.h.bf16 %v141_v1  ;;  %v123_v43 = vld [vmem:[%s207_s1] ss:$0 sm:$0xff] }
   0x3   :  { %v124_v45 = vld [vmem:[%s208_s2] ss:$0 sm:$0xff] }
   0x4   :  { %v23_v6 = vsel %vm22_vm0, %v135_v2, 0.0  ;;  %v29_v7 = vsel %vm22_vm0, %v139_v3, 0.0  ;;  %v26_v8 = vsel %vm22_vm0, %v136_v4, 0.0  ;;  %v32_v9 = vsel %vm22_vm0, %v140_v5, 0.0 }
   0x5   :  { %24 = vadd.xlane.f32.xlu0 %v23_v6  ;;  %30 = vadd.xlane.f32.xlu1 %v29_v7 }
   0x9   :  { %27 = vadd.xlane.f32.xlu0 %v26_v8  ;;  %33 = vadd.xlane.f32.xlu1 %v32_v9 }
  0x92   :  { %v25_v10 = vpop.xlane.xlu0 %24  ;;  %v31_v11 = vpop.xlane.xlu1 %30 }
  0x93   :  { %v36_v12 = vmul.f32 0.03125, %v25_v10  ;;  %v38_v13 = vmul.f32 0.03125, %v31_v11 }
  0x95   :  { %v40_v14 = vsub.f32 %v135_v2, %v36_v12  ;;  %v42_v15 = vsub.f32 %v139_v3, %v38_v13 }
  0x96   :  { %v28_v16 = vpop.xlane.xlu0 %27  ;;  %v34_v17 = vpop.xlane.xlu1 %33 }
  0x97   :  { %v37_v18 = vmul.f32 0.03125, %v28_v16  ;;  %v39_v19 = vmul.f32 0.03125, %v34_v17  ;;  %v44_v20 = vmul.f32 %v40_v14, %v40_v14  ;;  %v46_v21 = vmul.f32 %v42_v15, %v42_v15 }
  0x99   :  { %v41_v22 = vsub.f32 %v136_v4, %v37_v18  ;;  %v43_v23 = vsub.f32 %v140_v5, %v39_v19  ;;  %v48_v24 = vsel %vm22_vm0, %v44_v20, 0.0  ;;  %v54_v25 = vsel %vm22_vm0, %v46_v21, 0.0 }
  0x9a   :  { %49 = vadd.xlane.f32.xlu0 %v48_v24 }
  0x9b   :  { %v45_v26 = vmul.f32 %v41_v22, %v41_v22  ;;  %v47_v27 = vmul.f32 %v43_v23, %v43_v23 }
  0x9d   :  { %v51_v28 = vsel %vm22_vm0, %v45_v26, 0.0  ;;  %v57_v29 = vsel %vm22_vm0, %v47_v27, 0.0 }
  0x9e   :  { %55 = vadd.xlane.f32.xlu0 %v54_v25  ;;  %52 = vadd.xlane.f32.xlu1 %v51_v28 }
  0xa2   :  { %58 = vadd.xlane.f32.xlu1 %v57_v29 }
 0x127   :  { %v50_v30 = vpop.xlane.xlu0 %49 }
 0x128   :  { %v60_v31 = vmul.f32 0.03125, %v50_v30 }
 0x12a   :  { %v64_v32 = vadd.f32 1e-05, %v60_v31 }
 0x12b   :  { %v53_v33 = vpop.xlane.xlu1 %52  ;;  %v56_v34 = vpop.xlane.xlu0 %55 }
 0x12c   :  { %142 = vrsqrt.f32 %v64_v32  ;;  %v61_v35 = vmul.f32 0.03125, %v53_v33  ;;  %v62_v36 = vmul.f32 0.03125, %v56_v34 }
 0x12e   :  { %v65_v37 = vadd.f32 1e-05, %v61_v35  ;;  %v66_v38 = vadd.f32 1e-05, %v62_v36 }
 0x12f   :  { %v59_v39 = vpop.xlane.xlu1 %58 }
 0x130   :  { %144 = vrsqrt.f32 %v65_v37  ;;  %v63_v40 = vmul.f32 0.03125, %v59_v39 }
 0x131   :  { %146 = vrsqrt.f32 %v66_v38 }
 0x132   :  { %v67_v41 = vadd.f32 1e-05, %v63_v40 }
 0x134   :  { %148 = vrsqrt.f32 %v67_v41 }
 0x136   :  { %v143_v42 = vpop.eup %142 }
 0x137   :  { %v72_v44 = vmul.f32 %v143_v42, %v40_v14 }
 0x139   :  { %v83_v46 = vmul.f32 %v123_v43, %v72_v44 }
 0x13a   :  { %v145_v47 = vpop.eup %144 }
 0x13b   :  { %v147_v48 = vpop.eup %146  ;;  %v94_v49 = vadd.f32 %v124_v45, %v83_v46  ;;  %v73_v50 = vmul.f32 %v145_v47, %v41_v22 }
 0x13c   :  { %v74_v51 = vmul.f32 %v147_v48, %v42_v15 }
 0x13d   :  { %v129_v52 = vpack.c.bf16 %v94_v49, %v94_v49  ;;  %v84_v53 = vmul.f32 %v123_v43, %v73_v50 }
 0x13e   :  { %v149_v54 = vpop.eup %148  ;;  %v85_v55 = vmul.f32 %v123_v43, %v74_v51 }
 0x13f   :  { %115 = vst.msk [vmem:[%s209_s3] sm:$0xf] %vm114_vm1, %v129_v52  ;;  %v95_v56 = vadd.f32 %v124_v45, %v84_v53  ;;  %v75_v57 = vmul.f32 %v149_v54, %v43_v23 }
 0x140   :  { %v96_v58 = vadd.f32 %v124_v45, %v85_v55 }
 0x141   :  { %v130_v59 = vpack.c.bf16 %v95_v56, %v95_v56  ;;  %v86_v60 = vmul.f32 %v123_v43, %v75_v57 }
 0x142   :  { %v131_v61 = vpack.c.bf16 %v96_v58, %v96_v58 }
 0x143   :  { %116 = vst.msk [vmem:[%s209_s3 + $0x4] sm:$0xf] %vm114_vm1, %v130_v59  ;;  %v97_v62 = vadd.f32 %v124_v45, %v86_v60 }
 0x144   :  { %117 = vst.msk [vmem:[%s209_s3 + $0x8] sm:$0xf] %vm114_vm1, %v131_v61 }
 0x145   :  { %v132_v63 = vpack.c.bf16 %v97_v62, %v97_v62 }
 0x147   :  { %118 = vst.msk [vmem:[%s209_s3 + $0xc] sm:$0xf] %vm114_vm1, %v132_v63 }

// kernel: _lambda_.61
= control target key start
LH: loop header
LB: loop body
LE: loop exit
PB: predicated region body
PF: predicated region fallthrough
CT: control target
= control target key end

     0   :  { %vm19_vm0 = vcmask 261120   ;;  %v197_v1 = vmov 0.0   ;;  %vm156_vm1 = vcmask 257024   ;;  %s255_s1 = inlined_call_operand.vmem [shape: bf16[32,32], index: 1, kind: input, shape index: {}]   ;;  %s256_s0 = inlined_call_operand.vmem [shape: bf16[32,32], index: 0, kind: input, shape index: {}]   ;;  %s257_s2 = inlined_call_operand.vmem [shape: f32[1,32], index: 2, kind: input, shape index: {}]   ;;  %s258_s3 = inlined_call_operand.vmem [shape: bf16[32,32], index: 3, kind: output, shape index: {}]  }
   0x1   :  { %v193_v0 = vld [vmem:[%s255_s1] sm:$0xff]   ;;  %22 = vst.msk [vmem:[#allocation2 + $0x10] sm:$0xff] %vm19_vm0, %v197_v1  ;;  %20 = vst.msk [vmem:[#allocation2] sm:$0xff] %vm19_vm0, %v197_v1  ;;  %v194_v2 = vld [vmem:[%s255_s1 + $0x8] sm:$0xff]  }
   0x2   :  { %21 = vst.msk [vmem:[#allocation2 + $0x8] sm:$0xff] %vm19_vm0, %v197_v1  ;;  %23 = vst.msk [vmem:[#allocation2 + $0x18] sm:$0xff] %vm19_vm0, %v197_v1  ;;  %184 = vmatprep.subr.bf16.mxu0 %v193_v0  ;;  %v195_v3 = vld [vmem:[%s256_s0] sm:$0xff]   ;;  %v196_v4 = vld [vmem:[%s256_s0 + $0x8] sm:$0xff]  }
   0x3   :  { %185 = vmatpush3.bf16.msra.mxu0 %v193_v0  ;;  %188 = vmatprep.mubr.msk.bf16.mxu0 %vm19_vm0, %v195_v3  ;;  %v171_v17 = vld [vmem:[%s257_s2] ss:$0 sm:$0xff] }
   0x4   :  { %186 = vmatprep.subr.bf16.mxu0 %v194_v2 }
   0x7   :  { %187 = vmatpush3.bf16.msra.mxu0 %v194_v2 }
   0x8   :  { %v34_v5 = vld [vmem:[#allocation2 + $0x10] sm:$0xff]  ;;  %v32_v6 = vld [vmem:[#allocation2] sm:$0xff] }
   0x9   :  { %v35_v8 = vld [vmem:[#allocation2 + $0x18] sm:$0xff]  ;;  %v33_v11 = vld [vmem:[#allocation2 + $0x8] sm:$0xff] }
   0xa   :  { %189 = vmatmul.mubr.msk.bf16.vlgmr.msra.gmra.mrb[0].mxu0 %vm19_vm0, %v196_v4 }
  0xdd   :  { %v190_v7 = vpop.f32.mrb[0].mxu0 }
  0xde   :  { %v116_v9 = vadd.f32 %v190_v7, %v34_v5  ;;  %v99_v10 = vpop.f32.mrb[1].mxu0 }
  0xdf   :  { %v114_v12 = vadd.f32 %v99_v10, %v32_v6  ;;  %v191_v13 = vpop.f32.mrb[2].mxu0 }
  0xe0   :  { %120 = vst.msk [vmem:[#allocation2 + $0x10] sm:$0xff] %vm19_vm0, %v116_v9  ;;  %v117_v14 = vadd.f32 %v191_v13, %v35_v8  ;;  %v102_v15 = vpop.f32.mrb[3].mxu0 }
  0xe1   :  { %118 = vst.msk [vmem:[#allocation2] sm:$0xff] %vm19_vm0, %v114_v12  ;;  %v115_v16 = vadd.f32 %v102_v15, %v33_v11 }
  0xe2   :  { %121 = vst.msk [vmem:[#allocation2 + $0x18] sm:$0xff] %vm19_vm0, %v117_v14 }
  0xe3   :  { %119 = vst.msk [vmem:[#allocation2 + $0x8] sm:$0xff] %vm19_vm0, %v115_v16 }
  0xe7   :  { %v127_v18 = vld [vmem:[#allocation2 + $0x10] sm:$0xff] }
  0xe8   :  { %v138_v19 = vadd.f32 %v171_v17, %v127_v18  ;;  %v125_v20 = vld [vmem:[#allocation2] sm:$0xff] }
  0xe9   :  { %v136_v21 = vadd.f32 %v171_v17, %v125_v20  ;;  %v128_v22 = vld [vmem:[#allocation2 + $0x18] sm:$0xff] }
  0xea   :  { %v178_v23 = vpack.c.bf16 %v138_v19, %v138_v19  ;;  %v139_v24 = vadd.f32 %v171_v17, %v128_v22  ;;  %v126_v25 = vld [vmem:[#allocation2 + $0x8] sm:$0xff] }
  0xeb   :  { %v176_v26 = vpack.c.bf16 %v136_v21, %v136_v21  ;;  %v137_v27 = vadd.f32 %v171_v17, %v126_v25 }
  0xec   :  { %159 = vst.msk [vmem:[%s258_s3 + $0x8] sm:$0xf] %vm156_vm1, %v178_v23  ;;  %v179_v28 = vpack.c.bf16 %v139_v24, %v139_v24 }
  0xed   :  { %157 = vst.msk [vmem:[%s258_s3] sm:$0xf] %vm156_vm1, %v176_v26  ;;  %v177_v29 = vpack.c.bf16 %v137_v27, %v137_v27 }
  0xee   :  { %160 = vst.msk [vmem:[%s258_s3 + $0xc] sm:$0xf] %vm156_vm1, %v179_v28 }
  0xef   :  { %158 = vst.msk [vmem:[%s258_s3 + $0x4] sm:$0xf] %vm156_vm1, %v177_v29 }

// kernel: _lambda_.62
= control target key start
LH: loop header
LB: loop body
LE: loop exit
PB: predicated region body
PF: predicated region fallthrough
CT: control target
= control target key end

     0   :  { %vm33_vm0 = vcmask 261120   ;;  %vm210_vm1 = vcmask 257024   ;;  %s340_s0 = inlined_call_operand.vmem [shape: bf16[32,32], index: 0, kind: input, shape index: {}]   ;;  %s341_s3 = inlined_call_operand.vmem [shape: bf16[32,32], index: 3, kind: input, shape index: {}]   ;;  %s342_s1 = inlined_call_operand.vmem [shape: f32[1,32], index: 1, kind: input, shape index: {}]   ;;  %s343_s2 = inlined_call_operand.vmem [shape: f32[1,32], index: 2, kind: input, shape index: {}]   ;;  %s344_s4 = inlined_call_operand.vmem [shape: f32[1,32], index: 4, kind: input, shape index: {}]   ;;  %s345_s5 = inlined_call_operand.vmem [shape: bf16[32,32], index: 5, kind: output, shape index: {}]  }
   0x1   :  { %v235_v0 = vld [vmem:[%s340_s0] sm:$0xff]   ;;  %v242_v1 = vld [vmem:[%s340_s0 + $0x8] sm:$0xff]  }
   0x2   :  { %v236_v2 = vunpack.c.l.bf16 %v235_v0  ;;  %v240_v3 = vunpack.c.l.bf16 %v242_v1  ;;  %v237_v4 = vunpack.c.h.bf16 %v235_v0  ;;  %v241_v5 = vunpack.c.h.bf16 %v242_v1  ;;  %v255_v30 = vld [vmem:[%s341_s3] sm:$0xff]   ;;  %v256_v31 = vld [vmem:[%s341_s3 + $0x8] sm:$0xff]  }
   0x3   :  { %247 = vmatprep.subr.bf16.mxu0 %v255_v30  ;;  %v219_v46 = vld [vmem:[%s342_s1] ss:$0 sm:$0xff] }
   0x4   :  { %v34_v6 = vsel %vm33_vm0, %v236_v2, 0.0  ;;  %v40_v7 = vsel %vm33_vm0, %v240_v3, 0.0  ;;  %v37_v8 = vsel %vm33_vm0, %v237_v4, 0.0  ;;  %v43_v9 = vsel %vm33_vm0, %v241_v5, 0.0  ;;  %248 = vmatpush3.bf16.msra.mxu0 %v255_v30  ;;  %v220_v51 = vld [vmem:[%s343_s2] ss:$0 sm:$0xff] }
   0x5   :  { %35 = vadd.xlane.f32.xlu0 %v34_v6  ;;  %41 = vadd.xlane.f32.xlu1 %v40_v7 }
   0x6   :  { %249 = vmatprep.subr.bf16.mxu0 %v256_v31 }
   0x8   :  { %250 = vmatpush3.bf16.msra.mxu0 %v256_v31 }
   0x9   :  { %38 = vadd.xlane.f32.xlu0 %v37_v8  ;;  %44 = vadd.xlane.f32.xlu1 %v43_v9 }
  0x92   :  { %v36_v10 = vpop.xlane.xlu0 %35  ;;  %v42_v11 = vpop.xlane.xlu1 %41 }
  0x93   :  { %v47_v12 = vmul.f32 0.03125, %v36_v10  ;;  %v49_v13 = vmul.f32 0.03125, %v42_v11 }
  0x95   :  { %v51_v14 = vsub.f32 %v236_v2, %v47_v12  ;;  %v53_v15 = vsub.f32 %v240_v3, %v49_v13  ;;  %v221_v2 = vld [vmem:[%s344_s4] ss:$0 sm:$0xff] }
  0x96   :  { %v39_v16 = vpop.xlane.xlu0 %38  ;;  %v45_v17 = vpop.xlane.xlu1 %44 }
  0x97   :  { %v48_v18 = vmul.f32 0.03125, %v39_v16  ;;  %v50_v19 = vmul.f32 0.03125, %v45_v17  ;;  %v55_v20 = vmul.f32 %v51_v14, %v51_v14  ;;  %v57_v21 = vmul.f32 %v53_v15, %v53_v15 }
  0x99   :  { %v52_v22 = vsub.f32 %v237_v4, %v48_v18  ;;  %v54_v23 = vsub.f32 %v241_v5, %v50_v19  ;;  %v59_v24 = vsel %vm33_vm0, %v55_v20, 0.0  ;;  %v65_v25 = vsel %vm33_vm0, %v57_v21, 0.0 }
  0x9a   :  { %60 = vadd.xlane.f32.xlu0 %v59_v24 }
  0x9b   :  { %v56_v26 = vmul.f32 %v52_v22, %v52_v22  ;;  %v58_v27 = vmul.f32 %v54_v23, %v54_v23 }
  0x9d   :  { %v62_v28 = vsel %vm33_vm0, %v56_v26, 0.0  ;;  %v68_v29 = vsel %vm33_vm0, %v58_v27, 0.0 }
  0x9e   :  { %66 = vadd.xlane.f32.xlu0 %v65_v25  ;;  %63 = vadd.xlane.f32.xlu1 %v62_v28 }
  0xa2   :  { %69 = vadd.xlane.f32.xlu1 %v68_v29 }
 0x127   :  { %v61_v32 = vpop.xlane.xlu0 %60 }
 0x128   :  { %v71_v33 = vmul.f32 0.03125, %v61_v32 }
 0x12a   :  { %v75_v34 = vadd.f32 1e-05, %v71_v33 }
 0x12b   :  { %v64_v35 = vpop.xlane.xlu1 %63  ;;  %v67_v36 = vpop.xlane.xlu0 %66 }
 0x12c   :  { %257 = vrsqrt.f32 %v75_v34  ;;  %v72_v37 = vmul.f32 0.03125, %v64_v35  ;;  %v73_v38 = vmul.f32 0.03125, %v67_v36 }
 0x12e   :  { %v76_v39 = vadd.f32 1e-05, %v72_v37  ;;  %v77_v40 = vadd.f32 1e-05, %v73_v38 }
 0x12f   :  { %v70_v41 = vpop.xlane.xlu1 %69 }
 0x130   :  { %259 = vrsqrt.f32 %v76_v39  ;;  %v74_v42 = vmul.f32 0.03125, %v70_v41 }
 0x131   :  { %261 = vrsqrt.f32 %v77_v40 }
 0x132   :  { %v78_v43 = vadd.f32 1e-05, %v74_v42 }
 0x134   :  { %263 = vrsqrt.f32 %v78_v43 }
 0x136   :  { %v258_v44 = vpop.eup %257 }
 0x137   :  { %v83_v45 = vmul.f32 %v258_v44, %v51_v14 }
 0x139   :  { %v94_v49 = vmul.f32 %v219_v46, %v83_v45 }
 0x13a   :  { %v260_v47 = vpop.eup %259 }
 0x13b   :  { %v262_v48 = vpop.eup %261  ;;  %v84_v50 = vmul.f32 %v260_v47, %v52_v22  ;;  %v105_v55 = vadd.f32 %v220_v51, %v94_v49 }
 0x13c   :  { %v85_v52 = vmul.f32 %v262_v48, %v53_v15 }
 0x13d   :  { %v95_v53 = vmul.f32 %v219_v46, %v84_v50 }
 0x13e   :  { %v264_v54 = vpop.eup %263  ;;  %v96_v57 = vmul.f32 %v219_v46, %v85_v52 }
 0x13f   :  { %v106_v56 = vadd.f32 %v220_v51, %v95_v53  ;;  %v86_v58 = vmul.f32 %v264_v54, %v54_v23 }
 0x140   :  { %v107_v61 = vadd.f32 %v220_v51, %v96_v57 }
 0x141   :  { %v109_v59 = vpack.c.bf16 %v106_v56, %v105_v55  ;;  %v97_v60 = vmul.f32 %v219_v46, %v86_v58 }
 0x143   :  { %111 = vst.msk [vmem:[#allocation2] sm:$0xff] %vm33_vm0, %v109_v59  ;;  %v108_v62 = vadd.f32 %v220_v51, %v97_v60 }
 0x145   :  { %v110_v63 = vpack.c.bf16 %v108_v62, %v107_v61 }
 0x147   :  { %112 = vst.msk [vmem:[#allocation2 + $0x8] sm:$0xff] %vm33_vm0, %v110_v63 }
 0x14a   :  { %v113_v0 = vld [vmem:[#allocation2] sm:$0xff] }
 0x14b   :  { %251 = vmatprep.mubr.msk.bf16.mxu0 %vm33_vm0, %v113_v0 }
 0x14e   :  { %v114_v1 = vld [vmem:[#allocation2 + $0x8] sm:$0xff] }
 0x14f   :  { %252 = vmatmul.mubr.msk.bf16.vlgmr.msra.gmra.mrb[0].mxu0 %vm33_vm0, %v114_v1 }
 0x222   :  { %v253_v3 = vpop.f32.mrb[0].mxu0 }
 0x223   :  { %v188_v4 = vadd.f32 %v253_v3, %v221_v2  ;;  %v179_v5 = vpop.f32.mrb[1].mxu0 }
 0x224   :  { %v180_v6 = vadd.f32 %v221_v2, %v179_v5  ;;  %v254_v7 = vpop.f32.mrb[2].mxu0 }
 0x225   :  { %v232_v8 = vpack.c.bf16 %v188_v4, %v188_v4  ;;  %v191_v9 = vadd.f32 %v254_v7, %v221_v2  ;;  %v182_v10 = vpop.f32.mrb[3].mxu0 }
 0x226   :  { %v230_v11 = vpack.c.bf16 %v180_v6, %v180_v6  ;;  %v183_v12 = vadd.f32 %v221_v2, %v182_v10 }
 0x227   :  { %213 = vst.msk [vmem:[%s345_s5 + $0x8] sm:$0xf] %vm210_vm1, %v232_v8  ;;  %v233_v13 = vpack.c.bf16 %v191_v9, %v191_v9 }
 0x228   :  { %211 = vst.msk [vmem:[%s345_s5] sm:$0xf] %vm210_vm1, %v230_v11  ;;  %v231_v14 = vpack.c.bf16 %v183_v12, %v183_v12 }
 0x229   :  { %214 = vst.msk [vmem:[%s345_s5 + $0xc] sm:$0xf] %vm210_vm1, %v233_v13 }
 0x22a   :  { %212 = vst.msk [vmem:[%s345_s5 + $0x4] sm:$0xf] %vm210_vm1, %v231_v14 }

// kernel: _lambda_.63
= control target key start
LH: loop header
LB: loop body
LE: loop exit
PB: predicated region body
PF: predicated region fallthrough
CT: control target
= control target key end

     0   :  { %vm19_vm0 = vcmask 261120   ;;  %v171_v0 = vmov 0.0   ;;  %vm172_vm1 = vmmov 0   ;;  %vm59_vm2 = vcmask 523264   ;;  %s224_s1 = inlined_call_operand.vmem [shape: bf16[64,32], index: 1, kind: input, shape index: {}]   ;;  %s225_s0 = inlined_call_operand.vmem [shape: f32[16,64], index: 0, kind: input, shape index: {}]   ;;  %s226_s2 = inlined_call_operand.vmem [shape: f32[1,32], index: 2, kind: input, shape index: {}]   ;;  %s227_s3 = inlined_call_operand.vmem [shape: bf16[16,32], index: 3, kind: output, shape index: {}]  }
   0x1   :  { %153 = vmatprep.subr.bf16.mxu0 %v171_v0  ;;  %v167_v1 = vld [vmem:[%s224_s1] sm:$0xff]   ;;  %161 = vmatprep.mubr.msk.bf16.mxu0 %vm172_vm1, %v171_v0  ;;  %20 = vst.msk [vmem:[#allocation2] sm:$0xff] %vm19_vm0, %v171_v0  ;;  %21 = vst.msk [vmem:[#allocation2 + $0x8] sm:$0xff] %vm19_vm0, %v171_v0  ;;  %v168_v2 = vld [vmem:[%s224_s1 + $0x8] sm:$0xff]   ;;  %vm131_vm3 = vcmask 257024  }
   0x2   :  { %154 = vmatpush3.bf16.msra.mxu0 %v167_v1  ;;  %v169_v3 = vld [vmem:[%s224_s1 + $0x10] sm:$0xff]   ;;  %v170_v4 = vld [vmem:[%s224_s1 + $0x18] sm:$0xff]   ;;  %v22_v5 = vld [vmem:[%s225_s0] sm:$0xff] }
   0x3   :  { %155 = vmatprep.subr.bf16.mxu0 %v171_v0  ;;  %v23_v6 = vld [vmem:[%s225_s0 + $0x8] sm:$0xff]  ;;  %v143_v16 = vld [vmem:[%s226_s2] ss:$0 sm:$0xff] }
   0x4   :  { %v32_v7 = vpack.c.bf16 %v23_v6, %v22_v5 }
   0x6   :  { %156 = vmatpush3.bf16.msra.mxu0 %v168_v2 }
   0x7   :  { %157 = vmatprep.subr.bf16.mxu0 %v171_v0 }
   0x8   :  { %v33_v8 = vld [vmem:[#allocation2] sm:$0xff]  ;;  %v34_v10 = vld [vmem:[#allocation2 + $0x8] sm:$0xff] }
   0xa   :  { %158 = vmatpush3.bf16.msra.mxu0 %v169_v3 }
   0xb   :  { %159 = vmatprep.subr.bf16.mxu0 %v171_v0 }
   0xe   :  { %160 = vmatpush3.bf16.msra.mxu0 %v170_v4 }
  0x11   :  { %162 = vmatmul.mubr.msk.bf16.vlgmr.msra.gmra.mrb[0].mxu0 %vm59_vm2, %v32_v7 }
  0xe4   :  { %v97_v9 = vpop.f32.mrb[0].mxu0 }
  0xe5   :  { %v104_v11 = vadd.f32 %v97_v9, %v33_v8  ;;  %v163_v12 = vpop.f32.mrb[1].mxu0 }
  0xe6   :  { %v100_v13 = vpop.f32.mrb[2].mxu0 }
  0xe7   :  { %107 = vst.msk [vmem:[#allocation2] sm:$0xff] %vm19_vm0, %v104_v11  ;;  %v105_v14 = vadd.f32 %v100_v13, %v34_v10  ;;  %v164_v15 = vpop.f32.mrb[3].mxu0 }
  0xe9   :  { %108 = vst.msk [vmem:[#allocation2 + $0x8] sm:$0xff] %vm19_vm0, %v105_v14 }
  0xee   :  { %v112_v17 = vld [vmem:[#allocation2] sm:$0xff] }
  0xef   :  { %v121_v18 = vadd.f32 %v143_v16, %v112_v17 }
  0xf0   :  { %v113_v19 = vld [vmem:[#allocation2 + $0x8] sm:$0xff] }
  0xf1   :  { %v146_v20 = vpack.c.bf16 %v121_v18, %v121_v18  ;;  %v122_v21 = vadd.f32 %v143_v16, %v113_v19 }
  0xf3   :  { %132 = vst.msk [vmem:[%s227_s3] sm:$0xf] %vm131_vm3, %v146_v20  ;;  %v147_v22 = vpack.c.bf16 %v122_v21, %v122_v21 }
  0xf5   :  { %133 = vst.msk [vmem:[%s227_s3 + $0x4] sm:$0xf] %vm131_vm3, %v147_v22 }

// kernel: _lambda_.64
= control target key start
LH: loop header
LB: loop body
LE: loop exit
PB: predicated region body
PF: predicated region fallthrough
CT: control target
= control target key end

     0   :  { %vm29_vm0 = vcmask 261120   ;;  %v194_v16 = vmov 0.0   ;;  %vm195_vm1 = vmmov 0   ;;  %vm154_vm2 = vcmask 781312   ;;  %s256_s0 = inlined_call_operand.vmem [shape: bf16[16,32], index: 0, kind: input, shape index: {}]   ;;  %s257_s3 = inlined_call_operand.vmem [shape: bf16[32,96], index: 3, kind: input, shape index: {}]   ;;  %s258_s1 = inlined_call_operand.vmem [shape: f32[1,32], index: 1, kind: input, shape index: {}]   ;;  %s259_s2 = inlined_call_operand.vmem [shape: f32[1,32], index: 2, kind: input, shape index: {}]   ;;  %s260_s4 = inlined_call_operand.vmem [shape: f32[1,96], index: 4, kind: input, shape index: {}]   ;;  %s261_s5 = inlined_call_operand.vmem [shape: bf16[16,96], index: 5, kind: output, shape index: {}]  }
   0x1   :  { %v172_v0 = vld [vmem:[%s256_s0] sm:$0xff]   ;;  %178 = vmatprep.subr.bf16.mxu0 %v194_v16  ;;  %v189_v17 = vld [vmem:[%s257_s3 + $0x8] sm:$0xff]   ;;  %182 = vmatprep.mubr.msk.bf16.mxu0 %vm195_vm1, %v194_v16 }
   0x2   :  { %v173_v1 = vunpack.c.l.bf16 %v172_v0  ;;  %v174_v2 = vunpack.c.h.bf16 %v172_v0  ;;  %v188_v15 = vld [vmem:[%s257_s3] sm:$0xff]  }
   0x3   :  { %179 = vmatpush3.bf16.msra.mxu0 %v188_v15  ;;  %v161_v26 = vld [vmem:[%s258_s1] ss:$0 sm:$0xff] }
   0x4   :  { %v30_v3 = vsel %vm29_vm0, %v173_v1, 0.0  ;;  %v33_v4 = vsel %vm29_vm0, %v174_v2, 0.0  ;;  %180 = vmatprep.subr.bf16.mxu0 %v194_v16  ;;  %v162_v30 = vld [vmem:[%s259_s2] ss:$0 sm:$0xff] }
   0x5   :  { %31 = vadd.xlane.f32.xlu0 %v30_v3  ;;  %v163_v36 = vld [vmem:[%s260_s4] ss:$0 sm:$0xff] }
   0x7   :  { %181 = vmatpush3.bf16.msra.mxu0 %v189_v17 }
   0x9   :  { %34 = vadd.xlane.f32.xlu0 %v33_v4 }
  0x92   :  { %v32_v5 = vpop.xlane.xlu0 %31 }
  0x93   :  { %v37_v6 = vmul.f32 0.03125, %v32_v5 }
  0x95   :  { %v39_v7 = vsub.f32 %v173_v1, %v37_v6 }
  0x96   :  { %v35_v8 = vpop.xlane.xlu0 %34 }
  0x97   :  { %v38_v9 = vmul.f32 0.03125, %v35_v8  ;;  %v41_v10 = vmul.f32 %v39_v7, %v39_v7 }
  0x99   :  { %v40_v11 = vsub.f32 %v174_v2, %v38_v9  ;;  %v43_v12 = vsel %vm29_vm0, %v41_v10, 0.0 }
  0x9a   :  { %44 = vadd.xlane.f32.xlu1 %v43_v12 }
  0x9b   :  { %v42_v13 = vmul.f32 %v40_v11, %v40_v11 }
  0x9d   :  { %v46_v14 = vsel %vm29_vm0, %v42_v13, 0.0 }
  0x9e   :  { %47 = vadd.xlane.f32.xlu1 %v46_v14 }
 0x127   :  { %v45_v18 = vpop.xlane.xlu1 %44 }
 0x128   :  { %v49_v19 = vmul.f32 0.03125, %v45_v18 }
 0x12a   :  { %v51_v20 = vadd.f32 1e-05, %v49_v19 }
 0x12b   :  { %v48_v21 = vpop.xlane.xlu1 %47 }
 0x12c   :  { %190 = vrsqrt.f32 %v51_v20  ;;  %v50_v22 = vmul.f32 0.03125, %v48_v21 }
 0x12e   :  { %v52_v23 = vadd.f32 1e-05, %v50_v22 }
 0x130   :  { %192 = vrsqrt.f32 %v52_v23 }
 0x136   :  { %v191_v24 = vpop.eup %190 }
 0x137   :  { %v55_v25 = vmul.f32 %v191_v24, %v39_v7 }
 0x139   :  { %v64_v28 = vmul.f32 %v161_v26, %v55_v25 }
 0x13a   :  { %v193_v27 = vpop.eup %192 }
 0x13b   :  { %v56_v29 = vmul.f32 %v193_v27, %v40_v11  ;;  %v73_v32 = vadd.f32 %v162_v30, %v64_v28 }
 0x13d   :  { %v65_v31 = vmul.f32 %v161_v26, %v56_v29 }
 0x13f   :  { %v74_v33 = vadd.f32 %v162_v30, %v65_v31 }
 0x141   :  { %v75_v34 = vpack.c.bf16 %v74_v33, %v73_v32 }
 0x143   :  { %76 = vst.msk [vmem:[#allocation2] sm:$0xff] %vm29_vm0, %v75_v34 }
 0x14a   :  { %v77_v35 = vld [vmem:[#allocation2] sm:$0xff] }
 0x14b   :  { %183 = vmatmul.mubr.msk.bf16.vlgmr.msra.gmra.mrb[0].mxu0 %vm29_vm0, %v77_v35 }
 0x21e   :  { %v139_v37 = vpop.f32.mrb[0].mxu0 }
 0x21f   :  { %v140_v38 = vadd.f32 %v163_v36, %v139_v37  ;;  %v184_v39 = vpop.f32.mrb[1].mxu0 }
 0x220   :  { %v142_v40 = vpop.f32.mrb[2].mxu0 }
 0x221   :  { %v169_v41 = vpack.c.bf16 %v140_v38, %v140_v38  ;;  %v143_v42 = vadd.f32 %v163_v36, %v142_v40  ;;  %v185_v43 = vpop.f32.mrb[3].mxu0 }
 0x223   :  { %155 = vst.msk [vmem:[%s261_s5] sm:$0xf] %vm154_vm2, %v169_v41  ;;  %v170_v44 = vpack.c.bf16 %v143_v42, %v143_v42 }
 0x225   :  { %156 = vst.msk [vmem:[%s261_s5 + $0x4] sm:$0xf] %vm154_vm2, %v170_v44 }

// kernel: _lambda_.65
= control target key start
LH: loop header
LB: loop body
LE: loop exit
PB: predicated region body
PF: predicated region fallthrough
CT: control target
= control target key end

     0   :  { %s1505_s9 = smov 0   ;;  %s1507_s10 = smov 0   ;;  %s1698_s0 = inlined_call_operand.vmem [shape: bf16[2,8,96], index: 0, kind: input, shape index: {}, may-alias: {0,1}]   ;;  %s1699_s1 = inlined_call_operand.vmem [shape: bf16[2,8,96], index: 1, kind: input, shape index: {}, may-alias: {0,1}]   ;;  %s1700_s2 = inlined_call_operand.vmem [shape: bf16[2,8,32], index: 2, kind: output, shape index: {}]  }
   0x1   :  { %s1509_s11 = smov 0  }
   0x2 LB: > { %s24_s12 = sadd.s32 1, %s1471_s10  ;;  %p1314_p0 = scmp.ge.s32.totalorder %s1475_s11, 1  ;;  %s1475_s11 = sphi %s1509_s11, %s12_s11   ;;  %s1471_s10 = sphi %s1507_s10, %s1702_s10   ;;  %s1467_s9 = sphi %s1505_s9, %s1701_s9  }
   0x3   : > { %p26_p1 = scmp.ge.s32.totalorder %s24_s12, 2  ;;  %p139_p2 = scmp.lt.s32.totalorder %s1475_s11, 3 }
   0x5   : > { %s1704_s12 = smov (%p26_p1, %s24_s12), 0  ;;  %p140_p3 = pnand %p1314_p0, %p139_p2 }
   0x6   : > { %p169_p4 = scmp.lt.s32.totalorder (!%p140_p3), %s1467_s9, 1  ;;  %s1477_s17 = smov (!%p140_p3), 120   ;;  %v1481_v5 = vmov (!%p140_p3), 0.0   ;;  %vm1482_vm0 = vmmov (!%p140_p3), 0   ;;  %v1483_v6 = vmov (!%p140_p3), 1983009808   ;;  %v213_v8 = vlaneseq (!%p140_p3) }
   0x7   : > { %143 = sbr.rel (%p140_p3) target bundleno = 1221 (0x4c5), region = 28  ;;  %s1478_s18 = smov (!%p140_p3), 104   ;;  %1352 = vmatprep.subr.bf16.mxu0 (!%p140_p3), %v1481_v5  ;;  %1358 = vmatprep.subr.bf16.mxu1 (!%p140_p3), %v1481_v5  ;;  %v211_v7 = vunpack.c.l.s4 (!%p140_p3), %v1483_v6  ;;  %v1484_v12 = vmov (!%p140_p3), 1934713408   ;;  %vm646_vm1 = vcmask (!%p140_p3), 64512   ;;  %vm886_vm2 = vcmask (!%p140_p3), 1043456  }
   0x8   : > { %s1479_s19 = smov (!%p140_p3), 112   ;;  %s1480_s20 = smov (!%p140_p3), 96   ;;  %1354 = vmatprep.mubr.msk.bf16.mxu0 (!%p140_p3), %vm1482_vm0, %v1481_v5  ;;  %1360 = vmatprep.mubr.msk.bf16.mxu1 (!%p140_p3), %vm1482_vm0, %v1481_v5  ;;  %v214_v11 = vshrl.u32 (!%p140_p3), %v213_v8, 7  ;;  %v228_v13 = vunpack.c.l.s4 (!%p140_p3), %v1484_v12  ;;  %vm1217_vm3 = vcmask (!%p140_p3), 130048   ;;  %vm1219_vm4 = vcmask (!%p140_p3), 195584  }
   0x9   : > { %v212_v10 = vunpack.c.0.s8 (!%p140_p3), %v211_v7  ;;  %s1486_s24 = smov (!%p140_p3), 64   ;;  %s1487_s25 = smov (!%p140_p3), 16   ;;  %vm1222_vm5 = vcmask (!%p140_p3), 257024  }
   0xa   : > { %v229_v19 = vunpack.c.0.s8 (!%p140_p3), %v228_v13  ;;  %s1488_s26 = smov (!%p140_p3), 8   ;;  %s1489_s27 = smov (!%p140_p3), 24  }
   0xb   : > { %v1554_v17 = vsub.s32 (!%p140_p3), %v212_v10, %v214_v11 }
   0xc   : > { %v1557_v27 = vsub.s32 (!%p140_p3), %v229_v19, %v214_v11 }
   0xe   : > { %s1706_s9 = smov (!%p169_p4, %s1467_s9), 1 }
   0xf   : > { %s1523_s13 = sshll.u32 %s1706_s9, 2 }
  0x10   : > { %s179_s16 = scalar_lea.vmem %s1699_s1, %s1523_s13  ;;  %s175_s23 = scalar_lea.vmem %s1698_s0, %s1523_s13 }
  0x11   : > { %v1529_v0 = vld [vmem:[%s179_s16] sm:$0xf]  ;;  %s186_s30 = scalar_lea.vmem %s1700_s2, %s1523_s13 }
  0x12   : > { %340 = vrot.lane.b32.xlu0 %v1529_v0, %s1477_s17  ;;  %344 = vrot.lane.b32.xlu1 %v1529_v0, %s1478_s18  ;;  %v188_v4 = vld [vmem:[%s175_s23] sm:$0xf] }
  0x13   : > { %v200_v36 = vshrl.u32 %v188_v4, 16 }
  0x16   : > { %342 = vrot.lane.b32.xlu0 %v1529_v0, %s1479_s19  ;;  %346 = vrot.lane.b32.xlu1 %v1529_v0, %s1480_s20 }
  0x84   : > { %v1535_v1 = vpop.permute.xlu0 %340  ;;  %v1538_v2 = vpop.permute.xlu1 %344 }
  0x85   : > { %348 = vrot.lane.b32.xlu0 %v1535_v1, %s1480_s20 }
  0x88   : > { %v1544_v3 = vpop.permute.xlu0 %342  ;;  %v347_v9 = vpop.permute.xlu1 %346 }
  0x89   : > { %352 = vrot.lane.b32.xlu0 %v1538_v2, %s1480_s20  ;;  %350 = vrot.lane.b32.xlu1 %v1544_v3, %s1480_s20  ;;  %v357_v15 = vshrl.u32 %v347_v9, 16 }
  0x8d   : > { %191 = vrot.lane.b32.xlu1 %v188_v4, %s1477_s17  ;;  %193 = vrot.lane.b32.xlu0 %v188_v4, %s1479_s19 }
  0x91   : > { %195 = vrot.lane.b32.xlu1 %v188_v4, %s1478_s18 }
  0xf7   : > { %v349_v14 = vpop.permute.xlu0 %348 }
  0xf8   : > { %v358_v16 = vshrl.u32 %v349_v14, 16  ;;  %v356_v18 = vpack.i.b16 %v349_v14, %v347_v9 }
  0xfa   : > { %v359_v22 = vpack.i.b16 %v358_v16, %v357_v15  ;;  %v373_v26 = vrot.slane %v356_v18, %v1554_v17 }
  0xfb   : > { %v351_v20 = vpop.permute.xlu1 %350  ;;  %v353_v21 = vpop.permute.xlu0 %352 }
  0xfc   : > { %v363_v23 = vshrl.u32 %v351_v20, 16  ;;  %v362_v24 = vpack.i.b16 %v353_v21, %v351_v20  ;;  %v364_v25 = vshrl.u32 %v353_v21, 16  ;;  %v407_v31 = vrot.slane %v359_v22, %v1554_v17 }
  0xfd   : > { %v1485_v22 = vmov 0  }
  0xfe   : > { %v365_v28 = vpack.i.b16 %v364_v25, %v363_v23  ;;  %v381_v29 = vrot.slane %v362_v24, %v1554_v17 }
  0xff   : > { %v192_v30 = vpop.permute.xlu1 %191  ;;  %v194_v35 = vpop.permute.xlu0 %193 }
 0x100   : > { %v382_v32 = vcombine.low %v373_v26, %v381_v29  ;;  %v383_v33 = vcombine.high %v373_v26, %v381_v29  ;;  %v415_v34 = vrot.slane %v365_v28, %v1554_v17  ;;  %v201_v37 = vshrl.u32 %v192_v30, 16 }
 0x101   : > { %v199_v42 = vpack.i.b16 %v192_v30, %v188_v4  ;;  %v206_v43 = vshrl.u32 %v194_v35, 16 }
 0x102   : > { %v390_v38 = vrot.slane %v382_v32, %v1557_v27  ;;  %v397_v39 = vrot.slane %v383_v33, %v1557_v27  ;;  %v416_v40 = vcombine.low %v407_v31, %v415_v34  ;;  %v417_v41 = vcombine.high %v407_v31, %v415_v34 }
 0x103   : > { %v196_v44 = vpop.permute.xlu1 %195  ;;  %v202_v49 = vpack.i.b16 %v201_v37, %v200_v36  ;;  %v216_v56 = vrot.slane %v199_v42, %v1554_v17 }
 0x104   : > { %v424_v45 = vrot.slane %v416_v40, %v1557_v27  ;;  %v431_v46 = vrot.slane %v417_v41, %v1557_v27  ;;  %v434_v47 = vcombine.low %v390_v38, %v397_v39  ;;  %v1320_v48 = vcombine.high %v390_v38, %v397_v39 }
 0x105   : > { %v205_v50 = vpack.i.b16 %v196_v44, %v194_v35  ;;  %v207_v51 = vshrl.u32 %v196_v44, 16  ;;  %v250_v62 = vrot.slane %v202_v49, %v1554_v17 }
 0x106   : > { %v459_v52 = vcombine.low %v424_v45, %v431_v46  ;;  %v1321_v53 = vcombine.high %v424_v45, %v431_v46  ;;  %v441_v54 = vrot.slane %v434_v47, %v1554_v17  ;;  %v449_v55 = vrot.slane %v1320_v48, %v1554_v17 }
 0x107   : > { %v208_v57 = vpack.i.b16 %v207_v51, %v206_v43  ;;  %v224_v58 = vrot.slane %v205_v50, %v1554_v17 }
 0x108   : > { %v450_v59 = vcombine.low %v441_v54, %v449_v55  ;;  %v466_v60 = vrot.slane %v459_v52, %v1554_v17  ;;  %v474_v61 = vrot.slane %v1321_v53, %v1554_v17 }
 0x109   : > { %v225_v63 = vcombine.low %v216_v56, %v224_v58  ;;  %v226_v4 = vcombine.high %v216_v56, %v224_v58  ;;  %v258_v6 = vrot.slane %v208_v57, %v1554_v17 }
 0x10a   : > { %v457_v7 = vrot.slane %v450_v59, %v1557_v27  ;;  %v475_v8 = vcombine.low %v466_v60, %v474_v61 }
 0x10b   : > { %v233_v9 = vrot.slane %v225_v63, %v1557_v27  ;;  %v240_v10 = vrot.slane %v226_v4, %v1557_v27  ;;  %v259_v11 = vcombine.low %v250_v62, %v258_v6  ;;  %v260_v12 = vcombine.high %v250_v62, %v258_v6 }
 0x10c   : > { %v482_v13 = vrot.slane %v475_v8, %v1557_v27  ;;  %v487_v20 = vshrl.u32 %v457_v7, 16  ;;  %v458_v34 = vcombine.high %v457_v7, %v1485_v22 }
 0x10d   : > { %v267_v14 = vrot.slane %v259_v11, %v1557_v27  ;;  %v274_v15 = vrot.slane %v260_v12, %v1557_v27  ;;  %v277_v16 = vcombine.low %v233_v9, %v240_v10  ;;  %v1318_v18 = vcombine.high %v233_v9, %v240_v10 }
 0x10e   : > { %v486_v19 = vpack.i.b16 %v482_v13, %v457_v7  ;;  %v488_v21 = vshrl.u32 %v482_v13, 16  ;;  %v483_v23 = vcombine.high %v482_v13, %v1485_v22  ;;  %v493_v41 = vshrl.u32 %v458_v34, 16 }
 0x10f   : > { %v284_v24 = vrot.slane %v277_v16, %v1554_v17  ;;  %v292_v25 = vrot.slane %v1318_v18, %v1554_v17  ;;  %v302_v26 = vcombine.low %v267_v14, %v274_v15  ;;  %v1319_v28 = vcombine.high %v267_v14, %v274_v15 }
 0x110   : > { %v651_v29 = vsel %vm646_vm1, %v486_v19, 0  ;;  %v489_v30 = vpack.i.b16 %v488_v21, %v487_v20  ;;  %v494_v38 = vshrl.u32 %v483_v23, 16  ;;  %v492_v40 = vpack.i.b16 %v483_v23, %v458_v34 }
 0x111   : > { %v293_v31 = vcombine.low %v284_v24, %v292_v25  ;;  %v309_v32 = vrot.slane %v302_v26, %v1554_v17  ;;  %v317_v33 = vrot.slane %v1319_v28, %v1554_v17  ;;  %1353 = vmatpush3.bf16.xpose.msra.mxu0 %v651_v29 }
 0x112   : > { %v697_v35 = vsel %vm646_vm1, %v489_v30, 0  ;;  %1364 = vmatprep.subr.bf16.mxu0 %v1481_v5  ;;  %v495_v45 = vpack.i.b16 %v494_v38, %v493_v41  ;;  %v743_v46 = vsel %vm646_vm1, %v492_v40, 0 }
 0x113   : > { %1359 = vmatpush3.bf16.xpose.msra.mxu1 %v697_v35  ;;  %v300_v36 = vrot.slane %v293_v31, %v1557_v27  ;;  %v318_v37 = vcombine.low %v309_v32, %v317_v33 }
 0x114   : > { %1370 = vmatprep.subr.bf16.mxu1 %v1481_v5  ;;  %v789_v49 = vsel %vm646_vm1, %v495_v45, 0 }
 0x115   : > { %v325_v39 = vrot.slane %v318_v37, %v1557_v27  ;;  %v330_v43 = vshrl.u32 %v300_v36, 16  ;;  %v301_v50 = vcombine.high %v300_v36, %v1485_v22 }
 0x117   : > { %v329_v42 = vpack.i.b16 %v325_v39, %v300_v36  ;;  %v331_v44 = vshrl.u32 %v325_v39, 16  ;;  %v326_v48 = vcombine.high %v325_v39, %v1485_v22  ;;  %v336_v53 = vshrl.u32 %v301_v50, 16 }
 0x119   : > { %1355 = vmatmul.mubr.msk.bf16.vlgmr.msra.gmra.mrb[0].mxu0 %vm646_vm1, %v329_v42  ;;  %v332_v47 = vpack.i.b16 %v331_v44, %v330_v43  ;;  %v337_v51 = vshrl.u32 %v326_v48, 16  ;;  %v335_v52 = vpack.i.b16 %v326_v48, %v301_v50 }
 0x11a   : > { %1365 = vmatpush3.bf16.xpose.msra.mxu0 %v743_v46  ;;  %1366 = vmatprep.mubr.msk.bf16.mxu0 %vm1482_vm0, %v1481_v5 }
 0x11b   : > { %1361 = vmatmul.mubr.msk.bf16.vlgmr.msra.gmra.mrb[0].mxu1 %vm646_vm1, %v332_v47  ;;  %1376 = vmatprep.subr.bf16.mxu0 %v1481_v5  ;;  %v338_v54 = vpack.i.b16 %v337_v51, %v336_v53 }
 0x11c   : > { %1371 = vmatpush3.bf16.xpose.msra.mxu1 %v789_v49  ;;  %1372 = vmatprep.mubr.msk.bf16.mxu1 %vm1482_vm0, %v1481_v5 }
 0x11d   : > { %1382 = vmatprep.subr.bf16.mxu1 %v1481_v5 }
 0x121   : > { %1367 = vmatmul.mubr.msk.bf16.vlgmr.msra.gmra.mrb[4].mxu0 %vm646_vm1, %v335_v52 }
 0x122   : > { %1378 = vmatprep.mubr.msk.bf16.mxu0 %vm1482_vm0, %v1481_v5 }
 0x123   : > { %1373 = vmatmul.mubr.msk.bf16.vlgmr.msra.gmra.mrb[4].mxu1 %vm646_vm1, %v338_v54 }
 0x124   : > { %1384 = vmatprep.mubr.msk.bf16.mxu1 %vm1482_vm0, %v1481_v5 }
 0x1ec   : > { %v687_v55 = vpop.f32.mrb[0].mxu0 }
 0x1ed   : > { %v831_v56 = vmul.f32 0.35355338, %v687_v55  ;;  %v1356_v57 = vpop.f32.mrb[1].mxu0 }
 0x1ee   : > { %v690_v58 = vpop.f32.mrb[2].mxu0  ;;  %v733_v59 = vpop.f32.mrb[0].mxu1 }
 0x1ef   : > { %v832_v60 = vmul.f32 0.35355338, %v733_v59  ;;  %v1357_v61 = vpop.f32.mrb[3].mxu0  ;;  %v1362_v62 = vpop.f32.mrb[1].mxu1  ;;  %v835_v63 = vsel %vm646_vm1, %v831_v56, -inf }
 0x1f0   : > { %v736_v4 = vpop.f32.mrb[2].mxu1  ;;  %836 = vmax.xlane.f32.xlu0 %v835_v63 }
 0x1f1   : > { %v1363_v6 = vpop.f32.mrb[3].mxu1  ;;  %v838_v7 = vsel %vm646_vm1, %v832_v60, -inf }
 0x1f2   : > { %839 = vmax.xlane.f32.xlu1 %v838_v7 }
 0x1f4   : > { %v779_v8 = vpop.f32.mrb[4].mxu0 }
 0x1f5   : > { %v833_v9 = vmul.f32 0.35355338, %v779_v8  ;;  %v1368_v10 = vpop.f32.mrb[5].mxu0 }
 0x1f6   : > { %v782_v11 = vpop.f32.mrb[6].mxu0  ;;  %v825_v12 = vpop.f32.mrb[4].mxu1 }
 0x1f7   : > { %v834_v13 = vmul.f32 0.35355338, %v825_v12  ;;  %v1369_v14 = vpop.f32.mrb[7].mxu0  ;;  %v1374_v15 = vpop.f32.mrb[5].mxu1  ;;  %v841_v16 = vsel %vm646_vm1, %v833_v9, -inf }
 0x1f8   : > { %v828_v18 = vpop.f32.mrb[6].mxu1  ;;  %842 = vmax.xlane.f32.xlu0 %v841_v16 }
 0x1f9   : > { %v1375_v19 = vpop.f32.mrb[7].mxu1  ;;  %v844_v20 = vsel %vm646_vm1, %v834_v13, -inf }
 0x1fc   : > { %845 = vmax.xlane.f32.xlu0 %v844_v20 }
 0x203   : > { %496 = vrot.lane.b32.xlu1 %v1529_v0, %s1486_s24 }
 0x27d   : > { %v837_v21 = vpop.xlane.xlu0 %836 }
 0x27e   : > { %v847_v23 = vsub.f32 %v831_v56, %v837_v21 }
 0x27f   : > { %v840_v24 = vpop.xlane.xlu1 %839 }
 0x280   : > { %v851_v25 = vmul.f32 1.442695, %v847_v23  ;;  %v848_v26 = vsub.f32 %v832_v60, %v840_v24 }
 0x282   : > { %1437 = vpow2.f32 %v851_v25  ;;  %v853_v28 = vmul.f32 1.442695, %v848_v26 }
 0x284   : > { %1439 = vpow2.f32 %v853_v28 }
 0x285   : > { %v843_v0 = vpop.xlane.xlu0 %842 }
 0x286   : > { %v849_v34 = vsub.f32 %v833_v9, %v843_v0 }
 0x288   : > { %v855_v36 = vmul.f32 1.442695, %v849_v34 }
 0x289   : > { %v846_v33 = vpop.xlane.xlu0 %845 }
 0x28a   : > { %v850_v35 = vsub.f32 %v834_v13, %v846_v33  ;;  %1441 = vpow2.f32 %v855_v36 }
 0x28c   : > { %v1615_v29 = vpop.eup %1437  ;;  %v857_v37 = vmul.f32 1.442695, %v850_v35 }
 0x28d   : > { %v859_v30 = vsel %vm646_vm1, %v1615_v29, 0.0 }
 0x28e   : > { %v1619_v31 = vpop.eup %1439  ;;  %860 = vadd.xlane.f32.xlu1 %v859_v30  ;;  %1443 = vpow2.f32 %v857_v37 }
 0x28f   : > { %v862_v32 = vsel %vm646_vm1, %v1619_v31, 0.0 }
 0x290   : > { %863 = vadd.xlane.f32.xlu0 %v862_v32 }
 0x294   : > { %v1626_v38 = vpop.eup %1441 }
 0x295   : > { %v865_v40 = vsel %vm646_vm1, %v1626_v38, 0.0 }
 0x298   : > { %v1628_v39 = vpop.eup %1443 }
 0x29f   : > { %500 = vrot.lane.b32.xlu1 %v1544_v3, %s1486_s24 }
 0x2a3   : > { %502 = vrot.lane.b32.xlu1 %v1538_v2, %s1486_s24  ;;  %v868_v2 = vsel %vm646_vm1, %v1628_v39, 0.0 }
 0x2a6   : > { %498 = vrot.lane.b32.xlu0 %v1535_v1, %s1486_s24  ;;  %v497_v1 = vpop.permute.xlu1 %496 }
 0x2a7   : > { %v507_v44 = vshrl.u32 %v497_v1, 16 }
 0x2c5   : > { %866 = vadd.xlane.f32.xlu0 %v865_v40 }
 0x2c7   : > { %869 = vadd.xlane.f32.xlu1 %v868_v2 }
 0x31b   : > { %v861_v3 = vpop.xlane.xlu1 %860 }
 0x31c   : > { %1445 = vrcp.f32 %v861_v3 }
 0x31d   : > { %v864_v41 = vpop.xlane.xlu0 %863 }
 0x31e   : > { %1447 = vrcp.f32 %v864_v41 }
 0x31f   : > { %v501_v42 = vpop.permute.xlu1 %500 }
 0x320   : > { %v513_v48 = vshrl.u32 %v501_v42, 16 }
 0x321   : > { %v499_v43 = vpop.permute.xlu0 %498 }
 0x322   : > { %v506_v45 = vpack.i.b16 %v499_v43, %v497_v1  ;;  %v508_v46 = vshrl.u32 %v499_v43, 16 }
 0x323   : > { %v503_v47 = vpop.permute.xlu1 %502 }
 0x324   : > { %v509_v49 = vpack.i.b16 %v508_v46, %v507_v44  ;;  %v512_v50 = vpack.i.b16 %v503_v47, %v501_v42  ;;  %v514_v51 = vshrl.u32 %v503_v47, 16  ;;  %v523_v52 = vrot.slane %v506_v45, %v1554_v17 }
 0x326   : > { %v515_v53 = vpack.i.b16 %v514_v51, %v513_v48  ;;  %v531_v54 = vrot.slane %v512_v50, %v1554_v17  ;;  %v557_v55 = vrot.slane %v509_v49, %v1554_v17  ;;  %v1446_v15 = vpop.eup %1445 }
 0x327   : > { %v872_v23 = vmul.f32 %v1446_v15, %v1615_v29 }
 0x328   : > { %v532_v56 = vcombine.low %v523_v52, %v531_v54  ;;  %v533_v57 = vcombine.high %v523_v52, %v531_v54  ;;  %v565_v58 = vrot.slane %v515_v53, %v1554_v17  ;;  %v1448_v19 = vpop.eup %1447 }
 0x329   : > { %v874_v30 = vmul.f32 %v1448_v19, %v1619_v31  ;;  %v879_v37 = vpack.c.bf16 %v872_v23, %v872_v23 }
 0x32a   : > { %v540_v59 = vrot.slane %v532_v56, %v1557_v27  ;;  %v547_v60 = vrot.slane %v533_v57, %v1557_v27  ;;  %v566_v61 = vcombine.low %v557_v55, %v565_v58  ;;  %v567_v62 = vcombine.high %v557_v55, %v565_v58 }
 0x32b   : > { %v880_v40 = vpack.c.bf16 %v874_v30, %v874_v30 }
 0x32c   : > { %v574_v63 = vrot.slane %v566_v61, %v1557_v27  ;;  %v581_v4 = vrot.slane %v567_v62, %v1557_v27  ;;  %v584_v6 = vcombine.low %v540_v59, %v547_v60  ;;  %v1322_v7 = vcombine.high %v540_v59, %v547_v60 }
 0x32e   : > { %v591_v8 = vrot.slane %v584_v6, %v1554_v17  ;;  %v599_v9 = vrot.slane %v1322_v7, %v1554_v17  ;;  %v609_v10 = vcombine.low %v574_v63, %v581_v4  ;;  %v1323_v11 = vcombine.high %v574_v63, %v581_v4 }
 0x330   : > { %v616_v12 = vrot.slane %v609_v10, %v1554_v17  ;;  %v624_v13 = vrot.slane %v1323_v11, %v1554_v17  ;;  %v600_v14 = vcombine.low %v591_v8, %v599_v9 }
 0x332   : > { %v607_v16 = vrot.slane %v600_v14, %v1557_v27  ;;  %v625_v18 = vcombine.low %v616_v12, %v624_v13 }
 0x334   : > { %v632_v20 = vrot.slane %v625_v18, %v1557_v27  ;;  %v608_v21 = vcombine.high %v607_v16, %v1485_v22  ;;  %v637_v25 = vshrl.u32 %v607_v16, 16 }
 0x336   : > { %v636_v24 = vpack.i.b16 %v632_v20, %v607_v16  ;;  %v638_v26 = vshrl.u32 %v632_v20, 16  ;;  %v633_v28 = vcombine.high %v632_v20, %v1485_v22  ;;  %v643_v32 = vshrl.u32 %v608_v21, 16 }
 0x338   : > { %v888_v0 = vsel %vm886_vm2, %v636_v24, 0  ;;  %v639_v33 = vpack.i.b16 %v638_v26, %v637_v25  ;;  %v642_v34 = vpack.i.b16 %v633_v28, %v608_v21  ;;  %v644_v35 = vshrl.u32 %v633_v28, 16 }
 0x339   : > { %1377 = vmatpush3.bf16.msra.mxu0 %v888_v0 }
 0x33a   : > { %v934_v36 = vsel %vm886_vm2, %v639_v33, 0  ;;  %1388 = vmatprep.subr.bf16.mxu0 %v1481_v5  ;;  %v645_v29 = vpack.i.b16 %v644_v35, %v643_v32  ;;  %v980_v22 = vsel %vm886_vm2, %v642_v34, 0 }
 0x33b   : > { %1383 = vmatpush3.bf16.msra.mxu1 %v934_v36 }
 0x33c   : > { %1379 = vmatmul.mubr.msk.bf16.vlgmr.msra.gmra.mrb[8].mxu0 %vm646_vm1, %v879_v37  ;;  %1394 = vmatprep.subr.bf16.mxu1 %v1481_v5  ;;  %v1026_v31 = vsel %vm886_vm2, %v645_v29, 0 }
 0x33d   : > { %1389 = vmatpush3.bf16.msra.mxu0 %v980_v22  ;;  %1390 = vmatprep.mubr.msk.bf16.mxu0 %vm1482_vm0, %v1481_v5 }
 0x33e   : > { %1385 = vmatmul.mubr.msk.bf16.vlgmr.msra.gmra.mrb[8].mxu1 %vm646_vm1, %v880_v40 }
 0x33f   : > { %1395 = vmatpush3.bf16.msra.mxu1 %v1026_v31  ;;  %1396 = vmatprep.mubr.msk.bf16.mxu1 %vm1482_vm0, %v1481_v5 }
 0x352   : > { %v867_v2 = vpop.xlane.xlu0 %866 }
 0x353   : > { %1449 = vrcp.f32 %v867_v2 }
 0x354   : > { %v870_v1 = vpop.xlane.xlu1 %869 }
 0x355   : > { %1451 = vrcp.f32 %v870_v1 }
 0x35d   : > { %v1450_v3 = vpop.eup %1449 }
 0x35e   : > { %v876_v41 = vmul.f32 %v1450_v3, %v1626_v38 }
 0x35f   : > { %v1452_v42 = vpop.eup %1451 }
 0x360   : > { %v878_v43 = vmul.f32 %v1452_v42, %v1628_v39  ;;  %v881_v44 = vpack.c.bf16 %v876_v41, %v876_v41 }
 0x362   : > { %1391 = vmatmul.mubr.msk.bf16.vlgmr.msra.gmra.mrb[12].mxu0 %vm646_vm1, %v881_v44  ;;  %v882_v45 = vpack.c.bf16 %v878_v43, %v878_v43 }
 0x364   : > { %1397 = vmatmul.mubr.msk.bf16.vlgmr.msra.gmra.mrb[12].mxu1 %vm646_vm1, %v882_v45 }
 0x40f   : > { %v924_v46 = vpop.f32.mrb[8].mxu0 }
 0x410   : > { %v1380_v47 = vpop.f32.mrb[9].mxu0 }
 0x411   : > { %v927_v48 = vpop.f32.mrb[10].mxu0  ;;  %v970_v5 = vpop.f32.mrb[8].mxu1 }
 0x412   : > { %v1381_v49 = vpop.f32.mrb[11].mxu0  ;;  %v1386_v50 = vpop.f32.mrb[9].mxu1 }
 0x413   : > { %v973_v51 = vpop.f32.mrb[10].mxu1 }
 0x414   : > { %v1387_v52 = vpop.f32.mrb[11].mxu1 }
 0x435   : > { %v1016_v53 = vpop.f32.mrb[12].mxu0 }
 0x436   : > { %v1068_v54 = vcombine.low %v924_v46, %v1016_v53  ;;  %v1069_v38 = vcombine.high %v924_v46, %v1016_v53  ;;  %v1392_v55 = vpop.f32.mrb[13].mxu0 }
 0x437   : > { %v1019_v56 = vpop.f32.mrb[14].mxu0  ;;  %v1062_v39 = vpop.f32.mrb[12].mxu1 }
 0x438   : > { %v1084_v57 = vcombine.low %v970_v5, %v1062_v39  ;;  %v1085_v58 = vcombine.high %v970_v5, %v1062_v39  ;;  %v1393_v59 = vpop.f32.mrb[15].mxu0  ;;  %v1398_v60 = vpop.f32.mrb[13].mxu1  ;;  %v1076_v62 = vrot.slane %v1068_v54, %v1554_v17  ;;  %v1083_v63 = vrot.slane %v1069_v38, %v1554_v17 }
 0x439   : > { %v1065_v61 = vpop.f32.mrb[14].mxu1 }
 0x43a   : > { %v1092_v4 = vrot.slane %v1084_v57, %v1554_v17  ;;  %v1099_v6 = vrot.slane %v1085_v58, %v1554_v17  ;;  %v1399_v7 = vpop.f32.mrb[15].mxu1 }
 0x43c   : > { %v1100_v8 = vcombine.low %v1076_v62, %v1092_v4  ;;  %v1101_v9 = vcombine.high %v1076_v62, %v1092_v4  ;;  %v1116_v10 = vcombine.low %v1083_v63, %v1099_v6  ;;  %v1117_v11 = vcombine.high %v1083_v63, %v1099_v6 }
 0x43e   : > { %v1108_v12 = vrot.slane %v1100_v8, %v1557_v27  ;;  %v1115_v13 = vrot.slane %v1101_v9, %v1557_v27  ;;  %v1124_v14 = vrot.slane %v1116_v10, %v1557_v27  ;;  %v1131_v15 = vrot.slane %v1117_v11, %v1557_v27 }
 0x440   : > { %v1136_v16 = vcombine.low %v1108_v12, %v1115_v13  ;;  %v1332_v18 = vcombine.high %v1108_v12, %v1115_v13  ;;  %v1152_v19 = vcombine.low %v1124_v14, %v1131_v15  ;;  %v1333_v20 = vcombine.high %v1124_v14, %v1131_v15 }
 0x442   : > { %v1143_v21 = vrot.slane %v1136_v16, %v1554_v17  ;;  %v1151_v23 = vrot.slane %v1332_v18, %v1554_v17  ;;  %v1159_v24 = vrot.slane %v1152_v19, %v1554_v17  ;;  %v1167_v25 = vrot.slane %v1333_v20, %v1554_v17 }
 0x444   : > { %v1169_v26 = vcombine.high %v1143_v21, %v1151_v23  ;;  %v1185_v28 = vcombine.high %v1159_v24, %v1167_v25  ;;  %v1168_v30 = vcombine.low %v1143_v21, %v1151_v23  ;;  %v1184_v32 = vcombine.low %v1159_v24, %v1167_v25 }
 0x446   : > { %v1183_v0 = vrot.slane %v1169_v26, %v1557_v27  ;;  %v1199_v33 = vrot.slane %v1185_v28, %v1557_v27  ;;  %v1176_v34 = vrot.slane %v1168_v30, %v1557_v27  ;;  %v1192_v35 = vrot.slane %v1184_v32, %v1557_v27 }
 0x448   : > { %v1202_v36 = vcombine.low %v1183_v0, %v1199_v33  ;;  %v1201_v37 = vcombine.high %v1176_v34, %v1192_v35  ;;  %v1203_v29 = vcombine.high %v1183_v0, %v1199_v33  ;;  %v1200_v22 = vcombine.low %v1176_v34, %v1192_v35 }
 0x44a   : > { %1209 = vrot.lane.b32.xlu1 %v1202_v36, %s1487_s25  ;;  %1205 = vrot.lane.b32.xlu0 %v1201_v37, %s1488_s26 }
 0x44e   : > { %1213 = vrot.lane.b32.xlu0 %v1203_v29, %s1489_s27 }
 0x4bc   : > { %v1206_v17 = vpop.permute.xlu0 %1205  ;;  %v1210_v40 = vpop.permute.xlu1 %1209 }
 0x4bd   : > { %v1216_v31 = vsel %vm646_vm1, %v1200_v22, %v1206_v17 }
 0x4be   : > { %v1218_v1 = vsel %vm1217_vm3, %v1216_v31, %v1210_v40 }
 0x4c0   : > { %v1214_v2 = vpop.permute.xlu0 %1213 }
 0x4c1   : > { %v1220_v27 = vsel %vm1219_vm4, %v1218_v1, %v1214_v2 }
 0x4c2   : > { %v1221_v3 = vpack.c.bf16 %v1220_v27, %v1220_v27 }
 0x4c4   : > { %1223 = vst.msk [vmem:[%s186_s30] sm:$0xf] %vm1222_vm5, %v1221_v3 }
 0x4c5 PF: > { %s12_s11 = sadd.s32 1, %s1475_s11   ;;  %s1701_s9 = smov %s1471_s10 }
 0x4c6   : > { %p9_p5 = scmp.ge.s32.totalorder %s12_s11, 4   ;;  %s1702_s10 = smov %s1704_s12 }
 0x4c8   :  { %11 = sbr.rel (!%p9_p5) target bundleno = 2 (0x2), region = 61 }

// kernel: _lambda_.66
= control target key start
LH: loop header
LB: loop body
LE: loop exit
PB: predicated region body
PF: predicated region fallthrough
CT: control target
= control target key end

     0   :  { %vm22_vm0 = vcmask 261120   ;;  %v163_v0 = vmov 0.0   ;;  %vm164_vm1 = vmmov 0   ;;  %vm127_vm2 = vcmask 257024   ;;  %s216_s1 = inlined_call_operand.vmem [shape: bf16[32,32], index: 1, kind: input, shape index: {}]   ;;  %s217_s0 = inlined_call_operand.vmem [shape: bf16[16,32], index: 0, kind: input, shape index: {}]   ;;  %s218_s3 = inlined_call_operand.vmem [shape: bf16[16,32], index: 3, kind: input, shape index: {}]   ;;  %s219_s2 = inlined_call_operand.vmem [shape: f32[1,32], index: 2, kind: input, shape index: {}]   ;;  %s220_s4 = inlined_call_operand.vmem [shape: bf16[16,32], index: 4, kind: output, shape index: {}]  }
   0x1   :  { %150 = vmatprep.subr.bf16.mxu0 %v163_v0  ;;  %v160_v1 = vld [vmem:[%s216_s1] sm:$0xff]   ;;  %154 = vmatprep.mubr.msk.bf16.mxu0 %vm164_vm1, %v163_v0  ;;  %23 = vst.msk [vmem:[#allocation2] sm:$0xff] %vm22_vm0, %v163_v0  ;;  %24 = vst.msk [vmem:[#allocation2 + $0x8] sm:$0xff] %vm22_vm0, %v163_v0  ;;  %v161_v2 = vld [vmem:[%s216_s1 + $0x8] sm:$0xff]  }
   0x2   :  { %151 = vmatpush3.bf16.msra.mxu0 %v160_v1  ;;  %v162_v3 = vld [vmem:[%s217_s0] sm:$0xff]  }
   0x3   :  { %152 = vmatprep.subr.bf16.mxu0 %v163_v0  ;;  %v144_v12 = vld [vmem:[%s218_s3] sm:$0xff]  }
   0x4   :  { %v138_v13 = vld [vmem:[%s219_s2] ss:$0 sm:$0xff]  ;;  %v145_v14 = vunpack.c.l.bf16 %v144_v12  ;;  %v146_v17 = vunpack.c.h.bf16 %v144_v12 }
   0x6   :  { %153 = vmatpush3.bf16.msra.mxu0 %v161_v2 }
   0x8   :  { %v31_v4 = vld [vmem:[#allocation2] sm:$0xff]  ;;  %v32_v6 = vld [vmem:[#allocation2 + $0x8] sm:$0xff] }
   0x9   :  { %155 = vmatmul.mubr.msk.bf16.vlgmr.msra.gmra.mrb[0].mxu0 %vm22_vm0, %v162_v3 }
  0xdc   :  { %v88_v5 = vpop.f32.mrb[0].mxu0 }
  0xdd   :  { %v95_v7 = vadd.f32 %v88_v5, %v31_v4  ;;  %v156_v8 = vpop.f32.mrb[1].mxu0 }
  0xde   :  { %v91_v9 = vpop.f32.mrb[2].mxu0 }
  0xdf   :  { %97 = vst.msk [vmem:[#allocation2] sm:$0xff] %vm22_vm0, %v95_v7  ;;  %v96_v10 = vadd.f32 %v91_v9, %v32_v6  ;;  %v157_v11 = vpop.f32.mrb[3].mxu0 }
  0xe1   :  { %98 = vst.msk [vmem:[#allocation2 + $0x8] sm:$0xff] %vm22_vm0, %v96_v10 }
  0xe6   :  { %v102_v15 = vld [vmem:[#allocation2] sm:$0xff] }
  0xe7   :  { %v111_v16 = vadd.f32 %v138_v13, %v102_v15 }
  0xe8   :  { %v103_v18 = vld [vmem:[#allocation2 + $0x8] sm:$0xff] }
  0xe9   :  { %v117_v19 = vadd.f32 %v145_v14, %v111_v16  ;;  %v112_v20 = vadd.f32 %v138_v13, %v103_v18 }
  0xeb   :  { %v141_v21 = vpack.c.bf16 %v117_v19, %v117_v19  ;;  %v118_v22 = vadd.f32 %v146_v17, %v112_v20 }
  0xed   :  { %128 = vst.msk [vmem:[%s220_s4] sm:$0xf] %vm127_vm2, %v141_v21  ;;  %v142_v23 = vpack.c.bf16 %v118_v22, %v118_v22 }
  0xef   :  { %129 = vst.msk [vmem:[%s220_s4 + $0x4] sm:$0xf] %vm127_vm2, %v142_v23 }

// kernel: _lambda_.67
= control target key start
LH: loop header
LB: loop body
LE: loop exit
PB: predicated region body
PF: predicated region fallthrough
CT: control target
= control target key end

     0   :  { %vm35_vm0 = vcmask 261120   ;;  %v396_v19 = vmov 0.0   ;;  %vm397_vm1 = vmmov 0   ;;  %vm306_vm2 = vcmask 257024   ;;  %s499_s0 = inlined_call_operand.vmem [shape: bf16[16,32], index: 0, kind: input, shape index: {}]   ;;  %s500_s6 = inlined_call_operand.vmem [shape: f32[1,32], index: 6, kind: input, shape index: {}]   ;;  %s501_s3 = inlined_call_operand.vmem [shape: bf16[32,128], index: 3, kind: input, shape index: {}]   ;;  %s502_s1 = inlined_call_operand.vmem [shape: f32[1,32], index: 1, kind: input, shape index: {}]   ;;  %s503_s2 = inlined_call_operand.vmem [shape: f32[1,32], index: 2, kind: input, shape index: {}]   ;;  %s504_s5 = inlined_call_operand.vmem [shape: bf16[128,32], index: 5, kind: input, shape index: {}]   ;;  %s505_s4 = inlined_call_operand.vmem [shape: f32[1,128], index: 4, kind: input, shape index: {}]   ;;  %s506_s7 = inlined_call_operand.vmem [shape: bf16[16,32], index: 7, kind: output, shape index: {}]  }
   0x1   :  { %v333_v0 = vld [vmem:[%s499_s0] sm:$0xff]   ;;  %348 = vmatprep.subr.bf16.mxu0 %v396_v19  ;;  %356 = vmatprep.subr.bf16.mxu1 %v396_v19  ;;  %v379_v20 = vld [vmem:[%s501_s3 + $0x8] sm:$0xff]   ;;  %v382_v41 = vld [vmem:[%s504_s5 + $0x10] sm:$0xff]  }
   0x2   :  { %v315_v1 = vld [vmem:[%s500_s6] ss:$0 sm:$0xff]  ;;  %v334_v2 = vunpack.c.l.bf16 %v333_v0  ;;  %v335_v3 = vunpack.c.h.bf16 %v333_v0  ;;  %352 = vmatprep.mubr.msk.bf16.mxu0 %vm397_vm1, %v396_v19  ;;  %372 = vmatprep.mubr.msk.bf16.mxu1 %vm397_vm1, %v396_v19  ;;  %v381_v40 = vld [vmem:[%s504_s5 + $0x8] sm:$0xff]   ;;  %v383_v42 = vld [vmem:[%s504_s5 + $0x18] sm:$0xff]  }
   0x3   :  { %v378_v18 = vld [vmem:[%s501_s3] sm:$0xff]   ;;  %v385_v44 = vld [vmem:[%s504_s5 + $0x28] sm:$0xff]   ;;  %v386_v45 = vld [vmem:[%s504_s5 + $0x30] sm:$0xff]  }
   0x4   :  { %v36_v4 = vsel %vm35_vm0, %v334_v2, 0.0  ;;  %v90_v5 = vadd.f32 %v334_v2, %v315_v1  ;;  %v91_v6 = vadd.f32 %v335_v3, %v315_v1  ;;  %v39_v7 = vsel %vm35_vm0, %v335_v3, 0.0  ;;  %349 = vmatpush3.bf16.msra.mxu0 %v378_v18  ;;  %v313_v29 = vld [vmem:[%s502_s1] ss:$0 sm:$0xff]  ;;  %v387_v46 = vld [vmem:[%s504_s5 + $0x38] sm:$0xff]  }
   0x5   :  { %37 = vadd.xlane.f32.xlu0 %v36_v4  ;;  %350 = vmatprep.subr.bf16.mxu0 %v396_v19  ;;  %v314_v33 = vld [vmem:[%s503_s2] ss:$0 sm:$0xff] }
   0x6   :  { %92 = vst.msk [vmem:[#allocation2] sm:$0xff] %vm35_vm0, %v90_v5  ;;  %93 = vst.msk [vmem:[#allocation2 + $0x8] sm:$0xff] %vm35_vm0, %v91_v6  ;;  %v380_v39 = vld [vmem:[%s504_s5] sm:$0xff]  }
   0x7   :  { %357 = vmatpush3.bf16.msra.mxu1 %v380_v39  ;;  %v384_v43 = vld [vmem:[%s504_s5 + $0x20] sm:$0xff]  }
   0x8   :  { %351 = vmatpush3.bf16.msra.mxu0 %v379_v20  ;;  %358 = vmatprep.subr.bf16.mxu1 %v396_v19  ;;  %v316_v47 = vld [vmem:[%s505_s4] ss:$0 sm:$0xff] }
   0x9   :  { %40 = vadd.xlane.f32.xlu0 %v39_v7 }
   0xb   :  { %359 = vmatpush3.bf16.msra.mxu1 %v381_v40 }
   0xc   :  { %360 = vmatprep.subr.bf16.mxu1 %v396_v19 }
   0xf   :  { %361 = vmatpush3.bf16.msra.mxu1 %v382_v41 }
  0x10   :  { %362 = vmatprep.subr.bf16.mxu1 %v396_v19 }
  0x13   :  { %363 = vmatpush3.bf16.msra.mxu1 %v383_v42 }
  0x14   :  { %364 = vmatprep.subr.bf16.mxu1 %v396_v19 }
  0x17   :  { %365 = vmatpush3.bf16.msra.mxu1 %v384_v43 }
  0x18   :  { %366 = vmatprep.subr.bf16.mxu1 %v396_v19 }
  0x1b   :  { %367 = vmatpush3.bf16.msra.mxu1 %v385_v44 }
  0x1c   :  { %368 = vmatprep.subr.bf16.mxu1 %v396_v19 }
  0x1f   :  { %369 = vmatpush3.bf16.msra.mxu1 %v386_v45 }
  0x20   :  { %370 = vmatprep.subr.bf16.mxu1 %v396_v19 }
  0x23   :  { %371 = vmatpush3.bf16.msra.mxu1 %v387_v46 }
  0x92   :  { %v38_v8 = vpop.xlane.xlu0 %37 }
  0x93   :  { %v43_v9 = vmul.f32 0.03125, %v38_v8 }
  0x95   :  { %v45_v10 = vsub.f32 %v334_v2, %v43_v9  ;;  %v181_v9 = vld [vmem:[#allocation2] sm:$0xff] }
  0x96   :  { %v41_v11 = vpop.xlane.xlu0 %40 }
  0x97   :  { %v44_v12 = vmul.f32 0.03125, %v41_v11  ;;  %v47_v13 = vmul.f32 %v45_v10, %v45_v10  ;;  %v182_v11 = vld [vmem:[#allocation2 + $0x8] sm:$0xff] }
  0x99   :  { %v46_v14 = vsub.f32 %v335_v3, %v44_v12  ;;  %v49_v15 = vsel %vm35_vm0, %v47_v13, 0.0 }
  0x9a   :  { %50 = vadd.xlane.f32.xlu1 %v49_v15 }
  0x9b   :  { %v48_v16 = vmul.f32 %v46_v14, %v46_v14 }
  0x9d   :  { %v52_v17 = vsel %vm35_vm0, %v48_v16, 0.0 }
  0x9e   :  { %53 = vadd.xlane.f32.xlu1 %v52_v17 }
 0x127   :  { %v51_v21 = vpop.xlane.xlu1 %50 }
 0x128   :  { %v55_v22 = vmul.f32 0.03125, %v51_v21 }
 0x12a   :  { %v57_v23 = vadd.f32 1e-05, %v55_v22 }
 0x12b   :  { %v54_v24 = vpop.xlane.xlu1 %53 }
 0x12c   :  { %388 = vrsqrt.f32 %v57_v23  ;;  %v56_v25 = vmul.f32 0.03125, %v54_v24 }
 0x12e   :  { %v58_v26 = vadd.f32 1e-05, %v56_v25 }
 0x130   :  { %390 = vrsqrt.f32 %v58_v26 }
 0x136   :  { %v389_v27 = vpop.eup %388 }
 0x137   :  { %v61_v28 = vmul.f32 %v389_v27, %v45_v10 }
 0x139   :  { %v70_v31 = vmul.f32 %v313_v29, %v61_v28 }
 0x13a   :  { %v391_v30 = vpop.eup %390 }
 0x13b   :  { %v62_v32 = vmul.f32 %v391_v30, %v46_v14  ;;  %v79_v35 = vadd.f32 %v314_v33, %v70_v31 }
 0x13d   :  { %v71_v34 = vmul.f32 %v313_v29, %v62_v32 }
 0x13f   :  { %v80_v36 = vadd.f32 %v314_v33, %v71_v34 }
 0x141   :  { %v81_v37 = vpack.c.bf16 %v80_v36, %v79_v35 }
 0x143   :  { %82 = vst.msk [vmem:[#allocation3] sm:$0xff] %vm35_vm0, %v81_v37 }
 0x14a   :  { %v94_v38 = vld [vmem:[#allocation3] sm:$0xff] }
 0x14b   :  { %353 = vmatmul.mubr.msk.bf16.vlgmr.msra.gmra.mrb[0].mxu0 %vm35_vm0, %v94_v38 }
 0x21e   :  { %v156_v48 = vpop.f32.mrb[0].mxu0 }
 0x21f   :  { %v157_v49 = vadd.f32 %v316_v47, %v156_v48  ;;  %v354_v50 = vpop.f32.mrb[1].mxu0 }
 0x220   :  { %v159_v51 = vpop.f32.mrb[2].mxu0 }
 0x221   :  { %v163_v52 = vmul.f32 %v157_v49, %v157_v49  ;;  %v160_v53 = vadd.f32 %v316_v47, %v159_v51  ;;  %v355_v54 = vpop.f32.mrb[3].mxu0 }
 0x223   :  { %v165_v55 = vmul.f32 %v163_v52, %v157_v49  ;;  %v164_v56 = vmul.f32 %v160_v53, %v160_v53 }
 0x225   :  { %v167_v57 = vmul.f32 0.044715, %v165_v55  ;;  %v166_v58 = vmul.f32 %v164_v56, %v160_v53 }
 0x227   :  { %v169_v59 = vadd.f32 %v167_v57, %v157_v49  ;;  %v168_v60 = vmul.f32 0.044715, %v166_v58 }
 0x229   :  { %v171_v61 = vmul.f32 0.7978846, %v169_v59  ;;  %v170_v62 = vadd.f32 %v168_v60, %v160_v53 }
 0x22b   :  { %392 = vtanh.f32 %v171_v61  ;;  %v172_v63 = vmul.f32 0.7978846, %v170_v62 }
 0x22d   :  { %394 = vtanh.f32 %v172_v63 }
 0x235   :  { %v393_v0 = vpop.eup %392 }
 0x236   :  { %v175_v1 = vadd.f32 1.0, %v393_v0 }
 0x237   :  { %v395_v2 = vpop.eup %394 }
 0x238   :  { %v176_v3 = vadd.f32 1.0, %v395_v2  ;;  %v177_v4 = vmul.f32 0.5, %v175_v1 }
 0x23a   :  { %v178_v5 = vmul.f32 0.5, %v176_v3  ;;  %v179_v6 = vmul.f32 %v177_v4, %v157_v49 }
 0x23c   :  { %v180_v7 = vmul.f32 %v178_v5, %v160_v53 }
 0x23e   :  { %v183_v8 = vpack.c.bf16 %v180_v7, %v179_v6 }
 0x240   :  { %373 = vmatmul.mubr.bf16.vlgmr.msra.gmra.mrb[0].mxu1 %v183_v8 }
 0x313   :  { %v282_v10 = vpop.f32.mrb[0].mxu1 }
 0x314   :  { %v289_v12 = vadd.f32 %v282_v10, %v181_v9  ;;  %v374_v13 = vpop.f32.mrb[1].mxu1 }
 0x315   :  { %v285_v14 = vpop.f32.mrb[2].mxu1 }
 0x316   :  { %291 = vst.msk [vmem:[#allocation2] sm:$0xff] %vm35_vm0, %v289_v12  ;;  %v290_v15 = vadd.f32 %v285_v14, %v182_v11  ;;  %v375_v16 = vpop.f32.mrb[3].mxu1 }
 0x318   :  { %292 = vst.msk [vmem:[#allocation2 + $0x8] sm:$0xff] %vm35_vm0, %v290_v15 }
 0x31d   :  { %v296_v17 = vld [vmem:[#allocation2] sm:$0xff] }
 0x31e   :  { %v330_v18 = vpack.c.bf16 %v296_v17, %v296_v17 }
 0x31f   :  { %v297_v19 = vld [vmem:[#allocation2 + $0x8] sm:$0xff] }
 0x320   :  { %307 = vst.msk [vmem:[%s506_s7] sm:$0xf] %vm306_vm2, %v330_v18  ;;  %v331_v20 = vpack.c.bf16 %v297_v19, %v297_v19 }
 0x322   :  { %308 = vst.msk [vmem:[%s506_s7 + $0x4] sm:$0xf] %vm306_vm2, %v331_v20 }

// kernel: _lambda_.68
= control target key start
LH: loop header
LB: loop body
LE: loop exit
PB: predicated region body
PF: predicated region fallthrough
CT: control target
= control target key end

     0   :  { %vm18_vm0 = vcmask 261120   ;;  %vm72_vm1 = vcmask 257024   ;;  %s132_s0 = inlined_call_operand.vmem [shape: bf16[16,32], index: 0, kind: input, shape index: {}]   ;;  %s133_s1 = inlined_call_operand.vmem [shape: f32[1,32], index: 1, kind: input, shape index: {}]   ;;  %s134_s2 = inlined_call_operand.vmem [shape: f32[1,32], index: 2, kind: input, shape index: {}]   ;;  %s135_s3 = inlined_call_operand.vmem [shape: bf16[16,32], index: 3, kind: output, shape index: {}]  }
   0x1   :  { %v86_v0 = vld [vmem:[%s132_s0] sm:$0xff]  }
   0x2   :  { %v87_v1 = vunpack.c.l.bf16 %v86_v0  ;;  %v88_v2 = vunpack.c.h.bf16 %v86_v0  ;;  %v79_v22 = vld [vmem:[%s133_s1] ss:$0 sm:$0xff] }
   0x3   :  { %v80_v24 = vld [vmem:[%s134_s2] ss:$0 sm:$0xff] }
   0x4   :  { %v19_v3 = vsel %vm18_vm0, %v87_v1, 0.0  ;;  %v22_v4 = vsel %vm18_vm0, %v88_v2, 0.0 }
   0x5   :  { %20 = vadd.xlane.f32.xlu0 %v19_v3 }
   0x9   :  { %23 = vadd.xlane.f32.xlu0 %v22_v4 }
  0x92   :  { %v21_v5 = vpop.xlane.xlu0 %20 }
  0x93   :  { %v26_v6 = vmul.f32 0.03125, %v21_v5 }
  0x95   :  { %v28_v7 = vsub.f32 %v87_v1, %v26_v6 }
  0x96   :  { %v24_v8 = vpop.xlane.xlu0 %23 }
  0x97   :  { %v27_v9 = vmul.f32 0.03125, %v24_v8  ;;  %v30_v10 = vmul.f32 %v28_v7, %v28_v7 }
  0x99   :  { %v29_v11 = vsub.f32 %v88_v2, %v27_v9  ;;  %v32_v12 = vsel %vm18_vm0, %v30_v10, 0.0 }
  0x9a   :  { %33 = vadd.xlane.f32.xlu1 %v32_v12 }
  0x9b   :  { %v31_v13 = vmul.f32 %v29_v11, %v29_v11 }
  0x9d   :  { %v35_v14 = vsel %vm18_vm0, %v31_v13, 0.0 }
  0x9e   :  { %36 = vadd.xlane.f32.xlu1 %v35_v14 }
 0x127   :  { %v34_v15 = vpop.xlane.xlu1 %33 }
 0x128   :  { %v38_v16 = vmul.f32 0.03125, %v34_v15 }
 0x12a   :  { %v40_v17 = vadd.f32 1e-05, %v38_v16 }
 0x12b   :  { %v37_v18 = vpop.xlane.xlu1 %36 }
 0x12c   :  { %89 = vrsqrt.f32 %v40_v17  ;;  %v39_v19 = vmul.f32 0.03125, %v37_v18 }
 0x12e   :  { %v41_v20 = vadd.f32 1e-05, %v39_v19 }
 0x130   :  { %91 = vrsqrt.f32 %v41_v20 }
 0x136   :  { %v90_v21 = vpop.eup %89 }
 0x137   :  { %v44_v23 = vmul.f32 %v90_v21, %v28_v7 }
 0x139   :  { %v53_v25 = vmul.f32 %v79_v22, %v44_v23 }
 0x13a   :  { %v92_v26 = vpop.eup %91 }
 0x13b   :  { %v62_v27 = vadd.f32 %v80_v24, %v53_v25  ;;  %v45_v28 = vmul.f32 %v92_v26, %v29_v11 }
 0x13d   :  { %v83_v29 = vpack.c.bf16 %v62_v27, %v62_v27  ;;  %v54_v30 = vmul.f32 %v79_v22, %v45_v28 }
 0x13f   :  { %73 = vst.msk [vmem:[%s135_s3] sm:$0xf] %vm72_vm1, %v83_v29  ;;  %v63_v31 = vadd.f32 %v80_v24, %v54_v30 }
 0x141   :  { %v84_v32 = vpack.c.bf16 %v63_v31, %v63_v31 }
 0x143   :  { %74 = vst.msk [vmem:[%s135_s3 + $0x4] sm:$0xf] %vm72_vm1, %v84_v32 }

// kernel: _lambda_.69
= control target key start
LH: loop header
LB: loop body
LE: loop exit
PB: predicated region body
PF: predicated region fallthrough
CT: control target
= control target key end

     0   :  { %vm19_vm0 = vcmask 523264   ;;  %v151_v0 = vmov 0.0   ;;  %vm152_vm1 = vmmov 0   ;;  %vm47_vm2 = vcmask 261120   ;;  %s195_s1 = inlined_call_operand.vmem [shape: bf16[32,64], index: 1, kind: input, shape index: {}]   ;;  %s196_s0 = inlined_call_operand.vmem [shape: bf16[16,32], index: 0, kind: input, shape index: {}]   ;;  %s197_s2 = inlined_call_operand.vmem [shape: f32[1,64], index: 2, kind: input, shape index: {}]   ;;  %s198_s3 = inlined_call_operand.vmem [shape: bf16[16,64], index: 3, kind: output, shape index: {}]  }
   0x1   :  { %138 = vmatprep.subr.bf16.mxu0 %v151_v0  ;;  %v148_v1 = vld [vmem:[%s195_s1] sm:$0xff]   ;;  %142 = vmatprep.mubr.msk.bf16.mxu0 %vm152_vm1, %v151_v0  ;;  %20 = vst.msk [vmem:[#allocation2] sm:$0xff] %vm19_vm0, %v151_v0  ;;  %21 = vst.msk [vmem:[#allocation2 + $0x8] sm:$0xff] %vm19_vm0, %v151_v0  ;;  %v149_v2 = vld [vmem:[%s195_s1 + $0x8] sm:$0xff]   ;;  %vm119_vm3 = vcmask 519168  }
   0x2   :  { %139 = vmatpush3.bf16.msra.mxu0 %v148_v1  ;;  %v150_v3 = vld [vmem:[%s196_s0] sm:$0xff]  }
   0x3   :  { %140 = vmatprep.subr.bf16.mxu0 %v151_v0  ;;  %v130_v12 = vld [vmem:[%s197_s2] ss:$0 sm:$0xff] }
   0x6   :  { %141 = vmatpush3.bf16.msra.mxu0 %v149_v2 }
   0x8   :  { %v28_v4 = vld [vmem:[#allocation2] sm:$0xff]  ;;  %v29_v6 = vld [vmem:[#allocation2 + $0x8] sm:$0xff] }
   0x9   :  { %143 = vmatmul.mubr.msk.bf16.vlgmr.msra.gmra.mrb[0].mxu0 %vm47_vm2, %v150_v3 }
  0xdc   :  { %v85_v5 = vpop.f32.mrb[0].mxu0 }
  0xdd   :  { %v92_v7 = vadd.f32 %v85_v5, %v28_v4  ;;  %v144_v8 = vpop.f32.mrb[1].mxu0 }
  0xde   :  { %v88_v9 = vpop.f32.mrb[2].mxu0 }
  0xdf   :  { %95 = vst.msk [vmem:[#allocation2] sm:$0xff] %vm19_vm0, %v92_v7  ;;  %v93_v10 = vadd.f32 %v88_v9, %v29_v6  ;;  %v145_v11 = vpop.f32.mrb[3].mxu0 }
  0xe1   :  { %96 = vst.msk [vmem:[#allocation2 + $0x8] sm:$0xff] %vm19_vm0, %v93_v10 }
  0xe6   :  { %v100_v13 = vld [vmem:[#allocation2] sm:$0xff] }
  0xe7   :  { %v109_v14 = vadd.f32 %v130_v12, %v100_v13 }
  0xe8   :  { %v101_v15 = vld [vmem:[#allocation2 + $0x8] sm:$0xff] }
  0xe9   :  { %v133_v16 = vpack.c.bf16 %v109_v14, %v109_v14  ;;  %v110_v17 = vadd.f32 %v130_v12, %v101_v15 }
  0xeb   :  { %120 = vst.msk [vmem:[%s198_s3] sm:$0xf] %vm119_vm3, %v133_v16  ;;  %v134_v18 = vpack.c.bf16 %v110_v17, %v110_v17 }
  0xed   :  { %121 = vst.msk [vmem:[%s198_s3 + $0x4] sm:$0xf] %vm119_vm3, %v134_v18 }

// kernel: _lambda_.79
= control target key start
LH: loop header
LB: loop body
LE: loop exit
PB: predicated region body
PF: predicated region fallthrough
CT: control target
= control target key end

     0   :  { %vm66_vm0 = vcmask 261120   ;;  %s385_s0 = inlined_call_operand.vmem [shape: bf16[32,32], index: 0, kind: input, shape index: {}]   ;;  %s386_s1 = inlined_call_operand.vmem [shape: bf16[32,4], index: 1, kind: input, shape index: {}]   ;;  %s387_s2 = inlined_call_operand.vmem [shape: f32[1,4], index: 2, kind: input, shape index: {}]   ;;  %s388_s3 = inlined_call_operand.vmem [shape: f32[32,4], index: 3, kind: input, shape index: {}]   ;;  %s389_s4 = inlined_call_operand.vmem [shape: f32[32,1], index: 4, kind: input, shape index: {}]   ;;  %s390_s5 = inlined_call_operand.hbm [shape: f32[1,1], index: 5, kind: output, shape index: {}]  }
   0x1   :  { %v259_v0 = vld [vmem:[%s386_s1] sm:$0xff]   ;;  %v260_v1 = vld [vmem:[%s386_s1 + $0x8] sm:$0xff]  }
   0x2   :  { %249 = vmatprep.subr.bf16.mxu0 %v259_v0  ;;  %v261_v2 = vld [vmem:[%s385_s0] sm:$0xff]  }
   0x3   :  { %250 = vmatpush3.bf16.msra.mxu0 %v259_v0  ;;  %253 = vmatprep.mubr.msk.bf16.mxu0 %vm66_vm0, %v261_v2 }
   0x4   :  { %251 = vmatprep.subr.bf16.mxu0 %v260_v1 }
   0x5   :  { %10 = vsyncpa [#allocation5], 0  ;;  %v262_v3 = vld [vmem:[%s385_s0 + $0x8] sm:$0xff]   ;;  %v238_v4 = vld [vmem:[%s387_s2] ss:$0 sm:$0xff]  ;;  %vm134_vm1 = vcmask 31744  }
   0x6   :  { %v124_v6 = vld [vmem:[%s388_s3 + $0x10] sm:$0xff]  ;;  %v122_v9 = vld [vmem:[%s388_s3] sm:$0xff]  ;;  %v125_v12 = vld [vmem:[%s388_s3 + $0x18] sm:$0xff]  ;;  %vm179_vm2 = vcmask 7168   ;;  %vm26_vm3 = vcmask 0   ;;  %v289_v43 = vmov 0.0  }
   0x7   :  { %252 = vmatpush3.bf16.msra.mxu0 %v260_v1  ;;  %v123_v15 = vld [vmem:[%s388_s3 + $0x8] sm:$0xff]  ;;  %v153_v29 = vld [vmem:[%s389_s4 + $0x10] sm:$0xff]  ;;  %v151_v30 = vld [vmem:[%s389_s4] sm:$0xff]  ;;  %27 = vst.msk [vmem:[#allocation2] sm:$0x1] %vm26_vm3, %v289_v43 }
   0x8   :  { %v152_v31 = vld [vmem:[%s389_s4 + $0x8] sm:$0xff]  ;;  %v204_v32 = vsel %vm179_vm2, %v153_v29, 0.0  ;;  %v201_v33 = vsel %vm179_vm2, %v151_v30, 0.0  ;;  %v154_v36 = vld [vmem:[%s389_s4 + $0x18] sm:$0xff]  ;;  %28 = vst.msk [vmem:[#allocation3] sm:$0x1] %vm26_vm3, %v289_v43 }
   0x9   :  { %v202_v34 = vsel %vm179_vm2, %v152_v31, 0.0  ;;  %v206_v38 = vsel %vm179_vm2, %v154_v36, 0.0  ;;  %s290_s4 = smov [#allocation4]  }
   0xa   :  { %254 = vmatmul.mubr.msk.bf16.vlgmr.msra.gmra.mrb[0].mxu0 %vm66_vm0, %v262_v3  ;;  %v203_v35 = vadd.f32 %v202_v34, %v201_v33  ;;  %s230_s15 = sshll.u32 %s290_s4, 4  ;;  %s231_s15 = int_to_ptr.vmem [resolvable:$true] %s230_s15 }
   0xb   :  { %s265_s16 = scalar_lea.vmem %s231_s15, 16  ;;  %s269_s17 = scalar_lea.vmem %s231_s15, 32 }
   0xc   :  { %v205_v37 = vadd.f32 %v204_v32, %v203_v35  ;;  %p266_p0 = scmp.ne.s32.totalorder %s231_s15, %s265_s16  ;;  %p270_p1 = scmp.lt.s32.totalorder %s231_s15, %s231_s15 }
   0xd   :  { %p271_p2 = scmp.lt.s32.totalorder %s269_s17, %s265_s16 }
   0xe   :  { %v207_v39 = vadd.f32 %v206_v38, %v205_v37 }
   0xf   :  { %v196_v47 = vld [vmem:[#allocation3] sm:$0x1]  ;;  %p272_p3 = por %p271_p2, %p270_p1 }
  0x10   :  { %v208_v40 = vrot.slane %v207_v39, 4 }
  0x11   :  { %p273_p4 = pnand %p272_p3, %p266_p0 }
  0x12   :  { %v209_v41 = vadd.f32 %v208_v40, %v207_v39 }
  0x14   :  { %v210_v42 = vrot.slane %v209_v41, 2 }
  0x16   :  { %v211_v44 = vadd.f32 %v210_v42, %v209_v41 }
  0x18   :  { %v212_v45 = vrot.slane %v211_v44, 1 }
  0x1a   :  { %v213_v46 = vadd.f32 %v212_v45, %v211_v44 }
  0x1c   :  { %v214_v48 = vadd.f32 %v213_v46, %v196_v47 }
  0x1e   :  { %215 = vst.msk [vmem:[#allocation3] sm:$0x1] %vm26_vm3, %v214_v48 }
  0xdd   :  { %v255_v5 = vpop.f32.mrb[0].mxu0 }
  0xde   :  { %v116_v7 = vadd.f32 %v255_v5, %v238_v4  ;;  %v107_v8 = vpop.f32.mrb[1].mxu0 }
  0xdf   :  { %v108_v10 = vadd.f32 %v238_v4, %v107_v8  ;;  %v256_v11 = vpop.f32.mrb[2].mxu0  ;;  %v220_v8 = vld [vmem:[#allocation3] sm:$0x1] }
  0xe0   :  { %v119_v13 = vadd.f32 %v256_v11, %v238_v4  ;;  %v110_v14 = vpop.f32.mrb[3].mxu0  ;;  %v128_v16 = vsub.f32 %v116_v7, %v124_v6  ;;  %263 = vrcp.f32 %v220_v8 }
  0xe1   :  { %v111_v17 = vadd.f32 %v238_v4, %v110_v14  ;;  %v126_v18 = vsub.f32 %v108_v10, %v122_v9  ;;  %v170_v10 = vld [vmem:[#allocation2] sm:$0x1] }
  0xe2   :  { %v129_v19 = vsub.f32 %v119_v13, %v125_v12  ;;  %v132_v20 = vmul.f32 %v128_v16, %v128_v16 }
  0xe3   :  { %v127_v21 = vsub.f32 %v111_v17, %v123_v15  ;;  %v130_v22 = vmul.f32 %v126_v18, %v126_v18 }
  0xe4   :  { %v141_v23 = vsel %vm134_vm1, %v132_v20, 0.0  ;;  %v133_v24 = vmul.f32 %v129_v19, %v129_v19 }
  0xe5   :  { %142 = vadd.xlane.f32.xlu1 %v141_v23  ;;  %v135_v25 = vsel %vm134_vm1, %v130_v22, 0.0  ;;  %v131_v26 = vmul.f32 %v127_v21, %v127_v21 }
  0xe6   :  { %136 = vadd.xlane.f32.xlu0 %v135_v25  ;;  %v144_v27 = vsel %vm134_vm1, %v133_v24, 0.0 }
  0xe7   :  { %v138_v28 = vsel %vm134_vm1, %v131_v26, 0.0 }
  0xe9   :  { %145 = vadd.xlane.f32.xlu1 %v144_v27 }
  0xea   :  { %139 = vadd.xlane.f32.xlu0 %v138_v28  ;;  %v264_v13 = vpop.eup %263 }
 0x172   :  { %v143_v49 = vpop.xlane.xlu1 %142 }
 0x173   :  { %v137_v50 = vpop.xlane.xlu0 %136  ;;  %v149_v52 = vmul.f32 0.25, %v143_v49 }
 0x174   :  { %v147_v51 = vmul.f32 0.25, %v137_v50 }
 0x175   :  { %v173_v58 = vmul.f32 %v153_v29, %v149_v52 }
 0x176   :  { %v146_v53 = vpop.xlane.xlu1 %145  ;;  %v171_v55 = vmul.f32 %v151_v30, %v147_v51 }
 0x177   :  { %v140_v54 = vpop.xlane.xlu0 %139  ;;  %v150_v56 = vmul.f32 0.25, %v146_v53  ;;  %v183_v0 = vsel %vm179_vm2, %v173_v58, 0.0 }
 0x178   :  { %v148_v57 = vmul.f32 0.25, %v140_v54  ;;  %v180_v60 = vsel %vm179_vm2, %v171_v55, 0.0 }
 0x179   :  { %v174_v61 = vmul.f32 %v154_v36, %v150_v56 }
 0x17a   :  { %v172_v59 = vmul.f32 %v152_v31, %v148_v57 }
 0x17b   :  { %v185_v2 = vsel %vm179_vm2, %v174_v61, 0.0 }
 0x17c   :  { %v181_v62 = vsel %vm179_vm2, %v172_v59, 0.0 }
 0x17d   :  { %v182_v63 = vadd.f32 %v181_v62, %v180_v60 }
 0x17f   :  { %v184_v1 = vadd.f32 %v183_v0, %v182_v63 }
 0x181   :  { %v186_v3 = vadd.f32 %v185_v2, %v184_v1 }
 0x183   :  { %v187_v4 = vrot.slane %v186_v3, 4 }
 0x185   :  { %v188_v5 = vadd.f32 %v187_v4, %v186_v3 }
 0x187   :  { %v189_v6 = vrot.slane %v188_v5, 2 }
 0x189   :  { %v190_v7 = vadd.f32 %v189_v6, %v188_v5 }
 0x18b   :  { %v191_v9 = vrot.slane %v190_v7, 1 }
 0x18d   :  { %v192_v11 = vadd.f32 %v191_v9, %v190_v7 }
 0x18f   :  { %v193_v12 = vadd.f32 %v192_v11, %v170_v10 }
 0x191   :  { %195 = vst.msk [vmem:[#allocation2] sm:$0x1] %vm26_vm3, %v193_v12 }
 0x198   :  { %v219_v14 = vld [vmem:[#allocation2] sm:$0x1] }
 0x199   :  { %v222_v15 = vmul.f32 %v264_v13, %v219_v14 }
 0x19b   :  { %223 = vst.msk [vmem:[#allocation4] sm:$0x1] %vm26_vm3, %v222_v15 }
 0x19c   :  { %276 = shalt.err (!%p273_p4)
}
 0x19d   :  { %s277_s20 = scalar_lea.hbm %s390_s5, 16 }
 0x19e   :  { %p278_p5 = scmp.ne.s32.totalorder %s390_s5, %s277_s20  ;;  %p281_p6 = scmp.lt.u32.totalorder %s277_s20, %s390_s5 }
 0x1a0   :  { %p283_p7 = pnand %p281_p6, %p278_p5 }
 0x1a2   :  { %286 = shalt.err (!%p283_p7)
}
 0x1a3   :  { %233 = dma.vmem_to_hbm [thread:$0]  %s231_s15, 16, %s390_s5, [#allocation5]  }
 0x1a4   :  { %287 = dma.done.wait [#allocation5], 16  }
 0x1a5   :  { %288 = vsyncadd [#allocation5], 4294967280 }
 0x1a6   :  { %237 = vsyncpa [#allocation5], 1 }

// kernel: _lambda_.70
= control target key start
LH: loop header
LB: loop body
LE: loop exit
PB: predicated region body
PF: predicated region fallthrough
CT: control target
= control target key end

     0   :  { %s1945_s9 = smov 0   ;;  %s1947_s10 = smov 0   ;;  %s2209_s0 = inlined_call_operand.vmem [shape: bf16[2,16,32], index: 0, kind: input, shape index: {}]   ;;  %s2210_s1 = inlined_call_operand.vmem [shape: bf16[2,8,64], index: 1, kind: input, shape index: {}]   ;;  %s2211_s2 = inlined_call_operand.vmem [shape: bf16[2,16,32], index: 2, kind: output, shape index: {}]  }
   0x1   :  { %s1949_s11 = smov 0  }
   0x2 LB: > { %s24_s12 = sadd.s32 1, %s1912_s10  ;;  %p1709_p0 = scmp.ge.s32.totalorder %s1916_s11, 1  ;;  %s1916_s11 = sphi %s1949_s11, %s12_s11   ;;  %s1912_s10 = sphi %s1947_s10, %s2213_s10   ;;  %s1908_s9 = sphi %s1945_s9, %s2212_s9  }
   0x3   : > { %p26_p1 = scmp.ge.s32.totalorder %s24_s12, 2  ;;  %p142_p2 = scmp.lt.s32.totalorder %s1916_s11, 3 }
   0x5   : > { %s2215_s12 = smov (%p26_p1, %s24_s12), 0  ;;  %p143_p3 = pnand %p1709_p0, %p142_p2 }
   0x6   : > { %p177_p4 = scmp.lt.s32.totalorder (!%p143_p3), %s1908_s9, 1  ;;  %s1918_s21 = smov (!%p143_p3), 104   ;;  %v1921_v3 = vmov (!%p143_p3), 0.0   ;;  %vm1922_vm0 = vmmov (!%p143_p3), 0   ;;  %v1923_v4 = vmov (!%p143_p3), 1983009808   ;;  %v246_v6 = vlaneseq (!%p143_p3) }
   0x7   : > { %146 = sbr.rel (%p143_p3) target bundleno = 1077 (0x435), region = 28  ;;  %s1919_s22 = smov (!%p143_p3), 120   ;;  %1763 = vmatprep.subr.bf16.mxu0 (!%p143_p3), %v1921_v3  ;;  %1769 = vmatprep.subr.bf16.mxu1 (!%p143_p3), %v1921_v3  ;;  %v244_v5 = vunpack.c.l.s4 (!%p143_p3), %v1923_v4  ;;  %v1924_v9 = vmov (!%p143_p3), 1934713408   ;;  %vm804_vm1 = vcmask (!%p143_p3), 64512   ;;  %vm1105_vm2 = vcmask (!%p143_p3), 1043456  }
   0x8   : > { %s1920_s23 = smov (!%p143_p3), 112   ;;  %1765 = vmatprep.mubr.msk.bf16.mxu0 (!%p143_p3), %vm1922_vm0, %v1921_v3  ;;  %1771 = vmatprep.mubr.msk.bf16.mxu1 (!%p143_p3), %vm1922_vm0, %v1921_v3  ;;  %v247_v8 = vshrl.u32 (!%p143_p3), %v246_v6, 7  ;;  %v261_v10 = vunpack.c.l.s4 (!%p143_p3), %v1924_v9  ;;  %s1926_s24 = smov (!%p143_p3), 96   ;;  %vm1589_vm3 = vcmask (!%p143_p3), 130048   ;;  %vm1592_vm4 = vcmask (!%p143_p3), 195584  }
   0x9   : > { %v245_v7 = vunpack.c.0.s8 (!%p143_p3), %v244_v5  ;;  %s1927_s25 = smov (!%p143_p3), 16   ;;  %s1928_s26 = smov (!%p143_p3), 8   ;;  %vm1603_vm5 = vcmask (!%p143_p3), 257024  }
   0xa   : > { %v262_v18 = vunpack.c.0.s8 (!%p143_p3), %v261_v10  ;;  %s1929_s27 = smov (!%p143_p3), 24  }
   0xb   : > { %v1998_v16 = vsub.s32 (!%p143_p3), %v245_v7, %v247_v8 }
   0xc   : > { %v2008_v27 = vsub.s32 (!%p143_p3), %v262_v18, %v247_v8 }
   0xe   : > { %s2217_s9 = smov (!%p177_p4, %s1908_s9), 1 }
   0xf   : > { %s1712_s13 = sshll.u32 %s2217_s9, 2  ;;  %s1743_s14 = sshll.u32 %s2217_s9, 3 }
  0x10   : > { %s189_s17 = scalar_lea.vmem %s2210_s1, %s1712_s13  ;;  %s184_s20 = scalar_lea.vmem %s2209_s0, %s1743_s14 }
  0x11   : > { %v1975_v0 = vld [vmem:[%s189_s17] sm:$0xf]  ;;  %v1980_v2 = vld [vmem:[%s184_s20 + $0x4] sm:$0xf]  ;;  %s198_s30 = scalar_lea.vmem %s2211_s2, %s1743_s14 }
  0x12   : > { %507 = vrot.lane.b32.xlu1 %v1975_v0, %s1918_s21  ;;  %503 = vrot.lane.b32.xlu0 %v1975_v0, %s1919_s22  ;;  %v201_v1 = vld [vmem:[%s184_s20] sm:$0xf]  ;;  %v512_v13 = vshrl.u32 %v1975_v0, 16  ;;  %v233_v38 = vshrl.u32 %v1980_v2, 16 }
  0x13   : > { %v221_v24 = vshrl.u32 %v201_v1, 16 }
  0x16   : > { %505 = vrot.lane.b32.xlu0 %v1975_v0, %s1920_s23  ;;  %206 = vrot.lane.b32.xlu1 %v201_v1, %s1919_s22 }
  0x1a   : > { %208 = vrot.lane.b32.xlu0 %v1980_v2, %s1919_s22  ;;  %210 = vrot.lane.b32.xlu1 %v201_v1, %s1920_s23 }
  0x1e   : > { %212 = vrot.lane.b32.xlu0 %v1980_v2, %s1920_s23  ;;  %214 = vrot.lane.b32.xlu1 %v201_v1, %s1918_s21 }
  0x22   : > { %216 = vrot.lane.b32.xlu0 %v1980_v2, %s1918_s21 }
  0x84   : > { %v1991_v11 = vpop.permute.xlu1 %507  ;;  %v1993_v12 = vpop.permute.xlu0 %503 }
  0x85   : > { %v513_v14 = vshrl.u32 %v1993_v12, 16  ;;  %v519_v15 = vshrl.u32 %v1991_v11, 16  ;;  %v511_v17 = vpack.i.b16 %v1993_v12, %v1975_v0 }
  0x87   : > { %v514_v21 = vpack.i.b16 %v513_v14, %v512_v13  ;;  %v528_v26 = vrot.slane %v511_v17, %v1998_v16 }
  0x88   : > { %v2002_v19 = vpop.permute.xlu0 %505  ;;  %v207_v20 = vpop.permute.xlu1 %206 }
  0x89   : > { %v517_v22 = vpack.i.b16 %v1991_v11, %v2002_v19  ;;  %v518_v23 = vshrl.u32 %v2002_v19, 16  ;;  %v222_v25 = vshrl.u32 %v207_v20, 16  ;;  %v220_v30 = vpack.i.b16 %v207_v20, %v201_v1 }
  0x8a   : > { %v562_v33 = vrot.slane %v514_v21, %v1998_v16 }
  0x8b   : > { %v520_v28 = vpack.i.b16 %v519_v15, %v518_v23  ;;  %v536_v29 = vrot.slane %v517_v22, %v1998_v16  ;;  %v223_v37 = vpack.i.b16 %v222_v25, %v221_v24  ;;  %v249_v44 = vrot.slane %v220_v30, %v1998_v16 }
  0x8c   : > { %v209_v31 = vpop.permute.xlu0 %208  ;;  %v211_v32 = vpop.permute.xlu1 %210 }
  0x8d   : > { %v537_v34 = vcombine.low %v528_v26, %v536_v29  ;;  %v538_v35 = vcombine.high %v528_v26, %v536_v29  ;;  %v570_v36 = vrot.slane %v520_v28, %v1998_v16  ;;  %v234_v39 = vshrl.u32 %v209_v31, 16 }
  0x8e   : > { %v232_v45 = vpack.i.b16 %v209_v31, %v1980_v2  ;;  %v227_v46 = vshrl.u32 %v211_v32, 16  ;;  %v283_v53 = vrot.slane %v223_v37, %v1998_v16 }
  0x8f   : > { %v545_v40 = vrot.slane %v537_v34, %v2008_v27  ;;  %v552_v41 = vrot.slane %v538_v35, %v2008_v27  ;;  %v571_v42 = vcombine.low %v562_v33, %v570_v36  ;;  %v572_v43 = vcombine.high %v562_v33, %v570_v36 }
  0x90   : > { %v213_v47 = vpop.permute.xlu0 %212  ;;  %v215_v48 = vpop.permute.xlu1 %214  ;;  %v235_v54 = vpack.i.b16 %v234_v39, %v233_v38  ;;  %v317_v61 = vrot.slane %v232_v45, %v1998_v16 }
  0x91   : > { %v579_v49 = vrot.slane %v571_v42, %v2008_v27  ;;  %v586_v50 = vrot.slane %v572_v43, %v2008_v27  ;;  %v589_v51 = vcombine.low %v545_v40, %v552_v41  ;;  %v1719_v52 = vcombine.high %v545_v40, %v552_v41 }
  0x92   : > { %v226_v55 = vpack.i.b16 %v215_v48, %v211_v32  ;;  %v228_v56 = vshrl.u32 %v215_v48, 16  ;;  %v239_v62 = vshrl.u32 %v213_v47, 16  ;;  %v351_v14 = vrot.slane %v235_v54, %v1998_v16 }
  0x93   : > { %v596_v57 = vrot.slane %v589_v51, %v1998_v16  ;;  %v604_v58 = vrot.slane %v1719_v52, %v1998_v16  ;;  %v614_v59 = vcombine.low %v579_v49, %v586_v50  ;;  %v1720_v60 = vcombine.high %v579_v49, %v586_v50 }
  0x94   : > { %v229_v63 = vpack.i.b16 %v228_v56, %v227_v46  ;;  %v257_v1 = vrot.slane %v226_v55, %v1998_v16  ;;  %v217_v2 = vpop.permute.xlu0 %216 }
  0x95   : > { %v238_v4 = vpack.i.b16 %v217_v2, %v213_v47  ;;  %v240_v5 = vshrl.u32 %v217_v2, 16  ;;  %v605_v6 = vcombine.low %v596_v57, %v604_v58  ;;  %v621_v7 = vrot.slane %v614_v59, %v1998_v16 }
  0x96   : > { %v258_v8 = vcombine.low %v249_v44, %v257_v1  ;;  %v259_v9 = vcombine.high %v249_v44, %v257_v1  ;;  %v291_v10 = vrot.slane %v229_v63, %v1998_v16  ;;  %v629_v13 = vrot.slane %v1720_v60, %v1998_v16 }
  0x97   : > { %v241_v15 = vpack.i.b16 %v240_v5, %v239_v62  ;;  %v325_v17 = vrot.slane %v238_v4, %v1998_v16  ;;  %v612_v18 = vrot.slane %v605_v6, %v2008_v27  ;;  %v1925_v1 = vmov 0  }
  0x98   : > { %v266_v20 = vrot.slane %v258_v8, %v2008_v27  ;;  %v273_v21 = vrot.slane %v259_v9, %v2008_v27  ;;  %v292_v22 = vcombine.low %v283_v53, %v291_v10  ;;  %v293_v23 = vcombine.high %v283_v53, %v291_v10 }
  0x99   : > { %v326_v24 = vcombine.low %v317_v61, %v325_v17  ;;  %v327_v25 = vcombine.high %v317_v61, %v325_v17  ;;  %v359_v26 = vrot.slane %v241_v15, %v1998_v16  ;;  %v630_v28 = vcombine.low %v621_v7, %v629_v13 }
  0x9a   : > { %v300_v29 = vrot.slane %v292_v22, %v2008_v27  ;;  %v307_v30 = vrot.slane %v293_v23, %v2008_v27  ;;  %v378_v31 = vcombine.low %v266_v20, %v273_v21  ;;  %v1715_v32 = vcombine.high %v266_v20, %v273_v21 }
  0x9b   : > { %v334_v33 = vrot.slane %v326_v24, %v2008_v27  ;;  %v341_v34 = vrot.slane %v327_v25, %v2008_v27  ;;  %v360_v35 = vcombine.low %v351_v14, %v359_v26  ;;  %v361_v36 = vcombine.high %v351_v14, %v359_v26 }
  0x9c   : > { %v385_v37 = vrot.slane %v378_v31, %v1998_v16  ;;  %v393_v38 = vrot.slane %v1715_v32, %v1998_v16  ;;  %v403_v39 = vcombine.low %v300_v29, %v307_v30  ;;  %v1716_v40 = vcombine.high %v300_v29, %v307_v30 }
  0x9d   : > { %v368_v41 = vrot.slane %v360_v35, %v2008_v27  ;;  %v375_v42 = vrot.slane %v361_v36, %v2008_v27  ;;  %v428_v43 = vcombine.low %v334_v33, %v341_v34  ;;  %v1717_v44 = vcombine.high %v334_v33, %v341_v34 }
  0x9e   : > { %v394_v45 = vcombine.low %v385_v37, %v393_v38  ;;  %v410_v46 = vrot.slane %v403_v39, %v1998_v16  ;;  %v418_v47 = vrot.slane %v1716_v40, %v1998_v16  ;;  %v637_v48 = vrot.slane %v630_v28, %v2008_v27 }
  0x9f   : > { %v435_v49 = vrot.slane %v428_v43, %v1998_v16  ;;  %v443_v50 = vrot.slane %v1717_v44, %v1998_v16  ;;  %v453_v51 = vcombine.low %v368_v41, %v375_v42  ;;  %v1718_v52 = vcombine.high %v368_v41, %v375_v42 }
  0xa0   : > { %v419_v53 = vcombine.low %v410_v46, %v418_v47  ;;  %v641_v54 = vpack.i.b16 %v637_v48, %v612_v18  ;;  %v642_v55 = vshrl.u32 %v612_v18, 16  ;;  %v643_v56 = vshrl.u32 %v637_v48, 16 }
  0xa1   : > { %v444_v57 = vcombine.low %v435_v49, %v443_v50  ;;  %v460_v58 = vrot.slane %v453_v51, %v1998_v16  ;;  %v468_v59 = vrot.slane %v1718_v52, %v1998_v16  ;;  %v401_v60 = vrot.slane %v394_v45, %v2008_v27 }
  0xa2   : > { %v809_v61 = vsel %vm804_vm1, %v641_v54, 0  ;;  %v644_v62 = vpack.i.b16 %v643_v56, %v642_v55  ;;  %v426_v63 = vrot.slane %v419_v53, %v2008_v27  ;;  %v613_v2 = vcombine.high %v612_v18, %v1925_v1 }
  0xa3   : > { %v469_v4 = vcombine.low %v460_v58, %v468_v59  ;;  %1764 = vmatpush3.bf16.xpose.msra.mxu0 %v809_v61  ;;  %v451_v5 = vrot.slane %v444_v57, %v2008_v27  ;;  %v638_v6 = vcombine.high %v637_v48, %v1925_v1  ;;  %v481_v14 = vshrl.u32 %v401_v60, 16 }
  0xa4   : > { %v859_v7 = vsel %vm804_vm1, %v644_v62, 0  ;;  %1775 = vmatprep.subr.bf16.mxu0 %v1921_v3  ;;  %v482_v8 = vshrl.u32 %v426_v63, 16  ;;  %v480_v13 = vpack.i.b16 %v426_v63, %v401_v60  ;;  %v648_v15 = vshrl.u32 %v613_v2, 16 }
  0xa5   : > { %1770 = vmatpush3.bf16.xpose.msra.mxu1 %v859_v7  ;;  %v476_v9 = vrot.slane %v469_v4, %v2008_v27  ;;  %v649_v10 = vshrl.u32 %v638_v6, 16  ;;  %v647_v18 = vpack.i.b16 %v638_v6, %v613_v2  ;;  %v493_v20 = vshrl.u32 %v451_v5, 16 }
  0xa6   : > { %1781 = vmatprep.subr.bf16.mxu1 %v1921_v3  ;;  %v483_v22 = vpack.i.b16 %v482_v8, %v481_v14  ;;  %v427_v23 = vcombine.high %v426_v63, %v1925_v1  ;;  %v452_v29 = vcombine.high %v451_v5, %v1925_v1  ;;  %v402_v32 = vcombine.high %v401_v60, %v1925_v1 }
  0xa7   : > { %v492_v17 = vpack.i.b16 %v476_v9, %v451_v5  ;;  %v494_v21 = vshrl.u32 %v476_v9, 16  ;;  %v477_v24 = vcombine.high %v476_v9, %v1925_v1  ;;  %v650_v28 = vpack.i.b16 %v649_v10, %v648_v15 }
  0xa8   : > { %v909_v30 = vsel %vm804_vm1, %v647_v18, 0  ;;  %v488_v36 = vshrl.u32 %v427_v23, 16  ;;  %v499_v37 = vshrl.u32 %v452_v29, 16  ;;  %v486_v38 = vpack.i.b16 %v427_v23, %v402_v32 }
  0xa9   : > { %v1723_v25 = vcombine.low %v480_v13, %v492_v17  ;;  %v495_v26 = vpack.i.b16 %v494_v21, %v493_v20  ;;  %v500_v33 = vshrl.u32 %v477_v24, 16  ;;  %v959_v34 = vsel %vm804_vm1, %v650_v28, 0 }
  0xaa   : > { %v498_v35 = vpack.i.b16 %v477_v24, %v452_v29  ;;  %v487_v39 = vshrl.u32 %v402_v32, 16 }
  0xab   : > { %1766 = vmatmul.mubr.msk.bf16.vlgmr.msra.gmra.mrb[0].mxu0 %vm804_vm1, %v1723_v25  ;;  %v1725_v31 = vcombine.low %v483_v22, %v495_v26  ;;  %v501_v40 = vpack.i.b16 %v500_v33, %v499_v37 }
  0xac   : > { %1776 = vmatpush3.bf16.xpose.msra.mxu0 %v909_v30  ;;  %1777 = vmatprep.mubr.msk.bf16.mxu0 %vm1922_vm0, %v1921_v3  ;;  %v1727_v41 = vcombine.low %v486_v38, %v498_v35  ;;  %v489_v42 = vpack.i.b16 %v488_v36, %v487_v39 }
  0xad   : > { %1772 = vmatmul.mubr.msk.bf16.vlgmr.msra.gmra.mrb[0].mxu1 %vm804_vm1, %v1725_v31  ;;  %1787 = vmatprep.subr.bf16.mxu0 %v1921_v3 }
  0xae   : > { %1782 = vmatpush3.bf16.xpose.msra.mxu1 %v959_v34  ;;  %1783 = vmatprep.mubr.msk.bf16.mxu1 %vm1922_vm0, %v1921_v3  ;;  %v1729_v43 = vcombine.low %v489_v42, %v501_v40 }
  0xaf   : > { %1793 = vmatprep.subr.bf16.mxu1 %v1921_v3 }
  0xb3   : > { %1778 = vmatmul.mubr.msk.bf16.vlgmr.msra.gmra.mrb[4].mxu0 %vm804_vm1, %v1727_v41 }
  0xb4   : > { %1789 = vmatprep.mubr.msk.bf16.mxu0 %vm1922_vm0, %v1921_v3 }
  0xb5   : > { %1784 = vmatmul.mubr.msk.bf16.vlgmr.msra.gmra.mrb[4].mxu1 %vm804_vm1, %v1729_v43 }
  0xb6   : > { %1795 = vmatprep.mubr.msk.bf16.mxu1 %vm1922_vm0, %v1921_v3 }
 0x17e   : > { %v845_v44 = vpop.f32.mrb[0].mxu0 }
 0x17f   : > { %v1002_v45 = vmul.f32 0.35355338, %v845_v44  ;;  %v1767_v46 = vpop.f32.mrb[1].mxu0 }
 0x180   : > { %v848_v47 = vpop.f32.mrb[2].mxu0  ;;  %v895_v48 = vpop.f32.mrb[0].mxu1 }
 0x181   : > { %v1003_v49 = vmul.f32 0.35355338, %v848_v47  ;;  %v1768_v50 = vpop.f32.mrb[3].mxu0  ;;  %v1773_v51 = vpop.f32.mrb[1].mxu1  ;;  %v1010_v53 = vsel %vm804_vm1, %v1002_v45, -inf }
 0x182   : > { %v898_v52 = vpop.f32.mrb[2].mxu1  ;;  %v1004_v54 = vmul.f32 0.35355338, %v895_v48  ;;  %1011 = vmax.xlane.f32.xlu1 %v1010_v53 }
 0x183   : > { %v1005_v55 = vmul.f32 0.35355338, %v898_v52  ;;  %v1774_v56 = vpop.f32.mrb[3].mxu1  ;;  %v1013_v57 = vsel %vm804_vm1, %v1003_v49, -inf }
 0x184   : > { %1014 = vmax.xlane.f32.xlu0 %v1013_v57  ;;  %v1016_v62 = vsel %vm804_vm1, %v1004_v54, -inf }
 0x185   : > { %v1019_v58 = vsel %vm804_vm1, %v1005_v55, -inf }
 0x186   : > { %v945_v59 = vpop.f32.mrb[4].mxu0  ;;  %1020 = vmax.xlane.f32.xlu1 %v1019_v58 }
 0x187   : > { %v1006_v60 = vmul.f32 0.35355338, %v945_v59  ;;  %v1779_v61 = vpop.f32.mrb[5].mxu0 }
 0x188   : > { %1017 = vmax.xlane.f32.xlu0 %v1016_v62  ;;  %v948_v63 = vpop.f32.mrb[6].mxu0  ;;  %v995_v2 = vpop.f32.mrb[4].mxu1 }
 0x189   : > { %v1007_v4 = vmul.f32 0.35355338, %v948_v63  ;;  %v1780_v5 = vpop.f32.mrb[7].mxu0  ;;  %v1785_v6 = vpop.f32.mrb[5].mxu1  ;;  %v1008_v7 = vmul.f32 0.35355338, %v995_v2 }
 0x18a   : > { %v998_v8 = vpop.f32.mrb[6].mxu1  ;;  %v1022_v13 = vsel %vm804_vm1, %v1006_v60, -inf }
 0x18b   : > { %v1009_v9 = vmul.f32 0.35355338, %v998_v8  ;;  %v1786_v10 = vpop.f32.mrb[7].mxu1  ;;  %v1025_v14 = vsel %vm804_vm1, %v1007_v4, -inf  ;;  %v1028_v15 = vsel %vm804_vm1, %v1008_v7, -inf }
 0x18c   : > { %1023 = vmax.xlane.f32.xlu0 %v1022_v13  ;;  %1026 = vmax.xlane.f32.xlu1 %v1025_v14 }
 0x18d   : > { %v1031_v17 = vsel %vm804_vm1, %v1009_v9, -inf }
 0x190   : > { %1029 = vmax.xlane.f32.xlu0 %v1028_v15  ;;  %1032 = vmax.xlane.f32.xlu1 %v1031_v17 }
 0x1a1   : > { %653 = vrot.lane.b32.xlu1 %v1993_v12, %s1926_s24 }
 0x1a5   : > { %655 = vrot.lane.b32.xlu1 %v2002_v19, %s1926_s24 }
 0x1a6   : > { %651 = vrot.lane.b32.xlu0 %v1975_v0, %s1926_s24 }
 0x1aa   : > { %657 = vrot.lane.b32.xlu0 %v1991_v11, %s1926_s24 }
 0x20f   : > { %v1012_v18 = vpop.xlane.xlu1 %1011 }
 0x210   : > { %v1034_v20 = vsub.f32 %v1002_v45, %v1012_v18 }
 0x211   : > { %v1015_v21 = vpop.xlane.xlu0 %1014 }
 0x212   : > { %v1035_v22 = vsub.f32 %v1003_v49, %v1015_v21  ;;  %v1042_v23 = vmul.f32 1.442695, %v1034_v20 }
 0x213   : > { %v1021_v25 = vpop.xlane.xlu1 %1020 }
 0x214   : > { %v1044_v24 = vmul.f32 1.442695, %v1035_v22  ;;  %1862 = vpow2.f32 %v1042_v23  ;;  %v1037_v26 = vsub.f32 %v1005_v55, %v1021_v25 }
 0x215   : > { %v1018_v28 = vpop.xlane.xlu0 %1017 }
 0x216   : > { %1864 = vpow2.f32 %v1044_v24  ;;  %v1036_v29 = vsub.f32 %v1004_v54, %v1018_v28  ;;  %v1048_v30 = vmul.f32 1.442695, %v1037_v26 }
 0x218   : > { %v1046_v12 = vmul.f32 1.442695, %v1036_v29  ;;  %1866 = vpow2.f32 %v1048_v30 }
 0x219   : > { %v1024_v19 = vpop.xlane.xlu0 %1023  ;;  %v1027_v31 = vpop.xlane.xlu1 %1026 }
 0x21a   : > { %1868 = vpow2.f32 %v1046_v12  ;;  %v1038_v0 = vsub.f32 %v1006_v60, %v1024_v19  ;;  %v1039_v11 = vsub.f32 %v1007_v4, %v1027_v31 }
 0x21c   : > { %v1050_v32 = vmul.f32 1.442695, %v1038_v0  ;;  %v1052_v33 = vmul.f32 1.442695, %v1039_v11 }
 0x21d   : > { %v1030_v34 = vpop.xlane.xlu0 %1029  ;;  %v1033_v35 = vpop.xlane.xlu1 %1032 }
 0x21e   : > { %1870 = vpow2.f32 %v1050_v32  ;;  %v1040_v36 = vsub.f32 %v1008_v7, %v1030_v34  ;;  %v1041_v37 = vsub.f32 %v1009_v9, %v1033_v35  ;;  %v2091_v38 = vpop.eup %1862 }
 0x21f   : > { %1872 = vpow2.f32 %v1052_v33  ;;  %v1058_v42 = vsel %vm804_vm1, %v2091_v38, 0.0 }
 0x220   : > { %v2093_v39 = vpop.eup %1864  ;;  %v1054_v40 = vmul.f32 1.442695, %v1040_v36  ;;  %v1056_v41 = vmul.f32 1.442695, %v1041_v37  ;;  %1059 = vadd.xlane.f32.xlu0 %v1058_v42 }
 0x221   : > { %v652_v43 = vpop.permute.xlu0 %651  ;;  %v654_v44 = vpop.permute.xlu1 %653  ;;  %v1061_v45 = vsel %vm804_vm1, %v2093_v39, 0.0 }
 0x222   : > { %1874 = vpow2.f32 %v1054_v40  ;;  %v662_v46 = vshrl.u32 %v652_v43, 16  ;;  %v663_v47 = vshrl.u32 %v654_v44, 16  ;;  %1062 = vadd.xlane.f32.xlu1 %v1061_v45  ;;  %v2099_v48 = vpop.eup %1866  ;;  %v661_v50 = vpack.i.b16 %v654_v44, %v652_v43 }
 0x223   : > { %1876 = vpow2.f32 %v1056_v41  ;;  %v1067_v55 = vsel %vm804_vm1, %v2099_v48, 0.0 }
 0x224   : > { %v2101_v49 = vpop.eup %1868  ;;  %v664_v51 = vpack.i.b16 %v663_v47, %v662_v46  ;;  %v678_v60 = vrot.slane %v661_v50, %v1998_v16 }
 0x225   : > { %v658_v52 = vpop.permute.xlu0 %657  ;;  %v656_v53 = vpop.permute.xlu1 %655  ;;  %v1064_v54 = vsel %vm804_vm1, %v2101_v49, 0.0 }
 0x226   : > { %v669_v56 = vshrl.u32 %v658_v52, 16  ;;  %v667_v57 = vpack.i.b16 %v658_v52, %v656_v53  ;;  %v668_v58 = vshrl.u32 %v656_v53, 16  ;;  %1065 = vadd.xlane.f32.xlu0 %v1064_v54  ;;  %1068 = vadd.xlane.f32.xlu1 %v1067_v55  ;;  %v712_v2 = vrot.slane %v664_v51, %v1998_v16 }
 0x228   : > { %v2107_v59 = vpop.eup %1870  ;;  %v670_v61 = vpack.i.b16 %v669_v56, %v668_v58  ;;  %v686_v62 = vrot.slane %v667_v57, %v1998_v16 }
 0x229   : > { %v2111_v63 = vpop.eup %1872  ;;  %v1070_v4 = vsel %vm804_vm1, %v2107_v59, 0.0 }
 0x22a   : > { %v687_v5 = vcombine.low %v678_v60, %v686_v62  ;;  %v688_v6 = vcombine.high %v678_v60, %v686_v62  ;;  %v720_v7 = vrot.slane %v670_v61, %v1998_v16  ;;  %1071 = vadd.xlane.f32.xlu1 %v1070_v4  ;;  %v1073_v8 = vsel %vm804_vm1, %v2111_v63, 0.0 }
 0x22b   : > { %1074 = vadd.xlane.f32.xlu0 %v1073_v8 }
 0x22c   : > { %v2119_v9 = vpop.eup %1874  ;;  %v695_v10 = vrot.slane %v687_v5, %v2008_v27  ;;  %v702_v13 = vrot.slane %v688_v6, %v2008_v27  ;;  %v721_v14 = vcombine.low %v712_v2, %v720_v7  ;;  %v722_v15 = vcombine.high %v712_v2, %v720_v7 }
 0x22d   : > { %v2123_v17 = vpop.eup %1876  ;;  %v1076_v18 = vsel %vm804_vm1, %v2119_v9, 0.0 }
 0x22e   : > { %v729_v20 = vrot.slane %v721_v14, %v2008_v27  ;;  %v736_v21 = vrot.slane %v722_v15, %v2008_v27  ;;  %v739_v22 = vcombine.low %v695_v10, %v702_v13  ;;  %v1721_v23 = vcombine.high %v695_v10, %v702_v13 }
 0x22f   : > { %1077 = vadd.xlane.f32.xlu0 %v1076_v18  ;;  %v1079_v24 = vsel %vm804_vm1, %v2123_v17, 0.0 }
 0x230   : > { %v746_v25 = vrot.slane %v739_v22, %v1998_v16  ;;  %v754_v26 = vrot.slane %v1721_v23, %v1998_v16  ;;  %v764_v28 = vcombine.low %v729_v20, %v736_v21  ;;  %v1722_v29 = vcombine.high %v729_v20, %v736_v21  ;;  %1080 = vadd.xlane.f32.xlu1 %v1079_v24 }
 0x232   : > { %v771_v30 = vrot.slane %v764_v28, %v1998_v16  ;;  %v779_v12 = vrot.slane %v1722_v29, %v1998_v16  ;;  %v755_v19 = vcombine.low %v746_v25, %v754_v26 }
 0x234   : > { %v762_v31 = vrot.slane %v755_v19, %v2008_v27  ;;  %v780_v0 = vcombine.low %v771_v30, %v779_v12 }
 0x236   : > { %v787_v11 = vrot.slane %v780_v0, %v2008_v27  ;;  %v763_v32 = vcombine.high %v762_v31, %v1925_v1  ;;  %v792_v34 = vshrl.u32 %v762_v31, 16 }
 0x238   : > { %v791_v33 = vpack.i.b16 %v787_v11, %v762_v31  ;;  %v793_v35 = vshrl.u32 %v787_v11, 16  ;;  %v788_v36 = vcombine.high %v787_v11, %v1925_v1  ;;  %v798_v37 = vshrl.u32 %v763_v32, 16 }
 0x23a   : > { %v1107_v40 = vsel %vm1105_vm2, %v791_v33, 0  ;;  %v794_v41 = vpack.i.b16 %v793_v35, %v792_v34  ;;  %v797_v42 = vpack.i.b16 %v788_v36, %v763_v32  ;;  %v799_v43 = vshrl.u32 %v788_v36, 16 }
 0x23b   : > { %1788 = vmatpush3.bf16.msra.mxu0 %v1107_v40 }
 0x23c   : > { %v1154_v44 = vsel %vm1105_vm2, %v794_v41, 0  ;;  %1799 = vmatprep.subr.bf16.mxu0 %v1921_v3  ;;  %v1201_v45 = vsel %vm1105_vm2, %v797_v42, 0  ;;  %v800_v46 = vpack.i.b16 %v799_v43, %v798_v37 }
 0x23d   : > { %1794 = vmatpush3.bf16.msra.mxu1 %v1154_v44 }
 0x23e   : > { %1805 = vmatprep.subr.bf16.mxu1 %v1921_v3  ;;  %v1248_v47 = vsel %vm1105_vm2, %v800_v46, 0 }
 0x2ad   : > { %v1060_v1 = vpop.xlane.xlu0 %1059 }
 0x2ae   : > { %1878 = vrcp.f32 %v1060_v1 }
 0x2af   : > { %v1063_v50 = vpop.xlane.xlu1 %1062 }
 0x2b0   : > { %1880 = vrcp.f32 %v1063_v50 }
 0x2b3   : > { %v1066_v51 = vpop.xlane.xlu0 %1065  ;;  %v1069_v52 = vpop.xlane.xlu1 %1068 }
 0x2b4   : > { %1882 = vrcp.f32 %v1066_v51 }
 0x2b5   : > { %1884 = vrcp.f32 %v1069_v52 }
 0x2b7   : > { %v1072_v53 = vpop.xlane.xlu1 %1071 }
 0x2b8   : > { %v1075_v54 = vpop.xlane.xlu0 %1074  ;;  %1886 = vrcp.f32 %v1072_v53  ;;  %v1879_v55 = vpop.eup %1878 }
 0x2b9   : > { %1888 = vrcp.f32 %v1075_v54  ;;  %v1083_v57 = vmul.f32 %v1879_v55, %v2091_v38 }
 0x2ba   : > { %v1881_v56 = vpop.eup %1880 }
 0x2bb   : > { %v1085_v58 = vmul.f32 %v1881_v56, %v2093_v39 }
 0x2bc   : > { %v1078_v60 = vpop.xlane.xlu0 %1077 }
 0x2bd   : > { %1890 = vrcp.f32 %v1078_v60  ;;  %v1081_v61 = vpop.xlane.xlu1 %1080  ;;  %v1098_v62 = vpack.c.bf16 %v1085_v58, %v1083_v57 }
 0x2be   : > { %v1883_v2 = vpop.eup %1882  ;;  %1892 = vrcp.f32 %v1081_v61 }
 0x2bf   : > { %v1885_v4 = vpop.eup %1884  ;;  %v1087_v5 = vmul.f32 %v1883_v2, %v2101_v49  ;;  %1790 = vmatmul.mubr.msk.bf16.vlgmr.msra.gmra.mrb[8].mxu0 %vm804_vm1, %v1098_v62 }
 0x2c0   : > { %v1089_v6 = vmul.f32 %v1885_v4, %v2099_v48  ;;  %1800 = vmatpush3.bf16.msra.mxu0 %v1201_v45  ;;  %1801 = vmatprep.mubr.msk.bf16.mxu0 %vm1922_vm0, %v1921_v3 }
 0x2c2   : > { %v1887_v38 = vpop.eup %1886  ;;  %v1099_v7 = vpack.c.bf16 %v1089_v6, %v1087_v5 }
 0x2c3   : > { %v1889_v39 = vpop.eup %1888  ;;  %v1091_v8 = vmul.f32 %v1887_v38, %v2107_v59 }
 0x2c4   : > { %v1093_v10 = vmul.f32 %v1889_v39, %v2111_v63  ;;  %1796 = vmatmul.mubr.msk.bf16.vlgmr.msra.gmra.mrb[8].mxu1 %vm804_vm1, %v1099_v7 }
 0x2c5   : > { %1806 = vmatpush3.bf16.msra.mxu1 %v1248_v47  ;;  %1807 = vmatprep.mubr.msk.bf16.mxu1 %vm1922_vm0, %v1921_v3 }
 0x2c6   : > { %v1100_v49 = vpack.c.bf16 %v1093_v10, %v1091_v8 }
 0x2c7   : > { %v1891_v13 = vpop.eup %1890 }
 0x2c8   : > { %v1893_v48 = vpop.eup %1892  ;;  %v1095_v14 = vmul.f32 %v1891_v13, %v2119_v9  ;;  %1802 = vmatmul.mubr.msk.bf16.vlgmr.msra.gmra.mrb[12].mxu0 %vm804_vm1, %v1100_v49 }
 0x2c9   : > { %v1097_v15 = vmul.f32 %v1893_v48, %v2123_v17 }
 0x2cb   : > { %v1101_v18 = vpack.c.bf16 %v1097_v15, %v1095_v14 }
 0x2cd   : > { %1808 = vmatmul.mubr.msk.bf16.vlgmr.msra.gmra.mrb[12].mxu1 %vm804_vm1, %v1101_v18 }
 0x392   : > { %v1143_v59 = vpop.f32.mrb[8].mxu0 }
 0x393   : > { %v1791_v63 = vpop.f32.mrb[9].mxu0 }
 0x394   : > { %v1146_v20 = vpop.f32.mrb[10].mxu0 }
 0x395   : > { %v1792_v21 = vpop.f32.mrb[11].mxu0 }
 0x397   : > { %v1190_v22 = vpop.f32.mrb[8].mxu1 }
 0x398   : > { %v1797_v23 = vpop.f32.mrb[9].mxu1 }
 0x399   : > { %v1193_v24 = vpop.f32.mrb[10].mxu1 }
 0x39a   : > { %v1798_v3 = vpop.f32.mrb[11].mxu1 }
 0x39b   : > { %v1237_v25 = vpop.f32.mrb[12].mxu0 }
 0x39c   : > { %v1291_v26 = vcombine.low %v1143_v59, %v1237_v25  ;;  %v1292_v28 = vcombine.high %v1143_v59, %v1237_v25  ;;  %v1803_v29 = vpop.f32.mrb[13].mxu0 }
 0x39d   : > { %v1240_v9 = vpop.f32.mrb[14].mxu0 }
 0x39e   : > { %v1359_v30 = vcombine.low %v1146_v20, %v1240_v9  ;;  %v1360_v12 = vcombine.high %v1146_v20, %v1240_v9  ;;  %v1804_v19 = vpop.f32.mrb[15].mxu0  ;;  %v1299_v32 = vrot.slane %v1291_v26, %v1998_v16  ;;  %v1306_v33 = vrot.slane %v1292_v28, %v1998_v16 }
 0x3a0   : > { %v1284_v17 = vpop.f32.mrb[12].mxu1  ;;  %v1367_v46 = vrot.slane %v1359_v30, %v1998_v16  ;;  %v1374_v47 = vrot.slane %v1360_v12, %v1998_v16 }
 0x3a1   : > { %v1307_v31 = vcombine.low %v1190_v22, %v1284_v17  ;;  %v1308_v0 = vcombine.high %v1190_v22, %v1284_v17  ;;  %v1809_v11 = vpop.f32.mrb[13].mxu1 }
 0x3a2   : > { %v1287_v34 = vpop.f32.mrb[14].mxu1 }
 0x3a3   : > { %v1315_v35 = vrot.slane %v1307_v31, %v1998_v16  ;;  %v1322_v36 = vrot.slane %v1308_v0, %v1998_v16  ;;  %v1375_v37 = vcombine.low %v1193_v24, %v1287_v34  ;;  %v1376_v40 = vcombine.high %v1193_v24, %v1287_v34  ;;  %v1810_v41 = vpop.f32.mrb[15].mxu1 }
 0x3a5   : > { %v1323_v42 = vcombine.low %v1299_v32, %v1315_v35  ;;  %v1324_v43 = vcombine.high %v1299_v32, %v1315_v35  ;;  %v1339_v44 = vcombine.low %v1306_v33, %v1322_v36  ;;  %v1340_v45 = vcombine.high %v1306_v33, %v1322_v36 }
 0x3a6   : > { %v1383_v1 = vrot.slane %v1375_v37, %v1998_v16  ;;  %v1390_v50 = vrot.slane %v1376_v40, %v1998_v16 }
 0x3a7   : > { %v1331_v51 = vrot.slane %v1323_v42, %v2008_v27  ;;  %v1338_v52 = vrot.slane %v1324_v43, %v2008_v27  ;;  %v1347_v53 = vrot.slane %v1339_v44, %v2008_v27  ;;  %v1354_v54 = vrot.slane %v1340_v45, %v2008_v27 }
 0x3a8   : > { %v1391_v55 = vcombine.low %v1367_v46, %v1383_v1  ;;  %v1392_v56 = vcombine.high %v1367_v46, %v1383_v1  ;;  %v1407_v57 = vcombine.low %v1374_v47, %v1390_v50  ;;  %v1408_v58 = vcombine.high %v1374_v47, %v1390_v50 }
 0x3a9   : > { %v1427_v60 = vcombine.low %v1331_v51, %v1338_v52  ;;  %v1735_v61 = vcombine.high %v1331_v51, %v1338_v52  ;;  %v1443_v62 = vcombine.low %v1347_v53, %v1354_v54  ;;  %v1736_v2 = vcombine.high %v1347_v53, %v1354_v54 }
 0x3aa   : > { %v1399_v4 = vrot.slane %v1391_v55, %v2008_v27  ;;  %v1406_v5 = vrot.slane %v1392_v56, %v2008_v27  ;;  %v1415_v6 = vrot.slane %v1407_v57, %v2008_v27  ;;  %v1422_v38 = vrot.slane %v1408_v58, %v2008_v27 }
 0x3ab   : > { %v1434_v7 = vrot.slane %v1427_v60, %v1998_v16  ;;  %v1442_v39 = vrot.slane %v1735_v61, %v1998_v16  ;;  %v1450_v8 = vrot.slane %v1443_v62, %v1998_v16  ;;  %v1458_v10 = vrot.slane %v1736_v2, %v1998_v16 }
 0x3ac   : > { %v1495_v49 = vcombine.low %v1399_v4, %v1406_v5  ;;  %v1737_v13 = vcombine.high %v1399_v4, %v1406_v5  ;;  %v1511_v48 = vcombine.low %v1415_v6, %v1422_v38  ;;  %v1738_v14 = vcombine.high %v1415_v6, %v1422_v38 }
 0x3ad   : > { %v1460_v15 = vcombine.high %v1434_v7, %v1442_v39  ;;  %v1476_v18 = vcombine.high %v1450_v8, %v1458_v10  ;;  %v1459_v59 = vcombine.low %v1434_v7, %v1442_v39  ;;  %v1475_v63 = vcombine.low %v1450_v8, %v1458_v10 }
 0x3ae   : > { %v1502_v20 = vrot.slane %v1495_v49, %v1998_v16  ;;  %v1510_v21 = vrot.slane %v1737_v13, %v1998_v16  ;;  %v1518_v22 = vrot.slane %v1511_v48, %v1998_v16  ;;  %v1526_v23 = vrot.slane %v1738_v14, %v1998_v16 }
 0x3af   : > { %v1474_v24 = vrot.slane %v1460_v15, %v2008_v27  ;;  %v1490_v3 = vrot.slane %v1476_v18, %v2008_v27  ;;  %v1467_v25 = vrot.slane %v1459_v59, %v2008_v27  ;;  %v1483_v26 = vrot.slane %v1475_v63, %v2008_v27 }
 0x3b0   : > { %v1528_v28 = vcombine.high %v1502_v20, %v1510_v21  ;;  %v1544_v29 = vcombine.high %v1518_v22, %v1526_v23  ;;  %v1527_v9 = vcombine.low %v1502_v20, %v1510_v21  ;;  %v1543_v30 = vcombine.low %v1518_v22, %v1526_v23 }
 0x3b1   : > { %v1493_v12 = vcombine.low %v1474_v24, %v1490_v3  ;;  %v1492_v19 = vcombine.high %v1467_v25, %v1483_v26  ;;  %v1494_v17 = vcombine.high %v1474_v24, %v1490_v3  ;;  %v1491_v31 = vcombine.low %v1467_v25, %v1483_v26 }
 0x3b2   : > { %v1542_v0 = vrot.slane %v1528_v28, %v2008_v27  ;;  %v1558_v16 = vrot.slane %v1544_v29, %v2008_v27  ;;  %v1535_v11 = vrot.slane %v1527_v9, %v2008_v27  ;;  %v1551_v32 = vrot.slane %v1543_v30, %v2008_v27 }
 0x3b4   : > { %v1561_v33 = vcombine.low %v1542_v0, %v1558_v16  ;;  %v1560_v34 = vcombine.high %v1535_v11, %v1551_v32  ;;  %v1562_v35 = vcombine.high %v1542_v0, %v1558_v16  ;;  %v1559_v36 = vcombine.low %v1535_v11, %v1551_v32 }
 0x3b6   : > { %v1852_v37 = vpack.i.bf16 %v1561_v33, %v1493_v12  ;;  %v1847_v40 = vpack.i.bf16 %v1560_v34, %v1492_v19  ;;  %v1857_v41 = vpack.i.bf16 %v1562_v35, %v1494_v17 }
 0x3b8   : > { %1853 = vrot.lane.b32.xlu1 %v1852_v37, %s1927_s25  ;;  %1848 = vrot.lane.b32.xlu0 %v1847_v40, %s1928_s26 }
 0x3bc   : > { %1858 = vrot.lane.b32.xlu1 %v1857_v41, %s1929_s27 }
 0x42a   : > { %v1854_v42 = vpop.permute.xlu1 %1853  ;;  %v1849_v43 = vpop.permute.xlu0 %1848 }
 0x42b   : > { %v1851_v44 = vunpack.i.h.bf16 %v1849_v43  ;;  %v1850_v45 = vunpack.i.l.bf16 %v1849_v43  ;;  %v1856_v46 = vunpack.i.h.bf16 %v1854_v42  ;;  %v1855_v27 = vunpack.i.l.bf16 %v1854_v42 }
 0x42d   : > { %v1587_v47 = vsel %vm804_vm1, %v1491_v31, %v1850_v45  ;;  %v1588_v1 = vsel %vm804_vm1, %v1559_v36, %v1851_v44 }
 0x42e   : > { %v1859_v50 = vpop.permute.xlu1 %1858  ;;  %v1590_v53 = vsel %vm1589_vm3, %v1587_v47, %v1855_v27  ;;  %v1591_v54 = vsel %vm1589_vm3, %v1588_v1, %v1856_v46 }
 0x42f   : > { %v1861_v51 = vunpack.i.h.bf16 %v1859_v50  ;;  %v1860_v52 = vunpack.i.l.bf16 %v1859_v50 }
 0x431   : > { %v1593_v55 = vsel %vm1592_vm4, %v1590_v53, %v1860_v52  ;;  %v1594_v56 = vsel %vm1592_vm4, %v1591_v54, %v1861_v51 }
 0x432   : > { %v1745_v57 = vpack.c.bf16 %v1593_v55, %v1593_v55  ;;  %v1746_v58 = vpack.c.bf16 %v1594_v56, %v1594_v56 }
 0x434   : > { %1604 = vst.msk [vmem:[%s198_s30] sm:$0xf] %vm1603_vm5, %v1745_v57  ;;  %1605 = vst.msk [vmem:[%s198_s30 + $0x4] sm:$0xf] %vm1603_vm5, %v1746_v58 }
 0x435 PF: > { %s12_s11 = sadd.s32 1, %s1916_s11   ;;  %s2212_s9 = smov %s1912_s10 }
 0x436   : > { %p9_p5 = scmp.ge.s32.totalorder %s12_s11, 4   ;;  %s2213_s10 = smov %s2215_s12 }
 0x438   :  { %11 = sbr.rel (!%p9_p5) target bundleno = 2 (0x2), region = 61 }

</bundles_post_ra>
